<compile_context>
chip_gen: v7x
topology: tpu7x:2x2x1
jax: 0.10.0
libtpu: 0.0.40
codegen_flags: <defaults>
</compile_context>

<pallas_src>
import math
import functools

import jax
import jax.numpy as jnp
from jax.experimental import pallas as pl
from jax.experimental.pallas import tpu as pltpu


# --------------------------- in-kernel helpers ------------------------------

def _ln_rows(x, w):
    """F.layer_norm over last dim, eps=1e-5, weight only (bias=False config)."""
    mu = jnp.mean(x, axis=-1, keepdims=True)
    xc = x - mu
    var = jnp.mean(xc * xc, axis=-1, keepdims=True)
    return xc * jax.lax.rsqrt(var + 1e-5) * w


def _erf(x):
    # Abramowitz & Stegun 7.1.26 polynomial (|err| < 1.5e-7): f32-accurate erf
    # so exact GELU fuses in-kernel (exp runs on the otherwise-idle EUP slot).
    p = 0.3275911
    a1, a2, a3, a4, a5 = (0.254829592, -0.284496736, 1.421413741,
                          -1.453152027, 1.061405429)
    s = jnp.where(x >= 0.0, 1.0, -1.0)
    ax = jnp.abs(x)
    t = 1.0 / (1.0 + p * ax)
    poly = ((((a5 * t + a4) * t + a3) * t + a2) * t + a1) * t
    return s * (1.0 - poly * jnp.exp(-ax * ax))


def _gelu_exact(x):
    return 0.5 * x * (1.0 + _erf(x * (1.0 / math.sqrt(2.0))))


def _mha(xq, xkv, wq, wk, wv, wo, causal):
    """Batched multi-head attention (head = leading batch dim of all einsums).

    xq: (Tq, C) bf16, xkv: (Tk, C) bf16.
    wq/wk/wv: (H, C, Dh) bf16, wo: (H, Dh, C) bf16.  Returns (Tq, C) f32.
    """
    H, C, Dh = wq.shape
    Tq = xq.shape[0]
    Tk = xkv.shape[0]
    scale = 1.0 / math.sqrt(Dh)

    qb = jnp.broadcast_to(xq[None], (H, Tq, C))
    kb = jnp.broadcast_to(xkv[None], (H, Tk, C))

    q = jnp.einsum('htc,hcd->htd', qb, wq, preferred_element_type=jnp.float32)
    k = jnp.einsum('htc,hcd->htd', kb, wk, preferred_element_type=jnp.float32)
    v = jnp.einsum('htc,hcd->htd', kb, wv, preferred_element_type=jnp.float32)

    s = jnp.einsum('hqd,hkd->hqk', q.astype(jnp.bfloat16), k.astype(jnp.bfloat16),
                   preferred_element_type=jnp.float32) * scale
    if causal:
        row = jax.lax.broadcasted_iota(jnp.int32, (H, Tq, Tk), 1)
        col = jax.lax.broadcasted_iota(jnp.int32, (H, Tq, Tk), 2)
        # large finite negative (not -inf): safe even if a full row were masked
        s = jnp.where(col <= row, s, -1e30)

    m = jnp.max(s, axis=-1, keepdims=True)
    e = jnp.exp(s - m)
    p = e * pl.reciprocal(jnp.sum(e, axis=-1, keepdims=True), approx=True)

    y = jnp.einsum('hqk,hkd->hqd', p.astype(jnp.bfloat16), v.astype(jnp.bfloat16),
                   preferred_element_type=jnp.float32)            # (H, Tq, Dh)
    yo = jnp.einsum('htd,hdc->htc', y.astype(jnp.bfloat16), wo,
                    preferred_element_type=jnp.float32)           # (H, Tq, C)
    return jnp.sum(yo, axis=0)                                    # (Tq, C)


# ----------------------------- Pallas kernels -------------------------------

def _encoder_block_kernel(x_ref, ln1, wq, wk, wv, wo, ln2, wfc, wpm, lnf,
                          o_ref, *, apply_final_ln):
    x = x_ref[...]                                                # (T, C) f32
    h = _ln_rows(x, ln1[...]).astype(jnp.bfloat16)
    x = x + _mha(h, h, wq[...], wk[...], wv[...], wo[...], causal=False)
    h = _ln_rows(x, ln2[...]).astype(jnp.bfloat16)
    g = _gelu_exact(jnp.dot(h, wfc[...], preferred_element_type=jnp.float32))
    x = x + jnp.dot(g.astype(jnp.bfloat16), wpm[...],
                    preferred_element_type=jnp.float32)
    if apply_final_ln:                                            # fused enc ln_f
        x = _ln_rows(x, lnf[...])
    o_ref[...] = x


def _decoder_body(x, enc, ln1, wq1, wk1, wv1, wo1, ln2, wq2, wk2, wv2, wo2,
                  ln3, wfc, wpm):
    h = _ln_rows(x, ln1).astype(jnp.bfloat16)
    x = x + _mha(h, h, wq1, wk1, wv1, wo1, causal=True)           # causal self-attn
    h = _ln_rows(x, ln2).astype(jnp.bfloat16)
    x = x + _mha(h, enc.astype(jnp.bfloat16), wq2, wk2, wv2, wo2,
                 causal=False)                                    # cross-attn
    h = _ln_rows(x, ln3).astype(jnp.bfloat16)
    g = _gelu_exact(jnp.dot(h, wfc, preferred_element_type=jnp.float32))
    x = x + jnp.dot(g.astype(jnp.bfloat16), wpm,
                    preferred_element_type=jnp.float32)
    return x


def _decoder_block_kernel(x_ref, enc_ref, ln1, wq1, wk1, wv1, wo1, ln2,
                          wq2, wk2, wv2, wo2, ln3, wfc, wpm, o_ref):
    o_ref[...] = _decoder_body(
        x_ref[...], enc_ref[...], ln1[...], wq1[...], wk1[...], wv1[...],
        wo1[...], ln2[...], wq2[...], wk2[...], wv2[...], wo2[...],
        ln3[...], wfc[...], wpm[...])


def _decoder_last_block_kernel(x_ref, enc_ref, ln1, wq1, wk1, wv1, wo1, ln2,
                               wq2, wk2, wv2, wo2, ln3, wfc, wpm, lnf, wlm,
                               logits_ref):
    x = _decoder_body(
        x_ref[...], enc_ref[...], ln1[...], wq1[...], wk1[...], wv1[...],
        wo1[...], ln2[...], wq2[...], wk2[...], wv2[...], wo2[...],
        ln3[...], wfc[...], wpm[...])
    T = x.shape[0]
    xl = x[T - 1:T, :]                                            # (1, C) last token
    hl = _ln_rows(xl, lnf[...]).astype(jnp.bfloat16)              # fused dec ln_f
    # lm_head pre-transposed once to (C, V) bf16 -> plain matmul, no relayout.
    logits_ref[...] = jnp.dot(hl, wlm[...], preferred_element_type=jnp.float32)


# ------------------------------ wrappers -------------------------------------

_VMEM_LIMIT = 32 * 1024 * 1024
_CPARAMS = pltpu.CompilerParams(dimension_semantics=("parallel",),
                                vmem_limit_bytes=_VMEM_LIMIT)


def _const_spec(a):
    nd = a.ndim
    return pl.BlockSpec(a.shape, lambda b, _nd=nd: (0,) * _nd)


def encoder_block(x, p, lnf, apply_final_ln):
    B, T, C = x.shape
    ws = (p["ln_1"], p["wq"], p["wk"], p["wv"], p["wo"],
          p["ln_2"], p["w_fc"], p["w_pm"], lnf)
    return pl.pallas_call(
        functools.partial(_encoder_block_kernel, apply_final_ln=apply_final_ln),
        out_shape=jax.ShapeDtypeStruct((B, T, C), jnp.float32),
        grid=(B,),
        in_specs=[pl.BlockSpec((None, T, C), lambda b: (b, 0, 0))]
                 + [_const_spec(w) for w in ws],
        out_specs=pl.BlockSpec((None, T, C), lambda b: (b, 0, 0)),
        compiler_params=_CPARAMS,
    )(x, *ws)


def decoder_block(x, enc, p):
    B, T, C = x.shape
    Te = enc.shape[1]
    ws = (p["ln_1"], p["wq1"], p["wk1"], p["wv1"], p["wo1"],
          p["ln_2"], p["wq2"], p["wk2"], p["wv2"], p["wo2"],
          p["ln_3"], p["w_fc"], p["w_pm"])
    return pl.pallas_call(
        _decoder_block_kernel,
        out_shape=jax.ShapeDtypeStruct((B, T, C), jnp.float32),
        grid=(B,),
        in_specs=[pl.BlockSpec((None, T, C), lambda b: (b, 0, 0)),
                  pl.BlockSpec((None, Te, C), lambda b: (b, 0, 0))]
                 + [_const_spec(w) for w in ws],
        out_specs=pl.BlockSpec((None, T, C), lambda b: (b, 0, 0)),
        compiler_params=_CPARAMS,
    )(x, enc, *ws)


def decoder_last_block(x, enc, p, lnf, wlm_t):
    """Last decoder block fused with ln_f + lm_head (last position only)."""
    B, T, C = x.shape
    Te = enc.shape[1]
    V = wlm_t.shape[1]
    ws = (p["ln_1"], p["wq1"], p["wk1"], p["wv1"], p["wo1"],
          p["ln_2"], p["wq2"], p["wk2"], p["wv2"], p["wo2"],
          p["ln_3"], p["w_fc"], p["w_pm"], lnf, wlm_t)
    return pl.pallas_call(
        _decoder_last_block_kernel,
        out_shape=jax.ShapeDtypeStruct((B, 1, V), jnp.float32),
        grid=(B,),
        in_specs=[pl.BlockSpec((None, T, C), lambda b: (b, 0, 0)),
                  pl.BlockSpec((None, Te, C), lambda b: (b, 0, 0))]
                 + [_const_spec(w) for w in ws],
        out_specs=pl.BlockSpec((None, 1, V), lambda b: (b, 0, 0)),
        compiler_params=_CPARAMS,
    )(x, enc, *ws)


# ------------------------------ forward pass ---------------------------------

def seq2seq_forward(kp, src, idx, cfg):
    # ---- encoder ----  (embedding gathers stay in XLA)
    B, Ts = src.shape
    assert Ts <= cfg["src_len"]
    x = jnp.take(kp["enc_wte"], src, axis=0) + kp["enc_wpe"][:Ts][None]
    n_enc = len(kp["enc_h"])
    for i, p in enumerate(kp["enc_h"]):
        x = encoder_block(x, p, kp["enc_ln_f"], apply_final_ln=(i == n_enc - 1))
    enc_out = x                                       # enc ln_f already applied

    # ---- decoder ----
    B, Tt = idx.shape
    assert Tt <= cfg["tgt_len"]
    x = jnp.take(kp["dec_wte"], idx, axis=0) + kp["dec_wpe"][:Tt][None]
    for p in kp["dec_h"][:-1]:
        x = decoder_block(x, enc_out, p)
    # targets=None path: ln_f + lm_head only on the last time-step, loss None.
    logits = decoder_last_block(x, enc_out, kp["dec_h"][-1],
                                kp["dec_ln_f"], kp["lm_head_T"])
    return logits, None


# ------------------------------ parameters -----------------------------------

def init_params(key, cfg):
    """PyTorch-equivalent init, weights stored in (in, out) layout, f32."""
    C = cfg["n_embd"]
    std = 0.02
    proj_std = 0.02 / math.sqrt(2 * cfg["n_layer"])
    keys = iter(jax.random.split(key, 256))

    def nrm(shape, s=std):
        return jax.random.normal(next(keys), shape, jnp.float32) * s

    def enc_block():
        return dict(
            ln_1=jnp.ones((C,), jnp.float32),
            attn=dict(c_attn=nrm((C, 3 * C)), c_proj=nrm((C, C), proj_std)),
            ln_2=jnp.ones((C,), jnp.float32),
            mlp=dict(c_fc=nrm((C, 4 * C)), c_proj=nrm((4 * C, C), proj_std)),
        )

    def dec_block():
        return dict(
            ln_1=jnp.ones((C,), jnp.float32),
            attn1=dict(c_attn=nrm((C, 3 * C)), c_proj=nrm((C, C), proj_std)),
            ln_2=jnp.ones((C,), jnp.float32),
            attn2=dict(c_attn1=nrm((C, 2 * C)), c_attn2=nrm((C, C)),
                       c_proj=nrm((C, C), proj_std)),
            ln_3=jnp.ones((C,), jnp.float32),
            mlp=dict(c_fc=nrm((C, 4 * C)), c_proj=nrm((4 * C, C), proj_std)),
        )

    lm_head = nrm((cfg["tgt_vocab_size"], C))   # (tgt_vocab, C), PyTorch layout
    return dict(
        enc_wte=nrm((cfg["src_vocab_size"], C)),
        enc_wpe=nrm((cfg["src_len"], C)),
        enc_h=[enc_block() for _ in range(cfg["n_layer"])],
        enc_ln_f=jnp.ones((C,), jnp.float32),
        dec_wte=lm_head,                         # weight tying with lm_head
        dec_wpe=nrm((cfg["tgt_len"], C)),
        dec_h=[dec_block() for _ in range(cfg["n_layer"])],
        dec_ln_f=jnp.ones((C,), jnp.float32),
        lm_head=lm_head,
    )


def prepare_params(params, cfg):
    """One-time re-layout for the kernels: head-major bf16 attention weights,
    bf16 MLP weights, pre-transposed (C, V) bf16 lm_head, f32 LN weights."""
    H = cfg["n_head"]
    C = cfg["n_embd"]

    def heads_in(w):     # (C, H*Dh) -> (H, C, Dh) bf16
        Dh = w.shape[1] // H
        return jnp.transpose(w.reshape(C, H, Dh), (1, 0, 2)).astype(jnp.bfloat16)

    def heads_out(w):    # (C, C) -> (H, Dh, C) bf16   (rows = concat of heads)
        return w.reshape(H, C // H, C).astype(jnp.bfloat16)

    def ln(w):
        return w.reshape(1, C).astype(jnp.float32)

    def enc_blk(p):
        ca = p["attn"]["c_attn"]
        return dict(
            ln_1=ln(p["ln_1"]),
            wq=heads_in(ca[:, :C]), wk=heads_in(ca[:, C:2 * C]),
            wv=heads_in(ca[:, 2 * C:]),
            wo=heads_out(p["attn"]["c_proj"]),
            ln_2=ln(p["ln_2"]),
            w_fc=p["mlp"]["c_fc"].astype(jnp.bfloat16),
            w_pm=p["mlp"]["c_proj"].astype(jnp.bfloat16),
        )

    def dec_blk(p):
        ca = p["attn1"]["c_attn"]
        ckv = p["attn2"]["c_attn1"]
        return dict(
            ln_1=ln(p["ln_1"]),
            wq1=heads_in(ca[:, :C]), wk1=heads_in(ca[:, C:2 * C]),
            wv1=heads_in(ca[:, 2 * C:]),
            wo1=heads_out(p["attn1"]["c_proj"]),
            ln_2=ln(p["ln_2"]),
            wq2=heads_in(p["attn2"]["c_attn2"]),
            wk2=heads_in(ckv[:, :C]), wv2=heads_in(ckv[:, C:]),
            wo2=heads_out(p["attn2"]["c_proj"]),
            ln_3=ln(p["ln_3"]),
            w_fc=p["mlp"]["c_fc"].astype(jnp.bfloat16),
            w_pm=p["mlp"]["c_proj"].astype(jnp.bfloat16),
        )

    return dict(
        enc_wte=params["enc_wte"], enc_wpe=params["enc_wpe"],
        enc_h=[enc_blk(p) for p in params["enc_h"]],
        enc_ln_f=ln(params["enc_ln_f"]),
        dec_wte=params["dec_wte"], dec_wpe=params["dec_wpe"],
        dec_h=[dec_blk(p) for p in params["dec_h"]],
        dec_ln_f=ln(params["dec_ln_f"]),
        lm_head_T=jnp.transpose(params["lm_head"]).astype(jnp.bfloat16),  # (C, V)
    )


# --------------------------------- main ---------------------------------------

if __name__ == "__main__":
    cfg = dict(src_vocab_size=40, tgt_vocab_size=48, src_len=16, tgt_len=16,
               n_embd=32, n_head=4, n_layer=2, dropout=0.0, bias=False)

    key = jax.random.PRNGKey(0)
    pkey, skey, ikey = jax.random.split(key, 3)
    params = init_params(pkey, cfg)
    kparams = prepare_params(params, cfg)      # one-time weight re-layout

    B, Ts, Tt = 2, 8, 8
    src = jax.random.randint(skey, (B, Ts), 0, cfg["src_vocab_size"], dtype=jnp.int32)
    idx = jax.random.randint(ikey, (B, Tt), 0, cfg["tgt_vocab_size"], dtype=jnp.int32)

    fwd = jax.jit(lambda prm, s, i: seq2seq_forward(prm, s, i, cfg))
    logits, loss = fwd(kparams, src, idx)
    logits = jax.block_until_ready(logits)

    assert logits.shape == (B, 1, cfg["tgt_vocab_size"])
    assert loss is None
    assert bool(jnp.all(jnp.isfinite(logits)))
    print("KERNEL_OK")
</pallas_src>

<mosaic_0001>
module attributes {stable_mosaic.version = 11 : i64} {
  func.func @_encoder_block_kernel(%arg0: i32, %arg1: memref<1x8x32xf32, #tpu.memory_space<vmem>>, %arg2: memref<1x32xf32, #tpu.memory_space<vmem>>, %arg3: memref<4x32x8xbf16, #tpu.memory_space<vmem>>, %arg4: memref<4x32x8xbf16, #tpu.memory_space<vmem>>, %arg5: memref<4x32x8xbf16, #tpu.memory_space<vmem>>, %arg6: memref<4x8x32xbf16, #tpu.memory_space<vmem>>, %arg7: memref<1x32xf32, #tpu.memory_space<vmem>>, %arg8: memref<32x128xbf16, #tpu.memory_space<vmem>>, %arg9: memref<128x32xbf16, #tpu.memory_space<vmem>>, %arg10: memref<1x32xf32, #tpu.memory_space<vmem>>, %arg11: memref<1x8x32xf32, #tpu.memory_space<vmem>>) attributes {dimension_semantics = [#tpu.dimension_semantics<parallel>], iteration_bounds = array<i64: 2>, scalar_prefetch = 0 : i64, scratch_operands = 0 : i64, tpu.core_type = #tpu.core_type<tc>, window_params = [{transform_indices = @transform_0, window_bounds = array<i64: 1, 8, 32>}, {pipeline_mode = #tpu.pipeline_mode<synchronous>, transform_indices = @transform_1, window_bounds = array<i64: 1, 32>}, {pipeline_mode = #tpu.pipeline_mode<synchronous>, transform_indices = @transform_2, window_bounds = array<i64: 4, 32, 8>}, {pipeline_mode = #tpu.pipeline_mode<synchronous>, transform_indices = @transform_3, window_bounds = array<i64: 4, 32, 8>}, {pipeline_mode = #tpu.pipeline_mode<synchronous>, transform_indices = @transform_4, window_bounds = array<i64: 4, 32, 8>}, {pipeline_mode = #tpu.pipeline_mode<synchronous>, transform_indices = @transform_5, window_bounds = array<i64: 4, 8, 32>}, {pipeline_mode = #tpu.pipeline_mode<synchronous>, transform_indices = @transform_6, window_bounds = array<i64: 1, 32>}, {pipeline_mode = #tpu.pipeline_mode<synchronous>, transform_indices = @transform_7, window_bounds = array<i64: 32, 128>}, {pipeline_mode = #tpu.pipeline_mode<synchronous>, transform_indices = @transform_8, window_bounds = array<i64: 128, 32>}, {pipeline_mode = #tpu.pipeline_mode<synchronous>, transform_indices = @transform_9, window_bounds = array<i64: 1, 32>}, {transform_indices = @transform_10, window_bounds = array<i64: 1, 8, 32>}]} {
    %c0 = arith.constant 0 : index
    %c0_0 = arith.constant 0 : index
    %c0_1 = arith.constant 0 : index
    %0 = vector.load %arg1[%c0, %c0_0, %c0_1] : memref<1x8x32xf32, #tpu.memory_space<vmem>>, vector<1x8x32xf32>
    %1 = vector.shape_cast %0 : vector<1x8x32xf32> to vector<8x32xf32>
    %c0_2 = arith.constant 0 : index
    %c0_3 = arith.constant 0 : index
    %2 = vector.load %arg2[%c0_2, %c0_3] : memref<1x32xf32, #tpu.memory_space<vmem>>, vector<1x32xf32>
    %cst = arith.constant dense<0.000000e+00> : vector<8xf32>
    %3 = vector.multi_reduction <add>, %1, %cst [1] : vector<8x32xf32> to vector<8xf32>
    %4 = vector.shape_cast %3 : vector<8xf32> to vector<8x1xf32>
    %cst_4 = arith.constant 3.200000e+01 : f32
    %5 = vector.broadcast %cst_4 : f32 to vector<8x1xf32>
    %6 = arith.divf %4, %5 : vector<8x1xf32>
    %7 = vector.broadcast %6 : vector<8x1xf32> to vector<8x32xf32>
    %8 = arith.subf %1, %7 : vector<8x32xf32>
    %9 = arith.mulf %8, %8 : vector<8x32xf32>
    %cst_5 = arith.constant dense<0.000000e+00> : vector<8xf32>
    %10 = vector.multi_reduction <add>, %9, %cst_5 [1] : vector<8x32xf32> to vector<8xf32>
    %11 = vector.shape_cast %10 : vector<8xf32> to vector<8x1xf32>
    %cst_6 = arith.constant 3.200000e+01 : f32
    %12 = vector.broadcast %cst_6 : f32 to vector<8x1xf32>
    %13 = arith.divf %11, %12 : vector<8x1xf32>
    %cst_7 = arith.constant 9.99999974E-6 : f32
    %14 = vector.broadcast %cst_7 : f32 to vector<8x1xf32>
    %15 = arith.addf %13, %14 : vector<8x1xf32>
    %16 = math.rsqrt %15 : vector<8x1xf32>
    %17 = vector.broadcast %16 : vector<8x1xf32> to vector<8x32xf32>
    %18 = arith.mulf %8, %17 : vector<8x32xf32>
    %19 = vector.broadcast %2 : vector<1x32xf32> to vector<8x32xf32>
    %20 = arith.mulf %18, %19 : vector<8x32xf32>
    %21 = arith.truncf %20 : vector<8x32xf32> to vector<8x32xbf16>
    %c0_8 = arith.constant 0 : index
    %c0_9 = arith.constant 0 : index
    %c0_10 = arith.constant 0 : index
    %22 = vector.load %arg3[%c0_8, %c0_9, %c0_10] : memref<4x32x8xbf16, #tpu.memory_space<vmem>>, vector<4x32x8xbf16>
    %c0_11 = arith.constant 0 : index
    %c0_12 = arith.constant 0 : index
    %c0_13 = arith.constant 0 : index
    %23 = vector.load %arg4[%c0_11, %c0_12, %c0_13] : memref<4x32x8xbf16, #tpu.memory_space<vmem>>, vector<4x32x8xbf16>
    %c0_14 = arith.constant 0 : index
    %c0_15 = arith.constant 0 : index
    %c0_16 = arith.constant 0 : index
    %24 = vector.load %arg5[%c0_14, %c0_15, %c0_16] : memref<4x32x8xbf16, #tpu.memory_space<vmem>>, vector<4x32x8xbf16>
    %c0_17 = arith.constant 0 : index
    %c0_18 = arith.constant 0 : index
    %c0_19 = arith.constant 0 : index
    %25 = vector.load %arg6[%c0_17, %c0_18, %c0_19] : memref<4x8x32xbf16, #tpu.memory_space<vmem>>, vector<4x8x32xbf16>
    %26 = vector.shape_cast %21 : vector<8x32xbf16> to vector<1x8x32xbf16>
    %27 = vector.shape_cast %26 : vector<1x8x32xbf16> to vector<1x8x32xbf16>
    %28 = vector.broadcast %27 : vector<1x8x32xbf16> to vector<4x8x32xbf16>
    %29 = vector.shape_cast %21 : vector<8x32xbf16> to vector<1x8x32xbf16>
    %30 = vector.shape_cast %29 : vector<1x8x32xbf16> to vector<1x8x32xbf16>
    %31 = vector.broadcast %30 : vector<1x8x32xbf16> to vector<4x8x32xbf16>
    "tpu.trace_start"() <{level = 10 : i32, message = "htc,hcd->htd"}> : () -> ()
    %cst_20 = arith.constant dense<0.000000e+00> : vector<4x8x8xf32>
    %32 = tpu.matmul %28, %22, %cst_20 {dimension_numbers = #tpu.dot_dimension_numbers<[2], [1], [1], [2], [0, 0, 0, 1, 1, 2], [0], [0]>} : vector<4x8x32xbf16>, vector<4x32x8xbf16>, vector<4x8x8xf32> -> vector<4x8x8xf32>
    %cst_21 = arith.constant dense<0.000000e+00> : vector<4x8x8xf32>
    %33 = tpu.matmul %31, %23, %cst_21 {dimension_numbers = #tpu.dot_dimension_numbers<[2], [1], [1], [2], [0, 0, 0, 1, 1, 2], [0], [0]>} : vector<4x8x32xbf16>, vector<4x32x8xbf16>, vector<4x8x8xf32> -> vector<4x8x8xf32>
    %cst_22 = arith.constant dense<0.000000e+00> : vector<4x8x8xf32>
    %34 = tpu.matmul %31, %24, %cst_22 {dimension_numbers = #tpu.dot_dimension_numbers<[2], [1], [1], [2], [0, 0, 0, 1, 1, 2], [0], [0]>} : vector<4x8x32xbf16>, vector<4x32x8xbf16>, vector<4x8x8xf32> -> vector<4x8x8xf32>
    "tpu.trace_stop"() : () -> ()
    %35 = arith.truncf %32 : vector<4x8x8xf32> to vector<4x8x8xbf16>
    %36 = arith.truncf %33 : vector<4x8x8xf32> to vector<4x8x8xbf16>
    "tpu.trace_start"() <{level = 10 : i32, message = "hqd,hkd->hqk"}> : () -> ()
    %cst_23 = arith.constant dense<0.000000e+00> : vector<4x8x8xf32>
    %37 = tpu.matmul %35, %36, %cst_23 {dimension_numbers = #tpu.dot_dimension_numbers<[2], [2], [1], [1], [0, 0, 0, 1, 1, 1], [0], [0]>} : vector<4x8x8xbf16>, vector<4x8x8xbf16>, vector<4x8x8xf32> -> vector<4x8x8xf32>
    "tpu.trace_stop"() : () -> ()
    %cst_24 = arith.constant 0.353553385 : f32
    %38 = vector.broadcast %cst_24 : f32 to vector<4x8x8xf32>
    %39 = arith.mulf %37, %38 : vector<4x8x8xf32>
    %cst_25 = arith.constant dense<0xFF800000> : vector<4x8xf32>
    %40 = vector.multi_reduction <maximumf>, %39, %cst_25 [2] : vector<4x8x8xf32> to vector<4x8xf32>
    %41 = vector.shape_cast %40 : vector<4x8xf32> to vector<4x8x1xf32>
    %42 = vector.broadcast %41 : vector<4x8x1xf32> to vector<4x8x8xf32>
    %43 = arith.subf %39, %42 : vector<4x8x8xf32>
    %44 = math.exp %43 : vector<4x8x8xf32>
    %cst_26 = arith.constant dense<0.000000e+00> : vector<4x8xf32>
    %45 = vector.multi_reduction <add>, %44, %cst_26 [2] : vector<4x8x8xf32> to vector<4x8xf32>
    %46 = vector.shape_cast %45 : vector<4x8xf32> to vector<4x8x1xf32>
    %47 = tpu.reciprocal %46 {approx = true} : vector<4x8x1xf32> -> vector<4x8x1xf32>
    %48 = vector.broadcast %47 : vector<4x8x1xf32> to vector<4x8x8xf32>
    %49 = arith.mulf %44, %48 : vector<4x8x8xf32>
    %50 = arith.truncf %49 : vector<4x8x8xf32> to vector<4x8x8xbf16>
    %51 = arith.truncf %34 : vector<4x8x8xf32> to vector<4x8x8xbf16>
    "tpu.trace_start"() <{level = 10 : i32, message = "hqk,hkd->hqd"}> : () -> ()
    %cst_27 = arith.constant dense<0.000000e+00> : vector<4x8x8xf32>
    %52 = tpu.matmul %50, %51, %cst_27 {dimension_numbers = #tpu.dot_dimension_numbers<[2], [1], [1], [2], [0, 0, 0, 1, 1, 2], [0], [0]>} : vector<4x8x8xbf16>, vector<4x8x8xbf16>, vector<4x8x8xf32> -> vector<4x8x8xf32>
    "tpu.trace_stop"() : () -> ()
    %53 = arith.truncf %52 : vector<4x8x8xf32> to vector<4x8x8xbf16>
    "tpu.trace_start"() <{level = 10 : i32, message = "htd,hdc->htc"}> : () -> ()
    %cst_28 = arith.constant dense<0.000000e+00> : vector<4x8x32xf32>
    %54 = tpu.matmul %53, %25, %cst_28 {dimension_numbers = #tpu.dot_dimension_numbers<[2], [1], [1], [2], [0, 0, 0, 1, 1, 2], [0], [0]>} : vector<4x8x8xbf16>, vector<4x8x32xbf16>, vector<4x8x32xf32> -> vector<4x8x32xf32>
    "tpu.trace_stop"() : () -> ()
    %cst_29 = arith.constant dense<0.000000e+00> : vector<8x32xf32>
    %55 = vector.multi_reduction <add>, %54, %cst_29 [0] : vector<4x8x32xf32> to vector<8x32xf32>
    %56 = arith.addf %1, %55 : vector<8x32xf32>
    %c0_30 = arith.constant 0 : index
    %c0_31 = arith.constant 0 : index
    %57 = vector.load %arg7[%c0_30, %c0_31] : memref<1x32xf32, #tpu.memory_space<vmem>>, vector<1x32xf32>
    %cst_32 = arith.constant dense<0.000000e+00> : vector<8xf32>
    %58 = vector.multi_reduction <add>, %56, %cst_32 [1] : vector<8x32xf32> to vector<8xf32>
    %59 = vector.shape_cast %58 : vector<8xf32> to vector<8x1xf32>
    %cst_33 = arith.constant 3.200000e+01 : f32
    %60 = vector.broadcast %cst_33 : f32 to vector<8x1xf32>
    %61 = arith.divf %59, %60 : vector<8x1xf32>
    %62 = vector.broadcast %61 : vector<8x1xf32> to vector<8x32xf32>
    %63 = arith.subf %56, %62 : vector<8x32xf32>
    %64 = arith.mulf %63, %63 : vector<8x32xf32>
    %cst_34 = arith.constant dense<0.000000e+00> : vector<8xf32>
    %65 = vector.multi_reduction <add>, %64, %cst_34 [1] : vector<8x32xf32> to vector<8xf32>
    %66 = vector.shape_cast %65 : vector<8xf32> to vector<8x1xf32>
    %cst_35 = arith.constant 3.200000e+01 : f32
    %67 = vector.broadcast %cst_35 : f32 to vector<8x1xf32>
    %68 = arith.divf %66, %67 : vector<8x1xf32>
    %cst_36 = arith.constant 9.99999974E-6 : f32
    %69 = vector.broadcast %cst_36 : f32 to vector<8x1xf32>
    %70 = arith.addf %68, %69 : vector<8x1xf32>
    %71 = math.rsqrt %70 : vector<8x1xf32>
    %72 = vector.broadcast %71 : vector<8x1xf32> to vector<8x32xf32>
    %73 = arith.mulf %63, %72 : vector<8x32xf32>
    %74 = vector.broadcast %57 : vector<1x32xf32> to vector<8x32xf32>
    %75 = arith.mulf %73, %74 : vector<8x32xf32>
    %76 = arith.truncf %75 : vector<8x32xf32> to vector<8x32xbf16>
    %c0_37 = arith.constant 0 : index
    %c0_38 = arith.constant 0 : index
    %77 = vector.load %arg8[%c0_37, %c0_38] : memref<32x128xbf16, #tpu.memory_space<vmem>>, vector<32x128xbf16>
    %cst_39 = arith.constant dense<0.000000e+00> : vector<8x128xf32>
    %78 = tpu.matmul %76, %77, %cst_39 {dimension_numbers = #tpu.dot_dimension_numbers<[1], [0], [0], [1], [0, 0, 1, 1], [], []>} : vector<8x32xbf16>, vector<32x128xbf16>, vector<8x128xf32> -> vector<8x128xf32>
    %cst_40 = arith.constant 5.000000e-01 : f32
    %79 = vector.broadcast %cst_40 : f32 to vector<8x128xf32>
    %80 = arith.mulf %79, %78 : vector<8x128xf32>
    %cst_41 = arith.constant 0.707106769 : f32
    %81 = vector.broadcast %cst_41 : f32 to vector<8x128xf32>
    %82 = arith.mulf %78, %81 : vector<8x128xf32>
    %cst_42 = arith.constant 0.000000e+00 : f32
    %83 = vector.broadcast %cst_42 : f32 to vector<8x128xf32>
    %84 = arith.cmpf oge, %82, %83 : vector<8x128xf32>
    %cst_43 = arith.constant 1.000000e+00 : f32
    %cst_44 = arith.constant -1.000000e+00 : f32
    %85 = vector.broadcast %cst_43 : f32 to vector<8x128xf32>
    %86 = vector.broadcast %cst_44 : f32 to vector<8x128xf32>
    %87 = arith.select %84, %85, %86 : vector<8x128xi1>, vector<8x128xf32>
    %88 = math.absf %82 : vector<8x128xf32>
    %cst_45 = arith.constant 0.327591091 : f32
    %89 = vector.broadcast %cst_45 : f32 to vector<8x128xf32>
    %90 = arith.mulf %89, %88 : vector<8x128xf32>
    %cst_46 = arith.constant 1.000000e+00 : f32
    %91 = vector.broadcast %cst_46 : f32 to vector<8x128xf32>
    %92 = arith.addf %91, %90 : vector<8x128xf32>
    %cst_47 = arith.constant 1.000000e+00 : f32
    %93 = vector.broadcast %cst_47 : f32 to vector<8x128xf32>
    %94 = arith.divf %93, %92 : vector<8x128xf32>
    %cst_48 = arith.constant 1.06140542 : f32
    %95 = vector.broadcast %cst_48 : f32 to vector<8x128xf32>
    %96 = arith.mulf %95, %94 : vector<8x128xf32>
    %cst_49 = arith.constant -1.45315206 : f32
    %97 = vector.broadcast %cst_49 : f32 to vector<8x128xf32>
    %98 = arith.addf %96, %97 : vector<8x128xf32>
    %99 = arith.mulf %98, %94 : vector<8x128xf32>
    %cst_50 = arith.constant 1.42141378 : f32
    %100 = vector.broadcast %cst_50 : f32 to vector<8x128xf32>
    %101 = arith.addf %99, %100 : vector<8x128xf32>
    %102 = arith.mulf %101, %94 : vector<8x128xf32>
    %cst_51 = arith.constant -0.284496725 : f32
    %103 = vector.broadcast %cst_51 : f32 to vector<8x128xf32>
    %104 = arith.addf %102, %103 : vector<8x128xf32>
    %105 = arith.mulf %104, %94 : vector<8x128xf32>
    %cst_52 = arith.constant 0.254829586 : f32
    %106 = vector.broadcast %cst_52 : f32 to vector<8x128xf32>
    %107 = arith.addf %105, %106 : vector<8x128xf32>
    %108 = arith.mulf %107, %94 : vector<8x128xf32>
    %cst_53 = arith.constant 0.000000e+00 : f32
    %109 = vector.broadcast %cst_53 : f32 to vector<8x128xf32>
    %110 = arith.subf %109, %88 : vector<8x128xf32>
    %111 = arith.mulf %110, %88 : vector<8x128xf32>
    %112 = math.exp %111 : vector<8x128xf32>
    %113 = arith.mulf %108, %112 : vector<8x128xf32>
    %cst_54 = arith.constant 1.000000e+00 : f32
    %114 = vector.broadcast %cst_54 : f32 to vector<8x128xf32>
    %115 = arith.subf %114, %113 : vector<8x128xf32>
    %116 = arith.mulf %87, %115 : vector<8x128xf32>
    %cst_55 = arith.constant 1.000000e+00 : f32
    %117 = vector.broadcast %cst_55 : f32 to vector<8x128xf32>
    %118 = arith.addf %117, %116 : vector<8x128xf32>
    %119 = arith.mulf %80, %118 : vector<8x128xf32>
    %120 = arith.truncf %119 : vector<8x128xf32> to vector<8x128xbf16>
    %c0_56 = arith.constant 0 : index
    %c0_57 = arith.constant 0 : index
    %121 = vector.load %arg9[%c0_56, %c0_57] : memref<128x32xbf16, #tpu.memory_space<vmem>>, vector<128x32xbf16>
    %cst_58 = arith.constant dense<0.000000e+00> : vector<8x32xf32>
    %122 = tpu.matmul %120, %121, %cst_58 {dimension_numbers = #tpu.dot_dimension_numbers<[1], [0], [0], [1], [0, 0, 1, 1], [], []>} : vector<8x128xbf16>, vector<128x32xbf16>, vector<8x32xf32> -> vector<8x32xf32>
    %123 = arith.addf %56, %122 : vector<8x32xf32>
    %c0_59 = arith.constant 0 : index
    %c0_60 = arith.constant 0 : index
    %c0_61 = arith.constant 0 : index
    %124 = vector.load %arg11[%c0_59, %c0_60, %c0_61] : memref<1x8x32xf32, #tpu.memory_space<vmem>>, vector<1x8x32xf32>
    %125 = vector.shape_cast %124 : vector<1x8x32xf32> to vector<8x32xf32>
    %126 = vector.shape_cast %123 : vector<8x32xf32> to vector<1x8x32xf32>
    tpu.vector_store %arg11[%c0_59, %c0_60, %c0_61], %126 {strides = array<i32>} : memref<1x8x32xf32, #tpu.memory_space<vmem>>, vector<1x8x32xf32>,
    return
  }
  func.func @transform_0(%arg0: i32) -> (i32, i32, i32) {
    %c0_i32 = arith.constant 0 : i32
    %c0_i32_0 = arith.constant 0 : i32
    %c0_i32_1 = arith.constant 0 : i32
    return %arg0, %c0_i32, %c0_i32_0 : i32, i32, i32
  }
  func.func @transform_1(%arg0: i32) -> (i32, i32) {
    %c0_i32 = arith.constant 0 : i32
    %c0_i32_0 = arith.constant 0 : i32
    %c0_i32_1 = arith.constant 0 : i32
    return %c0_i32, %c0_i32_0 : i32, i32
  }
  func.func @transform_2(%arg0: i32) -> (i32, i32, i32) {
    %c0_i32 = arith.constant 0 : i32
    %c0_i32_0 = arith.constant 0 : i32
    %c0_i32_1 = arith.constant 0 : i32
    %c0_i32_2 = arith.constant 0 : i32
    return %c0_i32, %c0_i32_0, %c0_i32_1 : i32, i32, i32
  }
  func.func @transform_3(%arg0: i32) -> (i32, i32, i32) {
    %c0_i32 = arith.constant 0 : i32
    %c0_i32_0 = arith.constant 0 : i32
    %c0_i32_1 = arith.constant 0 : i32
    %c0_i32_2 = arith.constant 0 : i32
    return %c0_i32, %c0_i32_0, %c0_i32_1 : i32, i32, i32
  }
  func.func @transform_4(%arg0: i32) -> (i32, i32, i32) {
    %c0_i32 = arith.constant 0 : i32
    %c0_i32_0 = arith.constant 0 : i32
    %c0_i32_1 = arith.constant 0 : i32
    %c0_i32_2 = arith.constant 0 : i32
    return %c0_i32, %c0_i32_0, %c0_i32_1 : i32, i32, i32
  }
  func.func @transform_5(%arg0: i32) -> (i32, i32, i32) {
    %c0_i32 = arith.constant 0 : i32
    %c0_i32_0 = arith.constant 0 : i32
    %c0_i32_1 = arith.constant 0 : i32
    %c0_i32_2 = arith.constant 0 : i32
    return %c0_i32, %c0_i32_0, %c0_i32_1 : i32, i32, i32
  }
  func.func @transform_6(%arg0: i32) -> (i32, i32) {
    %c0_i32 = arith.constant 0 : i32
    %c0_i32_0 = arith.constant 0 : i32
    %c0_i32_1 = arith.constant 0 : i32
    return %c0_i32, %c0_i32_0 : i32, i32
  }
  func.func @transform_7(%arg0: i32) -> (i32, i32) {
    %c0_i32 = arith.constant 0 : i32
    %c0_i32_0 = arith.constant 0 : i32
    %c0_i32_1 = arith.constant 0 : i32
    return %c0_i32, %c0_i32_0 : i32, i32
  }
  func.func @transform_8(%arg0: i32) -> (i32, i32) {
    %c0_i32 = arith.constant 0 : i32
    %c0_i32_0 = arith.constant 0 : i32
    %c0_i32_1 = arith.constant 0 : i32
    return %c0_i32, %c0_i32_0 : i32, i32
  }
  func.func @transform_9(%arg0: i32) -> (i32, i32) {
    %c0_i32 = arith.constant 0 : i32
    %c0_i32_0 = arith.constant 0 : i32
    %c0_i32_1 = arith.constant 0 : i32
    return %c0_i32, %c0_i32_0 : i32, i32
  }
  func.func @transform_10(%arg0: i32) -> (i32, i32, i32) {
    %c0_i32 = arith.constant 0 : i32
    %c0_i32_0 = arith.constant 0 : i32
    %c0_i32_1 = arith.constant 0 : i32
    return %arg0, %c0_i32, %c0_i32_0 : i32, i32, i32
  }
}

module attributes {stable_mosaic.version = 11 : i64} {
  func.func @_encoder_block_kernel(%arg0: i32, %arg1: memref<1x8x32xf32, #tpu.memory_space<vmem>>, %arg2: memref<1x32xf32, #tpu.memory_space<vmem>>, %arg3: memref<4x32x8xbf16, #tpu.memory_space<vmem>>, %arg4: memref<4x32x8xbf16, #tpu.memory_space<vmem>>, %arg5: memref<4x32x8xbf16, #tpu.memory_space<vmem>>, %arg6: memref<4x8x32xbf16, #tpu.memory_space<vmem>>, %arg7: memref<1x32xf32, #tpu.memory_space<vmem>>, %arg8: memref<32x128xbf16, #tpu.memory_space<vmem>>, %arg9: memref<128x32xbf16, #tpu.memory_space<vmem>>, %arg10: memref<1x32xf32, #tpu.memory_space<vmem>>, %arg11: memref<1x8x32xf32, #tpu.memory_space<vmem>>) attributes {dimension_semantics = [#tpu.dimension_semantics<parallel>], iteration_bounds = array<i64: 2>, scalar_prefetch = 0 : i64, scratch_operands = 0 : i64, tpu.core_type = #tpu.core_type<tc>, window_params = [{transform_indices = @transform_0, window_bounds = array<i64: 1, 8, 32>}, {pipeline_mode = #tpu.pipeline_mode<synchronous>, transform_indices = @transform_1, window_bounds = array<i64: 1, 32>}, {pipeline_mode = #tpu.pipeline_mode<synchronous>, transform_indices = @transform_2, window_bounds = array<i64: 4, 32, 8>}, {pipeline_mode = #tpu.pipeline_mode<synchronous>, transform_indices = @transform_3, window_bounds = array<i64: 4, 32, 8>}, {pipeline_mode = #tpu.pipeline_mode<synchronous>, transform_indices = @transform_4, window_bounds = array<i64: 4, 32, 8>}, {pipeline_mode = #tpu.pipeline_mode<synchronous>, transform_indices = @transform_5, window_bounds = array<i64: 4, 8, 32>}, {pipeline_mode = #tpu.pipeline_mode<synchronous>, transform_indices = @transform_6, window_bounds = array<i64: 1, 32>}, {pipeline_mode = #tpu.pipeline_mode<synchronous>, transform_indices = @transform_7, window_bounds = array<i64: 32, 128>}, {pipeline_mode = #tpu.pipeline_mode<synchronous>, transform_indices = @transform_8, window_bounds = array<i64: 128, 32>}, {pipeline_mode = #tpu.pipeline_mode<synchronous>, transform_indices = @transform_9, window_bounds = array<i64: 1, 32>}, {transform_indices = @transform_10, window_bounds = array<i64: 1, 8, 32>}]} {
    %c0 = arith.constant 0 : index
    %c0_0 = arith.constant 0 : index
    %c0_1 = arith.constant 0 : index
    %0 = vector.load %arg1[%c0, %c0_0, %c0_1] : memref<1x8x32xf32, #tpu.memory_space<vmem>>, vector<1x8x32xf32>
    %1 = vector.shape_cast %0 : vector<1x8x32xf32> to vector<8x32xf32>
    %c0_2 = arith.constant 0 : index
    %c0_3 = arith.constant 0 : index
    %2 = vector.load %arg2[%c0_2, %c0_3] : memref<1x32xf32, #tpu.memory_space<vmem>>, vector<1x32xf32>
    %cst = arith.constant dense<0.000000e+00> : vector<8xf32>
    %3 = vector.multi_reduction <add>, %1, %cst [1] : vector<8x32xf32> to vector<8xf32>
    %4 = vector.shape_cast %3 : vector<8xf32> to vector<8x1xf32>
    %cst_4 = arith.constant 3.200000e+01 : f32
    %5 = vector.broadcast %cst_4 : f32 to vector<8x1xf32>
    %6 = arith.divf %4, %5 : vector<8x1xf32>
    %7 = vector.broadcast %6 : vector<8x1xf32> to vector<8x32xf32>
    %8 = arith.subf %1, %7 : vector<8x32xf32>
    %9 = arith.mulf %8, %8 : vector<8x32xf32>
    %cst_5 = arith.constant dense<0.000000e+00> : vector<8xf32>
    %10 = vector.multi_reduction <add>, %9, %cst_5 [1] : vector<8x32xf32> to vector<8xf32>
    %11 = vector.shape_cast %10 : vector<8xf32> to vector<8x1xf32>
    %cst_6 = arith.constant 3.200000e+01 : f32
    %12 = vector.broadcast %cst_6 : f32 to vector<8x1xf32>
    %13 = arith.divf %11, %12 : vector<8x1xf32>
    %cst_7 = arith.constant 9.99999974E-6 : f32
    %14 = vector.broadcast %cst_7 : f32 to vector<8x1xf32>
    %15 = arith.addf %13, %14 : vector<8x1xf32>
    %16 = math.rsqrt %15 : vector<8x1xf32>
    %17 = vector.broadcast %16 : vector<8x1xf32> to vector<8x32xf32>
    %18 = arith.mulf %8, %17 : vector<8x32xf32>
    %19 = vector.broadcast %2 : vector<1x32xf32> to vector<8x32xf32>
    %20 = arith.mulf %18, %19 : vector<8x32xf32>
    %21 = arith.truncf %20 : vector<8x32xf32> to vector<8x32xbf16>
    %c0_8 = arith.constant 0 : index
    %c0_9 = arith.constant 0 : index
    %c0_10 = arith.constant 0 : index
    %22 = vector.load %arg3[%c0_8, %c0_9, %c0_10] : memref<4x32x8xbf16, #tpu.memory_space<vmem>>, vector<4x32x8xbf16>
    %c0_11 = arith.constant 0 : index
    %c0_12 = arith.constant 0 : index
    %c0_13 = arith.constant 0 : index
    %23 = vector.load %arg4[%c0_11, %c0_12, %c0_13] : memref<4x32x8xbf16, #tpu.memory_space<vmem>>, vector<4x32x8xbf16>
    %c0_14 = arith.constant 0 : index
    %c0_15 = arith.constant 0 : index
    %c0_16 = arith.constant 0 : index
    %24 = vector.load %arg5[%c0_14, %c0_15, %c0_16] : memref<4x32x8xbf16, #tpu.memory_space<vmem>>, vector<4x32x8xbf16>
    %c0_17 = arith.constant 0 : index
    %c0_18 = arith.constant 0 : index
    %c0_19 = arith.constant 0 : index
    %25 = vector.load %arg6[%c0_17, %c0_18, %c0_19] : memref<4x8x32xbf16, #tpu.memory_space<vmem>>, vector<4x8x32xbf16>
    %26 = vector.shape_cast %21 : vector<8x32xbf16> to vector<1x8x32xbf16>
    %27 = vector.shape_cast %26 : vector<1x8x32xbf16> to vector<1x8x32xbf16>
    %28 = vector.broadcast %27 : vector<1x8x32xbf16> to vector<4x8x32xbf16>
    %29 = vector.shape_cast %21 : vector<8x32xbf16> to vector<1x8x32xbf16>
    %30 = vector.shape_cast %29 : vector<1x8x32xbf16> to vector<1x8x32xbf16>
    %31 = vector.broadcast %30 : vector<1x8x32xbf16> to vector<4x8x32xbf16>
    "tpu.trace_start"() <{level = 10 : i32, message = "htc,hcd->htd"}> : () -> ()
    %cst_20 = arith.constant dense<0.000000e+00> : vector<4x8x8xf32>
    %32 = tpu.matmul %28, %22, %cst_20 {dimension_numbers = #tpu.dot_dimension_numbers<[2], [1], [1], [2], [0, 0, 0, 1, 1, 2], [0], [0]>} : vector<4x8x32xbf16>, vector<4x32x8xbf16>, vector<4x8x8xf32> -> vector<4x8x8xf32>
    %cst_21 = arith.constant dense<0.000000e+00> : vector<4x8x8xf32>
    %33 = tpu.matmul %31, %23, %cst_21 {dimension_numbers = #tpu.dot_dimension_numbers<[2], [1], [1], [2], [0, 0, 0, 1, 1, 2], [0], [0]>} : vector<4x8x32xbf16>, vector<4x32x8xbf16>, vector<4x8x8xf32> -> vector<4x8x8xf32>
    %cst_22 = arith.constant dense<0.000000e+00> : vector<4x8x8xf32>
    %34 = tpu.matmul %31, %24, %cst_22 {dimension_numbers = #tpu.dot_dimension_numbers<[2], [1], [1], [2], [0, 0, 0, 1, 1, 2], [0], [0]>} : vector<4x8x32xbf16>, vector<4x32x8xbf16>, vector<4x8x8xf32> -> vector<4x8x8xf32>
    "tpu.trace_stop"() : () -> ()
    %35 = arith.truncf %32 : vector<4x8x8xf32> to vector<4x8x8xbf16>
    %36 = arith.truncf %33 : vector<4x8x8xf32> to vector<4x8x8xbf16>
    "tpu.trace_start"() <{level = 10 : i32, message = "hqd,hkd->hqk"}> : () -> ()
    %cst_23 = arith.constant dense<0.000000e+00> : vector<4x8x8xf32>
    %37 = tpu.matmul %35, %36, %cst_23 {dimension_numbers = #tpu.dot_dimension_numbers<[2], [2], [1], [1], [0, 0, 0, 1, 1, 1], [0], [0]>} : vector<4x8x8xbf16>, vector<4x8x8xbf16>, vector<4x8x8xf32> -> vector<4x8x8xf32>
    "tpu.trace_stop"() : () -> ()
    %cst_24 = arith.constant 0.353553385 : f32
    %38 = vector.broadcast %cst_24 : f32 to vector<4x8x8xf32>
    %39 = arith.mulf %37, %38 : vector<4x8x8xf32>
    %cst_25 = arith.constant dense<0xFF800000> : vector<4x8xf32>
    %40 = vector.multi_reduction <maximumf>, %39, %cst_25 [2] : vector<4x8x8xf32> to vector<4x8xf32>
    %41 = vector.shape_cast %40 : vector<4x8xf32> to vector<4x8x1xf32>
    %42 = vector.broadcast %41 : vector<4x8x1xf32> to vector<4x8x8xf32>
    %43 = arith.subf %39, %42 : vector<4x8x8xf32>
    %44 = math.exp %43 : vector<4x8x8xf32>
    %cst_26 = arith.constant dense<0.000000e+00> : vector<4x8xf32>
    %45 = vector.multi_reduction <add>, %44, %cst_26 [2] : vector<4x8x8xf32> to vector<4x8xf32>
    %46 = vector.shape_cast %45 : vector<4x8xf32> to vector<4x8x1xf32>
    %47 = tpu.reciprocal %46 {approx = true} : vector<4x8x1xf32> -> vector<4x8x1xf32>
    %48 = vector.broadcast %47 : vector<4x8x1xf32> to vector<4x8x8xf32>
    %49 = arith.mulf %44, %48 : vector<4x8x8xf32>
    %50 = arith.truncf %49 : vector<4x8x8xf32> to vector<4x8x8xbf16>
    %51 = arith.truncf %34 : vector<4x8x8xf32> to vector<4x8x8xbf16>
    "tpu.trace_start"() <{level = 10 : i32, message = "hqk,hkd->hqd"}> : () -> ()
    %cst_27 = arith.constant dense<0.000000e+00> : vector<4x8x8xf32>
    %52 = tpu.matmul %50, %51, %cst_27 {dimension_numbers = #tpu.dot_dimension_numbers<[2], [1], [1], [2], [0, 0, 0, 1, 1, 2], [0], [0]>} : vector<4x8x8xbf16>, vector<4x8x8xbf16>, vector<4x8x8xf32> -> vector<4x8x8xf32>
    "tpu.trace_stop"() : () -> ()
    %53 = arith.truncf %52 : vector<4x8x8xf32> to vector<4x8x8xbf16>
    "tpu.trace_start"() <{level = 10 : i32, message = "htd,hdc->htc"}> : () -> ()
    %cst_28 = arith.constant dense<0.000000e+00> : vector<4x8x32xf32>
    %54 = tpu.matmul %53, %25, %cst_28 {dimension_numbers = #tpu.dot_dimension_numbers<[2], [1], [1], [2], [0, 0, 0, 1, 1, 2], [0], [0]>} : vector<4x8x8xbf16>, vector<4x8x32xbf16>, vector<4x8x32xf32> -> vector<4x8x32xf32>
    "tpu.trace_stop"() : () -> ()
    %cst_29 = arith.constant dense<0.000000e+00> : vector<8x32xf32>
    %55 = vector.multi_reduction <add>, %54, %cst_29 [0] : vector<4x8x32xf32> to vector<8x32xf32>
    %56 = arith.addf %1, %55 : vector<8x32xf32>
    %c0_30 = arith.constant 0 : index
    %c0_31 = arith.constant 0 : index
    %57 = vector.load %arg7[%c0_30, %c0_31] : memref<1x32xf32, #tpu.memory_space<vmem>>, vector<1x32xf32>
    %cst_32 = arith.constant dense<0.000000e+00> : vector<8xf32>
    %58 = vector.multi_reduction <add>, %56, %cst_32 [1] : vector<8x32xf32> to vector<8xf32>
    %59 = vector.shape_cast %58 : vector<8xf32> to vector<8x1xf32>
    %cst_33 = arith.constant 3.200000e+01 : f32
    %60 = vector.broadcast %cst_33 : f32 to vector<8x1xf32>
    %61 = arith.divf %59, %60 : vector<8x1xf32>
    %62 = vector.broadcast %61 : vector<8x1xf32> to vector<8x32xf32>
    %63 = arith.subf %56, %62 : vector<8x32xf32>
    %64 = arith.mulf %63, %63 : vector<8x32xf32>
    %cst_34 = arith.constant dense<0.000000e+00> : vector<8xf32>
    %65 = vector.multi_reduction <add>, %64, %cst_34 [1] : vector<8x32xf32> to vector<8xf32>
    %66 = vector.shape_cast %65 : vector<8xf32> to vector<8x1xf32>
    %cst_35 = arith.constant 3.200000e+01 : f32
    %67 = vector.broadcast %cst_35 : f32 to vector<8x1xf32>
    %68 = arith.divf %66, %67 : vector<8x1xf32>
    %cst_36 = arith.constant 9.99999974E-6 : f32
    %69 = vector.broadcast %cst_36 : f32 to vector<8x1xf32>
    %70 = arith.addf %68, %69 : vector<8x1xf32>
    %71 = math.rsqrt %70 : vector<8x1xf32>
    %72 = vector.broadcast %71 : vector<8x1xf32> to vector<8x32xf32>
    %73 = arith.mulf %63, %72 : vector<8x32xf32>
    %74 = vector.broadcast %57 : vector<1x32xf32> to vector<8x32xf32>
    %75 = arith.mulf %73, %74 : vector<8x32xf32>
    %76 = arith.truncf %75 : vector<8x32xf32> to vector<8x32xbf16>
    %c0_37 = arith.constant 0 : index
    %c0_38 = arith.constant 0 : index
    %77 = vector.load %arg8[%c0_37, %c0_38] : memref<32x128xbf16, #tpu.memory_space<vmem>>, vector<32x128xbf16>
    %cst_39 = arith.constant dense<0.000000e+00> : vector<8x128xf32>
    %78 = tpu.matmul %76, %77, %cst_39 {dimension_numbers = #tpu.dot_dimension_numbers<[1], [0], [0], [1], [0, 0, 1, 1], [], []>} : vector<8x32xbf16>, vector<32x128xbf16>, vector<8x128xf32> -> vector<8x128xf32>
    %cst_40 = arith.constant 5.000000e-01 : f32
    %79 = vector.broadcast %cst_40 : f32 to vector<8x128xf32>
    %80 = arith.mulf %79, %78 : vector<8x128xf32>
    %cst_41 = arith.constant 0.707106769 : f32
    %81 = vector.broadcast %cst_41 : f32 to vector<8x128xf32>
    %82 = arith.mulf %78, %81 : vector<8x128xf32>
    %cst_42 = arith.constant 0.000000e+00 : f32
    %83 = vector.broadcast %cst_42 : f32 to vector<8x128xf32>
    %84 = arith.cmpf oge, %82, %83 : vector<8x128xf32>
    %cst_43 = arith.constant 1.000000e+00 : f32
    %cst_44 = arith.constant -1.000000e+00 : f32
    %85 = vector.broadcast %cst_43 : f32 to vector<8x128xf32>
    %86 = vector.broadcast %cst_44 : f32 to vector<8x128xf32>
    %87 = arith.select %84, %85, %86 : vector<8x128xi1>, vector<8x128xf32>
    %88 = math.absf %82 : vector<8x128xf32>
    %cst_45 = arith.constant 0.327591091 : f32
    %89 = vector.broadcast %cst_45 : f32 to vector<8x128xf32>
    %90 = arith.mulf %89, %88 : vector<8x128xf32>
    %cst_46 = arith.constant 1.000000e+00 : f32
    %91 = vector.broadcast %cst_46 : f32 to vector<8x128xf32>
    %92 = arith.addf %91, %90 : vector<8x128xf32>
    %cst_47 = arith.constant 1.000000e+00 : f32
    %93 = vector.broadcast %cst_47 : f32 to vector<8x128xf32>
    %94 = arith.divf %93, %92 : vector<8x128xf32>
    %cst_48 = arith.constant 1.06140542 : f32
    %95 = vector.broadcast %cst_48 : f32 to vector<8x128xf32>
    %96 = arith.mulf %95, %94 : vector<8x128xf32>
    %cst_49 = arith.constant -1.45315206 : f32
    %97 = vector.broadcast %cst_49 : f32 to vector<8x128xf32>
    %98 = arith.addf %96, %97 : vector<8x128xf32>
    %99 = arith.mulf %98, %94 : vector<8x128xf32>
    %cst_50 = arith.constant 1.42141378 : f32
    %100 = vector.broadcast %cst_50 : f32 to vector<8x128xf32>
    %101 = arith.addf %99, %100 : vector<8x128xf32>
    %102 = arith.mulf %101, %94 : vector<8x128xf32>
    %cst_51 = arith.constant -0.284496725 : f32
    %103 = vector.broadcast %cst_51 : f32 to vector<8x128xf32>
    %104 = arith.addf %102, %103 : vector<8x128xf32>
    %105 = arith.mulf %104, %94 : vector<8x128xf32>
    %cst_52 = arith.constant 0.254829586 : f32
    %106 = vector.broadcast %cst_52 : f32 to vector<8x128xf32>
    %107 = arith.addf %105, %106 : vector<8x128xf32>
    %108 = arith.mulf %107, %94 : vector<8x128xf32>
    %cst_53 = arith.constant 0.000000e+00 : f32
    %109 = vector.broadcast %cst_53 : f32 to vector<8x128xf32>
    %110 = arith.subf %109, %88 : vector<8x128xf32>
    %111 = arith.mulf %110, %88 : vector<8x128xf32>
    %112 = math.exp %111 : vector<8x128xf32>
    %113 = arith.mulf %108, %112 : vector<8x128xf32>
    %cst_54 = arith.constant 1.000000e+00 : f32
    %114 = vector.broadcast %cst_54 : f32 to vector<8x128xf32>
    %115 = arith.subf %114, %113 : vector<8x128xf32>
    %116 = arith.mulf %87, %115 : vector<8x128xf32>
    %cst_55 = arith.constant 1.000000e+00 : f32
    %117 = vector.broadcast %cst_55 : f32 to vector<8x128xf32>
    %118 = arith.addf %117, %116 : vector<8x128xf32>
    %119 = arith.mulf %80, %118 : vector<8x128xf32>
    %120 = arith.truncf %119 : vector<8x128xf32> to vector<8x128xbf16>
    %c0_56 = arith.constant 0 : index
    %c0_57 = arith.constant 0 : index
    %121 = vector.load %arg9[%c0_56, %c0_57] : memref<128x32xbf16, #tpu.memory_space<vmem>>, vector<128x32xbf16>
    %cst_58 = arith.constant dense<0.000000e+00> : vector<8x32xf32>
    %122 = tpu.matmul %120, %121, %cst_58 {dimension_numbers = #tpu.dot_dimension_numbers<[1], [0], [0], [1], [0, 0, 1, 1], [], []>} : vector<8x128xbf16>, vector<128x32xbf16>, vector<8x32xf32> -> vector<8x32xf32>
    %123 = arith.addf %56, %122 : vector<8x32xf32>
    %c0_59 = arith.constant 0 : index
    %c0_60 = arith.constant 0 : index
    %124 = vector.load %arg10[%c0_59, %c0_60] : memref<1x32xf32, #tpu.memory_space<vmem>>, vector<1x32xf32>
    %cst_61 = arith.constant dense<0.000000e+00> : vector<8xf32>
    %125 = vector.multi_reduction <add>, %123, %cst_61 [1] : vector<8x32xf32> to vector<8xf32>
    %126 = vector.shape_cast %125 : vector<8xf32> to vector<8x1xf32>
    %cst_62 = arith.constant 3.200000e+01 : f32
    %127 = vector.broadcast %cst_62 : f32 to vector<8x1xf32>
    %128 = arith.divf %126, %127 : vector<8x1xf32>
    %129 = vector.broadcast %128 : vector<8x1xf32> to vector<8x32xf32>
    %130 = arith.subf %123, %129 : vector<8x32xf32>
    %131 = arith.mulf %130, %130 : vector<8x32xf32>
    %cst_63 = arith.constant dense<0.000000e+00> : vector<8xf32>
    %132 = vector.multi_reduction <add>, %131, %cst_63 [1] : vector<8x32xf32> to vector<8xf32>
    %133 = vector.shape_cast %132 : vector<8xf32> to vector<8x1xf32>
    %cst_64 = arith.constant 3.200000e+01 : f32
    %134 = vector.broadcast %cst_64 : f32 to vector<8x1xf32>
    %135 = arith.divf %133, %134 : vector<8x1xf32>
    %cst_65 = arith.constant 9.99999974E-6 : f32
    %136 = vector.broadcast %cst_65 : f32 to vector<8x1xf32>
    %137 = arith.addf %135, %136 : vector<8x1xf32>
    %138 = math.rsqrt %137 : vector<8x1xf32>
    %139 = vector.broadcast %138 : vector<8x1xf32> to vector<8x32xf32>
    %140 = arith.mulf %130, %139 : vector<8x32xf32>
    %141 = vector.broadcast %124 : vector<1x32xf32> to vector<8x32xf32>
    %142 = arith.mulf %140, %141 : vector<8x32xf32>
    %c0_66 = arith.constant 0 : index
    %c0_67 = arith.constant 0 : index
    %c0_68 = arith.constant 0 : index
    %143 = vector.load %arg11[%c0_66, %c0_67, %c0_68] : memref<1x8x32xf32, #tpu.memory_space<vmem>>, vector<1x8x32xf32>
    %144 = vector.shape_cast %143 : vector<1x8x32xf32> to vector<8x32xf32>
    %145 = vector.shape_cast %142 : vector<8x32xf32> to vector<1x8x32xf32>
    tpu.vector_store %arg11[%c0_66, %c0_67, %c0_68], %145 {strides = array<i32>} : memref<1x8x32xf32, #tpu.memory_space<vmem>>, vector<1x8x32xf32>,
    return
  }
  func.func @transform_0(%arg0: i32) -> (i32, i32, i32) {
    %c0_i32 = arith.constant 0 : i32
    %c0_i32_0 = arith.constant 0 : i32
    %c0_i32_1 = arith.constant 0 : i32
    return %arg0, %c0_i32, %c0_i32_0 : i32, i32, i32
  }
  func.func @transform_1(%arg0: i32) -> (i32, i32) {
    %c0_i32 = arith.constant 0 : i32
    %c0_i32_0 = arith.constant 0 : i32
    %c0_i32_1 = arith.constant 0 : i32
    return %c0_i32, %c0_i32_0 : i32, i32
  }
  func.func @transform_2(%arg0: i32) -> (i32, i32, i32) {
    %c0_i32 = arith.constant 0 : i32
    %c0_i32_0 = arith.constant 0 : i32
    %c0_i32_1 = arith.constant 0 : i32
    %c0_i32_2 = arith.constant 0 : i32
    return %c0_i32, %c0_i32_0, %c0_i32_1 : i32, i32, i32
  }
  func.func @transform_3(%arg0: i32) -> (i32, i32, i32) {
    %c0_i32 = arith.constant 0 : i32
    %c0_i32_0 = arith.constant 0 : i32
    %c0_i32_1 = arith.constant 0 : i32
    %c0_i32_2 = arith.constant 0 : i32
    return %c0_i32, %c0_i32_0, %c0_i32_1 : i32, i32, i32
  }
  func.func @transform_4(%arg0: i32) -> (i32, i32, i32) {
    %c0_i32 = arith.constant 0 : i32
    %c0_i32_0 = arith.constant 0 : i32
    %c0_i32_1 = arith.constant 0 : i32
    %c0_i32_2 = arith.constant 0 : i32
    return %c0_i32, %c0_i32_0, %c0_i32_1 : i32, i32, i32
  }
  func.func @transform_5(%arg0: i32) -> (i32, i32, i32) {
    %c0_i32 = arith.constant 0 : i32
    %c0_i32_0 = arith.constant 0 : i32
    %c0_i32_1 = arith.constant 0 : i32
    %c0_i32_2 = arith.constant 0 : i32
    return %c0_i32, %c0_i32_0, %c0_i32_1 : i32, i32, i32
  }
  func.func @transform_6(%arg0: i32) -> (i32, i32) {
    %c0_i32 = arith.constant 0 : i32
    %c0_i32_0 = arith.constant 0 : i32
    %c0_i32_1 = arith.constant 0 : i32
    return %c0_i32, %c0_i32_0 : i32, i32
  }
  func.func @transform_7(%arg0: i32) -> (i32, i32) {
    %c0_i32 = arith.constant 0 : i32
    %c0_i32_0 = arith.constant 0 : i32
    %c0_i32_1 = arith.constant 0 : i32
    return %c0_i32, %c0_i32_0 : i32, i32
  }
  func.func @transform_8(%arg0: i32) -> (i32, i32) {
    %c0_i32 = arith.constant 0 : i32
    %c0_i32_0 = arith.constant 0 : i32
    %c0_i32_1 = arith.constant 0 : i32
    return %c0_i32, %c0_i32_0 : i32, i32
  }
  func.func @transform_9(%arg0: i32) -> (i32, i32) {
    %c0_i32 = arith.constant 0 : i32
    %c0_i32_0 = arith.constant 0 : i32
    %c0_i32_1 = arith.constant 0 : i32
    return %c0_i32, %c0_i32_0 : i32, i32
  }
  func.func @transform_10(%arg0: i32) -> (i32, i32, i32) {
    %c0_i32 = arith.constant 0 : i32
    %c0_i32_0 = arith.constant 0 : i32
    %c0_i32_1 = arith.constant 0 : i32
    return %arg0, %c0_i32, %c0_i32_0 : i32, i32, i32
  }
}

module attributes {stable_mosaic.version = 11 : i64} {
  func.func @_decoder_block_kernel(%arg0: i32, %arg1: memref<1x8x32xf32, #tpu.memory_space<vmem>>, %arg2: memref<1x8x32xf32, #tpu.memory_space<vmem>>, %arg3: memref<1x32xf32, #tpu.memory_space<vmem>>, %arg4: memref<4x32x8xbf16, #tpu.memory_space<vmem>>, %arg5: memref<4x32x8xbf16, #tpu.memory_space<vmem>>, %arg6: memref<4x32x8xbf16, #tpu.memory_space<vmem>>, %arg7: memref<4x8x32xbf16, #tpu.memory_space<vmem>>, %arg8: memref<1x32xf32, #tpu.memory_space<vmem>>, %arg9: memref<4x32x8xbf16, #tpu.memory_space<vmem>>, %arg10: memref<4x32x8xbf16, #tpu.memory_space<vmem>>, %arg11: memref<4x32x8xbf16, #tpu.memory_space<vmem>>, %arg12: memref<4x8x32xbf16, #tpu.memory_space<vmem>>, %arg13: memref<1x32xf32, #tpu.memory_space<vmem>>, %arg14: memref<32x128xbf16, #tpu.memory_space<vmem>>, %arg15: memref<128x32xbf16, #tpu.memory_space<vmem>>, %arg16: memref<1x8x32xf32, #tpu.memory_space<vmem>>) attributes {dimension_semantics = [#tpu.dimension_semantics<parallel>], iteration_bounds = array<i64: 2>, scalar_prefetch = 0 : i64, scratch_operands = 0 : i64, tpu.core_type = #tpu.core_type<tc>, window_params = [{transform_indices = @transform_0, window_bounds = array<i64: 1, 8, 32>}, {transform_indices = @transform_1, window_bounds = array<i64: 1, 8, 32>}, {pipeline_mode = #tpu.pipeline_mode<synchronous>, transform_indices = @transform_2, window_bounds = array<i64: 1, 32>}, {pipeline_mode = #tpu.pipeline_mode<synchronous>, transform_indices = @transform_3, window_bounds = array<i64: 4, 32, 8>}, {pipeline_mode = #tpu.pipeline_mode<synchronous>, transform_indices = @transform_4, window_bounds = array<i64: 4, 32, 8>}, {pipeline_mode = #tpu.pipeline_mode<synchronous>, transform_indices = @transform_5, window_bounds = array<i64: 4, 32, 8>}, {pipeline_mode = #tpu.pipeline_mode<synchronous>, transform_indices = @transform_6, window_bounds = array<i64: 4, 8, 32>}, {pipeline_mode = #tpu.pipeline_mode<synchronous>, transform_indices = @transform_7, window_bounds = array<i64: 1, 32>}, {pipeline_mode = #tpu.pipeline_mode<synchronous>, transform_indices = @transform_8, window_bounds = array<i64: 4, 32, 8>}, {pipeline_mode = #tpu.pipeline_mode<synchronous>, transform_indices = @transform_9, window_bounds = array<i64: 4, 32, 8>}, {pipeline_mode = #tpu.pipeline_mode<synchronous>, transform_indices = @transform_10, window_bounds = array<i64: 4, 32, 8>}, {pipeline_mode = #tpu.pipeline_mode<synchronous>, transform_indices = @transform_11, window_bounds = array<i64: 4, 8, 32>}, {pipeline_mode = #tpu.pipeline_mode<synchronous>, transform_indices = @transform_12, window_bounds = array<i64: 1, 32>}, {pipeline_mode = #tpu.pipeline_mode<synchronous>, transform_indices = @transform_13, window_bounds = array<i64: 32, 128>}, {pipeline_mode = #tpu.pipeline_mode<synchronous>, transform_indices = @transform_14, window_bounds = array<i64: 128, 32>}, {transform_indices = @transform_15, window_bounds = array<i64: 1, 8, 32>}]} {
    %c0 = arith.constant 0 : index
    %c0_0 = arith.constant 0 : index
    %c0_1 = arith.constant 0 : index
    %0 = vector.load %arg1[%c0, %c0_0, %c0_1] : memref<1x8x32xf32, #tpu.memory_space<vmem>>, vector<1x8x32xf32>
    %1 = vector.shape_cast %0 : vector<1x8x32xf32> to vector<8x32xf32>
    %c0_2 = arith.constant 0 : index
    %c0_3 = arith.constant 0 : index
    %c0_4 = arith.constant 0 : index
    %2 = vector.load %arg2[%c0_2, %c0_3, %c0_4] : memref<1x8x32xf32, #tpu.memory_space<vmem>>, vector<1x8x32xf32>
    %3 = vector.shape_cast %2 : vector<1x8x32xf32> to vector<8x32xf32>
    %c0_5 = arith.constant 0 : index
    %c0_6 = arith.constant 0 : index
    %4 = vector.load %arg3[%c0_5, %c0_6] : memref<1x32xf32, #tpu.memory_space<vmem>>, vector<1x32xf32>
    %c0_7 = arith.constant 0 : index
    %c0_8 = arith.constant 0 : index
    %c0_9 = arith.constant 0 : index
    %5 = vector.load %arg4[%c0_7, %c0_8, %c0_9] : memref<4x32x8xbf16, #tpu.memory_space<vmem>>, vector<4x32x8xbf16>
    %c0_10 = arith.constant 0 : index
    %c0_11 = arith.constant 0 : index
    %c0_12 = arith.constant 0 : index
    %6 = vector.load %arg5[%c0_10, %c0_11, %c0_12] : memref<4x32x8xbf16, #tpu.memory_space<vmem>>, vector<4x32x8xbf16>
    %c0_13 = arith.constant 0 : index
    %c0_14 = arith.constant 0 : index
    %c0_15 = arith.constant 0 : index
    %7 = vector.load %arg6[%c0_13, %c0_14, %c0_15] : memref<4x32x8xbf16, #tpu.memory_space<vmem>>, vector<4x32x8xbf16>
    %c0_16 = arith.constant 0 : index
    %c0_17 = arith.constant 0 : index
    %c0_18 = arith.constant 0 : index
    %8 = vector.load %arg7[%c0_16, %c0_17, %c0_18] : memref<4x8x32xbf16, #tpu.memory_space<vmem>>, vector<4x8x32xbf16>
    %c0_19 = arith.constant 0 : index
    %c0_20 = arith.constant 0 : index
    %9 = vector.load %arg8[%c0_19, %c0_20] : memref<1x32xf32, #tpu.memory_space<vmem>>, vector<1x32xf32>
    %c0_21 = arith.constant 0 : index
    %c0_22 = arith.constant 0 : index
    %c0_23 = arith.constant 0 : index
    %10 = vector.load %arg9[%c0_21, %c0_22, %c0_23] : memref<4x32x8xbf16, #tpu.memory_space<vmem>>, vector<4x32x8xbf16>
    %c0_24 = arith.constant 0 : index
    %c0_25 = arith.constant 0 : index
    %c0_26 = arith.constant 0 : index
    %11 = vector.load %arg10[%c0_24, %c0_25, %c0_26] : memref<4x32x8xbf16, #tpu.memory_space<vmem>>, vector<4x32x8xbf16>
    %c0_27 = arith.constant 0 : index
    %c0_28 = arith.constant 0 : index
    %c0_29 = arith.constant 0 : index
    %12 = vector.load %arg11[%c0_27, %c0_28, %c0_29] : memref<4x32x8xbf16, #tpu.memory_space<vmem>>, vector<4x32x8xbf16>
    %c0_30 = arith.constant 0 : index
    %c0_31 = arith.constant 0 : index
    %c0_32 = arith.constant 0 : index
    %13 = vector.load %arg12[%c0_30, %c0_31, %c0_32] : memref<4x8x32xbf16, #tpu.memory_space<vmem>>, vector<4x8x32xbf16>
    %c0_33 = arith.constant 0 : index
    %c0_34 = arith.constant 0 : index
    %14 = vector.load %arg13[%c0_33, %c0_34] : memref<1x32xf32, #tpu.memory_space<vmem>>, vector<1x32xf32>
    %c0_35 = arith.constant 0 : index
    %c0_36 = arith.constant 0 : index
    %15 = vector.load %arg14[%c0_35, %c0_36] : memref<32x128xbf16, #tpu.memory_space<vmem>>, vector<32x128xbf16>
    %c0_37 = arith.constant 0 : index
    %c0_38 = arith.constant 0 : index
    %16 = vector.load %arg15[%c0_37, %c0_38] : memref<128x32xbf16, #tpu.memory_space<vmem>>, vector<128x32xbf16>
    %cst = arith.constant dense<0.000000e+00> : vector<8xf32>
    %17 = vector.multi_reduction <add>, %1, %cst [1] : vector<8x32xf32> to vector<8xf32>
    %18 = vector.shape_cast %17 : vector<8xf32> to vector<8x1xf32>
    %cst_39 = arith.constant 3.200000e+01 : f32
    %19 = vector.broadcast %cst_39 : f32 to vector<8x1xf32>
    %20 = arith.divf %18, %19 : vector<8x1xf32>
    %21 = vector.broadcast %20 : vector<8x1xf32> to vector<8x32xf32>
    %22 = arith.subf %1, %21 : vector<8x32xf32>
    %23 = arith.mulf %22, %22 : vector<8x32xf32>
    %cst_40 = arith.constant dense<0.000000e+00> : vector<8xf32>
    %24 = vector.multi_reduction <add>, %23, %cst_40 [1] : vector<8x32xf32> to vector<8xf32>
    %25 = vector.shape_cast %24 : vector<8xf32> to vector<8x1xf32>
    %cst_41 = arith.constant 3.200000e+01 : f32
    %26 = vector.broadcast %cst_41 : f32 to vector<8x1xf32>
    %27 = arith.divf %25, %26 : vector<8x1xf32>
    %cst_42 = arith.constant 9.99999974E-6 : f32
    %28 = vector.broadcast %cst_42 : f32 to vector<8x1xf32>
    %29 = arith.addf %27, %28 : vector<8x1xf32>
    %30 = math.rsqrt %29 : vector<8x1xf32>
    %31 = vector.broadcast %30 : vector<8x1xf32> to vector<8x32xf32>
    %32 = arith.mulf %22, %31 : vector<8x32xf32>
    %33 = vector.broadcast %4 : vector<1x32xf32> to vector<8x32xf32>
    %34 = arith.mulf %32, %33 : vector<8x32xf32>
    %35 = arith.truncf %34 : vector<8x32xf32> to vector<8x32xbf16>
    %36 = vector.shape_cast %35 : vector<8x32xbf16> to vector<1x8x32xbf16>
    %37 = vector.shape_cast %36 : vector<1x8x32xbf16> to vector<1x8x32xbf16>
    %38 = vector.broadcast %37 : vector<1x8x32xbf16> to vector<4x8x32xbf16>
    %39 = vector.shape_cast %35 : vector<8x32xbf16> to vector<1x8x32xbf16>
    %40 = vector.shape_cast %39 : vector<1x8x32xbf16> to vector<1x8x32xbf16>
    %41 = vector.broadcast %40 : vector<1x8x32xbf16> to vector<4x8x32xbf16>
    "tpu.trace_start"() <{level = 10 : i32, message = "htc,hcd->htd"}> : () -> ()
    %cst_43 = arith.constant dense<0.000000e+00> : vector<4x8x8xf32>
    %42 = tpu.matmul %38, %5, %cst_43 {dimension_numbers = #tpu.dot_dimension_numbers<[2], [1], [1], [2], [0, 0, 0, 1, 1, 2], [0], [0]>} : vector<4x8x32xbf16>, vector<4x32x8xbf16>, vector<4x8x8xf32> -> vector<4x8x8xf32>
    %cst_44 = arith.constant dense<0.000000e+00> : vector<4x8x8xf32>
    %43 = tpu.matmul %41, %6, %cst_44 {dimension_numbers = #tpu.dot_dimension_numbers<[2], [1], [1], [2], [0, 0, 0, 1, 1, 2], [0], [0]>} : vector<4x8x32xbf16>, vector<4x32x8xbf16>, vector<4x8x8xf32> -> vector<4x8x8xf32>
    %cst_45 = arith.constant dense<0.000000e+00> : vector<4x8x8xf32>
    %44 = tpu.matmul %41, %7, %cst_45 {dimension_numbers = #tpu.dot_dimension_numbers<[2], [1], [1], [2], [0, 0, 0, 1, 1, 2], [0], [0]>} : vector<4x8x32xbf16>, vector<4x32x8xbf16>, vector<4x8x8xf32> -> vector<4x8x8xf32>
    "tpu.trace_stop"() : () -> ()
    %45 = arith.truncf %42 : vector<4x8x8xf32> to vector<4x8x8xbf16>
    %46 = arith.truncf %43 : vector<4x8x8xf32> to vector<4x8x8xbf16>
    "tpu.trace_start"() <{level = 10 : i32, message = "hqd,hkd->hqk"}> : () -> ()
    %cst_46 = arith.constant dense<0.000000e+00> : vector<4x8x8xf32>
    %47 = tpu.matmul %45, %46, %cst_46 {dimension_numbers = #tpu.dot_dimension_numbers<[2], [2], [1], [1], [0, 0, 0, 1, 1, 1], [0], [0]>} : vector<4x8x8xbf16>, vector<4x8x8xbf16>, vector<4x8x8xf32> -> vector<4x8x8xf32>
    "tpu.trace_stop"() : () -> ()
    %cst_47 = arith.constant 0.353553385 : f32
    %48 = vector.broadcast %cst_47 : f32 to vector<4x8x8xf32>
    %49 = arith.mulf %47, %48 : vector<4x8x8xf32>
    %50 = tpu.iota {dimensions = array<i32: 1>} : vector<4x8x8xi32>
    %51 = tpu.iota {dimensions = array<i32: 2>} : vector<4x8x8xi32>
    %52 = arith.cmpi sle, %51, %50 : vector<4x8x8xi32>
    %cst_48 = arith.constant -1.000000e+30 : f32
    %53 = vector.broadcast %cst_48 : f32 to vector<4x8x8xf32>
    %54 = arith.select %52, %49, %53 : vector<4x8x8xi1>, vector<4x8x8xf32>
    %cst_49 = arith.constant dense<0xFF800000> : vector<4x8xf32>
    %55 = vector.multi_reduction <maximumf>, %54, %cst_49 [2] : vector<4x8x8xf32> to vector<4x8xf32>
    %56 = vector.shape_cast %55 : vector<4x8xf32> to vector<4x8x1xf32>
    %57 = vector.broadcast %56 : vector<4x8x1xf32> to vector<4x8x8xf32>
    %58 = arith.subf %54, %57 : vector<4x8x8xf32>
    %59 = math.exp %58 : vector<4x8x8xf32>
    %cst_50 = arith.constant dense<0.000000e+00> : vector<4x8xf32>
    %60 = vector.multi_reduction <add>, %59, %cst_50 [2] : vector<4x8x8xf32> to vector<4x8xf32>
    %61 = vector.shape_cast %60 : vector<4x8xf32> to vector<4x8x1xf32>
    %62 = tpu.reciprocal %61 {approx = true} : vector<4x8x1xf32> -> vector<4x8x1xf32>
    %63 = vector.broadcast %62 : vector<4x8x1xf32> to vector<4x8x8xf32>
    %64 = arith.mulf %59, %63 : vector<4x8x8xf32>
    %65 = arith.truncf %64 : vector<4x8x8xf32> to vector<4x8x8xbf16>
    %66 = arith.truncf %44 : vector<4x8x8xf32> to vector<4x8x8xbf16>
    "tpu.trace_start"() <{level = 10 : i32, message = "hqk,hkd->hqd"}> : () -> ()
    %cst_51 = arith.constant dense<0.000000e+00> : vector<4x8x8xf32>
    %67 = tpu.matmul %65, %66, %cst_51 {dimension_numbers = #tpu.dot_dimension_numbers<[2], [1], [1], [2], [0, 0, 0, 1, 1, 2], [0], [0]>} : vector<4x8x8xbf16>, vector<4x8x8xbf16>, vector<4x8x8xf32> -> vector<4x8x8xf32>
    "tpu.trace_stop"() : () -> ()
    %68 = arith.truncf %67 : vector<4x8x8xf32> to vector<4x8x8xbf16>
    "tpu.trace_start"() <{level = 10 : i32, message = "htd,hdc->htc"}> : () -> ()
    %cst_52 = arith.constant dense<0.000000e+00> : vector<4x8x32xf32>
    %69 = tpu.matmul %68, %8, %cst_52 {dimension_numbers = #tpu.dot_dimension_numbers<[2], [1], [1], [2], [0, 0, 0, 1, 1, 2], [0], [0]>} : vector<4x8x8xbf16>, vector<4x8x32xbf16>, vector<4x8x32xf32> -> vector<4x8x32xf32>
    "tpu.trace_stop"() : () -> ()
    %cst_53 = arith.constant dense<0.000000e+00> : vector<8x32xf32>
    %70 = vector.multi_reduction <add>, %69, %cst_53 [0] : vector<4x8x32xf32> to vector<8x32xf32>
    %71 = arith.addf %1, %70 : vector<8x32xf32>
    %cst_54 = arith.constant dense<0.000000e+00> : vector<8xf32>
    %72 = vector.multi_reduction <add>, %71, %cst_54 [1] : vector<8x32xf32> to vector<8xf32>
    %73 = vector.shape_cast %72 : vector<8xf32> to vector<8x1xf32>
    %cst_55 = arith.constant 3.200000e+01 : f32
    %74 = vector.broadcast %cst_55 : f32 to vector<8x1xf32>
    %75 = arith.divf %73, %74 : vector<8x1xf32>
    %76 = vector.broadcast %75 : vector<8x1xf32> to vector<8x32xf32>
    %77 = arith.subf %71, %76 : vector<8x32xf32>
    %78 = arith.mulf %77, %77 : vector<8x32xf32>
    %cst_56 = arith.constant dense<0.000000e+00> : vector<8xf32>
    %79 = vector.multi_reduction <add>, %78, %cst_56 [1] : vector<8x32xf32> to vector<8xf32>
    %80 = vector.shape_cast %79 : vector<8xf32> to vector<8x1xf32>
    %cst_57 = arith.constant 3.200000e+01 : f32
    %81 = vector.broadcast %cst_57 : f32 to vector<8x1xf32>
    %82 = arith.divf %80, %81 : vector<8x1xf32>
    %cst_58 = arith.constant 9.99999974E-6 : f32
    %83 = vector.broadcast %cst_58 : f32 to vector<8x1xf32>
    %84 = arith.addf %82, %83 : vector<8x1xf32>
    %85 = math.rsqrt %84 : vector<8x1xf32>
    %86 = vector.broadcast %85 : vector<8x1xf32> to vector<8x32xf32>
    %87 = arith.mulf %77, %86 : vector<8x32xf32>
    %88 = vector.broadcast %9 : vector<1x32xf32> to vector<8x32xf32>
    %89 = arith.mulf %87, %88 : vector<8x32xf32>
    %90 = arith.truncf %89 : vector<8x32xf32> to vector<8x32xbf16>
    %91 = arith.truncf %3 : vector<8x32xf32> to vector<8x32xbf16>
    %92 = vector.shape_cast %90 : vector<8x32xbf16> to vector<1x8x32xbf16>
    %93 = vector.shape_cast %92 : vector<1x8x32xbf16> to vector<1x8x32xbf16>
    %94 = vector.broadcast %93 : vector<1x8x32xbf16> to vector<4x8x32xbf16>
    %95 = vector.shape_cast %91 : vector<8x32xbf16> to vector<1x8x32xbf16>
    %96 = vector.shape_cast %95 : vector<1x8x32xbf16> to vector<1x8x32xbf16>
    %97 = vector.broadcast %96 : vector<1x8x32xbf16> to vector<4x8x32xbf16>
    "tpu.trace_start"() <{level = 10 : i32, message = "htc,hcd->htd"}> : () -> ()
    %cst_59 = arith.constant dense<0.000000e+00> : vector<4x8x8xf32>
    %98 = tpu.matmul %94, %10, %cst_59 {dimension_numbers = #tpu.dot_dimension_numbers<[2], [1], [1], [2], [0, 0, 0, 1, 1, 2], [0], [0]>} : vector<4x8x32xbf16>, vector<4x32x8xbf16>, vector<4x8x8xf32> -> vector<4x8x8xf32>
    %cst_60 = arith.constant dense<0.000000e+00> : vector<4x8x8xf32>
    %99 = tpu.matmul %97, %11, %cst_60 {dimension_numbers = #tpu.dot_dimension_numbers<[2], [1], [1], [2], [0, 0, 0, 1, 1, 2], [0], [0]>} : vector<4x8x32xbf16>, vector<4x32x8xbf16>, vector<4x8x8xf32> -> vector<4x8x8xf32>
    %cst_61 = arith.constant dense<0.000000e+00> : vector<4x8x8xf32>
    %100 = tpu.matmul %97, %12, %cst_61 {dimension_numbers = #tpu.dot_dimension_numbers<[2], [1], [1], [2], [0, 0, 0, 1, 1, 2], [0], [0]>} : vector<4x8x32xbf16>, vector<4x32x8xbf16>, vector<4x8x8xf32> -> vector<4x8x8xf32>
    "tpu.trace_stop"() : () -> ()
    %101 = arith.truncf %98 : vector<4x8x8xf32> to vector<4x8x8xbf16>
    %102 = arith.truncf %99 : vector<4x8x8xf32> to vector<4x8x8xbf16>
    "tpu.trace_start"() <{level = 10 : i32, message = "hqd,hkd->hqk"}> : () -> ()
    %cst_62 = arith.constant dense<0.000000e+00> : vector<4x8x8xf32>
    %103 = tpu.matmul %101, %102, %cst_62 {dimension_numbers = #tpu.dot_dimension_numbers<[2], [2], [1], [1], [0, 0, 0, 1, 1, 1], [0], [0]>} : vector<4x8x8xbf16>, vector<4x8x8xbf16>, vector<4x8x8xf32> -> vector<4x8x8xf32>
    "tpu.trace_stop"() : () -> ()
    %cst_63 = arith.constant 0.353553385 : f32
    %104 = vector.broadcast %cst_63 : f32 to vector<4x8x8xf32>
    %105 = arith.mulf %103, %104 : vector<4x8x8xf32>
    %cst_64 = arith.constant dense<0xFF800000> : vector<4x8xf32>
    %106 = vector.multi_reduction <maximumf>, %105, %cst_64 [2] : vector<4x8x8xf32> to vector<4x8xf32>
    %107 = vector.shape_cast %106 : vector<4x8xf32> to vector<4x8x1xf32>
    %108 = vector.broadcast %107 : vector<4x8x1xf32> to vector<4x8x8xf32>
    %109 = arith.subf %105, %108 : vector<4x8x8xf32>
    %110 = math.exp %109 : vector<4x8x8xf32>
    %cst_65 = arith.constant dense<0.000000e+00> : vector<4x8xf32>
    %111 = vector.multi_reduction <add>, %110, %cst_65 [2] : vector<4x8x8xf32> to vector<4x8xf32>
    %112 = vector.shape_cast %111 : vector<4x8xf32> to vector<4x8x1xf32>
    %113 = tpu.reciprocal %112 {approx = true} : vector<4x8x1xf32> -> vector<4x8x1xf32>
    %114 = vector.broadcast %113 : vector<4x8x1xf32> to vector<4x8x8xf32>
    %115 = arith.mulf %110, %114 : vector<4x8x8xf32>
    %116 = arith.truncf %115 : vector<4x8x8xf32> to vector<4x8x8xbf16>
    %117 = arith.truncf %100 : vector<4x8x8xf32> to vector<4x8x8xbf16>
    "tpu.trace_start"() <{level = 10 : i32, message = "hqk,hkd->hqd"}> : () -> ()
    %cst_66 = arith.constant dense<0.000000e+00> : vector<4x8x8xf32>
    %118 = tpu.matmul %116, %117, %cst_66 {dimension_numbers = #tpu.dot_dimension_numbers<[2], [1], [1], [2], [0, 0, 0, 1, 1, 2], [0], [0]>} : vector<4x8x8xbf16>, vector<4x8x8xbf16>, vector<4x8x8xf32> -> vector<4x8x8xf32>
    "tpu.trace_stop"() : () -> ()
    %119 = arith.truncf %118 : vector<4x8x8xf32> to vector<4x8x8xbf16>
    "tpu.trace_start"() <{level = 10 : i32, message = "htd,hdc->htc"}> : () -> ()
    %cst_67 = arith.constant dense<0.000000e+00> : vector<4x8x32xf32>
    %120 = tpu.matmul %119, %13, %cst_67 {dimension_numbers = #tpu.dot_dimension_numbers<[2], [1], [1], [2], [0, 0, 0, 1, 1, 2], [0], [0]>} : vector<4x8x8xbf16>, vector<4x8x32xbf16>, vector<4x8x32xf32> -> vector<4x8x32xf32>
    "tpu.trace_stop"() : () -> ()
    %cst_68 = arith.constant dense<0.000000e+00> : vector<8x32xf32>
    %121 = vector.multi_reduction <add>, %120, %cst_68 [0] : vector<4x8x32xf32> to vector<8x32xf32>
    %122 = arith.addf %71, %121 : vector<8x32xf32>
    %cst_69 = arith.constant dense<0.000000e+00> : vector<8xf32>
    %123 = vector.multi_reduction <add>, %122, %cst_69 [1] : vector<8x32xf32> to vector<8xf32>
    %124 = vector.shape_cast %123 : vector<8xf32> to vector<8x1xf32>
    %cst_70 = arith.constant 3.200000e+01 : f32
    %125 = vector.broadcast %cst_70 : f32 to vector<8x1xf32>
    %126 = arith.divf %124, %125 : vector<8x1xf32>
    %127 = vector.broadcast %126 : vector<8x1xf32> to vector<8x32xf32>
    %128 = arith.subf %122, %127 : vector<8x32xf32>
    %129 = arith.mulf %128, %128 : vector<8x32xf32>
    %cst_71 = arith.constant dense<0.000000e+00> : vector<8xf32>
    %130 = vector.multi_reduction <add>, %129, %cst_71 [1] : vector<8x32xf32> to vector<8xf32>
    %131 = vector.shape_cast %130 : vector<8xf32> to vector<8x1xf32>
    %cst_72 = arith.constant 3.200000e+01 : f32
    %132 = vector.broadcast %cst_72 : f32 to vector<8x1xf32>
    %133 = arith.divf %131, %132 : vector<8x1xf32>
    %cst_73 = arith.constant 9.99999974E-6 : f32
    %134 = vector.broadcast %cst_73 : f32 to vector<8x1xf32>
    %135 = arith.addf %133, %134 : vector<8x1xf32>
    %136 = math.rsqrt %135 : vector<8x1xf32>
    %137 = vector.broadcast %136 : vector<8x1xf32> to vector<8x32xf32>
    %138 = arith.mulf %128, %137 : vector<8x32xf32>
    %139 = vector.broadcast %14 : vector<1x32xf32> to vector<8x32xf32>
    %140 = arith.mulf %138, %139 : vector<8x32xf32>
    %141 = arith.truncf %140 : vector<8x32xf32> to vector<8x32xbf16>
    %cst_74 = arith.constant dense<0.000000e+00> : vector<8x128xf32>
    %142 = tpu.matmul %141, %15, %cst_74 {dimension_numbers = #tpu.dot_dimension_numbers<[1], [0], [0], [1], [0, 0, 1, 1], [], []>} : vector<8x32xbf16>, vector<32x128xbf16>, vector<8x128xf32> -> vector<8x128xf32>
    %cst_75 = arith.constant 5.000000e-01 : f32
    %143 = vector.broadcast %cst_75 : f32 to vector<8x128xf32>
    %144 = arith.mulf %143, %142 : vector<8x128xf32>
    %cst_76 = arith.constant 0.707106769 : f32
    %145 = vector.broadcast %cst_76 : f32 to vector<8x128xf32>
    %146 = arith.mulf %142, %145 : vector<8x128xf32>
    %cst_77 = arith.constant 0.000000e+00 : f32
    %147 = vector.broadcast %cst_77 : f32 to vector<8x128xf32>
    %148 = arith.cmpf oge, %146, %147 : vector<8x128xf32>
    %cst_78 = arith.constant 1.000000e+00 : f32
    %cst_79 = arith.constant -1.000000e+00 : f32
    %149 = vector.broadcast %cst_78 : f32 to vector<8x128xf32>
    %150 = vector.broadcast %cst_79 : f32 to vector<8x128xf32>
    %151 = arith.select %148, %149, %150 : vector<8x128xi1>, vector<8x128xf32>
    %152 = math.absf %146 : vector<8x128xf32>
    %cst_80 = arith.constant 0.327591091 : f32
    %153 = vector.broadcast %cst_80 : f32 to vector<8x128xf32>
    %154 = arith.mulf %153, %152 : vector<8x128xf32>
    %cst_81 = arith.constant 1.000000e+00 : f32
    %155 = vector.broadcast %cst_81 : f32 to vector<8x128xf32>
    %156 = arith.addf %155, %154 : vector<8x128xf32>
    %cst_82 = arith.constant 1.000000e+00 : f32
    %157 = vector.broadcast %cst_82 : f32 to vector<8x128xf32>
    %158 = arith.divf %157, %156 : vector<8x128xf32>
    %cst_83 = arith.constant 1.06140542 : f32
    %159 = vector.broadcast %cst_83 : f32 to vector<8x128xf32>
    %160 = arith.mulf %159, %158 : vector<8x128xf32>
    %cst_84 = arith.constant -1.45315206 : f32
    %161 = vector.broadcast %cst_84 : f32 to vector<8x128xf32>
    %162 = arith.addf %160, %161 : vector<8x128xf32>
    %163 = arith.mulf %162, %158 : vector<8x128xf32>
    %cst_85 = arith.constant 1.42141378 : f32
    %164 = vector.broadcast %cst_85 : f32 to vector<8x128xf32>
    %165 = arith.addf %163, %164 : vector<8x128xf32>
    %166 = arith.mulf %165, %158 : vector<8x128xf32>
    %cst_86 = arith.constant -0.284496725 : f32
    %167 = vector.broadcast %cst_86 : f32 to vector<8x128xf32>
    %168 = arith.addf %166, %167 : vector<8x128xf32>
    %169 = arith.mulf %168, %158 : vector<8x128xf32>
    %cst_87 = arith.constant 0.254829586 : f32
    %170 = vector.broadcast %cst_87 : f32 to vector<8x128xf32>
    %171 = arith.addf %169, %170 : vector<8x128xf32>
    %172 = arith.mulf %171, %158 : vector<8x128xf32>
    %cst_88 = arith.constant 0.000000e+00 : f32
    %173 = vector.broadcast %cst_88 : f32 to vector<8x128xf32>
    %174 = arith.subf %173, %152 : vector<8x128xf32>
    %175 = arith.mulf %174, %152 : vector<8x128xf32>
    %176 = math.exp %175 : vector<8x128xf32>
    %177 = arith.mulf %172, %176 : vector<8x128xf32>
    %cst_89 = arith.constant 1.000000e+00 : f32
    %178 = vector.broadcast %cst_89 : f32 to vector<8x128xf32>
    %179 = arith.subf %178, %177 : vector<8x128xf32>
    %180 = arith.mulf %151, %179 : vector<8x128xf32>
    %cst_90 = arith.constant 1.000000e+00 : f32
    %181 = vector.broadcast %cst_90 : f32 to vector<8x128xf32>
    %182 = arith.addf %181, %180 : vector<8x128xf32>
    %183 = arith.mulf %144, %182 : vector<8x128xf32>
    %184 = arith.truncf %183 : vector<8x128xf32> to vector<8x128xbf16>
    %cst_91 = arith.constant dense<0.000000e+00> : vector<8x32xf32>
    %185 = tpu.matmul %184, %16, %cst_91 {dimension_numbers = #tpu.dot_dimension_numbers<[1], [0], [0], [1], [0, 0, 1, 1], [], []>} : vector<8x128xbf16>, vector<128x32xbf16>, vector<8x32xf32> -> vector<8x32xf32>
    %186 = arith.addf %122, %185 : vector<8x32xf32>
    %c0_92 = arith.constant 0 : index
    %c0_93 = arith.constant 0 : index
    %c0_94 = arith.constant 0 : index
    %187 = vector.load %arg16[%c0_92, %c0_93, %c0_94] : memref<1x8x32xf32, #tpu.memory_space<vmem>>, vector<1x8x32xf32>
    %188 = vector.shape_cast %187 : vector<1x8x32xf32> to vector<8x32xf32>
    %189 = vector.shape_cast %186 : vector<8x32xf32> to vector<1x8x32xf32>
    tpu.vector_store %arg16[%c0_92, %c0_93, %c0_94], %189 {strides = array<i32>} : memref<1x8x32xf32, #tpu.memory_space<vmem>>, vector<1x8x32xf32>,
    return
  }
  func.func @transform_0(%arg0: i32) -> (i32, i32, i32) {
    %c0_i32 = arith.constant 0 : i32
    %c0_i32_0 = arith.constant 0 : i32
    %c0_i32_1 = arith.constant 0 : i32
    return %arg0, %c0_i32, %c0_i32_0 : i32, i32, i32
  }
  func.func @transform_1(%arg0: i32) -> (i32, i32, i32) {
    %c0_i32 = arith.constant 0 : i32
    %c0_i32_0 = arith.constant 0 : i32
    %c0_i32_1 = arith.constant 0 : i32
    return %arg0, %c0_i32, %c0_i32_0 : i32, i32, i32
  }
  func.func @transform_2(%arg0: i32) -> (i32, i32) {
    %c0_i32 = arith.constant 0 : i32
    %c0_i32_0 = arith.constant 0 : i32
    %c0_i32_1 = arith.constant 0 : i32
    return %c0_i32, %c0_i32_0 : i32, i32
  }
  func.func @transform_3(%arg0: i32) -> (i32, i32, i32) {
    %c0_i32 = arith.constant 0 : i32
    %c0_i32_0 = arith.constant 0 : i32
    %c0_i32_1 = arith.constant 0 : i32
    %c0_i32_2 = arith.constant 0 : i32
    return %c0_i32, %c0_i32_0, %c0_i32_1 : i32, i32, i32
  }
  func.func @transform_4(%arg0: i32) -> (i32, i32, i32) {
    %c0_i32 = arith.constant 0 : i32
    %c0_i32_0 = arith.constant 0 : i32
    %c0_i32_1 = arith.constant 0 : i32
    %c0_i32_2 = arith.constant 0 : i32
    return %c0_i32, %c0_i32_0, %c0_i32_1 : i32, i32, i32
  }
  func.func @transform_5(%arg0: i32) -> (i32, i32, i32) {
    %c0_i32 = arith.constant 0 : i32
    %c0_i32_0 = arith.constant 0 : i32
    %c0_i32_1 = arith.constant 0 : i32
    %c0_i32_2 = arith.constant 0 : i32
    return %c0_i32, %c0_i32_0, %c0_i32_1 : i32, i32, i32
  }
  func.func @transform_6(%arg0: i32) -> (i32, i32, i32) {
    %c0_i32 = arith.constant 0 : i32
    %c0_i32_0 = arith.constant 0 : i32
    %c0_i32_1 = arith.constant 0 : i32
    %c0_i32_2 = arith.constant 0 : i32
    return %c0_i32, %c0_i32_0, %c0_i32_1 : i32, i32, i32
  }
  func.func @transform_7(%arg0: i32) -> (i32, i32) {
    %c0_i32 = arith.constant 0 : i32
    %c0_i32_0 = arith.constant 0 : i32
    %c0_i32_1 = arith.constant 0 : i32
    return %c0_i32, %c0_i32_0 : i32, i32
  }
  func.func @transform_8(%arg0: i32) -> (i32, i32, i32) {
    %c0_i32 = arith.constant 0 : i32
    %c0_i32_0 = arith.constant 0 : i32
    %c0_i32_1 = arith.constant 0 : i32
    %c0_i32_2 = arith.constant 0 : i32
    return %c0_i32, %c0_i32_0, %c0_i32_1 : i32, i32, i32
  }
  func.func @transform_9(%arg0: i32) -> (i32, i32, i32) {
    %c0_i32 = arith.constant 0 : i32
    %c0_i32_0 = arith.constant 0 : i32
    %c0_i32_1 = arith.constant 0 : i32
    %c0_i32_2 = arith.constant 0 : i32
    return %c0_i32, %c0_i32_0, %c0_i32_1 : i32, i32, i32
  }
  func.func @transform_10(%arg0: i32) -> (i32, i32, i32) {
    %c0_i32 = arith.constant 0 : i32
    %c0_i32_0 = arith.constant 0 : i32
    %c0_i32_1 = arith.constant 0 : i32
    %c0_i32_2 = arith.constant 0 : i32
    return %c0_i32, %c0_i32_0, %c0_i32_1 : i32, i32, i32
  }
  func.func @transform_11(%arg0: i32) -> (i32, i32, i32) {
    %c0_i32 = arith.constant 0 : i32
    %c0_i32_0 = arith.constant 0 : i32
    %c0_i32_1 = arith.constant 0 : i32
    %c0_i32_2 = arith.constant 0 : i32
    return %c0_i32, %c0_i32_0, %c0_i32_1 : i32, i32, i32
  }
  func.func @transform_12(%arg0: i32) -> (i32, i32) {
    %c0_i32 = arith.constant 0 : i32
    %c0_i32_0 = arith.constant 0 : i32
    %c0_i32_1 = arith.constant 0 : i32
    return %c0_i32, %c0_i32_0 : i32, i32
  }
  func.func @transform_13(%arg0: i32) -> (i32, i32) {
    %c0_i32 = arith.constant 0 : i32
    %c0_i32_0 = arith.constant 0 : i32
    %c0_i32_1 = arith.constant 0 : i32
    return %c0_i32, %c0_i32_0 : i32, i32
  }
  func.func @transform_14(%arg0: i32) -> (i32, i32) {
    %c0_i32 = arith.constant 0 : i32
    %c0_i32_0 = arith.constant 0 : i32
    %c0_i32_1 = arith.constant 0 : i32
    return %c0_i32, %c0_i32_0 : i32, i32
  }
  func.func @transform_15(%arg0: i32) -> (i32, i32, i32) {
    %c0_i32 = arith.constant 0 : i32
    %c0_i32_0 = arith.constant 0 : i32
    %c0_i32_1 = arith.constant 0 : i32
    return %arg0, %c0_i32, %c0_i32_0 : i32, i32, i32
  }
}

module attributes {stable_mosaic.version = 11 : i64} {
  func.func @_decoder_last_block_kernel(%arg0: i32, %arg1: memref<1x8x32xf32, #tpu.memory_space<vmem>>, %arg2: memref<1x8x32xf32, #tpu.memory_space<vmem>>, %arg3: memref<1x32xf32, #tpu.memory_space<vmem>>, %arg4: memref<4x32x8xbf16, #tpu.memory_space<vmem>>, %arg5: memref<4x32x8xbf16, #tpu.memory_space<vmem>>, %arg6: memref<4x32x8xbf16, #tpu.memory_space<vmem>>, %arg7: memref<4x8x32xbf16, #tpu.memory_space<vmem>>, %arg8: memref<1x32xf32, #tpu.memory_space<vmem>>, %arg9: memref<4x32x8xbf16, #tpu.memory_space<vmem>>, %arg10: memref<4x32x8xbf16, #tpu.memory_space<vmem>>, %arg11: memref<4x32x8xbf16, #tpu.memory_space<vmem>>, %arg12: memref<4x8x32xbf16, #tpu.memory_space<vmem>>, %arg13: memref<1x32xf32, #tpu.memory_space<vmem>>, %arg14: memref<32x128xbf16, #tpu.memory_space<vmem>>, %arg15: memref<128x32xbf16, #tpu.memory_space<vmem>>, %arg16: memref<1x32xf32, #tpu.memory_space<vmem>>, %arg17: memref<32x48xbf16, #tpu.memory_space<vmem>>, %arg18: memref<1x1x48xf32, #tpu.memory_space<vmem>>) attributes {dimension_semantics = [#tpu.dimension_semantics<parallel>], iteration_bounds = array<i64: 2>, scalar_prefetch = 0 : i64, scratch_operands = 0 : i64, tpu.core_type = #tpu.core_type<tc>, window_params = [{transform_indices = @transform_0, window_bounds = array<i64: 1, 8, 32>}, {transform_indices = @transform_1, window_bounds = array<i64: 1, 8, 32>}, {pipeline_mode = #tpu.pipeline_mode<synchronous>, transform_indices = @transform_2, window_bounds = array<i64: 1, 32>}, {pipeline_mode = #tpu.pipeline_mode<synchronous>, transform_indices = @transform_3, window_bounds = array<i64: 4, 32, 8>}, {pipeline_mode = #tpu.pipeline_mode<synchronous>, transform_indices = @transform_4, window_bounds = array<i64: 4, 32, 8>}, {pipeline_mode = #tpu.pipeline_mode<synchronous>, transform_indices = @transform_5, window_bounds = array<i64: 4, 32, 8>}, {pipeline_mode = #tpu.pipeline_mode<synchronous>, transform_indices = @transform_6, window_bounds = array<i64: 4, 8, 32>}, {pipeline_mode = #tpu.pipeline_mode<synchronous>, transform_indices = @transform_7, window_bounds = array<i64: 1, 32>}, {pipeline_mode = #tpu.pipeline_mode<synchronous>, transform_indices = @transform_8, window_bounds = array<i64: 4, 32, 8>}, {pipeline_mode = #tpu.pipeline_mode<synchronous>, transform_indices = @transform_9, window_bounds = array<i64: 4, 32, 8>}, {pipeline_mode = #tpu.pipeline_mode<synchronous>, transform_indices = @transform_10, window_bounds = array<i64: 4, 32, 8>}, {pipeline_mode = #tpu.pipeline_mode<synchronous>, transform_indices = @transform_11, window_bounds = array<i64: 4, 8, 32>}, {pipeline_mode = #tpu.pipeline_mode<synchronous>, transform_indices = @transform_12, window_bounds = array<i64: 1, 32>}, {pipeline_mode = #tpu.pipeline_mode<synchronous>, transform_indices = @transform_13, window_bounds = array<i64: 32, 128>}, {pipeline_mode = #tpu.pipeline_mode<synchronous>, transform_indices = @transform_14, window_bounds = array<i64: 128, 32>}, {pipeline_mode = #tpu.pipeline_mode<synchronous>, transform_indices = @transform_15, window_bounds = array<i64: 1, 32>}, {pipeline_mode = #tpu.pipeline_mode<synchronous>, transform_indices = @transform_16, window_bounds = array<i64: 32, 48>}, {transform_indices = @transform_17, window_bounds = array<i64: 1, 1, 48>}]} {
    %c0 = arith.constant 0 : index
    %c0_0 = arith.constant 0 : index
    %c0_1 = arith.constant 0 : index
    %0 = vector.load %arg1[%c0, %c0_0, %c0_1] : memref<1x8x32xf32, #tpu.memory_space<vmem>>, vector<1x8x32xf32>
    %1 = vector.shape_cast %0 : vector<1x8x32xf32> to vector<8x32xf32>
    %c0_2 = arith.constant 0 : index
    %c0_3 = arith.constant 0 : index
    %c0_4 = arith.constant 0 : index
    %2 = vector.load %arg2[%c0_2, %c0_3, %c0_4] : memref<1x8x32xf32, #tpu.memory_space<vmem>>, vector<1x8x32xf32>
    %3 = vector.shape_cast %2 : vector<1x8x32xf32> to vector<8x32xf32>
    %c0_5 = arith.constant 0 : index
    %c0_6 = arith.constant 0 : index
    %4 = vector.load %arg3[%c0_5, %c0_6] : memref<1x32xf32, #tpu.memory_space<vmem>>, vector<1x32xf32>
    %c0_7 = arith.constant 0 : index
    %c0_8 = arith.constant 0 : index
    %c0_9 = arith.constant 0 : index
    %5 = vector.load %arg4[%c0_7, %c0_8, %c0_9] : memref<4x32x8xbf16, #tpu.memory_space<vmem>>, vector<4x32x8xbf16>
    %c0_10 = arith.constant 0 : index
    %c0_11 = arith.constant 0 : index
    %c0_12 = arith.constant 0 : index
    %6 = vector.load %arg5[%c0_10, %c0_11, %c0_12] : memref<4x32x8xbf16, #tpu.memory_space<vmem>>, vector<4x32x8xbf16>
    %c0_13 = arith.constant 0 : index
    %c0_14 = arith.constant 0 : index
    %c0_15 = arith.constant 0 : index
    %7 = vector.load %arg6[%c0_13, %c0_14, %c0_15] : memref<4x32x8xbf16, #tpu.memory_space<vmem>>, vector<4x32x8xbf16>
    %c0_16 = arith.constant 0 : index
    %c0_17 = arith.constant 0 : index
    %c0_18 = arith.constant 0 : index
    %8 = vector.load %arg7[%c0_16, %c0_17, %c0_18] : memref<4x8x32xbf16, #tpu.memory_space<vmem>>, vector<4x8x32xbf16>
    %c0_19 = arith.constant 0 : index
    %c0_20 = arith.constant 0 : index
    %9 = vector.load %arg8[%c0_19, %c0_20] : memref<1x32xf32, #tpu.memory_space<vmem>>, vector<1x32xf32>
    %c0_21 = arith.constant 0 : index
    %c0_22 = arith.constant 0 : index
    %c0_23 = arith.constant 0 : index
    %10 = vector.load %arg9[%c0_21, %c0_22, %c0_23] : memref<4x32x8xbf16, #tpu.memory_space<vmem>>, vector<4x32x8xbf16>
    %c0_24 = arith.constant 0 : index
    %c0_25 = arith.constant 0 : index
    %c0_26 = arith.constant 0 : index
    %11 = vector.load %arg10[%c0_24, %c0_25, %c0_26] : memref<4x32x8xbf16, #tpu.memory_space<vmem>>, vector<4x32x8xbf16>
    %c0_27 = arith.constant 0 : index
    %c0_28 = arith.constant 0 : index
    %c0_29 = arith.constant 0 : index
    %12 = vector.load %arg11[%c0_27, %c0_28, %c0_29] : memref<4x32x8xbf16, #tpu.memory_space<vmem>>, vector<4x32x8xbf16>
    %c0_30 = arith.constant 0 : index
    %c0_31 = arith.constant 0 : index
    %c0_32 = arith.constant 0 : index
    %13 = vector.load %arg12[%c0_30, %c0_31, %c0_32] : memref<4x8x32xbf16, #tpu.memory_space<vmem>>, vector<4x8x32xbf16>
    %c0_33 = arith.constant 0 : index
    %c0_34 = arith.constant 0 : index
    %14 = vector.load %arg13[%c0_33, %c0_34] : memref<1x32xf32, #tpu.memory_space<vmem>>, vector<1x32xf32>
    %c0_35 = arith.constant 0 : index
    %c0_36 = arith.constant 0 : index
    %15 = vector.load %arg14[%c0_35, %c0_36] : memref<32x128xbf16, #tpu.memory_space<vmem>>, vector<32x128xbf16>
    %c0_37 = arith.constant 0 : index
    %c0_38 = arith.constant 0 : index
    %16 = vector.load %arg15[%c0_37, %c0_38] : memref<128x32xbf16, #tpu.memory_space<vmem>>, vector<128x32xbf16>
    %cst = arith.constant dense<0.000000e+00> : vector<8xf32>
    %17 = vector.multi_reduction <add>, %1, %cst [1] : vector<8x32xf32> to vector<8xf32>
    %18 = vector.shape_cast %17 : vector<8xf32> to vector<8x1xf32>
    %cst_39 = arith.constant 3.200000e+01 : f32
    %19 = vector.broadcast %cst_39 : f32 to vector<8x1xf32>
    %20 = arith.divf %18, %19 : vector<8x1xf32>
    %21 = vector.broadcast %20 : vector<8x1xf32> to vector<8x32xf32>
    %22 = arith.subf %1, %21 : vector<8x32xf32>
    %23 = arith.mulf %22, %22 : vector<8x32xf32>
    %cst_40 = arith.constant dense<0.000000e+00> : vector<8xf32>
    %24 = vector.multi_reduction <add>, %23, %cst_40 [1] : vector<8x32xf32> to vector<8xf32>
    %25 = vector.shape_cast %24 : vector<8xf32> to vector<8x1xf32>
    %cst_41 = arith.constant 3.200000e+01 : f32
    %26 = vector.broadcast %cst_41 : f32 to vector<8x1xf32>
    %27 = arith.divf %25, %26 : vector<8x1xf32>
    %cst_42 = arith.constant 9.99999974E-6 : f32
    %28 = vector.broadcast %cst_42 : f32 to vector<8x1xf32>
    %29 = arith.addf %27, %28 : vector<8x1xf32>
    %30 = math.rsqrt %29 : vector<8x1xf32>
    %31 = vector.broadcast %30 : vector<8x1xf32> to vector<8x32xf32>
    %32 = arith.mulf %22, %31 : vector<8x32xf32>
    %33 = vector.broadcast %4 : vector<1x32xf32> to vector<8x32xf32>
    %34 = arith.mulf %32, %33 : vector<8x32xf32>
    %35 = arith.truncf %34 : vector<8x32xf32> to vector<8x32xbf16>
    %36 = vector.shape_cast %35 : vector<8x32xbf16> to vector<1x8x32xbf16>
    %37 = vector.shape_cast %36 : vector<1x8x32xbf16> to vector<1x8x32xbf16>
    %38 = vector.broadcast %37 : vector<1x8x32xbf16> to vector<4x8x32xbf16>
    %39 = vector.shape_cast %35 : vector<8x32xbf16> to vector<1x8x32xbf16>
    %40 = vector.shape_cast %39 : vector<1x8x32xbf16> to vector<1x8x32xbf16>
    %41 = vector.broadcast %40 : vector<1x8x32xbf16> to vector<4x8x32xbf16>
    "tpu.trace_start"() <{level = 10 : i32, message = "htc,hcd->htd"}> : () -> ()
    %cst_43 = arith.constant dense<0.000000e+00> : vector<4x8x8xf32>
    %42 = tpu.matmul %38, %5, %cst_43 {dimension_numbers = #tpu.dot_dimension_numbers<[2], [1], [1], [2], [0, 0, 0, 1, 1, 2], [0], [0]>} : vector<4x8x32xbf16>, vector<4x32x8xbf16>, vector<4x8x8xf32> -> vector<4x8x8xf32>
    %cst_44 = arith.constant dense<0.000000e+00> : vector<4x8x8xf32>
    %43 = tpu.matmul %41, %6, %cst_44 {dimension_numbers = #tpu.dot_dimension_numbers<[2], [1], [1], [2], [0, 0, 0, 1, 1, 2], [0], [0]>} : vector<4x8x32xbf16>, vector<4x32x8xbf16>, vector<4x8x8xf32> -> vector<4x8x8xf32>
    %cst_45 = arith.constant dense<0.000000e+00> : vector<4x8x8xf32>
    %44 = tpu.matmul %41, %7, %cst_45 {dimension_numbers = #tpu.dot_dimension_numbers<[2], [1], [1], [2], [0, 0, 0, 1, 1, 2], [0], [0]>} : vector<4x8x32xbf16>, vector<4x32x8xbf16>, vector<4x8x8xf32> -> vector<4x8x8xf32>
    "tpu.trace_stop"() : () -> ()
    %45 = arith.truncf %42 : vector<4x8x8xf32> to vector<4x8x8xbf16>
    %46 = arith.truncf %43 : vector<4x8x8xf32> to vector<4x8x8xbf16>
    "tpu.trace_start"() <{level = 10 : i32, message = "hqd,hkd->hqk"}> : () -> ()
    %cst_46 = arith.constant dense<0.000000e+00> : vector<4x8x8xf32>
    %47 = tpu.matmul %45, %46, %cst_46 {dimension_numbers = #tpu.dot_dimension_numbers<[2], [2], [1], [1], [0, 0, 0, 1, 1, 1], [0], [0]>} : vector<4x8x8xbf16>, vector<4x8x8xbf16>, vector<4x8x8xf32> -> vector<4x8x8xf32>
    "tpu.trace_stop"() : () -> ()
    %cst_47 = arith.constant 0.353553385 : f32
    %48 = vector.broadcast %cst_47 : f32 to vector<4x8x8xf32>
    %49 = arith.mulf %47, %48 : vector<4x8x8xf32>
    %50 = tpu.iota {dimensions = array<i32: 1>} : vector<4x8x8xi32>
    %51 = tpu.iota {dimensions = array<i32: 2>} : vector<4x8x8xi32>
    %52 = arith.cmpi sle, %51, %50 : vector<4x8x8xi32>
    %cst_48 = arith.constant -1.000000e+30 : f32
    %53 = vector.broadcast %cst_48 : f32 to vector<4x8x8xf32>
    %54 = arith.select %52, %49, %53 : vector<4x8x8xi1>, vector<4x8x8xf32>
    %cst_49 = arith.constant dense<0xFF800000> : vector<4x8xf32>
    %55 = vector.multi_reduction <maximumf>, %54, %cst_49 [2] : vector<4x8x8xf32> to vector<4x8xf32>
    %56 = vector.shape_cast %55 : vector<4x8xf32> to vector<4x8x1xf32>
    %57 = vector.broadcast %56 : vector<4x8x1xf32> to vector<4x8x8xf32>
    %58 = arith.subf %54, %57 : vector<4x8x8xf32>
    %59 = math.exp %58 : vector<4x8x8xf32>
    %cst_50 = arith.constant dense<0.000000e+00> : vector<4x8xf32>
    %60 = vector.multi_reduction <add>, %59, %cst_50 [2] : vector<4x8x8xf32> to vector<4x8xf32>
    %61 = vector.shape_cast %60 : vector<4x8xf32> to vector<4x8x1xf32>
    %62 = tpu.reciprocal %61 {approx = true} : vector<4x8x1xf32> -> vector<4x8x1xf32>
    %63 = vector.broadcast %62 : vector<4x8x1xf32> to vector<4x8x8xf32>
    %64 = arith.mulf %59, %63 : vector<4x8x8xf32>
    %65 = arith.truncf %64 : vector<4x8x8xf32> to vector<4x8x8xbf16>
    %66 = arith.truncf %44 : vector<4x8x8xf32> to vector<4x8x8xbf16>
    "tpu.trace_start"() <{level = 10 : i32, message = "hqk,hkd->hqd"}> : () -> ()
    %cst_51 = arith.constant dense<0.000000e+00> : vector<4x8x8xf32>
    %67 = tpu.matmul %65, %66, %cst_51 {dimension_numbers = #tpu.dot_dimension_numbers<[2], [1], [1], [2], [0, 0, 0, 1, 1, 2], [0], [0]>} : vector<4x8x8xbf16>, vector<4x8x8xbf16>, vector<4x8x8xf32> -> vector<4x8x8xf32>
    "tpu.trace_stop"() : () -> ()
    %68 = arith.truncf %67 : vector<4x8x8xf32> to vector<4x8x8xbf16>
    "tpu.trace_start"() <{level = 10 : i32, message = "htd,hdc->htc"}> : () -> ()
    %cst_52 = arith.constant dense<0.000000e+00> : vector<4x8x32xf32>
    %69 = tpu.matmul %68, %8, %cst_52 {dimension_numbers = #tpu.dot_dimension_numbers<[2], [1], [1], [2], [0, 0, 0, 1, 1, 2], [0], [0]>} : vector<4x8x8xbf16>, vector<4x8x32xbf16>, vector<4x8x32xf32> -> vector<4x8x32xf32>
    "tpu.trace_stop"() : () -> ()
    %cst_53 = arith.constant dense<0.000000e+00> : vector<8x32xf32>
    %70 = vector.multi_reduction <add>, %69, %cst_53 [0] : vector<4x8x32xf32> to vector<8x32xf32>
    %71 = arith.addf %1, %70 : vector<8x32xf32>
    %cst_54 = arith.constant dense<0.000000e+00> : vector<8xf32>
    %72 = vector.multi_reduction <add>, %71, %cst_54 [1] : vector<8x32xf32> to vector<8xf32>
    %73 = vector.shape_cast %72 : vector<8xf32> to vector<8x1xf32>
    %cst_55 = arith.constant 3.200000e+01 : f32
    %74 = vector.broadcast %cst_55 : f32 to vector<8x1xf32>
    %75 = arith.divf %73, %74 : vector<8x1xf32>
    %76 = vector.broadcast %75 : vector<8x1xf32> to vector<8x32xf32>
    %77 = arith.subf %71, %76 : vector<8x32xf32>
    %78 = arith.mulf %77, %77 : vector<8x32xf32>
    %cst_56 = arith.constant dense<0.000000e+00> : vector<8xf32>
    %79 = vector.multi_reduction <add>, %78, %cst_56 [1] : vector<8x32xf32> to vector<8xf32>
    %80 = vector.shape_cast %79 : vector<8xf32> to vector<8x1xf32>
    %cst_57 = arith.constant 3.200000e+01 : f32
    %81 = vector.broadcast %cst_57 : f32 to vector<8x1xf32>
    %82 = arith.divf %80, %81 : vector<8x1xf32>
    %cst_58 = arith.constant 9.99999974E-6 : f32
    %83 = vector.broadcast %cst_58 : f32 to vector<8x1xf32>
    %84 = arith.addf %82, %83 : vector<8x1xf32>
    %85 = math.rsqrt %84 : vector<8x1xf32>
    %86 = vector.broadcast %85 : vector<8x1xf32> to vector<8x32xf32>
    %87 = arith.mulf %77, %86 : vector<8x32xf32>
    %88 = vector.broadcast %9 : vector<1x32xf32> to vector<8x32xf32>
    %89 = arith.mulf %87, %88 : vector<8x32xf32>
    %90 = arith.truncf %89 : vector<8x32xf32> to vector<8x32xbf16>
    %91 = arith.truncf %3 : vector<8x32xf32> to vector<8x32xbf16>
    %92 = vector.shape_cast %90 : vector<8x32xbf16> to vector<1x8x32xbf16>
    %93 = vector.shape_cast %92 : vector<1x8x32xbf16> to vector<1x8x32xbf16>
    %94 = vector.broadcast %93 : vector<1x8x32xbf16> to vector<4x8x32xbf16>
    %95 = vector.shape_cast %91 : vector<8x32xbf16> to vector<1x8x32xbf16>
    %96 = vector.shape_cast %95 : vector<1x8x32xbf16> to vector<1x8x32xbf16>
    %97 = vector.broadcast %96 : vector<1x8x32xbf16> to vector<4x8x32xbf16>
    "tpu.trace_start"() <{level = 10 : i32, message = "htc,hcd->htd"}> : () -> ()
    %cst_59 = arith.constant dense<0.000000e+00> : vector<4x8x8xf32>
    %98 = tpu.matmul %94, %10, %cst_59 {dimension_numbers = #tpu.dot_dimension_numbers<[2], [1], [1], [2], [0, 0, 0, 1, 1, 2], [0], [0]>} : vector<4x8x32xbf16>, vector<4x32x8xbf16>, vector<4x8x8xf32> -> vector<4x8x8xf32>
    %cst_60 = arith.constant dense<0.000000e+00> : vector<4x8x8xf32>
    %99 = tpu.matmul %97, %11, %cst_60 {dimension_numbers = #tpu.dot_dimension_numbers<[2], [1], [1], [2], [0, 0, 0, 1, 1, 2], [0], [0]>} : vector<4x8x32xbf16>, vector<4x32x8xbf16>, vector<4x8x8xf32> -> vector<4x8x8xf32>
    %cst_61 = arith.constant dense<0.000000e+00> : vector<4x8x8xf32>
    %100 = tpu.matmul %97, %12, %cst_61 {dimension_numbers = #tpu.dot_dimension_numbers<[2], [1], [1], [2], [0, 0, 0, 1, 1, 2], [0], [0]>} : vector<4x8x32xbf16>, vector<4x32x8xbf16>, vector<4x8x8xf32> -> vector<4x8x8xf32>
    "tpu.trace_stop"() : () -> ()
    %101 = arith.truncf %98 : vector<4x8x8xf32> to vector<4x8x8xbf16>
    %102 = arith.truncf %99 : vector<4x8x8xf32> to vector<4x8x8xbf16>
    "tpu.trace_start"() <{level = 10 : i32, message = "hqd,hkd->hqk"}> : () -> ()
    %cst_62 = arith.constant dense<0.000000e+00> : vector<4x8x8xf32>
    %103 = tpu.matmul %101, %102, %cst_62 {dimension_numbers = #tpu.dot_dimension_numbers<[2], [2], [1], [1], [0, 0, 0, 1, 1, 1], [0], [0]>} : vector<4x8x8xbf16>, vector<4x8x8xbf16>, vector<4x8x8xf32> -> vector<4x8x8xf32>
    "tpu.trace_stop"() : () -> ()
    %cst_63 = arith.constant 0.353553385 : f32
    %104 = vector.broadcast %cst_63 : f32 to vector<4x8x8xf32>
    %105 = arith.mulf %103, %104 : vector<4x8x8xf32>
    %cst_64 = arith.constant dense<0xFF800000> : vector<4x8xf32>
    %106 = vector.multi_reduction <maximumf>, %105, %cst_64 [2] : vector<4x8x8xf32> to vector<4x8xf32>
    %107 = vector.shape_cast %106 : vector<4x8xf32> to vector<4x8x1xf32>
    %108 = vector.broadcast %107 : vector<4x8x1xf32> to vector<4x8x8xf32>
    %109 = arith.subf %105, %108 : vector<4x8x8xf32>
    %110 = math.exp %109 : vector<4x8x8xf32>
    %cst_65 = arith.constant dense<0.000000e+00> : vector<4x8xf32>
    %111 = vector.multi_reduction <add>, %110, %cst_65 [2] : vector<4x8x8xf32> to vector<4x8xf32>
    %112 = vector.shape_cast %111 : vector<4x8xf32> to vector<4x8x1xf32>
    %113 = tpu.reciprocal %112 {approx = true} : vector<4x8x1xf32> -> vector<4x8x1xf32>
    %114 = vector.broadcast %113 : vector<4x8x1xf32> to vector<4x8x8xf32>
    %115 = arith.mulf %110, %114 : vector<4x8x8xf32>
    %116 = arith.truncf %115 : vector<4x8x8xf32> to vector<4x8x8xbf16>
    %117 = arith.truncf %100 : vector<4x8x8xf32> to vector<4x8x8xbf16>
    "tpu.trace_start"() <{level = 10 : i32, message = "hqk,hkd->hqd"}> : () -> ()
    %cst_66 = arith.constant dense<0.000000e+00> : vector<4x8x8xf32>
    %118 = tpu.matmul %116, %117, %cst_66 {dimension_numbers = #tpu.dot_dimension_numbers<[2], [1], [1], [2], [0, 0, 0, 1, 1, 2], [0], [0]>} : vector<4x8x8xbf16>, vector<4x8x8xbf16>, vector<4x8x8xf32> -> vector<4x8x8xf32>
    "tpu.trace_stop"() : () -> ()
    %119 = arith.truncf %118 : vector<4x8x8xf32> to vector<4x8x8xbf16>
    "tpu.trace_start"() <{level = 10 : i32, message = "htd,hdc->htc"}> : () -> ()
    %cst_67 = arith.constant dense<0.000000e+00> : vector<4x8x32xf32>
    %120 = tpu.matmul %119, %13, %cst_67 {dimension_numbers = #tpu.dot_dimension_numbers<[2], [1], [1], [2], [0, 0, 0, 1, 1, 2], [0], [0]>} : vector<4x8x8xbf16>, vector<4x8x32xbf16>, vector<4x8x32xf32> -> vector<4x8x32xf32>
    "tpu.trace_stop"() : () -> ()
    %cst_68 = arith.constant dense<0.000000e+00> : vector<8x32xf32>
    %121 = vector.multi_reduction <add>, %120, %cst_68 [0] : vector<4x8x32xf32> to vector<8x32xf32>
    %122 = arith.addf %71, %121 : vector<8x32xf32>
    %cst_69 = arith.constant dense<0.000000e+00> : vector<8xf32>
    %123 = vector.multi_reduction <add>, %122, %cst_69 [1] : vector<8x32xf32> to vector<8xf32>
    %124 = vector.shape_cast %123 : vector<8xf32> to vector<8x1xf32>
    %cst_70 = arith.constant 3.200000e+01 : f32
    %125 = vector.broadcast %cst_70 : f32 to vector<8x1xf32>
    %126 = arith.divf %124, %125 : vector<8x1xf32>
    %127 = vector.broadcast %126 : vector<8x1xf32> to vector<8x32xf32>
    %128 = arith.subf %122, %127 : vector<8x32xf32>
    %129 = arith.mulf %128, %128 : vector<8x32xf32>
    %cst_71 = arith.constant dense<0.000000e+00> : vector<8xf32>
    %130 = vector.multi_reduction <add>, %129, %cst_71 [1] : vector<8x32xf32> to vector<8xf32>
    %131 = vector.shape_cast %130 : vector<8xf32> to vector<8x1xf32>
    %cst_72 = arith.constant 3.200000e+01 : f32
    %132 = vector.broadcast %cst_72 : f32 to vector<8x1xf32>
    %133 = arith.divf %131, %132 : vector<8x1xf32>
    %cst_73 = arith.constant 9.99999974E-6 : f32
    %134 = vector.broadcast %cst_73 : f32 to vector<8x1xf32>
    %135 = arith.addf %133, %134 : vector<8x1xf32>
    %136 = math.rsqrt %135 : vector<8x1xf32>
    %137 = vector.broadcast %136 : vector<8x1xf32> to vector<8x32xf32>
    %138 = arith.mulf %128, %137 : vector<8x32xf32>
    %139 = vector.broadcast %14 : vector<1x32xf32> to vector<8x32xf32>
    %140 = arith.mulf %138, %139 : vector<8x32xf32>
    %141 = arith.truncf %140 : vector<8x32xf32> to vector<8x32xbf16>
    %cst_74 = arith.constant dense<0.000000e+00> : vector<8x128xf32>
    %142 = tpu.matmul %141, %15, %cst_74 {dimension_numbers = #tpu.dot_dimension_numbers<[1], [0], [0], [1], [0, 0, 1, 1], [], []>} : vector<8x32xbf16>, vector<32x128xbf16>, vector<8x128xf32> -> vector<8x128xf32>
    %cst_75 = arith.constant 5.000000e-01 : f32
    %143 = vector.broadcast %cst_75 : f32 to vector<8x128xf32>
    %144 = arith.mulf %143, %142 : vector<8x128xf32>
    %cst_76 = arith.constant 0.707106769 : f32
    %145 = vector.broadcast %cst_76 : f32 to vector<8x128xf32>
    %146 = arith.mulf %142, %145 : vector<8x128xf32>
    %cst_77 = arith.constant 0.000000e+00 : f32
    %147 = vector.broadcast %cst_77 : f32 to vector<8x128xf32>
    %148 = arith.cmpf oge, %146, %147 : vector<8x128xf32>
    %cst_78 = arith.constant 1.000000e+00 : f32
    %cst_79 = arith.constant -1.000000e+00 : f32
    %149 = vector.broadcast %cst_78 : f32 to vector<8x128xf32>
    %150 = vector.broadcast %cst_79 : f32 to vector<8x128xf32>
    %151 = arith.select %148, %149, %150 : vector<8x128xi1>, vector<8x128xf32>
    %152 = math.absf %146 : vector<8x128xf32>
    %cst_80 = arith.constant 0.327591091 : f32
    %153 = vector.broadcast %cst_80 : f32 to vector<8x128xf32>
    %154 = arith.mulf %153, %152 : vector<8x128xf32>
    %cst_81 = arith.constant 1.000000e+00 : f32
    %155 = vector.broadcast %cst_81 : f32 to vector<8x128xf32>
    %156 = arith.addf %155, %154 : vector<8x128xf32>
    %cst_82 = arith.constant 1.000000e+00 : f32
    %157 = vector.broadcast %cst_82 : f32 to vector<8x128xf32>
    %158 = arith.divf %157, %156 : vector<8x128xf32>
    %cst_83 = arith.constant 1.06140542 : f32
    %159 = vector.broadcast %cst_83 : f32 to vector<8x128xf32>
    %160 = arith.mulf %159, %158 : vector<8x128xf32>
    %cst_84 = arith.constant -1.45315206 : f32
    %161 = vector.broadcast %cst_84 : f32 to vector<8x128xf32>
    %162 = arith.addf %160, %161 : vector<8x128xf32>
    %163 = arith.mulf %162, %158 : vector<8x128xf32>
    %cst_85 = arith.constant 1.42141378 : f32
    %164 = vector.broadcast %cst_85 : f32 to vector<8x128xf32>
    %165 = arith.addf %163, %164 : vector<8x128xf32>
    %166 = arith.mulf %165, %158 : vector<8x128xf32>
    %cst_86 = arith.constant -0.284496725 : f32
    %167 = vector.broadcast %cst_86 : f32 to vector<8x128xf32>
    %168 = arith.addf %166, %167 : vector<8x128xf32>
    %169 = arith.mulf %168, %158 : vector<8x128xf32>
    %cst_87 = arith.constant 0.254829586 : f32
    %170 = vector.broadcast %cst_87 : f32 to vector<8x128xf32>
    %171 = arith.addf %169, %170 : vector<8x128xf32>
    %172 = arith.mulf %171, %158 : vector<8x128xf32>
    %cst_88 = arith.constant 0.000000e+00 : f32
    %173 = vector.broadcast %cst_88 : f32 to vector<8x128xf32>
    %174 = arith.subf %173, %152 : vector<8x128xf32>
    %175 = arith.mulf %174, %152 : vector<8x128xf32>
    %176 = math.exp %175 : vector<8x128xf32>
    %177 = arith.mulf %172, %176 : vector<8x128xf32>
    %cst_89 = arith.constant 1.000000e+00 : f32
    %178 = vector.broadcast %cst_89 : f32 to vector<8x128xf32>
    %179 = arith.subf %178, %177 : vector<8x128xf32>
    %180 = arith.mulf %151, %179 : vector<8x128xf32>
    %cst_90 = arith.constant 1.000000e+00 : f32
    %181 = vector.broadcast %cst_90 : f32 to vector<8x128xf32>
    %182 = arith.addf %181, %180 : vector<8x128xf32>
    %183 = arith.mulf %144, %182 : vector<8x128xf32>
    %184 = arith.truncf %183 : vector<8x128xf32> to vector<8x128xbf16>
    %cst_91 = arith.constant dense<0.000000e+00> : vector<8x32xf32>
    %185 = tpu.matmul %184, %16, %cst_91 {dimension_numbers = #tpu.dot_dimension_numbers<[1], [0], [0], [1], [0, 0, 1, 1], [], []>} : vector<8x128xbf16>, vector<128x32xbf16>, vector<8x32xf32> -> vector<8x32xf32>
    %186 = arith.addf %122, %185 : vector<8x32xf32>
    %187 = vector.extract_strided_slice %186 {offsets = [7, 0], sizes = [1, 32], strides = [1, 1]} : vector<8x32xf32> to vector<1x32xf32>
    %c0_92 = arith.constant 0 : index
    %c0_93 = arith.constant 0 : index
    %188 = vector.load %arg16[%c0_92, %c0_93] : memref<1x32xf32, #tpu.memory_space<vmem>>, vector<1x32xf32>
    %cst_94 = arith.constant dense<0.000000e+00> : vector<1xf32>
    %189 = vector.multi_reduction <add>, %187, %cst_94 [1] : vector<1x32xf32> to vector<1xf32>
    %190 = vector.shape_cast %189 : vector<1xf32> to vector<1x1xf32>
    %cst_95 = arith.constant 3.200000e+01 : f32
    %191 = vector.broadcast %cst_95 : f32 to vector<1x1xf32>
    %192 = arith.divf %190, %191 : vector<1x1xf32>
    %193 = vector.broadcast %192 : vector<1x1xf32> to vector<1x32xf32>
    %194 = arith.subf %187, %193 : vector<1x32xf32>
    %195 = arith.mulf %194, %194 : vector<1x32xf32>
    %cst_96 = arith.constant dense<0.000000e+00> : vector<1xf32>
    %196 = vector.multi_reduction <add>, %195, %cst_96 [1] : vector<1x32xf32> to vector<1xf32>
    %197 = vector.shape_cast %196 : vector<1xf32> to vector<1x1xf32>
    %cst_97 = arith.constant 3.200000e+01 : f32
    %198 = vector.broadcast %cst_97 : f32 to vector<1x1xf32>
    %199 = arith.divf %197, %198 : vector<1x1xf32>
    %cst_98 = arith.constant 9.99999974E-6 : f32
    %200 = vector.broadcast %cst_98 : f32 to vector<1x1xf32>
    %201 = arith.addf %199, %200 : vector<1x1xf32>
    %202 = math.rsqrt %201 : vector<1x1xf32>
    %203 = vector.broadcast %202 : vector<1x1xf32> to vector<1x32xf32>
    %204 = arith.mulf %194, %203 : vector<1x32xf32>
    %205 = arith.mulf %204, %188 : vector<1x32xf32>
    %206 = arith.truncf %205 : vector<1x32xf32> to vector<1x32xbf16>
    %c0_99 = arith.constant 0 : index
    %c0_100 = arith.constant 0 : index
    %207 = vector.load %arg17[%c0_99, %c0_100] : memref<32x48xbf16, #tpu.memory_space<vmem>>, vector<32x48xbf16>
    %cst_101 = arith.constant dense<0.000000e+00> : vector<1x48xf32>
    %208 = tpu.matmul %206, %207, %cst_101 {dimension_numbers = #tpu.dot_dimension_numbers<[1], [0], [0], [1], [0, 0, 1, 1], [], []>} : vector<1x32xbf16>, vector<32x48xbf16>, vector<1x48xf32> -> vector<1x48xf32>
    %c0_102 = arith.constant 0 : index
    %c0_103 = arith.constant 0 : index
    %c0_104 = arith.constant 0 : index
    %209 = vector.load %arg18[%c0_102, %c0_103, %c0_104] : memref<1x1x48xf32, #tpu.memory_space<vmem>>, vector<1x1x48xf32>
    %210 = vector.shape_cast %209 : vector<1x1x48xf32> to vector<1x48xf32>
    %211 = vector.shape_cast %208 : vector<1x48xf32> to vector<1x1x48xf32>
    tpu.vector_store %arg18[%c0_102, %c0_103, %c0_104], %211 {strides = array<i32>} : memref<1x1x48xf32, #tpu.memory_space<vmem>>, vector<1x1x48xf32>,
    return
  }
  func.func @transform_0(%arg0: i32) -> (i32, i32, i32) {
    %c0_i32 = arith.constant 0 : i32
    %c0_i32_0 = arith.constant 0 : i32
    %c0_i32_1 = arith.constant 0 : i32
    return %arg0, %c0_i32, %c0_i32_0 : i32, i32, i32
  }
  func.func @transform_1(%arg0: i32) -> (i32, i32, i32) {
    %c0_i32 = arith.constant 0 : i32
    %c0_i32_0 = arith.constant 0 : i32
    %c0_i32_1 = arith.constant 0 : i32
    return %arg0, %c0_i32, %c0_i32_0 : i32, i32, i32
  }
  func.func @transform_2(%arg0: i32) -> (i32, i32) {
    %c0_i32 = arith.constant 0 : i32
    %c0_i32_0 = arith.constant 0 : i32
    %c0_i32_1 = arith.constant 0 : i32
    return %c0_i32, %c0_i32_0 : i32, i32
  }
  func.func @transform_3(%arg0: i32) -> (i32, i32, i32) {
    %c0_i32 = arith.constant 0 : i32
    %c0_i32_0 = arith.constant 0 : i32
    %c0_i32_1 = arith.constant 0 : i32
    %c0_i32_2 = arith.constant 0 : i32
    return %c0_i32, %c0_i32_0, %c0_i32_1 : i32, i32, i32
  }
  func.func @transform_4(%arg0: i32) -> (i32, i32, i32) {
    %c0_i32 = arith.constant 0 : i32
    %c0_i32_0 = arith.constant 0 : i32
    %c0_i32_1 = arith.constant 0 : i32
    %c0_i32_2 = arith.constant 0 : i32
    return %c0_i32, %c0_i32_0, %c0_i32_1 : i32, i32, i32
  }
  func.func @transform_5(%arg0: i32) -> (i32, i32, i32) {
    %c0_i32 = arith.constant 0 : i32
    %c0_i32_0 = arith.constant 0 : i32
    %c0_i32_1 = arith.constant 0 : i32
    %c0_i32_2 = arith.constant 0 : i32
    return %c0_i32, %c0_i32_0, %c0_i32_1 : i32, i32, i32
  }
  func.func @transform_6(%arg0: i32) -> (i32, i32, i32) {
    %c0_i32 = arith.constant 0 : i32
    %c0_i32_0 = arith.constant 0 : i32
    %c0_i32_1 = arith.constant 0 : i32
    %c0_i32_2 = arith.constant 0 : i32
    return %c0_i32, %c0_i32_0, %c0_i32_1 : i32, i32, i32
  }
  func.func @transform_7(%arg0: i32) -> (i32, i32) {
    %c0_i32 = arith.constant 0 : i32
    %c0_i32_0 = arith.constant 0 : i32
    %c0_i32_1 = arith.constant 0 : i32
    return %c0_i32, %c0_i32_0 : i32, i32
  }
  func.func @transform_8(%arg0: i32) -> (i32, i32, i32) {
    %c0_i32 = arith.constant 0 : i32
    %c0_i32_0 = arith.constant 0 : i32
    %c0_i32_1 = arith.constant 0 : i32
    %c0_i32_2 = arith.constant 0 : i32
    return %c0_i32, %c0_i32_0, %c0_i32_1 : i32, i32, i32
  }
  func.func @transform_9(%arg0: i32) -> (i32, i32, i32) {
    %c0_i32 = arith.constant 0 : i32
    %c0_i32_0 = arith.constant 0 : i32
    %c0_i32_1 = arith.constant 0 : i32
    %c0_i32_2 = arith.constant 0 : i32
    return %c0_i32, %c0_i32_0, %c0_i32_1 : i32, i32, i32
  }
  func.func @transform_10(%arg0: i32) -> (i32, i32, i32) {
    %c0_i32 = arith.constant 0 : i32
    %c0_i32_0 = arith.constant 0 : i32
    %c0_i32_1 = arith.constant 0 : i32
    %c0_i32_2 = arith.constant 0 : i32
    return %c0_i32, %c0_i32_0, %c0_i32_1 : i32, i32, i32
  }
  func.func @transform_11(%arg0: i32) -> (i32, i32, i32) {
    %c0_i32 = arith.constant 0 : i32
    %c0_i32_0 = arith.constant 0 : i32
    %c0_i32_1 = arith.constant 0 : i32
    %c0_i32_2 = arith.constant 0 : i32
    return %c0_i32, %c0_i32_0, %c0_i32_1 : i32, i32, i32
  }
  func.func @transform_12(%arg0: i32) -> (i32, i32) {
    %c0_i32 = arith.constant 0 : i32
    %c0_i32_0 = arith.constant 0 : i32
    %c0_i32_1 = arith.constant 0 : i32
    return %c0_i32, %c0_i32_0 : i32, i32
  }
  func.func @transform_13(%arg0: i32) -> (i32, i32) {
    %c0_i32 = arith.constant 0 : i32
    %c0_i32_0 = arith.constant 0 : i32
    %c0_i32_1 = arith.constant 0 : i32
    return %c0_i32, %c0_i32_0 : i32, i32
  }
  func.func @transform_14(%arg0: i32) -> (i32, i32) {
    %c0_i32 = arith.constant 0 : i32
    %c0_i32_0 = arith.constant 0 : i32
    %c0_i32_1 = arith.constant 0 : i32
    return %c0_i32, %c0_i32_0 : i32, i32
  }
  func.func @transform_15(%arg0: i32) -> (i32, i32) {
    %c0_i32 = arith.constant 0 : i32
    %c0_i32_0 = arith.constant 0 : i32
    %c0_i32_1 = arith.constant 0 : i32
    return %c0_i32, %c0_i32_0 : i32, i32
  }
  func.func @transform_16(%arg0: i32) -> (i32, i32) {
    %c0_i32 = arith.constant 0 : i32
    %c0_i32_0 = arith.constant 0 : i32
    %c0_i32_1 = arith.constant 0 : i32
    return %c0_i32, %c0_i32_0 : i32, i32
  }
  func.func @transform_17(%arg0: i32) -> (i32, i32, i32) {
    %c0_i32 = arith.constant 0 : i32
    %c0_i32_0 = arith.constant 0 : i32
    %c0_i32_1 = arith.constant 0 : i32
    return %arg0, %c0_i32, %c0_i32_0 : i32, i32, i32
  }
}

</mosaic_0001>

<bundles_post_ra>
// kernel: _lambda_.5
= control target key start
LH: loop header
LB: loop body
LE: loop exit
PB: predicated region body
PF: predicated region fallthrough
CT: control target
= control target key end

     0   :  { %s2455_s13 = smov 0   ;;  %s2792_s0 = inlined_call_operand.vmem [shape: f32[2,8,32], index: 0, kind: input, shape index: {}]   ;;  %s2793_s1 = inlined_call_operand.vmem [shape: f32[1,32], index: 1, kind: input, shape index: {}]   ;;  %s2794_s2 = inlined_call_operand.vmem [shape: bf16[4,32,8], index: 2, kind: input, shape index: {}]   ;;  %s2795_s3 = inlined_call_operand.vmem [shape: bf16[4,32,8], index: 3, kind: input, shape index: {}]   ;;  %s2796_s4 = inlined_call_operand.vmem [shape: bf16[4,32,8], index: 4, kind: input, shape index: {}]   ;;  %s2797_s5 = inlined_call_operand.vmem [shape: bf16[4,8,32], index: 5, kind: input, shape index: {}]   ;;  %s2798_s6 = inlined_call_operand.vmem [shape: f32[1,32], index: 6, kind: input, shape index: {}]   ;;  %s2799_s7 = inlined_call_operand.vmem [shape: bf16[32,128], index: 7, kind: input, shape index: {}]   ;;  %s2800_s8 = inlined_call_operand.vmem [shape: bf16[128,32], index: 8, kind: input, shape index: {}]   ;;  %s2801_s9 = inlined_call_operand.vmem [shape: f32[1,32], index: 9, kind: input, shape index: {}]   ;;  %s2802_s10 = inlined_call_operand.vmem [shape: f32[2,8,32], index: 10, kind: output, shape index: {}]  }
   0x1 LB: > { %s1979_s14 = sadd.s32 4294967295, %s2395_s13   ;;  %p1983_p0 = scmp.ge.s32.totalorder %s2395_s13, 1  ;;  %s2395_s13 = sphi %s2455_s13, %s20_s13  }
   0x2   : > { %p311_p1 = scmp.lt.s32.totalorder %s2395_s13, 3 }
   0x4   : > { %p312_p2 = pnand %p1983_p0, %p311_p1 }
   0x5   : > { %p347_p3 = scmp.lt.s32.totalorder (!%p312_p2), %s1979_s14, 1  ;;  %vm358_vm0 = vcmask (!%p312_p2), 261120   ;;  %v2329_v7 = vld [vmem:[%s2794_s2] sm:$0xff] (!%p312_p2)   ;;  %v2330_v8 = vld [vmem:[%s2794_s2 + $0x30] sm:$0xff] (!%p312_p2)   ;;  %v2397_v9 = vmov (!%p312_p2), 0.0   ;;  %v2331_v10 = vld [vmem:[%s2794_s2 + $0x8] sm:$0xff] (!%p312_p2)  }
   0x6   : > { %315 = sbr.rel (%p312_p2) target bundleno = 2649 (0xa59), region = 60  ;;  %2122 = vmatprep.subr.bf16.mxu0 (!%p312_p2), %v2397_v9  ;;  %2146 = vmatprep.subr.bf16.mxu1 (!%p312_p2), %v2397_v9  ;;  %v2332_v11 = vld [vmem:[%s2794_s2 + $0x38] sm:$0xff] (!%p312_p2)   ;;  %vm2398_vm1 = vmmov (!%p312_p2), 0   ;;  %v1986_v16 = vld [vmem:[%s2793_s1] ss:$0 sm:$0xff] (!%p312_p2)  ;;  %v2333_v19 = vld [vmem:[%s2794_s2 + $0x10] sm:$0xff] (!%p312_p2)  }
   0x7   : > { %2123 = vmatpush3.bf16.msra.mxu0 (!%p312_p2), %v2329_v7  ;;  %2147 = vmatpush3.bf16.msra.mxu1 (!%p312_p2), %v2330_v8  ;;  %v2334_v20 = vld [vmem:[%s2795_s3 + $0x10] sm:$0xff] (!%p312_p2)   ;;  %v2335_v22 = vld [vmem:[%s2794_s2 + $0x18] sm:$0xff] (!%p312_p2)   ;;  %v2337_v24 = vld [vmem:[%s2794_s2 + $0x20] sm:$0xff] (!%p312_p2)   ;;  %vm1068_vm2 = vcmask (!%p312_p2), 64512   ;;  %vm1312_vm3 = vcmask (!%p312_p2), 1043456  }
   0x8   : > { %2124 = vmatprep.subr.bf16.mxu0 (!%p312_p2), %v2397_v9  ;;  %2148 = vmatprep.subr.bf16.mxu1 (!%p312_p2), %v2397_v9  ;;  %v2336_v23 = vld [vmem:[%s2795_s3 + $0x18] sm:$0xff] (!%p312_p2)   ;;  %v2338_v25 = vld [vmem:[%s2795_s3 + $0x30] sm:$0xff] (!%p312_p2)   ;;  %v2339_v26 = vld [vmem:[%s2794_s2 + $0x28] sm:$0xff] (!%p312_p2)  }
   0x9   : > { %2126 = vmatprep.mubr.msk.bf16.mxu0 (!%p312_p2), %vm2398_vm1, %v2397_v9  ;;  %2150 = vmatprep.mubr.msk.bf16.mxu1 (!%p312_p2), %vm2398_vm1, %v2397_v9  ;;  %v2340_v27 = vld [vmem:[%s2795_s3 + $0x38] sm:$0xff] (!%p312_p2)   ;;  %v2341_v28 = vld [vmem:[%s2795_s3] sm:$0xff] (!%p312_p2)   ;;  %v2342_v29 = vld [vmem:[%s2796_s4 + $0x10] sm:$0xff] (!%p312_p2)  }
   0xa   : > { %v2343_v30 = vld [vmem:[%s2795_s3 + $0x8] sm:$0xff] (!%p312_p2)   ;;  %v2344_v31 = vld [vmem:[%s2796_s4 + $0x18] sm:$0xff] (!%p312_p2)   ;;  %v2345_v32 = vld [vmem:[%s2795_s3 + $0x20] sm:$0xff] (!%p312_p2)  }
   0xb   : > { %2125 = vmatpush3.bf16.msra.mxu0 (!%p312_p2), %v2331_v10  ;;  %2149 = vmatpush3.bf16.msra.mxu1 (!%p312_p2), %v2332_v11  ;;  %v2346_v33 = vld [vmem:[%s2796_s4 + $0x30] sm:$0xff] (!%p312_p2)   ;;  %v2347_v34 = vld [vmem:[%s2795_s3 + $0x28] sm:$0xff] (!%p312_p2)   ;;  %v2348_v35 = vld [vmem:[%s2796_s4 + $0x38] sm:$0xff] (!%p312_p2)  }
   0xc   : > { %2130 = vmatprep.subr.bf16.mxu0 (!%p312_p2), %v2397_v9  ;;  %2162 = vmatprep.subr.bf16.mxu1 (!%p312_p2), %v2397_v9  ;;  %v2349_v36 = vld [vmem:[%s2796_s4] sm:$0xff] (!%p312_p2)   ;;  %v2350_v37 = vld [vmem:[%s2796_s4 + $0x8] sm:$0xff] (!%p312_p2)  }
   0xd   : > { %s2804_s14 = smov (!%p347_p3, %s1979_s14), 1  ;;  %v2351_v38 = vld [vmem:[%s2796_s4 + $0x20] sm:$0xff]   ;;  %v2352_v39 = vld [vmem:[%s2796_s4 + $0x28] sm:$0xff]  }
   0xe   : > { %s1984_s15 = sshll.u32 %s2804_s14, 3 }
   0xf   : > { %s350_s18 = scalar_lea.vmem %s2792_s0, %s1984_s15 }
  0x10   : > { %v2471_v0 = vld [vmem:[%s350_s18] sm:$0xff]  ;;  %s354_s18 = scalar_lea.vmem %s2802_s10, %s1984_s15 }
  0x11   : > { %v359_v1 = vsel %vm358_vm0, %v2471_v0, 0.0 }
  0x12   : > { %360 = vadd.xlane.f32.xlu0 %v359_v1 }
  0x9f   : > { %v361_v2 = vpop.xlane.xlu0 %360 }
  0xa0   : > { %v363_v3 = vmul.f32 0.03125, %v361_v2 }
  0xa2   : > { %v364_v4 = vsub.f32 %v2471_v0, %v363_v3 }
  0xa4   : > { %v365_v5 = vmul.f32 %v364_v4, %v364_v4 }
  0xa6   : > { %v366_v6 = vsel %vm358_vm0, %v365_v5, 0.0 }
  0xa7   : > { %367 = vadd.xlane.f32.xlu0 %v366_v6 }
 0x134   : > { %v368_v12 = vpop.xlane.xlu0 %367 }
 0x135   : > { %v369_v13 = vmul.f32 0.03125, %v368_v12 }
 0x137   : > { %v370_v14 = vadd.f32 1e-05, %v369_v13 }
 0x139   : > { %2363 = vrsqrt.f32 %v370_v14 }
 0x143   : > { %v2364_v15 = vpop.eup %2363 }
 0x144   : > { %v372_v17 = vmul.f32 %v2364_v15, %v364_v4 }
 0x146   : > { %v379_v18 = vmul.f32 %v1986_v16, %v372_v17 }
 0x148   : > { %v2508_v21 = vpack.c.bf16 %v379_v18, %v379_v18 }
 0x14a   : > { %2127 = vmatmul.mubr.msk.bf16.vlgmr.msra.gmra.mrb[0].mxu0 %vm358_vm0, %v2508_v21  ;;  %2151 = vmatmul.mubr.msk.bf16.vlgmr.msra.gmra.mrb[0].mxu1 %vm358_vm0, %v2508_v21 }
 0x14b   : > { %2131 = vmatpush3.bf16.msra.mxu0 %v2333_v19  ;;  %2163 = vmatpush3.bf16.msra.mxu1 %v2334_v20 }
 0x14c   : > { %2132 = vmatprep.subr.bf16.mxu0 %v2397_v9  ;;  %2164 = vmatprep.subr.bf16.mxu1 %v2397_v9 }
 0x14d   : > { %2134 = vmatprep.mubr.msk.bf16.mxu0 %vm2398_vm1, %v2397_v9  ;;  %2166 = vmatprep.mubr.msk.bf16.mxu1 %vm2398_vm1, %v2397_v9 }
 0x14f   : > { %2133 = vmatpush3.bf16.msra.mxu0 %v2335_v22  ;;  %2165 = vmatpush3.bf16.msra.mxu1 %v2336_v23 }
 0x150   : > { %2138 = vmatprep.subr.bf16.mxu0 %v2397_v9  ;;  %2178 = vmatprep.subr.bf16.mxu1 %v2397_v9 }
 0x152   : > { %2135 = vmatmul.mubr.msk.bf16.vlgmr.msra.gmra.mrb[4].mxu0 %vm358_vm0, %v2508_v21  ;;  %2167 = vmatmul.mubr.msk.bf16.vlgmr.msra.gmra.mrb[4].mxu1 %vm358_vm0, %v2508_v21 }
 0x153   : > { %2139 = vmatpush3.bf16.msra.mxu0 %v2337_v24  ;;  %2179 = vmatpush3.bf16.msra.mxu1 %v2338_v25 }
 0x154   : > { %2140 = vmatprep.subr.bf16.mxu0 %v2397_v9  ;;  %2180 = vmatprep.subr.bf16.mxu1 %v2397_v9 }
 0x155   : > { %2142 = vmatprep.mubr.msk.bf16.mxu0 %vm2398_vm1, %v2397_v9  ;;  %2182 = vmatprep.mubr.msk.bf16.mxu1 %vm2398_vm1, %v2397_v9 }
 0x157   : > { %2141 = vmatpush3.bf16.msra.mxu0 %v2339_v26  ;;  %2181 = vmatpush3.bf16.msra.mxu1 %v2340_v27 }
 0x158   : > { %2154 = vmatprep.subr.bf16.mxu0 %v2397_v9  ;;  %2194 = vmatprep.subr.bf16.mxu1 %v2397_v9 }
 0x15a   : > { %2143 = vmatmul.mubr.msk.bf16.vlgmr.msra.gmra.mrb[8].mxu0 %vm358_vm0, %v2508_v21  ;;  %2183 = vmatmul.mubr.msk.bf16.vlgmr.msra.gmra.mrb[8].mxu1 %vm358_vm0, %v2508_v21 }
 0x15b   : > { %2155 = vmatpush3.bf16.msra.mxu0 %v2341_v28  ;;  %2195 = vmatpush3.bf16.msra.mxu1 %v2342_v29 }
 0x15c   : > { %2156 = vmatprep.subr.bf16.mxu0 %v2397_v9  ;;  %2196 = vmatprep.subr.bf16.mxu1 %v2397_v9 }
 0x15d   : > { %2158 = vmatprep.mubr.msk.bf16.mxu0 %vm2398_vm1, %v2397_v9  ;;  %2198 = vmatprep.mubr.msk.bf16.mxu1 %vm2398_vm1, %v2397_v9 }
 0x15f   : > { %2157 = vmatpush3.bf16.msra.mxu0 %v2343_v30  ;;  %2197 = vmatpush3.bf16.msra.mxu1 %v2344_v31 }
 0x160   : > { %2170 = vmatprep.subr.bf16.mxu0 %v2397_v9  ;;  %2210 = vmatprep.subr.bf16.mxu1 %v2397_v9 }
 0x162   : > { %2159 = vmatmul.mubr.msk.bf16.vlgmr.msra.gmra.mrb[12].mxu0 %vm358_vm0, %v2508_v21  ;;  %2199 = vmatmul.mubr.msk.bf16.vlgmr.msra.gmra.mrb[12].mxu1 %vm358_vm0, %v2508_v21 }
 0x163   : > { %2171 = vmatpush3.bf16.msra.mxu0 %v2345_v32  ;;  %2211 = vmatpush3.bf16.msra.mxu1 %v2346_v33 }
 0x164   : > { %2172 = vmatprep.subr.bf16.mxu0 %v2397_v9  ;;  %2212 = vmatprep.subr.bf16.mxu1 %v2397_v9 }
 0x165   : > { %2174 = vmatprep.mubr.msk.bf16.mxu0 %vm2398_vm1, %v2397_v9  ;;  %2214 = vmatprep.mubr.msk.bf16.mxu1 %vm2398_vm1, %v2397_v9 }
 0x167   : > { %2173 = vmatpush3.bf16.msra.mxu0 %v2347_v34  ;;  %2213 = vmatpush3.bf16.msra.mxu1 %v2348_v35 }
 0x168   : > { %2186 = vmatprep.subr.bf16.mxu0 %v2397_v9  ;;  %2224 = vmatprep.subr.bf16.mxu1 %v2397_v9 }
 0x16a   : > { %2175 = vmatmul.mubr.msk.bf16.vlgmr.msra.gmra.mrb[16].mxu0 %vm358_vm0, %v2508_v21  ;;  %2215 = vmatmul.mubr.msk.bf16.vlgmr.msra.gmra.mrb[16].mxu1 %vm358_vm0, %v2508_v21 }
 0x16b   : > { %2187 = vmatpush3.bf16.msra.mxu0 %v2349_v36  ;;  %2190 = vmatprep.mubr.msk.bf16.mxu0 %vm2398_vm1, %v2397_v9 }
 0x16c   : > { %2188 = vmatprep.subr.bf16.mxu0 %v2397_v9  ;;  %2226 = vmatprep.mubr.msk.bf16.mxu1 %vm2398_vm1, %v2397_v9 }
 0x16f   : > { %2189 = vmatpush3.bf16.msra.mxu0 %v2350_v37 }
 0x170   : > { %2202 = vmatprep.subr.bf16.mxu0 %v2397_v9 }
 0x172   : > { %2191 = vmatmul.mubr.msk.bf16.vlgmr.msra.gmra.mrb[20].mxu0 %vm358_vm0, %v2508_v21 }
 0x173   : > { %2203 = vmatpush3.bf16.msra.mxu0 %v2351_v38  ;;  %2206 = vmatprep.mubr.msk.bf16.mxu0 %vm2398_vm1, %v2397_v9 }
 0x174   : > { %2204 = vmatprep.subr.bf16.mxu0 %v2397_v9 }
 0x177   : > { %2205 = vmatpush3.bf16.msra.mxu0 %v2352_v39 }
 0x178   : > { %2218 = vmatprep.subr.bf16.mxu0 %v2397_v9 }
 0x17a   : > { %2207 = vmatmul.mubr.msk.bf16.vlgmr.msra.gmra.mrb[24].mxu0 %vm358_vm0, %v2508_v21 }
 0x17b   : > { %2220 = vmatprep.mubr.msk.bf16.mxu0 %vm2398_vm1, %v2397_v9 }
 0x21d   : > { %v2632_v40 = vpop.f32.mrb[0].mxu0  ;;  %v638_v41 = vpop.f32.mrb[0].mxu1 }
 0x21e   : > { %v2128_v42 = vpop.f32.mrb[1].mxu0  ;;  %v2152_v43 = vpop.f32.mrb[1].mxu1  ;;  %v1063_v8 = vpack.c.bf16 %v638_v41, %v638_v41  ;;  %v1060_v22 = vpack.c.bf16 %v2632_v40, %v2632_v40 }
 0x21f   : > { %v485_v44 = vpop.f32.mrb[2].mxu0  ;;  %v641_v45 = vpop.f32.mrb[2].mxu1 }
 0x220   : > { %v2129_v46 = vpop.f32.mrb[3].mxu0  ;;  %v2153_v47 = vpop.f32.mrb[3].mxu1 }
 0x225   : > { %v534_v48 = vpop.f32.mrb[4].mxu0  ;;  %v742_v49 = vpop.f32.mrb[4].mxu1 }
 0x226   : > { %v1065_v50 = vpack.c.bf16 %v742_v49, %v742_v49  ;;  %v2136_v51 = vpop.f32.mrb[5].mxu0  ;;  %v2168_v52 = vpop.f32.mrb[5].mxu1  ;;  %v1061_v60 = vpack.c.bf16 %v534_v48, %v534_v48 }
 0x227   : > { %v537_v53 = vpop.f32.mrb[6].mxu0  ;;  %v745_v54 = vpop.f32.mrb[6].mxu1 }
 0x228   : > { %v1119_v55 = vsel %vm1068_vm2, %v1065_v50, 0  ;;  %v2137_v56 = vpop.f32.mrb[7].mxu0  ;;  %v2169_v57 = vpop.f32.mrb[7].mxu1 }
 0x229   : > { %2225 = vmatpush3.bf16.xpose.msra.mxu1 %v1119_v55 }
 0x22a   : > { %2236 = vmatprep.subr.bf16.mxu1 %v2397_v9 }
 0x22d   : > { %v586_v58 = vpop.f32.mrb[8].mxu0  ;;  %v846_v59 = vpop.f32.mrb[8].mxu1 }
 0x22e   : > { %v1067_v61 = vpack.c.bf16 %v846_v59, %v846_v59  ;;  %v2144_v62 = vpop.f32.mrb[9].mxu0  ;;  %v2184_v63 = vpop.f32.mrb[9].mxu1  ;;  %v1062_v32 = vpack.c.bf16 %v586_v58, %v586_v58 }
 0x22f   : > { %v589_v1 = vpop.f32.mrb[10].mxu0  ;;  %v849_v2 = vpop.f32.mrb[10].mxu1 }
 0x230   : > { %v1211_v3 = vsel %vm1068_vm2, %v1067_v61, 0  ;;  %v2145_v4 = vpop.f32.mrb[11].mxu0  ;;  %v2185_v5 = vpop.f32.mrb[11].mxu1  ;;  %2227 = vmatmul.mubr.msk.bf16.vlgmr.msra.gmra.mrb[20].mxu1 %vm1068_vm2, %v1061_v60 }
 0x231   : > { %2237 = vmatpush3.bf16.xpose.msra.mxu1 %v1211_v3  ;;  %2238 = vmatprep.mubr.msk.bf16.mxu1 %vm2398_vm1, %v2397_v9 }
 0x232   : > { %2248 = vmatprep.subr.bf16.mxu1 %v2397_v9 }
 0x235   : > { %v690_v6 = vpop.f32.mrb[12].mxu0  ;;  %v950_v7 = vpop.f32.mrb[12].mxu1 }
 0x236   : > { %v1064_v10 = vpack.c.bf16 %v690_v6, %v690_v6  ;;  %v1306_v11 = vpack.c.bf16 %v950_v7, %v950_v7  ;;  %v2160_v12 = vpop.f32.mrb[13].mxu0  ;;  %v2200_v13 = vpop.f32.mrb[13].mxu1 }
 0x237   : > { %v693_v14 = vpop.f32.mrb[14].mxu0  ;;  %v953_v15 = vpop.f32.mrb[14].mxu1 }
 0x238   : > { %v1073_v16 = vsel %vm1068_vm2, %v1064_v10, 0  ;;  %v1360_v17 = vsel %vm1312_vm3, %v1306_v11, 0  ;;  %v2161_v18 = vpop.f32.mrb[15].mxu0  ;;  %v2201_v19 = vpop.f32.mrb[15].mxu1  ;;  %2239 = vmatmul.mubr.msk.bf16.vlgmr.msra.gmra.mrb[24].mxu1 %vm1068_vm2, %v1063_v8 }
 0x239   : > { %2219 = vmatpush3.bf16.xpose.msra.mxu0 %v1073_v16  ;;  %2249 = vmatpush3.bf16.msra.mxu1 %v1360_v17 }
 0x23a   : > { %2230 = vmatprep.subr.bf16.mxu0 %v2397_v9  ;;  %2250 = vmatprep.mubr.msk.bf16.mxu1 %vm2398_vm1, %v2397_v9 }
 0x23b   : > { %2260 = vmatprep.subr.bf16.mxu1 %v2397_v9 }
 0x23d   : > { %v794_v20 = vpop.f32.mrb[16].mxu0  ;;  %v2648_v21 = vpop.f32.mrb[16].mxu1 }
 0x23e   : > { %v1066_v23 = vpack.c.bf16 %v794_v20, %v794_v20  ;;  %v2176_v24 = vpop.f32.mrb[17].mxu0  ;;  %v2216_v25 = vpop.f32.mrb[17].mxu1 }
 0x23f   : > { %v797_v26 = vpop.f32.mrb[18].mxu0  ;;  %v1057_v27 = vpop.f32.mrb[18].mxu1 }
 0x240   : > { %v1165_v28 = vsel %vm1068_vm2, %v1066_v23, 0  ;;  %v2177_v29 = vpop.f32.mrb[19].mxu0  ;;  %v2217_v30 = vpop.f32.mrb[19].mxu1  ;;  %2221 = vmatmul.mubr.msk.bf16.vlgmr.msra.gmra.mrb[28].mxu0 %vm1068_vm2, %v1060_v22 }
 0x241   : > { %2231 = vmatpush3.bf16.xpose.msra.mxu0 %v1165_v28  ;;  %2232 = vmatprep.mubr.msk.bf16.mxu0 %vm2398_vm1, %v2397_v9 }
 0x242   : > { %2242 = vmatprep.subr.bf16.mxu0 %v2397_v9 }
 0x245   : > { %v898_v31 = vpop.f32.mrb[20].mxu0 }
 0x246   : > { %v1305_v33 = vpack.c.bf16 %v898_v31, %v898_v31  ;;  %v2192_v34 = vpop.f32.mrb[21].mxu0 }
 0x247   : > { %v901_v35 = vpop.f32.mrb[22].mxu0  ;;  %v1308_v34 = vpack.c.bf16 %v2648_v21, %v2648_v21  ;;  %v429_v21 = vld [vmem:[%s2797_s5] sm:$0xf] }
 0x248   : > { %v1314_v36 = vsel %vm1312_vm3, %v1305_v33, 0  ;;  %v2193_v37 = vpop.f32.mrb[23].mxu0  ;;  %2233 = vmatmul.mubr.msk.bf16.vlgmr.msra.gmra.mrb[32].mxu0 %vm1068_vm2, %v1062_v32 }
 0x249   : > { %2243 = vmatpush3.bf16.msra.mxu0 %v1314_v36  ;;  %2244 = vmatprep.mubr.msk.bf16.mxu0 %vm2398_vm1, %v2397_v9 }
 0x24a   : > { %2254 = vmatprep.subr.bf16.mxu0 %v2397_v9 }
 0x24d   : > { %v2662_v38 = vpop.f32.mrb[24].mxu0 }
 0x24e   : > { %v2208_v39 = vpop.f32.mrb[25].mxu0  ;;  %v1307_v30 = vpack.c.bf16 %v2662_v38, %v2662_v38 }
 0x24f   : > { %v1005_v40 = vpop.f32.mrb[26].mxu0 }
 0x250   : > { %v2209_v41 = vpop.f32.mrb[27].mxu0  ;;  %v1406_v35 = vsel %vm1312_vm3, %v1307_v30, 0  ;;  %v1452_v40 = vsel %vm1312_vm3, %v1308_v34, 0 }
 0x303   : > { %v1155_v42 = vpop.f32.mrb[20].mxu1 }
 0x304   : > { %v2228_v43 = vpop.f32.mrb[21].mxu1  ;;  %v1254_v54 = vmul.f32 0.35355338, %v1155_v42 }
 0x305   : > { %v1158_v44 = vpop.f32.mrb[22].mxu1 }
 0x306   : > { %v2229_v45 = vpop.f32.mrb[23].mxu1  ;;  %v1260_v58 = vsel %vm1068_vm2, %v1254_v54, -inf  ;;  %v1502_v44 = vsel %vm1312_vm3, %v429_v21, 0  ;;  %v2353_v21 = vld [vmem:[%s2799_s7] sm:$0xff]  }
 0x30b   : > { %v1247_v46 = vpop.f32.mrb[24].mxu1 }
 0x30c   : > { %v2240_v47 = vpop.f32.mrb[25].mxu1  ;;  %v1256_v57 = vmul.f32 0.35355338, %v1247_v46  ;;  %v430_v46 = vld [vmem:[%s2797_s5 + $0x4] sm:$0xf] }
 0x30d   : > { %v1250_v48 = vpop.f32.mrb[26].mxu1  ;;  %v1548_v47 = vsel %vm1312_vm3, %v430_v46, 0 }
 0x30e   : > { %v2241_v49 = vpop.f32.mrb[27].mxu1  ;;  %v1266_v1 = vsel %vm1068_vm2, %v1256_v57, -inf  ;;  %v431_v48 = vld [vmem:[%s2797_s5 + $0x8] sm:$0xf] }
 0x313   : > { %v1109_v50 = vpop.f32.mrb[28].mxu0 }
 0x314   : > { %v1253_v51 = vmul.f32 0.35355338, %v1109_v50  ;;  %v2222_v52 = vpop.f32.mrb[29].mxu0 }
 0x315   : > { %v1112_v53 = vpop.f32.mrb[30].mxu0  ;;  %v1594_v52 = vsel %vm1312_vm3, %v431_v48, 0 }
 0x316   : > { %v2223_v55 = vpop.f32.mrb[31].mxu0  ;;  %v1257_v56 = vsel %vm1068_vm2, %v1253_v51, -inf }
 0x317   : > { %1258 = vmax.xlane.f32.xlu1 %v1257_v56 }
 0x31b   : > { %1261 = vmax.xlane.f32.xlu1 %v1260_v58  ;;  %v1201_v59 = vpop.f32.mrb[32].mxu0 }
 0x31c   : > { %v1255_v60 = vmul.f32 0.35355338, %v1201_v59  ;;  %v2234_v61 = vpop.f32.mrb[33].mxu0 }
 0x31d   : > { %v1204_v62 = vpop.f32.mrb[34].mxu0 }
 0x31e   : > { %v2235_v63 = vpop.f32.mrb[35].mxu0  ;;  %v1263_v2 = vsel %vm1068_vm2, %v1255_v60, -inf }
 0x31f   : > { %1267 = vmax.xlane.f32.xlu1 %v1266_v1  ;;  %1264 = vmax.xlane.f32.xlu0 %v1263_v2 }
 0x3a4   : > { %v1259_v3 = vpop.xlane.xlu1 %1258 }
 0x3a5   : > { %v1269_v4 = vsub.f32 %v1253_v51, %v1259_v3 }
 0x3a7   : > { %v1273_v5 = vmul.f32 1.442695, %v1269_v4 }
 0x3a8   : > { %v1262_v6 = vpop.xlane.xlu1 %1261 }
 0x3a9   : > { %2365 = vpow2.f32 %v1273_v5  ;;  %v1270_v7 = vsub.f32 %v1254_v54, %v1262_v6  ;;  %v432_v54 = vld [vmem:[%s2797_s5 + $0xc] sm:$0xf] }
 0x3aa   : > { %v1640_v59 = vsel %vm1312_vm3, %v432_v54, 0  ;;  %v2360_v54 = vld [vmem:[%s2800_s8 + $0x28] sm:$0xff]  }
 0x3ab   : > { %v1275_v8 = vmul.f32 1.442695, %v1270_v7 }
 0x3ac   : > { %v1268_v10 = vpop.xlane.xlu1 %1267  ;;  %v1265_v11 = vpop.xlane.xlu0 %1264 }
 0x3ad   : > { %2367 = vpow2.f32 %v1275_v8  ;;  %v1272_v12 = vsub.f32 %v1256_v57, %v1268_v10  ;;  %v1271_v13 = vsub.f32 %v1255_v60, %v1265_v11 }
 0x3af   : > { %v1279_v14 = vmul.f32 1.442695, %v1272_v12  ;;  %v1277_v15 = vmul.f32 1.442695, %v1271_v13 }
 0x3b1   : > { %2369 = vpow2.f32 %v1279_v14 }
 0x3b2   : > { %2371 = vpow2.f32 %v1277_v15 }
 0x3b3   : > { %v2366_v16 = vpop.eup %2365 }
 0x3b4   : > { %v1281_v17 = vsel %vm1068_vm2, %v2366_v16, 0.0 }
 0x3b5   : > { %1282 = vadd.xlane.f32.xlu0 %v1281_v17 }
 0x3b7   : > { %v2368_v18 = vpop.eup %2367 }
 0x3b8   : > { %v1284_v19 = vsel %vm1068_vm2, %v2368_v18, 0.0 }
 0x3b9   : > { %1285 = vadd.xlane.f32.xlu1 %v1284_v19 }
 0x3bb   : > { %v2370_v20 = vpop.eup %2369 }
 0x3bc   : > { %v2372_v22 = vpop.eup %2371  ;;  %v1290_v23 = vsel %vm1068_vm2, %v2370_v20, 0.0 }
 0x3bd   : > { %1291 = vadd.xlane.f32.xlu1 %v1290_v23  ;;  %v1287_v24 = vsel %vm1068_vm2, %v2372_v22, 0.0 }
 0x3be   : > { %1288 = vadd.xlane.f32.xlu0 %v1287_v24 }
 0x442   : > { %v1283_v25 = vpop.xlane.xlu0 %1282 }
 0x443   : > { %2373 = vrcp.f32 %v1283_v25 }
 0x446   : > { %v1286_v26 = vpop.xlane.xlu1 %1285 }
 0x447   : > { %2375 = vrcp.f32 %v1286_v26 }
 0x44a   : > { %v1292_v27 = vpop.xlane.xlu1 %1291 }
 0x44b   : > { %2377 = vrcp.f32 %v1292_v27  ;;  %v1289_v28 = vpop.xlane.xlu0 %1288 }
 0x44c   : > { %2379 = vrcp.f32 %v1289_v28 }
 0x44d   : > { %v2374_v29 = vpop.eup %2373 }
 0x44e   : > { %v1297_v31 = vmul.f32 %v2374_v29, %v2366_v16 }
 0x450   : > { %v1301_v32 = vpack.c.bf16 %v1297_v31, %v1297_v31 }
 0x451   : > { %v2376_v33 = vpop.eup %2375 }
 0x452   : > { %v1298_v36 = vmul.f32 %v2376_v33, %v2368_v18  ;;  %2245 = vmatmul.mubr.msk.bf16.vlgmr.msra.gmra.mrb[36].mxu0 %vm1068_vm2, %v1301_v32 }
 0x453   : > { %2255 = vmatpush3.bf16.msra.mxu0 %v1406_v35  ;;  %2256 = vmatprep.mubr.msk.bf16.mxu0 %vm2398_vm1, %v2397_v9 }
 0x454   : > { %v1302_v37 = vpack.c.bf16 %v1298_v36, %v1298_v36  ;;  %2266 = vmatprep.subr.bf16.mxu0 %v2397_v9 }
 0x455   : > { %v2378_v39 = vpop.eup %2377 }
 0x456   : > { %v2380_v38 = vpop.eup %2379  ;;  %2251 = vmatmul.mubr.msk.bf16.vlgmr.msra.gmra.mrb[28].mxu1 %vm1068_vm2, %v1302_v37  ;;  %v1300_v42 = vmul.f32 %v2378_v39, %v2370_v20 }
 0x457   : > { %v1299_v41 = vmul.f32 %v2380_v38, %v2372_v22  ;;  %2261 = vmatpush3.bf16.msra.mxu1 %v1452_v40  ;;  %2262 = vmatprep.mubr.msk.bf16.mxu1 %vm2398_vm1, %v2397_v9 }
 0x458   : > { %2272 = vmatprep.subr.bf16.mxu1 %v2397_v9  ;;  %v1304_v45 = vpack.c.bf16 %v1300_v42, %v1300_v42 }
 0x459   : > { %v1303_v43 = vpack.c.bf16 %v1299_v41, %v1299_v41 }
 0x45b   : > { %2257 = vmatmul.mubr.msk.bf16.vlgmr.msra.gmra.mrb[40].mxu0 %vm1068_vm2, %v1303_v43 }
 0x45c   : > { %2267 = vmatpush3.bf16.msra.mxu0 %v1502_v44  ;;  %2268 = vmatprep.mubr.msk.bf16.mxu0 %vm2398_vm1, %v2397_v9 }
 0x45d   : > { %2278 = vmatprep.subr.bf16.mxu0 %v2397_v9 }
 0x45e   : > { %2263 = vmatmul.mubr.msk.bf16.vlgmr.msra.gmra.mrb[32].mxu1 %vm1068_vm2, %v1304_v45  ;;  %v2035_v45 = vld [vmem:[%s2798_s6] ss:$0 sm:$0xff] }
 0x45f   : > { %2274 = vmatprep.mubr.msk.bf16.mxu1 %vm2398_vm1, %v2397_v9  ;;  %2273 = vmatpush3.bf16.msra.mxu1 %v1548_v47 }
 0x460   : > { %2284 = vmatprep.subr.bf16.mxu1 %v2397_v9 }
 0x525   : > { %v1350_v49 = vpop.f32.mrb[36].mxu0 }
 0x526   : > { %v1494_v50 = vpack.c.bf16 %v1350_v49, %v1350_v49  ;;  %v2246_v51 = vpop.f32.mrb[37].mxu0  ;;  %v2355_v49 = vld [vmem:[%s2800_s8] sm:$0xff]  }
 0x527   : > { %v1353_v53 = vpop.f32.mrb[38].mxu0  ;;  %v2357_v51 = vld [vmem:[%s2800_s8 + $0x10] sm:$0xff]  }
 0x528   : > { %v2247_v55 = vpop.f32.mrb[39].mxu0  ;;  %2269 = vmatmul.mubr.msk.bf16.vlgmr.msra.gmra.mrb[44].mxu0 %vm1068_vm2, %v1494_v50  ;;  %v2356_v50 = vld [vmem:[%s2800_s8 + $0x8] sm:$0xff]   ;;  %v2359_v53 = vld [vmem:[%s2800_s8 + $0x20] sm:$0xff]  }
 0x529   : > { %v1396_v56 = vpop.f32.mrb[28].mxu1  ;;  %2279 = vmatpush3.bf16.msra.mxu0 %v1594_v52  ;;  %2280 = vmatprep.mubr.msk.bf16.mxu0 %vm2398_vm1, %v2397_v9  ;;  %v2358_v52 = vld [vmem:[%s2800_s8 + $0x18] sm:$0xff]   ;;  %v2361_v55 = vld [vmem:[%s2800_s8 + $0x30] sm:$0xff]  }
 0x52a   : > { %v1495_v57 = vpack.c.bf16 %v1396_v56, %v1396_v56  ;;  %v2252_v58 = vpop.f32.mrb[29].mxu1  ;;  %2290 = vmatprep.subr.bf16.mxu0 %v2397_v9  ;;  %v2362_v56 = vld [vmem:[%s2800_s8 + $0x38] sm:$0xff]  }
 0x52b   : > { %v1399_v60 = vpop.f32.mrb[30].mxu1 }
 0x52c   : > { %v2253_v61 = vpop.f32.mrb[31].mxu1  ;;  %2275 = vmatmul.mubr.msk.bf16.vlgmr.msra.gmra.mrb[36].mxu1 %vm1068_vm2, %v1495_v57 }
 0x52d   : > { %2285 = vmatpush3.bf16.msra.mxu1 %v1640_v59  ;;  %2286 = vmatprep.mubr.msk.bf16.mxu1 %vm2398_vm1, %v2397_v9 }
 0x52e   : > { %v1442_v62 = vpop.f32.mrb[40].mxu0  ;;  %2298 = vmatprep.subr.bf16.mxu1 %v2397_v9 }
 0x52f   : > { %v1496_v63 = vpack.c.bf16 %v1442_v62, %v1442_v62  ;;  %v2258_v1 = vpop.f32.mrb[41].mxu0 }
 0x530   : > { %v1445_v2 = vpop.f32.mrb[42].mxu0 }
 0x531   : > { %v2259_v3 = vpop.f32.mrb[43].mxu0  ;;  %2281 = vmatmul.mubr.msk.bf16.vlgmr.msra.gmra.mrb[48].mxu0 %vm1068_vm2, %v1496_v63  ;;  %v1488_v4 = vpop.f32.mrb[32].mxu1 }
 0x532   : > { %v1497_v5 = vpack.c.bf16 %v1488_v4, %v1488_v4  ;;  %v2264_v6 = vpop.f32.mrb[33].mxu1  ;;  %2294 = vmatprep.mubr.msk.bf16.mxu0 %vm2398_vm1, %v2397_v9  ;;  %2291 = vmatpush3.bf16.msra.mxu0 %v2353_v21 }
 0x533   : > { %v1491_v7 = vpop.f32.mrb[34].mxu1  ;;  %2292 = vmatprep.subr.bf16.mxu0 %v2397_v9 }
 0x534   : > { %v2265_v8 = vpop.f32.mrb[35].mxu1  ;;  %2287 = vmatmul.mubr.msk.bf16.vlgmr.msra.gmra.mrb[40].mxu1 %vm1068_vm2, %v1497_v5 }
 0x535   : > { %2314 = vmatprep.mubr.msk.bf16.mxu1 %vm2398_vm1, %v2397_v9  ;;  %2299 = vmatpush3.bf16.msra.mxu1 %v2355_v49 }
 0x536   : > { %2300 = vmatprep.subr.bf16.mxu1 %v2397_v9 }
 0x539   : > { %2301 = vmatpush3.bf16.msra.mxu1 %v2356_v50 }
 0x53a   : > { %2302 = vmatprep.subr.bf16.mxu1 %v2397_v9 }
 0x53d   : > { %2303 = vmatpush3.bf16.msra.mxu1 %v2357_v51 }
 0x53e   : > { %2304 = vmatprep.subr.bf16.mxu1 %v2397_v9 }
 0x541   : > { %2305 = vmatpush3.bf16.msra.mxu1 %v2358_v52 }
 0x542   : > { %2306 = vmatprep.subr.bf16.mxu1 %v2397_v9 }
 0x545   : > { %2307 = vmatpush3.bf16.msra.mxu1 %v2359_v53 }
 0x546   : > { %2308 = vmatprep.subr.bf16.mxu1 %v2397_v9 }
 0x549   : > { %2309 = vmatpush3.bf16.msra.mxu1 %v2360_v54 }
 0x54a   : > { %2310 = vmatprep.subr.bf16.mxu1 %v2397_v9 }
 0x54d   : > { %2311 = vmatpush3.bf16.msra.mxu1 %v2361_v55 }
 0x54e   : > { %2312 = vmatprep.subr.bf16.mxu1 %v2397_v9 }
 0x551   : > { %2313 = vmatpush3.bf16.msra.mxu1 %v2362_v56 }
 0x5fb   : > { %v1538_v10 = vpop.f32.mrb[44].mxu0 }
 0x5fc   : > { %v2270_v11 = vpop.f32.mrb[45].mxu0  ;;  %v1682_v15 = vsel %vm358_vm0, %v1538_v10, 0.0 }
 0x5fd   : > { %v1541_v12 = vpop.f32.mrb[46].mxu0 }
 0x5fe   : > { %v2271_v13 = vpop.f32.mrb[47].mxu0 }
 0x5ff   : > { %v1584_v14 = vpop.f32.mrb[36].mxu1 }
 0x600   : > { %v1683_v16 = vsel %vm358_vm0, %v1584_v14, 0.0  ;;  %v2276_v17 = vpop.f32.mrb[37].mxu1 }
 0x601   : > { %v1684_v18 = vadd.f32 %v1683_v16, %v1682_v15  ;;  %v1587_v19 = vpop.f32.mrb[38].mxu1 }
 0x602   : > { %v2277_v20 = vpop.f32.mrb[39].mxu1 }
 0x604   : > { %v1630_v22 = vpop.f32.mrb[48].mxu0 }
 0x605   : > { %v1685_v23 = vsel %vm358_vm0, %v1630_v22, 0.0  ;;  %v2282_v24 = vpop.f32.mrb[49].mxu0 }
 0x606   : > { %v1686_v25 = vadd.f32 %v1685_v23, %v1684_v18  ;;  %v1633_v26 = vpop.f32.mrb[50].mxu0  ;;  %v2399_v18 = vmov -1.0  }
 0x607   : > { %v2283_v27 = vpop.f32.mrb[51].mxu0  ;;  %v1676_v28 = vpop.f32.mrb[40].mxu1 }
 0x608   : > { %v1687_v29 = vsel %vm358_vm0, %v1676_v28, 0.0  ;;  %v2288_v30 = vpop.f32.mrb[41].mxu1 }
 0x609   : > { %v1688_v31 = vadd.f32 %v1687_v29, %v1686_v25  ;;  %v1679_v32 = vpop.f32.mrb[42].mxu1 }
 0x60a   : > { %v2289_v33 = vpop.f32.mrb[43].mxu1 }
 0x60b   : > { %v2729_v34 = vadd.f32 %v1688_v31, %v2471_v0  ;;  %v2354_v0 = vld [vmem:[%s2799_s7 + $0x8] sm:$0xff]  }
 0x60c   : > { %2293 = vmatpush3.bf16.msra.mxu0 %v2354_v0 }
 0x60d   : > { %v1691_v35 = vsel %vm358_vm0, %v2729_v34, 0.0 }
 0x60e   : > { %1692 = vadd.xlane.f32.xlu0 %v1691_v35 }
 0x69b   : > { %v1693_v36 = vpop.xlane.xlu0 %1692 }
 0x69c   : > { %v1694_v37 = vmul.f32 0.03125, %v1693_v36 }
 0x69e   : > { %v1695_v39 = vsub.f32 %v2729_v34, %v1694_v37 }
 0x6a0   : > { %v1696_v38 = vmul.f32 %v1695_v39, %v1695_v39 }
 0x6a2   : > { %v1697_v40 = vsel %vm358_vm0, %v1696_v38, 0.0 }
 0x6a3   : > { %1698 = vadd.xlane.f32.xlu1 %v1697_v40 }
 0x730   : > { %v1699_v41 = vpop.xlane.xlu1 %1698 }
 0x731   : > { %v1700_v42 = vmul.f32 0.03125, %v1699_v41 }
 0x733   : > { %v1701_v43 = vadd.f32 1e-05, %v1700_v42 }
 0x735   : > { %2381 = vrsqrt.f32 %v1701_v43 }
 0x73f   : > { %v2382_v44 = vpop.eup %2381 }
 0x740   : > { %v1703_v46 = vmul.f32 %v2382_v44, %v1695_v39 }
 0x742   : > { %v1710_v47 = vmul.f32 %v2035_v45, %v1703_v46 }
 0x744   : > { %v1711_v48 = vpack.c.bf16 %v1710_v47, %v1710_v47 }
 0x746   : > { %2295 = vmatmul.mubr.msk.bf16.vlgmr.msra.gmra.mrb[52].mxu0 %vm358_vm0, %v1711_v48 }
 0x819   : > { %v1765_v57 = vpop.f32.mrb[52].mxu0 }
 0x81a   : > { %v1772_v58 = vmul.f32 0.70710677, %v1765_v57  ;;  %v2296_v59 = vpop.f32.mrb[53].mxu0  ;;  %v1771_v22 = vmul.f32 0.5, %v1765_v57 }
 0x81b   : > { %v1768_v60 = vpop.f32.mrb[54].mxu0 }
 0x81c   : > { %v1775_v61 = vand.u32 2147483647, %v1772_v58  ;;  %v2297_v62 = vpop.f32.mrb[55].mxu0  ;;  %vm1773_vm4 = vcmp.ge.f32.partialorder %v1772_v58, 0.0 }
 0x81d   : > { %v1774_v19 = vsel %vm1773_vm4, 1.0, %v2399_v18 }
 0x81e   : > { %v1776_v63 = vmul.f32 0.3275911, %v1775_v61  ;;  %v1789_v2 = vsub.f32 0.0, %v1775_v61 }
 0x820   : > { %v1777_v1 = vadd.f32 1.0, %v1776_v63  ;;  %v1790_v4 = vmul.f32 %v1789_v2, %v1775_v61 }
 0x822   : > { %2383 = vrcp.f32 %v1777_v1  ;;  %v1791_v9 = vmul.f32 1.442695, %v1790_v4 }
 0x824   : > { %2385 = vpow2.f32 %v1791_v9 }
 0x82c   : > { %v2384_v3 = vpop.eup %2383 }
 0x82d   : > { %v1780_v5 = vmul.f32 1.0614054, %v2384_v3 }
 0x82e   : > { %v2386_v15 = vpop.eup %2385 }
 0x82f   : > { %v1781_v6 = vadd.f32 -1.4531521, %v1780_v5 }
 0x831   : > { %v1782_v7 = vmul.f32 %v2384_v3, %v1781_v6 }
 0x833   : > { %v1783_v8 = vadd.f32 1.4214138, %v1782_v7 }
 0x835   : > { %v1784_v10 = vmul.f32 %v2384_v3, %v1783_v8 }
 0x837   : > { %v1785_v11 = vadd.f32 -0.28449672, %v1784_v10 }
 0x839   : > { %v1786_v12 = vmul.f32 %v2384_v3, %v1785_v11 }
 0x83b   : > { %v1787_v13 = vadd.f32 0.2548296, %v1786_v12 }
 0x83d   : > { %v1788_v14 = vmul.f32 %v2384_v3, %v1787_v13 }
 0x83f   : > { %v1793_v16 = vmul.f32 %v2386_v15, %v1788_v14 }
 0x841   : > { %v1794_v17 = vsub.f32 1.0, %v1793_v16 }
 0x843   : > { %v1795_v20 = vmul.f32 %v1794_v17, %v1774_v19 }
 0x845   : > { %v1796_v23 = vadd.f32 1.0, %v1795_v20 }
 0x847   : > { %v1797_v24 = vmul.f32 %v1796_v23, %v1771_v22 }
 0x849   : > { %v1798_v25 = vpack.c.bf16 %v1797_v24, %v1797_v24 }
 0x84b   : > { %2315 = vmatmul.mubr.bf16.vlgmr.msra.gmra.mrb[44].mxu1 %v1798_v25 }
 0x91e   : > { %v1897_v26 = vpop.f32.mrb[44].mxu1 }
 0x91f   : > { %v1903_v27 = vadd.f32 %v1897_v26, %v2729_v34  ;;  %v2316_v28 = vpop.f32.mrb[45].mxu1  ;;  %v2047_v34 = vld [vmem:[%s2801_s9] ss:$0 sm:$0xff] }
 0x920   : > { %v1900_v29 = vpop.f32.mrb[46].mxu1 }
 0x921   : > { %v2317_v30 = vpop.f32.mrb[47].mxu1  ;;  %v1905_v31 = vsel %vm358_vm0, %v1903_v27, 0.0 }
 0x922   : > { %1906 = vadd.xlane.f32.xlu0 %v1905_v31 }
 0x9af   : > { %v1907_v32 = vpop.xlane.xlu0 %1906 }
 0x9b0   : > { %v1908_v33 = vmul.f32 0.03125, %v1907_v32 }
 0x9b2   : > { %v1909_v35 = vsub.f32 %v1903_v27, %v1908_v33 }
 0x9b4   : > { %v1910_v36 = vmul.f32 %v1909_v35, %v1909_v35 }
 0x9b6   : > { %v1911_v37 = vsel %vm358_vm0, %v1910_v36, 0.0 }
 0x9b7   : > { %1912 = vadd.xlane.f32.xlu1 %v1911_v37 }
 0xa44   : > { %v1913_v39 = vpop.xlane.xlu1 %1912 }
 0xa45   : > { %v1914_v38 = vmul.f32 0.03125, %v1913_v39 }
 0xa47   : > { %v1915_v40 = vadd.f32 1e-05, %v1914_v38 }
 0xa49   : > { %2387 = vrsqrt.f32 %v1915_v40 }
 0xa53   : > { %v2388_v21 = vpop.eup %2387 }
 0xa54   : > { %v1917_v0 = vmul.f32 %v2388_v21, %v1909_v35 }
 0xa56   : > { %v1924_v41 = vmul.f32 %v2047_v34, %v1917_v0 }
 0xa58   : > { %1925 = vst.msk [vmem:[%s354_s18] sm:$0xff] %vm358_vm0, %v1924_v41 }
 0xa59 PF: > { %s20_s13 = sadd.s32 1, %s2395_s13  }
 0xa5a   : > { %p17_p4 = scmp.ge.s32.totalorder %s20_s13, 4  }
 0xa5c   :  { %19 = sbr.rel (!%p17_p4) target bundleno = 1 (0x1), region = 90 }

// kernel: _lambda_.4
= control target key start
LH: loop header
LB: loop body
LE: loop exit
PB: predicated region body
PF: predicated region fallthrough
CT: control target
= control target key end

     0   :  { %s2431_s13 = smov 0   ;;  %s2763_s0 = inlined_call_operand.vmem [shape: f32[2,8,32], index: 0, kind: input, shape index: {}]   ;;  %s2764_s1 = inlined_call_operand.vmem [shape: f32[1,32], index: 1, kind: input, shape index: {}]   ;;  %s2765_s2 = inlined_call_operand.vmem [shape: bf16[4,32,8], index: 2, kind: input, shape index: {}]   ;;  %s2766_s3 = inlined_call_operand.vmem [shape: bf16[4,32,8], index: 3, kind: input, shape index: {}]   ;;  %s2767_s4 = inlined_call_operand.vmem [shape: bf16[4,32,8], index: 4, kind: input, shape index: {}]   ;;  %s2768_s5 = inlined_call_operand.vmem [shape: bf16[4,8,32], index: 5, kind: input, shape index: {}]   ;;  %s2769_s6 = inlined_call_operand.vmem [shape: f32[1,32], index: 6, kind: input, shape index: {}]   ;;  %s2770_s7 = inlined_call_operand.vmem [shape: bf16[32,128], index: 7, kind: input, shape index: {}]   ;;  %s2771_s8 = inlined_call_operand.vmem [shape: bf16[128,32], index: 8, kind: input, shape index: {}]   ;;  %s2772_s9 = inlined_call_operand.vmem [shape: f32[1,32], index: 9, kind: input, shape index: {}]   ;;  %s2773_s10 = inlined_call_operand.vmem [shape: f32[2,8,32], index: 10, kind: output, shape index: {}]  }
   0x1 LB: > { %s1958_s14 = sadd.s32 4294967295, %s2371_s13   ;;  %p1962_p0 = scmp.ge.s32.totalorder %s2371_s13, 1  ;;  %s2371_s13 = sphi %s2431_s13, %s20_s13  }
   0x2   : > { %p311_p1 = scmp.lt.s32.totalorder %s2371_s13, 3 }
   0x4   : > { %p312_p2 = pnand %p1962_p0, %p311_p1 }
   0x5   : > { %p347_p3 = scmp.lt.s32.totalorder (!%p312_p2), %s1958_s14, 1  ;;  %vm358_vm0 = vcmask (!%p312_p2), 261120   ;;  %v2307_v7 = vld [vmem:[%s2765_s2] sm:$0xff] (!%p312_p2)   ;;  %v2308_v8 = vld [vmem:[%s2765_s2 + $0x30] sm:$0xff] (!%p312_p2)   ;;  %v2373_v9 = vmov (!%p312_p2), 0.0   ;;  %v2309_v10 = vld [vmem:[%s2765_s2 + $0x8] sm:$0xff] (!%p312_p2)  }
   0x6   : > { %315 = sbr.rel (%p312_p2) target bundleno = 2338 (0x922), region = 60  ;;  %2100 = vmatprep.subr.bf16.mxu0 (!%p312_p2), %v2373_v9  ;;  %2124 = vmatprep.subr.bf16.mxu1 (!%p312_p2), %v2373_v9  ;;  %v2310_v11 = vld [vmem:[%s2765_s2 + $0x38] sm:$0xff] (!%p312_p2)   ;;  %vm2374_vm1 = vmmov (!%p312_p2), 0   ;;  %v1965_v16 = vld [vmem:[%s2764_s1] ss:$0 sm:$0xff] (!%p312_p2)  ;;  %v2311_v19 = vld [vmem:[%s2765_s2 + $0x10] sm:$0xff] (!%p312_p2)  }
   0x7   : > { %2101 = vmatpush3.bf16.msra.mxu0 (!%p312_p2), %v2307_v7  ;;  %2125 = vmatpush3.bf16.msra.mxu1 (!%p312_p2), %v2308_v8  ;;  %v2312_v20 = vld [vmem:[%s2766_s3 + $0x10] sm:$0xff] (!%p312_p2)   ;;  %v2313_v22 = vld [vmem:[%s2765_s2 + $0x18] sm:$0xff] (!%p312_p2)   ;;  %v2315_v24 = vld [vmem:[%s2765_s2 + $0x20] sm:$0xff] (!%p312_p2)   ;;  %vm1068_vm2 = vcmask (!%p312_p2), 64512   ;;  %vm1312_vm3 = vcmask (!%p312_p2), 1043456  }
   0x8   : > { %2102 = vmatprep.subr.bf16.mxu0 (!%p312_p2), %v2373_v9  ;;  %2126 = vmatprep.subr.bf16.mxu1 (!%p312_p2), %v2373_v9  ;;  %v2314_v23 = vld [vmem:[%s2766_s3 + $0x18] sm:$0xff] (!%p312_p2)   ;;  %v2316_v25 = vld [vmem:[%s2766_s3 + $0x30] sm:$0xff] (!%p312_p2)   ;;  %v2317_v26 = vld [vmem:[%s2765_s2 + $0x28] sm:$0xff] (!%p312_p2)  }
   0x9   : > { %2104 = vmatprep.mubr.msk.bf16.mxu0 (!%p312_p2), %vm2374_vm1, %v2373_v9  ;;  %2128 = vmatprep.mubr.msk.bf16.mxu1 (!%p312_p2), %vm2374_vm1, %v2373_v9  ;;  %v2318_v27 = vld [vmem:[%s2766_s3 + $0x38] sm:$0xff] (!%p312_p2)   ;;  %v2319_v28 = vld [vmem:[%s2766_s3] sm:$0xff] (!%p312_p2)   ;;  %v2320_v29 = vld [vmem:[%s2767_s4 + $0x10] sm:$0xff] (!%p312_p2)  }
   0xa   : > { %v2321_v30 = vld [vmem:[%s2766_s3 + $0x8] sm:$0xff] (!%p312_p2)   ;;  %v2322_v31 = vld [vmem:[%s2767_s4 + $0x18] sm:$0xff] (!%p312_p2)   ;;  %v2323_v32 = vld [vmem:[%s2766_s3 + $0x20] sm:$0xff] (!%p312_p2)  }
   0xb   : > { %2103 = vmatpush3.bf16.msra.mxu0 (!%p312_p2), %v2309_v10  ;;  %2127 = vmatpush3.bf16.msra.mxu1 (!%p312_p2), %v2310_v11  ;;  %v2324_v33 = vld [vmem:[%s2767_s4 + $0x30] sm:$0xff] (!%p312_p2)   ;;  %v2325_v34 = vld [vmem:[%s2766_s3 + $0x28] sm:$0xff] (!%p312_p2)   ;;  %v2326_v35 = vld [vmem:[%s2767_s4 + $0x38] sm:$0xff] (!%p312_p2)  }
   0xc   : > { %2108 = vmatprep.subr.bf16.mxu0 (!%p312_p2), %v2373_v9  ;;  %2140 = vmatprep.subr.bf16.mxu1 (!%p312_p2), %v2373_v9  ;;  %v2327_v36 = vld [vmem:[%s2767_s4] sm:$0xff] (!%p312_p2)   ;;  %v2328_v37 = vld [vmem:[%s2767_s4 + $0x8] sm:$0xff] (!%p312_p2)  }
   0xd   : > { %s2775_s14 = smov (!%p347_p3, %s1958_s14), 1  ;;  %v2329_v38 = vld [vmem:[%s2767_s4 + $0x20] sm:$0xff]   ;;  %v2330_v39 = vld [vmem:[%s2767_s4 + $0x28] sm:$0xff]  }
   0xe   : > { %s1963_s9 = sshll.u32 %s2775_s14, 3 }
   0xf   : > { %s350_s17 = scalar_lea.vmem %s2763_s0, %s1963_s9  ;;  %s354_s28 = scalar_lea.vmem %s2773_s10, %s1963_s9 }
  0x10   : > { %v2447_v0 = vld [vmem:[%s350_s17] sm:$0xff] }
  0x11   : > { %v359_v1 = vsel %vm358_vm0, %v2447_v0, 0.0 }
  0x12   : > { %360 = vadd.xlane.f32.xlu0 %v359_v1 }
  0x9f   : > { %v361_v2 = vpop.xlane.xlu0 %360 }
  0xa0   : > { %v363_v3 = vmul.f32 0.03125, %v361_v2 }
  0xa2   : > { %v364_v4 = vsub.f32 %v2447_v0, %v363_v3 }
  0xa4   : > { %v365_v5 = vmul.f32 %v364_v4, %v364_v4 }
  0xa6   : > { %v366_v6 = vsel %vm358_vm0, %v365_v5, 0.0 }
  0xa7   : > { %367 = vadd.xlane.f32.xlu0 %v366_v6 }
 0x134   : > { %v368_v12 = vpop.xlane.xlu0 %367 }
 0x135   : > { %v369_v13 = vmul.f32 0.03125, %v368_v12 }
 0x137   : > { %v370_v14 = vadd.f32 1e-05, %v369_v13 }
 0x139   : > { %2341 = vrsqrt.f32 %v370_v14 }
 0x143   : > { %v2342_v15 = vpop.eup %2341 }
 0x144   : > { %v372_v17 = vmul.f32 %v2342_v15, %v364_v4 }
 0x146   : > { %v379_v18 = vmul.f32 %v1965_v16, %v372_v17 }
 0x148   : > { %v2484_v21 = vpack.c.bf16 %v379_v18, %v379_v18 }
 0x14a   : > { %2105 = vmatmul.mubr.msk.bf16.vlgmr.msra.gmra.mrb[0].mxu0 %vm358_vm0, %v2484_v21  ;;  %2129 = vmatmul.mubr.msk.bf16.vlgmr.msra.gmra.mrb[0].mxu1 %vm358_vm0, %v2484_v21 }
 0x14b   : > { %2109 = vmatpush3.bf16.msra.mxu0 %v2311_v19  ;;  %2141 = vmatpush3.bf16.msra.mxu1 %v2312_v20 }
 0x14c   : > { %2110 = vmatprep.subr.bf16.mxu0 %v2373_v9  ;;  %2142 = vmatprep.subr.bf16.mxu1 %v2373_v9 }
 0x14d   : > { %2112 = vmatprep.mubr.msk.bf16.mxu0 %vm2374_vm1, %v2373_v9  ;;  %2144 = vmatprep.mubr.msk.bf16.mxu1 %vm2374_vm1, %v2373_v9 }
 0x14f   : > { %2111 = vmatpush3.bf16.msra.mxu0 %v2313_v22  ;;  %2143 = vmatpush3.bf16.msra.mxu1 %v2314_v23 }
 0x150   : > { %2116 = vmatprep.subr.bf16.mxu0 %v2373_v9  ;;  %2156 = vmatprep.subr.bf16.mxu1 %v2373_v9 }
 0x152   : > { %2113 = vmatmul.mubr.msk.bf16.vlgmr.msra.gmra.mrb[4].mxu0 %vm358_vm0, %v2484_v21  ;;  %2145 = vmatmul.mubr.msk.bf16.vlgmr.msra.gmra.mrb[4].mxu1 %vm358_vm0, %v2484_v21 }
 0x153   : > { %2117 = vmatpush3.bf16.msra.mxu0 %v2315_v24  ;;  %2157 = vmatpush3.bf16.msra.mxu1 %v2316_v25 }
 0x154   : > { %2118 = vmatprep.subr.bf16.mxu0 %v2373_v9  ;;  %2158 = vmatprep.subr.bf16.mxu1 %v2373_v9 }
 0x155   : > { %2120 = vmatprep.mubr.msk.bf16.mxu0 %vm2374_vm1, %v2373_v9  ;;  %2160 = vmatprep.mubr.msk.bf16.mxu1 %vm2374_vm1, %v2373_v9 }
 0x157   : > { %2119 = vmatpush3.bf16.msra.mxu0 %v2317_v26  ;;  %2159 = vmatpush3.bf16.msra.mxu1 %v2318_v27 }
 0x158   : > { %2132 = vmatprep.subr.bf16.mxu0 %v2373_v9  ;;  %2172 = vmatprep.subr.bf16.mxu1 %v2373_v9 }
 0x15a   : > { %2121 = vmatmul.mubr.msk.bf16.vlgmr.msra.gmra.mrb[8].mxu0 %vm358_vm0, %v2484_v21  ;;  %2161 = vmatmul.mubr.msk.bf16.vlgmr.msra.gmra.mrb[8].mxu1 %vm358_vm0, %v2484_v21 }
 0x15b   : > { %2133 = vmatpush3.bf16.msra.mxu0 %v2319_v28  ;;  %2173 = vmatpush3.bf16.msra.mxu1 %v2320_v29 }
 0x15c   : > { %2134 = vmatprep.subr.bf16.mxu0 %v2373_v9  ;;  %2174 = vmatprep.subr.bf16.mxu1 %v2373_v9 }
 0x15d   : > { %2136 = vmatprep.mubr.msk.bf16.mxu0 %vm2374_vm1, %v2373_v9  ;;  %2176 = vmatprep.mubr.msk.bf16.mxu1 %vm2374_vm1, %v2373_v9 }
 0x15f   : > { %2135 = vmatpush3.bf16.msra.mxu0 %v2321_v30  ;;  %2175 = vmatpush3.bf16.msra.mxu1 %v2322_v31 }
 0x160   : > { %2148 = vmatprep.subr.bf16.mxu0 %v2373_v9  ;;  %2188 = vmatprep.subr.bf16.mxu1 %v2373_v9 }
 0x162   : > { %2137 = vmatmul.mubr.msk.bf16.vlgmr.msra.gmra.mrb[12].mxu0 %vm358_vm0, %v2484_v21  ;;  %2177 = vmatmul.mubr.msk.bf16.vlgmr.msra.gmra.mrb[12].mxu1 %vm358_vm0, %v2484_v21 }
 0x163   : > { %2149 = vmatpush3.bf16.msra.mxu0 %v2323_v32  ;;  %2189 = vmatpush3.bf16.msra.mxu1 %v2324_v33 }
 0x164   : > { %2150 = vmatprep.subr.bf16.mxu0 %v2373_v9  ;;  %2190 = vmatprep.subr.bf16.mxu1 %v2373_v9 }
 0x165   : > { %2152 = vmatprep.mubr.msk.bf16.mxu0 %vm2374_vm1, %v2373_v9  ;;  %2192 = vmatprep.mubr.msk.bf16.mxu1 %vm2374_vm1, %v2373_v9 }
 0x167   : > { %2151 = vmatpush3.bf16.msra.mxu0 %v2325_v34  ;;  %2191 = vmatpush3.bf16.msra.mxu1 %v2326_v35 }
 0x168   : > { %2164 = vmatprep.subr.bf16.mxu0 %v2373_v9  ;;  %2202 = vmatprep.subr.bf16.mxu1 %v2373_v9 }
 0x16a   : > { %2153 = vmatmul.mubr.msk.bf16.vlgmr.msra.gmra.mrb[16].mxu0 %vm358_vm0, %v2484_v21  ;;  %2193 = vmatmul.mubr.msk.bf16.vlgmr.msra.gmra.mrb[16].mxu1 %vm358_vm0, %v2484_v21 }
 0x16b   : > { %2165 = vmatpush3.bf16.msra.mxu0 %v2327_v36  ;;  %2168 = vmatprep.mubr.msk.bf16.mxu0 %vm2374_vm1, %v2373_v9 }
 0x16c   : > { %2166 = vmatprep.subr.bf16.mxu0 %v2373_v9  ;;  %2204 = vmatprep.mubr.msk.bf16.mxu1 %vm2374_vm1, %v2373_v9 }
 0x16f   : > { %2167 = vmatpush3.bf16.msra.mxu0 %v2328_v37 }
 0x170   : > { %2180 = vmatprep.subr.bf16.mxu0 %v2373_v9 }
 0x172   : > { %2169 = vmatmul.mubr.msk.bf16.vlgmr.msra.gmra.mrb[20].mxu0 %vm358_vm0, %v2484_v21 }
 0x173   : > { %2181 = vmatpush3.bf16.msra.mxu0 %v2329_v38  ;;  %2184 = vmatprep.mubr.msk.bf16.mxu0 %vm2374_vm1, %v2373_v9 }
 0x174   : > { %2182 = vmatprep.subr.bf16.mxu0 %v2373_v9 }
 0x177   : > { %2183 = vmatpush3.bf16.msra.mxu0 %v2330_v39 }
 0x178   : > { %2196 = vmatprep.subr.bf16.mxu0 %v2373_v9 }
 0x17a   : > { %2185 = vmatmul.mubr.msk.bf16.vlgmr.msra.gmra.mrb[24].mxu0 %vm358_vm0, %v2484_v21 }
 0x17b   : > { %2198 = vmatprep.mubr.msk.bf16.mxu0 %vm2374_vm1, %v2373_v9 }
 0x21d   : > { %v2608_v40 = vpop.f32.mrb[0].mxu0  ;;  %v638_v41 = vpop.f32.mrb[0].mxu1 }
 0x21e   : > { %v2106_v42 = vpop.f32.mrb[1].mxu0  ;;  %v2130_v43 = vpop.f32.mrb[1].mxu1  ;;  %v1063_v8 = vpack.c.bf16 %v638_v41, %v638_v41  ;;  %v1060_v22 = vpack.c.bf16 %v2608_v40, %v2608_v40 }
 0x21f   : > { %v485_v44 = vpop.f32.mrb[2].mxu0  ;;  %v641_v45 = vpop.f32.mrb[2].mxu1 }
 0x220   : > { %v2107_v46 = vpop.f32.mrb[3].mxu0  ;;  %v2131_v47 = vpop.f32.mrb[3].mxu1 }
 0x225   : > { %v534_v48 = vpop.f32.mrb[4].mxu0  ;;  %v742_v49 = vpop.f32.mrb[4].mxu1 }
 0x226   : > { %v1065_v50 = vpack.c.bf16 %v742_v49, %v742_v49  ;;  %v2114_v51 = vpop.f32.mrb[5].mxu0  ;;  %v2146_v52 = vpop.f32.mrb[5].mxu1  ;;  %v1061_v60 = vpack.c.bf16 %v534_v48, %v534_v48 }
 0x227   : > { %v537_v53 = vpop.f32.mrb[6].mxu0  ;;  %v745_v54 = vpop.f32.mrb[6].mxu1 }
 0x228   : > { %v1119_v55 = vsel %vm1068_vm2, %v1065_v50, 0  ;;  %v2115_v56 = vpop.f32.mrb[7].mxu0  ;;  %v2147_v57 = vpop.f32.mrb[7].mxu1 }
 0x229   : > { %2203 = vmatpush3.bf16.xpose.msra.mxu1 %v1119_v55 }
 0x22a   : > { %2214 = vmatprep.subr.bf16.mxu1 %v2373_v9 }
 0x22d   : > { %v586_v58 = vpop.f32.mrb[8].mxu0  ;;  %v846_v59 = vpop.f32.mrb[8].mxu1 }
 0x22e   : > { %v1067_v61 = vpack.c.bf16 %v846_v59, %v846_v59  ;;  %v2122_v62 = vpop.f32.mrb[9].mxu0  ;;  %v2162_v63 = vpop.f32.mrb[9].mxu1  ;;  %v1062_v32 = vpack.c.bf16 %v586_v58, %v586_v58 }
 0x22f   : > { %v589_v1 = vpop.f32.mrb[10].mxu0  ;;  %v849_v2 = vpop.f32.mrb[10].mxu1 }
 0x230   : > { %v1211_v3 = vsel %vm1068_vm2, %v1067_v61, 0  ;;  %v2123_v4 = vpop.f32.mrb[11].mxu0  ;;  %v2163_v5 = vpop.f32.mrb[11].mxu1  ;;  %2205 = vmatmul.mubr.msk.bf16.vlgmr.msra.gmra.mrb[20].mxu1 %vm1068_vm2, %v1061_v60 }
 0x231   : > { %2215 = vmatpush3.bf16.xpose.msra.mxu1 %v1211_v3  ;;  %2216 = vmatprep.mubr.msk.bf16.mxu1 %vm2374_vm1, %v2373_v9 }
 0x232   : > { %2226 = vmatprep.subr.bf16.mxu1 %v2373_v9 }
 0x235   : > { %v690_v6 = vpop.f32.mrb[12].mxu0  ;;  %v950_v7 = vpop.f32.mrb[12].mxu1 }
 0x236   : > { %v1064_v10 = vpack.c.bf16 %v690_v6, %v690_v6  ;;  %v1306_v11 = vpack.c.bf16 %v950_v7, %v950_v7  ;;  %v2138_v12 = vpop.f32.mrb[13].mxu0  ;;  %v2178_v13 = vpop.f32.mrb[13].mxu1 }
 0x237   : > { %v693_v14 = vpop.f32.mrb[14].mxu0  ;;  %v953_v15 = vpop.f32.mrb[14].mxu1 }
 0x238   : > { %v1073_v16 = vsel %vm1068_vm2, %v1064_v10, 0  ;;  %v1360_v17 = vsel %vm1312_vm3, %v1306_v11, 0  ;;  %v2139_v18 = vpop.f32.mrb[15].mxu0  ;;  %v2179_v19 = vpop.f32.mrb[15].mxu1  ;;  %2217 = vmatmul.mubr.msk.bf16.vlgmr.msra.gmra.mrb[24].mxu1 %vm1068_vm2, %v1063_v8 }
 0x239   : > { %2197 = vmatpush3.bf16.xpose.msra.mxu0 %v1073_v16  ;;  %2227 = vmatpush3.bf16.msra.mxu1 %v1360_v17 }
 0x23a   : > { %2208 = vmatprep.subr.bf16.mxu0 %v2373_v9  ;;  %2228 = vmatprep.mubr.msk.bf16.mxu1 %vm2374_vm1, %v2373_v9 }
 0x23b   : > { %2238 = vmatprep.subr.bf16.mxu1 %v2373_v9 }
 0x23d   : > { %v794_v20 = vpop.f32.mrb[16].mxu0  ;;  %v2624_v21 = vpop.f32.mrb[16].mxu1 }
 0x23e   : > { %v1066_v23 = vpack.c.bf16 %v794_v20, %v794_v20  ;;  %v2154_v24 = vpop.f32.mrb[17].mxu0  ;;  %v2194_v25 = vpop.f32.mrb[17].mxu1 }
 0x23f   : > { %v797_v26 = vpop.f32.mrb[18].mxu0  ;;  %v1057_v27 = vpop.f32.mrb[18].mxu1 }
 0x240   : > { %v1165_v28 = vsel %vm1068_vm2, %v1066_v23, 0  ;;  %v2155_v29 = vpop.f32.mrb[19].mxu0  ;;  %v2195_v30 = vpop.f32.mrb[19].mxu1  ;;  %2199 = vmatmul.mubr.msk.bf16.vlgmr.msra.gmra.mrb[28].mxu0 %vm1068_vm2, %v1060_v22 }
 0x241   : > { %2209 = vmatpush3.bf16.xpose.msra.mxu0 %v1165_v28  ;;  %2210 = vmatprep.mubr.msk.bf16.mxu0 %vm2374_vm1, %v2373_v9 }
 0x242   : > { %2220 = vmatprep.subr.bf16.mxu0 %v2373_v9 }
 0x245   : > { %v898_v31 = vpop.f32.mrb[20].mxu0 }
 0x246   : > { %v1305_v33 = vpack.c.bf16 %v898_v31, %v898_v31  ;;  %v2170_v34 = vpop.f32.mrb[21].mxu0 }
 0x247   : > { %v901_v35 = vpop.f32.mrb[22].mxu0  ;;  %v1308_v34 = vpack.c.bf16 %v2624_v21, %v2624_v21  ;;  %v429_v21 = vld [vmem:[%s2768_s5] sm:$0xf] }
 0x248   : > { %v1314_v36 = vsel %vm1312_vm3, %v1305_v33, 0  ;;  %v2171_v37 = vpop.f32.mrb[23].mxu0  ;;  %2211 = vmatmul.mubr.msk.bf16.vlgmr.msra.gmra.mrb[32].mxu0 %vm1068_vm2, %v1062_v32 }
 0x249   : > { %2221 = vmatpush3.bf16.msra.mxu0 %v1314_v36  ;;  %2222 = vmatprep.mubr.msk.bf16.mxu0 %vm2374_vm1, %v2373_v9 }
 0x24a   : > { %2232 = vmatprep.subr.bf16.mxu0 %v2373_v9 }
 0x24d   : > { %v2638_v38 = vpop.f32.mrb[24].mxu0 }
 0x24e   : > { %v2186_v39 = vpop.f32.mrb[25].mxu0  ;;  %v1307_v30 = vpack.c.bf16 %v2638_v38, %v2638_v38 }
 0x24f   : > { %v1005_v40 = vpop.f32.mrb[26].mxu0 }
 0x250   : > { %v2187_v41 = vpop.f32.mrb[27].mxu0  ;;  %v1406_v35 = vsel %vm1312_vm3, %v1307_v30, 0  ;;  %v1452_v40 = vsel %vm1312_vm3, %v1308_v34, 0 }
 0x303   : > { %v1155_v42 = vpop.f32.mrb[20].mxu1 }
 0x304   : > { %v2206_v43 = vpop.f32.mrb[21].mxu1  ;;  %v1254_v54 = vmul.f32 0.35355338, %v1155_v42 }
 0x305   : > { %v1158_v44 = vpop.f32.mrb[22].mxu1 }
 0x306   : > { %v2207_v45 = vpop.f32.mrb[23].mxu1  ;;  %v1260_v58 = vsel %vm1068_vm2, %v1254_v54, -inf  ;;  %v1502_v44 = vsel %vm1312_vm3, %v429_v21, 0  ;;  %v2331_v21 = vld [vmem:[%s2770_s7] sm:$0xff]  }
 0x30b   : > { %v1247_v46 = vpop.f32.mrb[24].mxu1 }
 0x30c   : > { %v2218_v47 = vpop.f32.mrb[25].mxu1  ;;  %v1256_v57 = vmul.f32 0.35355338, %v1247_v46  ;;  %v430_v46 = vld [vmem:[%s2768_s5 + $0x4] sm:$0xf] }
 0x30d   : > { %v1250_v48 = vpop.f32.mrb[26].mxu1  ;;  %v1548_v47 = vsel %vm1312_vm3, %v430_v46, 0 }
 0x30e   : > { %v2219_v49 = vpop.f32.mrb[27].mxu1  ;;  %v1266_v1 = vsel %vm1068_vm2, %v1256_v57, -inf  ;;  %v431_v48 = vld [vmem:[%s2768_s5 + $0x8] sm:$0xf] }
 0x313   : > { %v1109_v50 = vpop.f32.mrb[28].mxu0 }
 0x314   : > { %v1253_v51 = vmul.f32 0.35355338, %v1109_v50  ;;  %v2200_v52 = vpop.f32.mrb[29].mxu0 }
 0x315   : > { %v1112_v53 = vpop.f32.mrb[30].mxu0  ;;  %v1594_v52 = vsel %vm1312_vm3, %v431_v48, 0 }
 0x316   : > { %v2201_v55 = vpop.f32.mrb[31].mxu0  ;;  %v1257_v56 = vsel %vm1068_vm2, %v1253_v51, -inf }
 0x317   : > { %1258 = vmax.xlane.f32.xlu1 %v1257_v56 }
 0x31b   : > { %1261 = vmax.xlane.f32.xlu1 %v1260_v58  ;;  %v1201_v59 = vpop.f32.mrb[32].mxu0 }
 0x31c   : > { %v1255_v60 = vmul.f32 0.35355338, %v1201_v59  ;;  %v2212_v61 = vpop.f32.mrb[33].mxu0 }
 0x31d   : > { %v1204_v62 = vpop.f32.mrb[34].mxu0 }
 0x31e   : > { %v2213_v63 = vpop.f32.mrb[35].mxu0  ;;  %v1263_v2 = vsel %vm1068_vm2, %v1255_v60, -inf }
 0x31f   : > { %1267 = vmax.xlane.f32.xlu1 %v1266_v1  ;;  %1264 = vmax.xlane.f32.xlu0 %v1263_v2 }
 0x3a4   : > { %v1259_v3 = vpop.xlane.xlu1 %1258 }
 0x3a5   : > { %v1269_v4 = vsub.f32 %v1253_v51, %v1259_v3 }
 0x3a7   : > { %v1273_v5 = vmul.f32 1.442695, %v1269_v4 }
 0x3a8   : > { %v1262_v6 = vpop.xlane.xlu1 %1261 }
 0x3a9   : > { %2343 = vpow2.f32 %v1273_v5  ;;  %v1270_v7 = vsub.f32 %v1254_v54, %v1262_v6  ;;  %v432_v54 = vld [vmem:[%s2768_s5 + $0xc] sm:$0xf] }
 0x3aa   : > { %v1640_v59 = vsel %vm1312_vm3, %v432_v54, 0  ;;  %v2338_v54 = vld [vmem:[%s2771_s8 + $0x28] sm:$0xff]  }
 0x3ab   : > { %v1275_v8 = vmul.f32 1.442695, %v1270_v7 }
 0x3ac   : > { %v1268_v10 = vpop.xlane.xlu1 %1267  ;;  %v1265_v11 = vpop.xlane.xlu0 %1264 }
 0x3ad   : > { %2345 = vpow2.f32 %v1275_v8  ;;  %v1272_v12 = vsub.f32 %v1256_v57, %v1268_v10  ;;  %v1271_v13 = vsub.f32 %v1255_v60, %v1265_v11 }
 0x3af   : > { %v1279_v14 = vmul.f32 1.442695, %v1272_v12  ;;  %v1277_v15 = vmul.f32 1.442695, %v1271_v13 }
 0x3b1   : > { %2347 = vpow2.f32 %v1279_v14 }
 0x3b2   : > { %2349 = vpow2.f32 %v1277_v15 }
 0x3b3   : > { %v2344_v16 = vpop.eup %2343 }
 0x3b4   : > { %v1281_v17 = vsel %vm1068_vm2, %v2344_v16, 0.0 }
 0x3b5   : > { %1282 = vadd.xlane.f32.xlu0 %v1281_v17 }
 0x3b7   : > { %v2346_v18 = vpop.eup %2345 }
 0x3b8   : > { %v1284_v19 = vsel %vm1068_vm2, %v2346_v18, 0.0 }
 0x3b9   : > { %1285 = vadd.xlane.f32.xlu1 %v1284_v19 }
 0x3bb   : > { %v2348_v20 = vpop.eup %2347 }
 0x3bc   : > { %v2350_v22 = vpop.eup %2349  ;;  %v1290_v23 = vsel %vm1068_vm2, %v2348_v20, 0.0 }
 0x3bd   : > { %1291 = vadd.xlane.f32.xlu1 %v1290_v23  ;;  %v1287_v24 = vsel %vm1068_vm2, %v2350_v22, 0.0 }
 0x3be   : > { %1288 = vadd.xlane.f32.xlu0 %v1287_v24 }
 0x442   : > { %v1283_v25 = vpop.xlane.xlu0 %1282 }
 0x443   : > { %2351 = vrcp.f32 %v1283_v25 }
 0x446   : > { %v1286_v26 = vpop.xlane.xlu1 %1285 }
 0x447   : > { %2353 = vrcp.f32 %v1286_v26 }
 0x44a   : > { %v1292_v27 = vpop.xlane.xlu1 %1291 }
 0x44b   : > { %2355 = vrcp.f32 %v1292_v27  ;;  %v1289_v28 = vpop.xlane.xlu0 %1288 }
 0x44c   : > { %2357 = vrcp.f32 %v1289_v28 }
 0x44d   : > { %v2352_v29 = vpop.eup %2351 }
 0x44e   : > { %v1297_v31 = vmul.f32 %v2352_v29, %v2344_v16 }
 0x450   : > { %v1301_v32 = vpack.c.bf16 %v1297_v31, %v1297_v31 }
 0x451   : > { %v2354_v33 = vpop.eup %2353 }
 0x452   : > { %v1298_v36 = vmul.f32 %v2354_v33, %v2346_v18  ;;  %2223 = vmatmul.mubr.msk.bf16.vlgmr.msra.gmra.mrb[36].mxu0 %vm1068_vm2, %v1301_v32 }
 0x453   : > { %2233 = vmatpush3.bf16.msra.mxu0 %v1406_v35  ;;  %2234 = vmatprep.mubr.msk.bf16.mxu0 %vm2374_vm1, %v2373_v9 }
 0x454   : > { %v1302_v37 = vpack.c.bf16 %v1298_v36, %v1298_v36  ;;  %2244 = vmatprep.subr.bf16.mxu0 %v2373_v9 }
 0x455   : > { %v2356_v39 = vpop.eup %2355 }
 0x456   : > { %v2358_v38 = vpop.eup %2357  ;;  %2229 = vmatmul.mubr.msk.bf16.vlgmr.msra.gmra.mrb[28].mxu1 %vm1068_vm2, %v1302_v37  ;;  %v1300_v42 = vmul.f32 %v2356_v39, %v2348_v20 }
 0x457   : > { %v1299_v41 = vmul.f32 %v2358_v38, %v2350_v22  ;;  %2239 = vmatpush3.bf16.msra.mxu1 %v1452_v40  ;;  %2240 = vmatprep.mubr.msk.bf16.mxu1 %vm2374_vm1, %v2373_v9 }
 0x458   : > { %2250 = vmatprep.subr.bf16.mxu1 %v2373_v9  ;;  %v1304_v45 = vpack.c.bf16 %v1300_v42, %v1300_v42 }
 0x459   : > { %v1303_v43 = vpack.c.bf16 %v1299_v41, %v1299_v41 }
 0x45b   : > { %2235 = vmatmul.mubr.msk.bf16.vlgmr.msra.gmra.mrb[40].mxu0 %vm1068_vm2, %v1303_v43 }
 0x45c   : > { %2245 = vmatpush3.bf16.msra.mxu0 %v1502_v44  ;;  %2246 = vmatprep.mubr.msk.bf16.mxu0 %vm2374_vm1, %v2373_v9 }
 0x45d   : > { %2256 = vmatprep.subr.bf16.mxu0 %v2373_v9 }
 0x45e   : > { %2241 = vmatmul.mubr.msk.bf16.vlgmr.msra.gmra.mrb[32].mxu1 %vm1068_vm2, %v1304_v45  ;;  %v2014_v45 = vld [vmem:[%s2769_s6] ss:$0 sm:$0xff] }
 0x45f   : > { %2252 = vmatprep.mubr.msk.bf16.mxu1 %vm2374_vm1, %v2373_v9  ;;  %2251 = vmatpush3.bf16.msra.mxu1 %v1548_v47 }
 0x460   : > { %2262 = vmatprep.subr.bf16.mxu1 %v2373_v9 }
 0x525   : > { %v1350_v49 = vpop.f32.mrb[36].mxu0 }
 0x526   : > { %v1494_v50 = vpack.c.bf16 %v1350_v49, %v1350_v49  ;;  %v2224_v51 = vpop.f32.mrb[37].mxu0  ;;  %v2333_v49 = vld [vmem:[%s2771_s8] sm:$0xff]  }
 0x527   : > { %v1353_v53 = vpop.f32.mrb[38].mxu0  ;;  %v2335_v51 = vld [vmem:[%s2771_s8 + $0x10] sm:$0xff]  }
 0x528   : > { %v2225_v55 = vpop.f32.mrb[39].mxu0  ;;  %2247 = vmatmul.mubr.msk.bf16.vlgmr.msra.gmra.mrb[44].mxu0 %vm1068_vm2, %v1494_v50  ;;  %v2334_v50 = vld [vmem:[%s2771_s8 + $0x8] sm:$0xff]   ;;  %v2337_v53 = vld [vmem:[%s2771_s8 + $0x20] sm:$0xff]  }
 0x529   : > { %v1396_v56 = vpop.f32.mrb[28].mxu1  ;;  %2257 = vmatpush3.bf16.msra.mxu0 %v1594_v52  ;;  %2258 = vmatprep.mubr.msk.bf16.mxu0 %vm2374_vm1, %v2373_v9  ;;  %v2336_v52 = vld [vmem:[%s2771_s8 + $0x18] sm:$0xff]   ;;  %v2339_v55 = vld [vmem:[%s2771_s8 + $0x30] sm:$0xff]  }
 0x52a   : > { %v1495_v57 = vpack.c.bf16 %v1396_v56, %v1396_v56  ;;  %v2230_v58 = vpop.f32.mrb[29].mxu1  ;;  %2268 = vmatprep.subr.bf16.mxu0 %v2373_v9  ;;  %v2340_v56 = vld [vmem:[%s2771_s8 + $0x38] sm:$0xff]  }
 0x52b   : > { %v1399_v60 = vpop.f32.mrb[30].mxu1 }
 0x52c   : > { %v2231_v61 = vpop.f32.mrb[31].mxu1  ;;  %2253 = vmatmul.mubr.msk.bf16.vlgmr.msra.gmra.mrb[36].mxu1 %vm1068_vm2, %v1495_v57 }
 0x52d   : > { %2263 = vmatpush3.bf16.msra.mxu1 %v1640_v59  ;;  %2264 = vmatprep.mubr.msk.bf16.mxu1 %vm2374_vm1, %v2373_v9 }
 0x52e   : > { %v1442_v62 = vpop.f32.mrb[40].mxu0  ;;  %2276 = vmatprep.subr.bf16.mxu1 %v2373_v9 }
 0x52f   : > { %v1496_v63 = vpack.c.bf16 %v1442_v62, %v1442_v62  ;;  %v2236_v1 = vpop.f32.mrb[41].mxu0 }
 0x530   : > { %v1445_v2 = vpop.f32.mrb[42].mxu0 }
 0x531   : > { %v2237_v3 = vpop.f32.mrb[43].mxu0  ;;  %2259 = vmatmul.mubr.msk.bf16.vlgmr.msra.gmra.mrb[48].mxu0 %vm1068_vm2, %v1496_v63  ;;  %v1488_v4 = vpop.f32.mrb[32].mxu1 }
 0x532   : > { %v1497_v5 = vpack.c.bf16 %v1488_v4, %v1488_v4  ;;  %v2242_v6 = vpop.f32.mrb[33].mxu1  ;;  %2272 = vmatprep.mubr.msk.bf16.mxu0 %vm2374_vm1, %v2373_v9  ;;  %2269 = vmatpush3.bf16.msra.mxu0 %v2331_v21 }
 0x533   : > { %v1491_v7 = vpop.f32.mrb[34].mxu1  ;;  %2270 = vmatprep.subr.bf16.mxu0 %v2373_v9 }
 0x534   : > { %v2243_v8 = vpop.f32.mrb[35].mxu1  ;;  %2265 = vmatmul.mubr.msk.bf16.vlgmr.msra.gmra.mrb[40].mxu1 %vm1068_vm2, %v1497_v5 }
 0x535   : > { %2292 = vmatprep.mubr.msk.bf16.mxu1 %vm2374_vm1, %v2373_v9  ;;  %2277 = vmatpush3.bf16.msra.mxu1 %v2333_v49 }
 0x536   : > { %2278 = vmatprep.subr.bf16.mxu1 %v2373_v9 }
 0x539   : > { %2279 = vmatpush3.bf16.msra.mxu1 %v2334_v50 }
 0x53a   : > { %2280 = vmatprep.subr.bf16.mxu1 %v2373_v9 }
 0x53d   : > { %2281 = vmatpush3.bf16.msra.mxu1 %v2335_v51 }
 0x53e   : > { %2282 = vmatprep.subr.bf16.mxu1 %v2373_v9 }
 0x541   : > { %2283 = vmatpush3.bf16.msra.mxu1 %v2336_v52 }
 0x542   : > { %2284 = vmatprep.subr.bf16.mxu1 %v2373_v9 }
 0x545   : > { %2285 = vmatpush3.bf16.msra.mxu1 %v2337_v53 }
 0x546   : > { %2286 = vmatprep.subr.bf16.mxu1 %v2373_v9 }
 0x549   : > { %2287 = vmatpush3.bf16.msra.mxu1 %v2338_v54 }
 0x54a   : > { %2288 = vmatprep.subr.bf16.mxu1 %v2373_v9 }
 0x54d   : > { %2289 = vmatpush3.bf16.msra.mxu1 %v2339_v55 }
 0x54e   : > { %2290 = vmatprep.subr.bf16.mxu1 %v2373_v9 }
 0x551   : > { %2291 = vmatpush3.bf16.msra.mxu1 %v2340_v56 }
 0x5fb   : > { %v1538_v10 = vpop.f32.mrb[44].mxu0 }
 0x5fc   : > { %v2248_v11 = vpop.f32.mrb[45].mxu0  ;;  %v1682_v15 = vsel %vm358_vm0, %v1538_v10, 0.0 }
 0x5fd   : > { %v1541_v12 = vpop.f32.mrb[46].mxu0 }
 0x5fe   : > { %v2249_v13 = vpop.f32.mrb[47].mxu0 }
 0x5ff   : > { %v1584_v14 = vpop.f32.mrb[36].mxu1 }
 0x600   : > { %v1683_v16 = vsel %vm358_vm0, %v1584_v14, 0.0  ;;  %v2254_v17 = vpop.f32.mrb[37].mxu1 }
 0x601   : > { %v1684_v18 = vadd.f32 %v1683_v16, %v1682_v15  ;;  %v1587_v19 = vpop.f32.mrb[38].mxu1 }
 0x602   : > { %v2255_v20 = vpop.f32.mrb[39].mxu1 }
 0x604   : > { %v1630_v22 = vpop.f32.mrb[48].mxu0 }
 0x605   : > { %v1685_v23 = vsel %vm358_vm0, %v1630_v22, 0.0  ;;  %v2260_v24 = vpop.f32.mrb[49].mxu0 }
 0x606   : > { %v1686_v25 = vadd.f32 %v1685_v23, %v1684_v18  ;;  %v1633_v26 = vpop.f32.mrb[50].mxu0  ;;  %v2375_v18 = vmov -1.0  }
 0x607   : > { %v2261_v27 = vpop.f32.mrb[51].mxu0  ;;  %v1676_v28 = vpop.f32.mrb[40].mxu1 }
 0x608   : > { %v1687_v29 = vsel %vm358_vm0, %v1676_v28, 0.0  ;;  %v2266_v30 = vpop.f32.mrb[41].mxu1 }
 0x609   : > { %v1688_v31 = vadd.f32 %v1687_v29, %v1686_v25  ;;  %v1679_v32 = vpop.f32.mrb[42].mxu1 }
 0x60a   : > { %v2267_v33 = vpop.f32.mrb[43].mxu1 }
 0x60b   : > { %v2705_v34 = vadd.f32 %v1688_v31, %v2447_v0  ;;  %v2332_v0 = vld [vmem:[%s2770_s7 + $0x8] sm:$0xff]  }
 0x60c   : > { %2271 = vmatpush3.bf16.msra.mxu0 %v2332_v0 }
 0x60d   : > { %v1691_v35 = vsel %vm358_vm0, %v2705_v34, 0.0 }
 0x60e   : > { %1692 = vadd.xlane.f32.xlu0 %v1691_v35 }
 0x69b   : > { %v1693_v36 = vpop.xlane.xlu0 %1692 }
 0x69c   : > { %v1694_v37 = vmul.f32 0.03125, %v1693_v36 }
 0x69e   : > { %v1695_v39 = vsub.f32 %v2705_v34, %v1694_v37 }
 0x6a0   : > { %v1696_v38 = vmul.f32 %v1695_v39, %v1695_v39 }
 0x6a2   : > { %v1697_v40 = vsel %vm358_vm0, %v1696_v38, 0.0 }
 0x6a3   : > { %1698 = vadd.xlane.f32.xlu1 %v1697_v40 }
 0x730   : > { %v1699_v41 = vpop.xlane.xlu1 %1698 }
 0x731   : > { %v1700_v42 = vmul.f32 0.03125, %v1699_v41 }
 0x733   : > { %v1701_v43 = vadd.f32 1e-05, %v1700_v42 }
 0x735   : > { %2359 = vrsqrt.f32 %v1701_v43 }
 0x73f   : > { %v2360_v44 = vpop.eup %2359 }
 0x740   : > { %v1703_v46 = vmul.f32 %v2360_v44, %v1695_v39 }
 0x742   : > { %v1710_v47 = vmul.f32 %v2014_v45, %v1703_v46 }
 0x744   : > { %v1711_v48 = vpack.c.bf16 %v1710_v47, %v1710_v47 }
 0x746   : > { %2273 = vmatmul.mubr.msk.bf16.vlgmr.msra.gmra.mrb[52].mxu0 %vm358_vm0, %v1711_v48 }
 0x819   : > { %v1765_v57 = vpop.f32.mrb[52].mxu0 }
 0x81a   : > { %v1772_v58 = vmul.f32 0.70710677, %v1765_v57  ;;  %v2274_v59 = vpop.f32.mrb[53].mxu0  ;;  %v1771_v22 = vmul.f32 0.5, %v1765_v57 }
 0x81b   : > { %v1768_v60 = vpop.f32.mrb[54].mxu0 }
 0x81c   : > { %v1775_v61 = vand.u32 2147483647, %v1772_v58  ;;  %v2275_v62 = vpop.f32.mrb[55].mxu0  ;;  %vm1773_vm4 = vcmp.ge.f32.partialorder %v1772_v58, 0.0 }
 0x81d   : > { %v1774_v19 = vsel %vm1773_vm4, 1.0, %v2375_v18 }
 0x81e   : > { %v1776_v63 = vmul.f32 0.3275911, %v1775_v61  ;;  %v1789_v2 = vsub.f32 0.0, %v1775_v61 }
 0x820   : > { %v1777_v1 = vadd.f32 1.0, %v1776_v63  ;;  %v1790_v4 = vmul.f32 %v1789_v2, %v1775_v61 }
 0x822   : > { %2361 = vrcp.f32 %v1777_v1  ;;  %v1791_v9 = vmul.f32 1.442695, %v1790_v4 }
 0x824   : > { %2363 = vpow2.f32 %v1791_v9 }
 0x82c   : > { %v2362_v3 = vpop.eup %2361 }
 0x82d   : > { %v1780_v5 = vmul.f32 1.0614054, %v2362_v3 }
 0x82e   : > { %v2364_v15 = vpop.eup %2363 }
 0x82f   : > { %v1781_v6 = vadd.f32 -1.4531521, %v1780_v5 }
 0x831   : > { %v1782_v7 = vmul.f32 %v2362_v3, %v1781_v6 }
 0x833   : > { %v1783_v8 = vadd.f32 1.4214138, %v1782_v7 }
 0x835   : > { %v1784_v10 = vmul.f32 %v2362_v3, %v1783_v8 }
 0x837   : > { %v1785_v11 = vadd.f32 -0.28449672, %v1784_v10 }
 0x839   : > { %v1786_v12 = vmul.f32 %v2362_v3, %v1785_v11 }
 0x83b   : > { %v1787_v13 = vadd.f32 0.2548296, %v1786_v12 }
 0x83d   : > { %v1788_v14 = vmul.f32 %v2362_v3, %v1787_v13 }
 0x83f   : > { %v1793_v16 = vmul.f32 %v2364_v15, %v1788_v14 }
 0x841   : > { %v1794_v17 = vsub.f32 1.0, %v1793_v16 }
 0x843   : > { %v1795_v20 = vmul.f32 %v1794_v17, %v1774_v19 }
 0x845   : > { %v1796_v23 = vadd.f32 1.0, %v1795_v20 }
 0x847   : > { %v1797_v24 = vmul.f32 %v1796_v23, %v1771_v22 }
 0x849   : > { %v1798_v25 = vpack.c.bf16 %v1797_v24, %v1797_v24 }
 0x84b   : > { %2293 = vmatmul.mubr.bf16.vlgmr.msra.gmra.mrb[44].mxu1 %v1798_v25 }
 0x91e   : > { %v1897_v26 = vpop.f32.mrb[44].mxu1 }
 0x91f   : > { %v1903_v27 = vadd.f32 %v1897_v26, %v2705_v34  ;;  %v2294_v28 = vpop.f32.mrb[45].mxu1 }
 0x920   : > { %v1900_v29 = vpop.f32.mrb[46].mxu1 }
 0x921   : > { %1904 = vst.msk [vmem:[%s354_s28] sm:$0xff] %vm358_vm0, %v1903_v27  ;;  %v2295_v30 = vpop.f32.mrb[47].mxu1 }
 0x922 PF: > { %s20_s13 = sadd.s32 1, %s2371_s13  }
 0x923   : > { %p17_p4 = scmp.ge.s32.totalorder %s20_s13, 4  }
 0x925   :  { %19 = sbr.rel (!%p17_p4) target bundleno = 1 (0x1), region = 90 }

// kernel: _lambda_.6
= control target key start
LH: loop header
LB: loop body
LE: loop exit
PB: predicated region body
PF: predicated region fallthrough
CT: control target
= control target key end

     0   :  { %s4283_s18 = smov 0   ;;  %s4850_s0 = inlined_call_operand.vmem [shape: f32[2,8,32], index: 0, kind: input, shape index: {}]   ;;  %s4851_s1 = inlined_call_operand.vmem [shape: f32[2,8,32], index: 1, kind: input, shape index: {}]   ;;  %s4852_s2 = inlined_call_operand.vmem [shape: f32[1,32], index: 2, kind: input, shape index: {}]   ;;  %s4853_s3 = inlined_call_operand.vmem [shape: bf16[4,32,8], index: 3, kind: input, shape index: {}]   ;;  %s4854_s4 = inlined_call_operand.vmem [shape: bf16[4,32,8], index: 4, kind: input, shape index: {}]   ;;  %s4855_s5 = inlined_call_operand.vmem [shape: bf16[4,32,8], index: 5, kind: input, shape index: {}]   ;;  %s4856_s6 = inlined_call_operand.vmem [shape: bf16[4,8,32], index: 6, kind: input, shape index: {}]   ;;  %s4857_s7 = inlined_call_operand.vmem [shape: f32[1,32], index: 7, kind: input, shape index: {}]   ;;  %s4858_s8 = inlined_call_operand.vmem [shape: bf16[4,32,8], index: 8, kind: input, shape index: {}]   ;;  %s4859_s9 = inlined_call_operand.vmem [shape: bf16[4,32,8], index: 9, kind: input, shape index: {}]   ;;  %s4860_s10 = inlined_call_operand.vmem [shape: bf16[4,32,8], index: 10, kind: input, shape index: {}]   ;;  %s4861_s11 = inlined_call_operand.vmem [shape: bf16[4,8,32], index: 11, kind: input, shape index: {}]   ;;  %s4862_s12 = inlined_call_operand.vmem [shape: f32[1,32], index: 12, kind: input, shape index: {}]   ;;  %s4863_s13 = inlined_call_operand.vmem [shape: bf16[32,128], index: 13, kind: input, shape index: {}]   ;;  %s4864_s14 = inlined_call_operand.vmem [shape: bf16[128,32], index: 14, kind: input, shape index: {}]   ;;  %s4865_s15 = inlined_call_operand.vmem [shape: f32[2,8,32], index: 15, kind: output, shape index: {}]  }
   0x1 LB: > { %s3465_s19 = sadd.s32 4294967295, %s4198_s18   ;;  %p3469_p0 = scmp.ge.s32.totalorder %s4198_s18, 1  ;;  %s4198_s18 = sphi %s4283_s18, %s25_s18  }
   0x2   : > { %p445_p1 = scmp.lt.s32.totalorder %s4198_s18, 3 }
   0x4   : > { %p446_p2 = pnand %p3469_p0, %p445_p1 }
   0x5   : > { %p495_p3 = scmp.lt.s32.totalorder (!%p446_p2), %s3465_s19, 1  ;;  %vm637_vm0 = vcmask (!%p446_p2), 261120   ;;  %v4092_v7 = vld [vmem:[%s4853_s3] sm:$0xff] (!%p446_p2)   ;;  %v4093_v8 = vld [vmem:[%s4853_s3 + $0x30] sm:$0xff] (!%p446_p2)   ;;  %v4200_v9 = vmov (!%p446_p2), 0.0   ;;  %v4094_v10 = vld [vmem:[%s4853_s3 + $0x8] sm:$0xff] (!%p446_p2)  }
   0x6   : > { %449 = sbr.rel (%p446_p2) target bundleno = 3862 (0xf16), region = 80  ;;  %3717 = vmatprep.subr.bf16.mxu0 (!%p446_p2), %v4200_v9  ;;  %3741 = vmatprep.subr.bf16.mxu1 (!%p446_p2), %v4200_v9  ;;  %v4095_v11 = vld [vmem:[%s4853_s3 + $0x38] sm:$0xff] (!%p446_p2)   ;;  %vm4201_vm1 = vmmov (!%p446_p2), 0   ;;  %v3473_v16 = vld [vmem:[%s4852_s2] ss:$0 sm:$0xff] (!%p446_p2)  ;;  %v4096_v19 = vld [vmem:[%s4853_s3 + $0x10] sm:$0xff] (!%p446_p2)  }
   0x7   : > { %3718 = vmatpush3.bf16.msra.mxu0 (!%p446_p2), %v4092_v7  ;;  %3742 = vmatpush3.bf16.msra.mxu1 (!%p446_p2), %v4093_v8  ;;  %v4097_v20 = vld [vmem:[%s4854_s4 + $0x10] sm:$0xff] (!%p446_p2)   ;;  %v4098_v22 = vld [vmem:[%s4853_s3 + $0x18] sm:$0xff] (!%p446_p2)   ;;  %v4100_v24 = vld [vmem:[%s4853_s3 + $0x20] sm:$0xff] (!%p446_p2)   ;;  %vm1295_vm2 = vcmask (!%p446_p2), 64512   ;;  %vm1548_vm3 = vcmask (!%p446_p2), 1043456  }
   0x8   : > { %3719 = vmatprep.subr.bf16.mxu0 (!%p446_p2), %v4200_v9  ;;  %3743 = vmatprep.subr.bf16.mxu1 (!%p446_p2), %v4200_v9  ;;  %v4099_v23 = vld [vmem:[%s4854_s4 + $0x18] sm:$0xff] (!%p446_p2)   ;;  %v4101_v25 = vld [vmem:[%s4854_s4 + $0x30] sm:$0xff] (!%p446_p2)   ;;  %v4102_v26 = vld [vmem:[%s4853_s3 + $0x28] sm:$0xff] (!%p446_p2)  }
   0x9   : > { %3721 = vmatprep.mubr.msk.bf16.mxu0 (!%p446_p2), %vm4201_vm1, %v4200_v9  ;;  %3745 = vmatprep.mubr.msk.bf16.mxu1 (!%p446_p2), %vm4201_vm1, %v4200_v9  ;;  %v4103_v27 = vld [vmem:[%s4854_s4 + $0x38] sm:$0xff] (!%p446_p2)   ;;  %v4104_v28 = vld [vmem:[%s4854_s4] sm:$0xff] (!%p446_p2)   ;;  %v4105_v29 = vld [vmem:[%s4855_s5 + $0x10] sm:$0xff] (!%p446_p2)  }
   0xa   : > { %v4106_v30 = vld [vmem:[%s4854_s4 + $0x8] sm:$0xff] (!%p446_p2)   ;;  %v4107_v31 = vld [vmem:[%s4855_s5 + $0x18] sm:$0xff] (!%p446_p2)   ;;  %v4108_v32 = vld [vmem:[%s4854_s4 + $0x20] sm:$0xff] (!%p446_p2)  }
   0xb   : > { %3720 = vmatpush3.bf16.msra.mxu0 (!%p446_p2), %v4094_v10  ;;  %3744 = vmatpush3.bf16.msra.mxu1 (!%p446_p2), %v4095_v11  ;;  %v4109_v33 = vld [vmem:[%s4855_s5 + $0x30] sm:$0xff] (!%p446_p2)   ;;  %v4110_v34 = vld [vmem:[%s4854_s4 + $0x28] sm:$0xff] (!%p446_p2)   ;;  %v4111_v35 = vld [vmem:[%s4855_s5 + $0x38] sm:$0xff] (!%p446_p2)  }
   0xc   : > { %3725 = vmatprep.subr.bf16.mxu0 (!%p446_p2), %v4200_v9  ;;  %3757 = vmatprep.subr.bf16.mxu1 (!%p446_p2), %v4200_v9  ;;  %v4112_v36 = vld [vmem:[%s4855_s5] sm:$0xff] (!%p446_p2)   ;;  %v4113_v37 = vld [vmem:[%s4855_s5 + $0x8] sm:$0xff] (!%p446_p2)  }
   0xd   : > { %s4867_s19 = smov (!%p495_p3, %s3465_s19), 1  ;;  %v4114_v38 = vld [vmem:[%s4855_s5 + $0x20] sm:$0xff]   ;;  %v4115_v39 = vld [vmem:[%s4855_s5 + $0x28] sm:$0xff]  }
   0xe   : > { %s4291_s20 = sshll.u32 %s4867_s19, 3 }
   0xf   : > { %s498_s23 = scalar_lea.vmem %s4850_s0, %s4291_s20  ;;  %s502_s28 = scalar_lea.vmem %s4851_s1, %s4291_s20 }
  0x10   : > { %v4297_v0 = vld [vmem:[%s498_s23] sm:$0xff]  ;;  %s506_s24 = scalar_lea.vmem %s4865_s15, %s4291_s20 }
  0x11   : > { %v638_v1 = vsel %vm637_vm0, %v4297_v0, 0.0 }
  0x12   : > { %639 = vadd.xlane.f32.xlu0 %v638_v1 }
  0x9f   : > { %v640_v2 = vpop.xlane.xlu0 %639 }
  0xa0   : > { %v642_v3 = vmul.f32 0.03125, %v640_v2 }
  0xa2   : > { %v643_v4 = vsub.f32 %v4297_v0, %v642_v3 }
  0xa4   : > { %v644_v5 = vmul.f32 %v643_v4, %v643_v4 }
  0xa6   : > { %v645_v6 = vsel %vm637_vm0, %v644_v5, 0.0 }
  0xa7   : > { %646 = vadd.xlane.f32.xlu0 %v645_v6 }
 0x134   : > { %v647_v12 = vpop.xlane.xlu0 %646 }
 0x135   : > { %v648_v13 = vmul.f32 0.03125, %v647_v12 }
 0x137   : > { %v649_v14 = vadd.f32 1e-05, %v648_v13 }
 0x139   : > { %4150 = vrsqrt.f32 %v649_v14 }
 0x143   : > { %v4151_v15 = vpop.eup %4150 }
 0x144   : > { %v651_v17 = vmul.f32 %v4151_v15, %v643_v4 }
 0x146   : > { %v658_v18 = vmul.f32 %v3473_v16, %v651_v17 }
 0x148   : > { %v4334_v21 = vpack.c.bf16 %v658_v18, %v658_v18 }
 0x14a   : > { %3722 = vmatmul.mubr.msk.bf16.vlgmr.msra.gmra.mrb[0].mxu0 %vm637_vm0, %v4334_v21  ;;  %3746 = vmatmul.mubr.msk.bf16.vlgmr.msra.gmra.mrb[0].mxu1 %vm637_vm0, %v4334_v21 }
 0x14b   : > { %3726 = vmatpush3.bf16.msra.mxu0 %v4096_v19  ;;  %3758 = vmatpush3.bf16.msra.mxu1 %v4097_v20 }
 0x14c   : > { %3727 = vmatprep.subr.bf16.mxu0 %v4200_v9  ;;  %3759 = vmatprep.subr.bf16.mxu1 %v4200_v9 }
 0x14d   : > { %3729 = vmatprep.mubr.msk.bf16.mxu0 %vm4201_vm1, %v4200_v9  ;;  %3761 = vmatprep.mubr.msk.bf16.mxu1 %vm4201_vm1, %v4200_v9 }
 0x14f   : > { %3728 = vmatpush3.bf16.msra.mxu0 %v4098_v22  ;;  %3760 = vmatpush3.bf16.msra.mxu1 %v4099_v23 }
 0x150   : > { %3733 = vmatprep.subr.bf16.mxu0 %v4200_v9  ;;  %3773 = vmatprep.subr.bf16.mxu1 %v4200_v9 }
 0x152   : > { %3730 = vmatmul.mubr.msk.bf16.vlgmr.msra.gmra.mrb[4].mxu0 %vm637_vm0, %v4334_v21  ;;  %3762 = vmatmul.mubr.msk.bf16.vlgmr.msra.gmra.mrb[4].mxu1 %vm637_vm0, %v4334_v21 }
 0x153   : > { %3734 = vmatpush3.bf16.msra.mxu0 %v4100_v24  ;;  %3774 = vmatpush3.bf16.msra.mxu1 %v4101_v25 }
 0x154   : > { %3735 = vmatprep.subr.bf16.mxu0 %v4200_v9  ;;  %3775 = vmatprep.subr.bf16.mxu1 %v4200_v9 }
 0x155   : > { %3737 = vmatprep.mubr.msk.bf16.mxu0 %vm4201_vm1, %v4200_v9  ;;  %3777 = vmatprep.mubr.msk.bf16.mxu1 %vm4201_vm1, %v4200_v9 }
 0x157   : > { %3736 = vmatpush3.bf16.msra.mxu0 %v4102_v26  ;;  %3776 = vmatpush3.bf16.msra.mxu1 %v4103_v27 }
 0x158   : > { %3749 = vmatprep.subr.bf16.mxu0 %v4200_v9  ;;  %3789 = vmatprep.subr.bf16.mxu1 %v4200_v9 }
 0x15a   : > { %3738 = vmatmul.mubr.msk.bf16.vlgmr.msra.gmra.mrb[8].mxu0 %vm637_vm0, %v4334_v21  ;;  %3778 = vmatmul.mubr.msk.bf16.vlgmr.msra.gmra.mrb[8].mxu1 %vm637_vm0, %v4334_v21 }
 0x15b   : > { %3750 = vmatpush3.bf16.msra.mxu0 %v4104_v28  ;;  %3790 = vmatpush3.bf16.msra.mxu1 %v4105_v29 }
 0x15c   : > { %3751 = vmatprep.subr.bf16.mxu0 %v4200_v9  ;;  %3791 = vmatprep.subr.bf16.mxu1 %v4200_v9 }
 0x15d   : > { %3753 = vmatprep.mubr.msk.bf16.mxu0 %vm4201_vm1, %v4200_v9  ;;  %3793 = vmatprep.mubr.msk.bf16.mxu1 %vm4201_vm1, %v4200_v9 }
 0x15f   : > { %3752 = vmatpush3.bf16.msra.mxu0 %v4106_v30  ;;  %3792 = vmatpush3.bf16.msra.mxu1 %v4107_v31 }
 0x160   : > { %3765 = vmatprep.subr.bf16.mxu0 %v4200_v9  ;;  %3805 = vmatprep.subr.bf16.mxu1 %v4200_v9 }
 0x162   : > { %3754 = vmatmul.mubr.msk.bf16.vlgmr.msra.gmra.mrb[12].mxu0 %vm637_vm0, %v4334_v21  ;;  %3794 = vmatmul.mubr.msk.bf16.vlgmr.msra.gmra.mrb[12].mxu1 %vm637_vm0, %v4334_v21 }
 0x163   : > { %3766 = vmatpush3.bf16.msra.mxu0 %v4108_v32  ;;  %3806 = vmatpush3.bf16.msra.mxu1 %v4109_v33 }
 0x164   : > { %3767 = vmatprep.subr.bf16.mxu0 %v4200_v9  ;;  %3807 = vmatprep.subr.bf16.mxu1 %v4200_v9 }
 0x165   : > { %3769 = vmatprep.mubr.msk.bf16.mxu0 %vm4201_vm1, %v4200_v9  ;;  %3809 = vmatprep.mubr.msk.bf16.mxu1 %vm4201_vm1, %v4200_v9 }
 0x167   : > { %3768 = vmatpush3.bf16.msra.mxu0 %v4110_v34  ;;  %3808 = vmatpush3.bf16.msra.mxu1 %v4111_v35 }
 0x168   : > { %3781 = vmatprep.subr.bf16.mxu0 %v4200_v9  ;;  %3819 = vmatprep.subr.bf16.mxu1 %v4200_v9 }
 0x16a   : > { %3770 = vmatmul.mubr.msk.bf16.vlgmr.msra.gmra.mrb[16].mxu0 %vm637_vm0, %v4334_v21  ;;  %3810 = vmatmul.mubr.msk.bf16.vlgmr.msra.gmra.mrb[16].mxu1 %vm637_vm0, %v4334_v21 }
 0x16b   : > { %3782 = vmatpush3.bf16.msra.mxu0 %v4112_v36  ;;  %3785 = vmatprep.mubr.msk.bf16.mxu0 %vm4201_vm1, %v4200_v9 }
 0x16c   : > { %3783 = vmatprep.subr.bf16.mxu0 %v4200_v9  ;;  %3821 = vmatprep.mubr.msk.bf16.mxu1 %vm4201_vm1, %v4200_v9 }
 0x16f   : > { %3784 = vmatpush3.bf16.msra.mxu0 %v4113_v37 }
 0x170   : > { %3797 = vmatprep.subr.bf16.mxu0 %v4200_v9 }
 0x172   : > { %3786 = vmatmul.mubr.msk.bf16.vlgmr.msra.gmra.mrb[20].mxu0 %vm637_vm0, %v4334_v21 }
 0x173   : > { %3798 = vmatpush3.bf16.msra.mxu0 %v4114_v38  ;;  %3801 = vmatprep.mubr.msk.bf16.mxu0 %vm4201_vm1, %v4200_v9 }
 0x174   : > { %3799 = vmatprep.subr.bf16.mxu0 %v4200_v9 }
 0x177   : > { %3800 = vmatpush3.bf16.msra.mxu0 %v4115_v39 }
 0x178   : > { %3813 = vmatprep.subr.bf16.mxu0 %v4200_v9 }
 0x17a   : > { %3802 = vmatmul.mubr.msk.bf16.vlgmr.msra.gmra.mrb[24].mxu0 %vm637_vm0, %v4334_v21 }
 0x17b   : > { %3815 = vmatprep.mubr.msk.bf16.mxu0 %vm4201_vm1, %v4200_v9 }
 0x21d   : > { %v4458_v40 = vpop.f32.mrb[0].mxu0  ;;  %v865_v41 = vpop.f32.mrb[0].mxu1 }
 0x21e   : > { %v3723_v42 = vpop.f32.mrb[1].mxu0  ;;  %v3747_v43 = vpop.f32.mrb[1].mxu1  ;;  %v1290_v8 = vpack.c.bf16 %v865_v41, %v865_v41  ;;  %v1287_v22 = vpack.c.bf16 %v4458_v40, %v4458_v40 }
 0x21f   : > { %v712_v44 = vpop.f32.mrb[2].mxu0  ;;  %v868_v45 = vpop.f32.mrb[2].mxu1 }
 0x220   : > { %v3724_v46 = vpop.f32.mrb[3].mxu0  ;;  %v3748_v47 = vpop.f32.mrb[3].mxu1 }
 0x225   : > { %v761_v48 = vpop.f32.mrb[4].mxu0  ;;  %v969_v49 = vpop.f32.mrb[4].mxu1 }
 0x226   : > { %v1292_v50 = vpack.c.bf16 %v969_v49, %v969_v49  ;;  %v3731_v51 = vpop.f32.mrb[5].mxu0  ;;  %v3763_v52 = vpop.f32.mrb[5].mxu1  ;;  %v1288_v60 = vpack.c.bf16 %v761_v48, %v761_v48  ;;  %v1484_v49 = vlaneseq }
 0x227   : > { %v764_v53 = vpop.f32.mrb[6].mxu0  ;;  %v972_v54 = vpop.f32.mrb[6].mxu1 }
 0x228   : > { %v1346_v55 = vsel %vm1295_vm2, %v1292_v50, 0  ;;  %v3732_v56 = vpop.f32.mrb[7].mxu0  ;;  %v3764_v57 = vpop.f32.mrb[7].mxu1  ;;  %v1485_v51 = vshrl.u32 %v1484_v49, 7  ;;  %v1487_v52 = vand.u32 127, %v1484_v49 }
 0x229   : > { %3820 = vmatpush3.bf16.xpose.msra.mxu1 %v1346_v55 }
 0x22a   : > { %3831 = vmatprep.subr.bf16.mxu1 %v4200_v9  ;;  %vm1488_vm4 = vcmp.le.s32.totalorder %v1487_v52, %v1485_v51 }
 0x22d   : > { %v813_v58 = vpop.f32.mrb[8].mxu0  ;;  %v1073_v59 = vpop.f32.mrb[8].mxu1 }
 0x22e   : > { %v1294_v61 = vpack.c.bf16 %v1073_v59, %v1073_v59  ;;  %v3739_v62 = vpop.f32.mrb[9].mxu0  ;;  %v3779_v63 = vpop.f32.mrb[9].mxu1  ;;  %v1289_v32 = vpack.c.bf16 %v813_v58, %v813_v58 }
 0x22f   : > { %v816_v1 = vpop.f32.mrb[10].mxu0  ;;  %v1076_v2 = vpop.f32.mrb[10].mxu1 }
 0x230   : > { %v1438_v3 = vsel %vm1295_vm2, %v1294_v61, 0  ;;  %v3740_v4 = vpop.f32.mrb[11].mxu0  ;;  %v3780_v5 = vpop.f32.mrb[11].mxu1  ;;  %3822 = vmatmul.mubr.msk.bf16.vlgmr.msra.gmra.mrb[20].mxu1 %vm1295_vm2, %v1288_v60 }
 0x231   : > { %3832 = vmatpush3.bf16.xpose.msra.mxu1 %v1438_v3  ;;  %3833 = vmatprep.mubr.msk.bf16.mxu1 %vm4201_vm1, %v4200_v9 }
 0x232   : > { %3843 = vmatprep.subr.bf16.mxu1 %v4200_v9 }
 0x235   : > { %v917_v6 = vpop.f32.mrb[12].mxu0  ;;  %v1177_v7 = vpop.f32.mrb[12].mxu1 }
 0x236   : > { %v1291_v10 = vpack.c.bf16 %v917_v6, %v917_v6  ;;  %v1542_v11 = vpack.c.bf16 %v1177_v7, %v1177_v7  ;;  %v3755_v12 = vpop.f32.mrb[13].mxu0  ;;  %v3795_v13 = vpop.f32.mrb[13].mxu1 }
 0x237   : > { %v920_v14 = vpop.f32.mrb[14].mxu0  ;;  %v1180_v15 = vpop.f32.mrb[14].mxu1 }
 0x238   : > { %v1300_v16 = vsel %vm1295_vm2, %v1291_v10, 0  ;;  %v1596_v17 = vsel %vm1548_vm3, %v1542_v11, 0  ;;  %v3756_v18 = vpop.f32.mrb[15].mxu0  ;;  %v3796_v19 = vpop.f32.mrb[15].mxu1  ;;  %3834 = vmatmul.mubr.msk.bf16.vlgmr.msra.gmra.mrb[24].mxu1 %vm1295_vm2, %v1290_v8 }
 0x239   : > { %3814 = vmatpush3.bf16.xpose.msra.mxu0 %v1300_v16  ;;  %3844 = vmatpush3.bf16.msra.mxu1 %v1596_v17 }
 0x23a   : > { %3825 = vmatprep.subr.bf16.mxu0 %v4200_v9  ;;  %3845 = vmatprep.mubr.msk.bf16.mxu1 %vm4201_vm1, %v4200_v9 }
 0x23b   : > { %3855 = vmatprep.subr.bf16.mxu1 %v4200_v9 }
 0x23d   : > { %v1021_v20 = vpop.f32.mrb[16].mxu0  ;;  %v4474_v21 = vpop.f32.mrb[16].mxu1 }
 0x23e   : > { %v1293_v23 = vpack.c.bf16 %v1021_v20, %v1021_v20  ;;  %v3771_v24 = vpop.f32.mrb[17].mxu0  ;;  %v3811_v25 = vpop.f32.mrb[17].mxu1 }
 0x23f   : > { %v1024_v26 = vpop.f32.mrb[18].mxu0  ;;  %v1284_v27 = vpop.f32.mrb[18].mxu1 }
 0x240   : > { %v1392_v28 = vsel %vm1295_vm2, %v1293_v23, 0  ;;  %v3772_v29 = vpop.f32.mrb[19].mxu0  ;;  %v3812_v30 = vpop.f32.mrb[19].mxu1  ;;  %3816 = vmatmul.mubr.msk.bf16.vlgmr.msra.gmra.mrb[28].mxu0 %vm1295_vm2, %v1287_v22 }
 0x241   : > { %3826 = vmatpush3.bf16.xpose.msra.mxu0 %v1392_v28  ;;  %3827 = vmatprep.mubr.msk.bf16.mxu0 %vm4201_vm1, %v4200_v9 }
 0x242   : > { %3837 = vmatprep.subr.bf16.mxu0 %v4200_v9 }
 0x245   : > { %v1125_v31 = vpop.f32.mrb[20].mxu0 }
 0x246   : > { %v1541_v33 = vpack.c.bf16 %v1125_v31, %v1125_v31  ;;  %v3787_v34 = vpop.f32.mrb[21].mxu0 }
 0x247   : > { %v1128_v35 = vpop.f32.mrb[22].mxu0 }
 0x248   : > { %v1550_v36 = vsel %vm1548_vm3, %v1541_v33, 0  ;;  %v3788_v37 = vpop.f32.mrb[23].mxu0  ;;  %3828 = vmatmul.mubr.msk.bf16.vlgmr.msra.gmra.mrb[32].mxu0 %vm1295_vm2, %v1289_v32 }
 0x249   : > { %3838 = vmatpush3.bf16.msra.mxu0 %v1550_v36  ;;  %3839 = vmatprep.mubr.msk.bf16.mxu0 %vm4201_vm1, %v4200_v9 }
 0x24a   : > { %3849 = vmatprep.subr.bf16.mxu0 %v4200_v9 }
 0x24d   : > { %v4488_v38 = vpop.f32.mrb[24].mxu0 }
 0x24e   : > { %v3803_v39 = vpop.f32.mrb[25].mxu0  ;;  %v1543_v37 = vpack.c.bf16 %v4488_v38, %v4488_v38 }
 0x24f   : > { %v1232_v40 = vpop.f32.mrb[26].mxu0 }
 0x250   : > { %v3804_v41 = vpop.f32.mrb[27].mxu0 }
 0x303   : > { %v1382_v42 = vpop.f32.mrb[20].mxu1 }
 0x304   : > { %v3823_v43 = vpop.f32.mrb[21].mxu1  ;;  %v1481_v54 = vmul.f32 0.35355338, %v1382_v42  ;;  %v1544_v42 = vpack.c.bf16 %v4474_v21, %v4474_v21  ;;  %v559_v21 = vld [vmem:[%s4856_s6] sm:$0xf] }
 0x305   : > { %v1385_v44 = vpop.f32.mrb[22].mxu1  ;;  %v1642_v43 = vsel %vm1548_vm3, %v1543_v37, 0  ;;  %v1738_v51 = vsel %vm1548_vm3, %v559_v21, 0  ;;  %v4116_v21 = vld [vmem:[%s4858_s8] sm:$0xff]  }
 0x306   : > { %v3824_v45 = vpop.f32.mrb[23].mxu1  ;;  %v1490_v62 = vsel %vm1488_vm4, %v1481_v54, -1e+30 }
 0x307   : > { %v1496_v1 = vsel %vm1295_vm2, %v1490_v62, -inf }
 0x30b   : > { %v1474_v46 = vpop.f32.mrb[24].mxu1 }
 0x30c   : > { %v3835_v47 = vpop.f32.mrb[25].mxu1  ;;  %v1483_v61 = vmul.f32 0.35355338, %v1474_v46 }
 0x30d   : > { %v1477_v48 = vpop.f32.mrb[26].mxu1  ;;  %v1688_v47 = vsel %vm1548_vm3, %v1544_v42, 0 }
 0x30e   : > { %v3836_v50 = vpop.f32.mrb[27].mxu1  ;;  %v1492_v4 = vsel %vm1488_vm4, %v1483_v61, -1e+30  ;;  %v562_v61 = vld [vmem:[%s4856_s6 + $0xc] sm:$0xf] }
 0x30f   : > { %v1502_v8 = vsel %vm1295_vm2, %v1492_v4, -inf }
 0x313   : > { %v1336_v53 = vpop.f32.mrb[28].mxu0 }
 0x314   : > { %v1480_v55 = vmul.f32 0.35355338, %v1336_v53  ;;  %v3817_v56 = vpop.f32.mrb[29].mxu0  ;;  %v560_v53 = vld [vmem:[%s4856_s6 + $0x4] sm:$0xf] }
 0x315   : > { %v1339_v57 = vpop.f32.mrb[30].mxu0  ;;  %v1784_v54 = vsel %vm1548_vm3, %v560_v53, 0 }
 0x316   : > { %v3818_v58 = vpop.f32.mrb[31].mxu0  ;;  %v1489_v59 = vsel %vm1488_vm4, %v1480_v55, -1e+30  ;;  %v561_v55 = vld [vmem:[%s4856_s6 + $0x8] sm:$0xf] }
 0x317   : > { %v1493_v60 = vsel %vm1295_vm2, %v1489_v59, -inf }
 0x318   : > { %1494 = vmax.xlane.f32.xlu1 %v1493_v60 }
 0x31b   : > { %v1428_v63 = vpop.f32.mrb[32].mxu0 }
 0x31c   : > { %v1482_v2 = vmul.f32 0.35355338, %v1428_v63  ;;  %1497 = vmax.xlane.f32.xlu1 %v1496_v1  ;;  %v3829_v3 = vpop.f32.mrb[33].mxu0 }
 0x31d   : > { %v1431_v5 = vpop.f32.mrb[34].mxu0  ;;  %v1876_v3 = vsel %vm1548_vm3, %v562_v61, 0  ;;  %v4123_v61 = vld [vmem:[%s4858_s8 + $0x38] sm:$0xff]  }
 0x31e   : > { %v3830_v6 = vpop.f32.mrb[35].mxu0  ;;  %v1491_v7 = vsel %vm1488_vm4, %v1482_v2, -1e+30 }
 0x31f   : > { %v1499_v10 = vsel %vm1295_vm2, %v1491_v7, -inf }
 0x320   : > { %1503 = vmax.xlane.f32.xlu1 %v1502_v8  ;;  %1500 = vmax.xlane.f32.xlu0 %v1499_v10 }
 0x3a5   : > { %v1495_v11 = vpop.xlane.xlu1 %1494 }
 0x3a6   : > { %v1505_v12 = vsub.f32 %v1489_v59, %v1495_v11  ;;  %v1830_v59 = vsel %vm1548_vm3, %v561_v55, 0 }
 0x3a8   : > { %v1509_v13 = vmul.f32 1.442695, %v1505_v12 }
 0x3a9   : > { %v1498_v14 = vpop.xlane.xlu1 %1497 }
 0x3aa   : > { %4152 = vpow2.f32 %v1509_v13  ;;  %v1506_v15 = vsub.f32 %v1490_v62, %v1498_v14 }
 0x3ac   : > { %v1511_v16 = vmul.f32 1.442695, %v1506_v15 }
 0x3ad   : > { %v1504_v17 = vpop.xlane.xlu1 %1503  ;;  %v1501_v18 = vpop.xlane.xlu0 %1500 }
 0x3ae   : > { %4154 = vpow2.f32 %v1511_v16  ;;  %v1508_v19 = vsub.f32 %v1492_v4, %v1504_v17  ;;  %v1507_v20 = vsub.f32 %v1491_v7, %v1501_v18 }
 0x3b0   : > { %v1515_v22 = vmul.f32 1.442695, %v1508_v19  ;;  %v1513_v23 = vmul.f32 1.442695, %v1507_v20 }
 0x3b2   : > { %4156 = vpow2.f32 %v1515_v22 }
 0x3b3   : > { %4158 = vpow2.f32 %v1513_v23 }
 0x3b4   : > { %v4153_v24 = vpop.eup %4152 }
 0x3b5   : > { %v1517_v25 = vsel %vm1295_vm2, %v4153_v24, 0.0 }
 0x3b6   : > { %1518 = vadd.xlane.f32.xlu0 %v1517_v25 }
 0x3b8   : > { %v4155_v26 = vpop.eup %4154 }
 0x3b9   : > { %v1520_v27 = vsel %vm1295_vm2, %v4155_v26, 0.0 }
 0x3ba   : > { %1521 = vadd.xlane.f32.xlu1 %v1520_v27 }
 0x3bc   : > { %v4157_v28 = vpop.eup %4156 }
 0x3bd   : > { %v4159_v29 = vpop.eup %4158  ;;  %v1526_v30 = vsel %vm1295_vm2, %v4157_v28, 0.0 }
 0x3be   : > { %1527 = vadd.xlane.f32.xlu1 %v1526_v30  ;;  %v1523_v31 = vsel %vm1295_vm2, %v4159_v29, 0.0 }
 0x3bf   : > { %1524 = vadd.xlane.f32.xlu0 %v1523_v31 }
 0x443   : > { %v1519_v32 = vpop.xlane.xlu0 %1518 }
 0x444   : > { %4160 = vrcp.f32 %v1519_v32 }
 0x447   : > { %v1522_v33 = vpop.xlane.xlu1 %1521 }
 0x448   : > { %4162 = vrcp.f32 %v1522_v33 }
 0x44b   : > { %v1528_v34 = vpop.xlane.xlu1 %1527 }
 0x44c   : > { %4164 = vrcp.f32 %v1528_v34  ;;  %v1525_v35 = vpop.xlane.xlu0 %1524 }
 0x44d   : > { %4166 = vrcp.f32 %v1525_v35 }
 0x44e   : > { %v4161_v36 = vpop.eup %4160 }
 0x44f   : > { %v1533_v39 = vmul.f32 %v4161_v36, %v4153_v24 }
 0x451   : > { %v1537_v40 = vpack.c.bf16 %v1533_v39, %v1533_v39 }
 0x452   : > { %v4163_v41 = vpop.eup %4162 }
 0x453   : > { %v1534_v44 = vmul.f32 %v4163_v41, %v4155_v26  ;;  %3840 = vmatmul.mubr.msk.bf16.vlgmr.msra.gmra.mrb[36].mxu0 %vm1295_vm2, %v1537_v40 }
 0x454   : > { %3850 = vmatpush3.bf16.msra.mxu0 %v1642_v43  ;;  %3851 = vmatprep.mubr.msk.bf16.mxu0 %vm4201_vm1, %v4200_v9 }
 0x455   : > { %v1538_v45 = vpack.c.bf16 %v1534_v44, %v1534_v44  ;;  %3861 = vmatprep.subr.bf16.mxu0 %v4200_v9 }
 0x456   : > { %v4165_v46 = vpop.eup %4164 }
 0x457   : > { %v4167_v38 = vpop.eup %4166  ;;  %3846 = vmatmul.mubr.msk.bf16.vlgmr.msra.gmra.mrb[28].mxu1 %vm1295_vm2, %v1538_v45  ;;  %v1536_v49 = vmul.f32 %v4165_v46, %v4157_v28 }
 0x458   : > { %v1535_v48 = vmul.f32 %v4167_v38, %v4159_v29  ;;  %3856 = vmatpush3.bf16.msra.mxu1 %v1688_v47  ;;  %3857 = vmatprep.mubr.msk.bf16.mxu1 %vm4201_vm1, %v4200_v9 }
 0x459   : > { %3867 = vmatprep.subr.bf16.mxu1 %v4200_v9  ;;  %v1540_v52 = vpack.c.bf16 %v1536_v49, %v1536_v49  ;;  %v4119_v49 = vld [vmem:[%s4858_s8 + $0x18] sm:$0xff]  }
 0x45a   : > { %v1539_v50 = vpack.c.bf16 %v1535_v48, %v1535_v48  ;;  %v4118_v48 = vld [vmem:[%s4858_s8 + $0x8] sm:$0xff]  }
 0x45c   : > { %3852 = vmatmul.mubr.msk.bf16.vlgmr.msra.gmra.mrb[40].mxu0 %vm1295_vm2, %v1539_v50 }
 0x45d   : > { %3862 = vmatpush3.bf16.msra.mxu0 %v1738_v51  ;;  %3863 = vmatprep.mubr.msk.bf16.mxu0 %vm4201_vm1, %v4200_v9 }
 0x45e   : > { %3873 = vmatprep.subr.bf16.mxu0 %v4200_v9 }
 0x45f   : > { %3858 = vmatmul.mubr.msk.bf16.vlgmr.msra.gmra.mrb[32].mxu1 %vm1295_vm2, %v1540_v52 }
 0x460   : > { %3869 = vmatprep.mubr.msk.bf16.mxu1 %vm4201_vm1, %v4200_v9  ;;  %3868 = vmatpush3.bf16.msra.mxu1 %v1784_v54  ;;  %v3522_v54 = vld [vmem:[%s4857_s7] ss:$0 sm:$0xff] }
 0x461   : > { %3879 = vmatprep.subr.bf16.mxu1 %v4200_v9 }
 0x526   : > { %v1586_v56 = vpop.f32.mrb[36].mxu0 }
 0x527   : > { %v1730_v57 = vpack.c.bf16 %v1586_v56, %v1586_v56  ;;  %v3841_v58 = vpop.f32.mrb[37].mxu0 }
 0x528   : > { %v1589_v60 = vpop.f32.mrb[38].mxu0  ;;  %v4121_v58 = vld [vmem:[%s4858_s8 + $0x30] sm:$0xff]  }
 0x529   : > { %v3842_v62 = vpop.f32.mrb[39].mxu0  ;;  %3864 = vmatmul.mubr.msk.bf16.vlgmr.msra.gmra.mrb[44].mxu0 %vm1295_vm2, %v1730_v57  ;;  %v4120_v57 = vld [vmem:[%s4858_s8 + $0x20] sm:$0xff]   ;;  %v4122_v60 = vld [vmem:[%s4858_s8 + $0x28] sm:$0xff]  }
 0x52a   : > { %v1632_v63 = vpop.f32.mrb[28].mxu1  ;;  %3874 = vmatpush3.bf16.msra.mxu0 %v1830_v59  ;;  %3875 = vmatprep.mubr.msk.bf16.mxu0 %vm4201_vm1, %v4200_v9  ;;  %v4124_v62 = vld [vmem:[%s4859_s9] sm:$0xff]  }
 0x52b   : > { %v1731_v1 = vpack.c.bf16 %v1632_v63, %v1632_v63  ;;  %v3847_v2 = vpop.f32.mrb[29].mxu1  ;;  %3885 = vmatprep.subr.bf16.mxu0 %v4200_v9  ;;  %v4125_v63 = vld [vmem:[%s4859_s9 + $0x10] sm:$0xff]  }
 0x52c   : > { %v1635_v4 = vpop.f32.mrb[30].mxu1  ;;  %v4126_v2 = vld [vmem:[%s4859_s9 + $0x8] sm:$0xff]  }
 0x52d   : > { %v3848_v5 = vpop.f32.mrb[31].mxu1  ;;  %3870 = vmatmul.mubr.msk.bf16.vlgmr.msra.gmra.mrb[36].mxu1 %vm1295_vm2, %v1731_v1  ;;  %v509_v1 = vld [vmem:[%s502_s28] sm:$0xff] }
 0x52e   : > { %3880 = vmatpush3.bf16.msra.mxu1 %v1876_v3  ;;  %3881 = vmatprep.mubr.msk.bf16.mxu1 %vm4201_vm1, %v4200_v9  ;;  %v4127_v3 = vld [vmem:[%s4859_s9 + $0x18] sm:$0xff]   ;;  %v1947_v4 = vpack.c.bf16 %v509_v1, %v509_v1  ;;  %v4128_v5 = vld [vmem:[%s4859_s9 + $0x20] sm:$0xff]  }
 0x52f   : > { %v1678_v6 = vpop.f32.mrb[40].mxu0  ;;  %3893 = vmatprep.subr.bf16.mxu1 %v4200_v9 }
 0x530   : > { %v1732_v7 = vpack.c.bf16 %v1678_v6, %v1678_v6  ;;  %v3853_v8 = vpop.f32.mrb[41].mxu0  ;;  %v4129_v6 = vld [vmem:[%s4859_s9 + $0x30] sm:$0xff]  }
 0x531   : > { %v1681_v10 = vpop.f32.mrb[42].mxu0  ;;  %v4131_v8 = vld [vmem:[%s4859_s9 + $0x38] sm:$0xff]  }
 0x532   : > { %v3854_v11 = vpop.f32.mrb[43].mxu0  ;;  %3876 = vmatmul.mubr.msk.bf16.vlgmr.msra.gmra.mrb[48].mxu0 %vm1295_vm2, %v1732_v7  ;;  %v1724_v12 = vpop.f32.mrb[32].mxu1  ;;  %v4130_v7 = vld [vmem:[%s4859_s9 + $0x28] sm:$0xff]   ;;  %v4132_v10 = vld [vmem:[%s4860_s10] sm:$0xff]  }
 0x533   : > { %v1733_v13 = vpack.c.bf16 %v1724_v12, %v1724_v12  ;;  %v3859_v14 = vpop.f32.mrb[33].mxu1  ;;  %3889 = vmatprep.mubr.msk.bf16.mxu0 %vm4201_vm1, %v4200_v9  ;;  %3886 = vmatpush3.bf16.msra.mxu0 %v4116_v21  ;;  %v4133_v11 = vld [vmem:[%s4860_s10 + $0x10] sm:$0xff]   ;;  %v4134_v12 = vld [vmem:[%s4860_s10 + $0x8] sm:$0xff]  }
 0x534   : > { %v1727_v15 = vpop.f32.mrb[34].mxu1  ;;  %3887 = vmatprep.subr.bf16.mxu0 %v4200_v9  ;;  %v4136_v14 = vld [vmem:[%s4860_s10 + $0x20] sm:$0xff]  }
 0x535   : > { %v3860_v16 = vpop.f32.mrb[35].mxu1  ;;  %3882 = vmatmul.mubr.msk.bf16.vlgmr.msra.gmra.mrb[40].mxu1 %vm1295_vm2, %v1733_v13  ;;  %v4135_v13 = vld [vmem:[%s4860_s10 + $0x18] sm:$0xff]   ;;  %v4137_v15 = vld [vmem:[%s4860_s10 + $0x30] sm:$0xff]  }
 0x536   : > { %3897 = vmatprep.mubr.msk.bf16.mxu1 %vm4201_vm1, %v4200_v9  ;;  %v4138_v16 = vld [vmem:[%s4860_s10 + $0x28] sm:$0xff]  }
 0x537   : > { %3888 = vmatpush3.bf16.msra.mxu0 %v4118_v48 }
 0x538   : > { %3901 = vmatprep.subr.bf16.mxu0 %v4200_v9 }
 0x5fc   : > { %v1774_v17 = vpop.f32.mrb[44].mxu0 }
 0x5fd   : > { %v3865_v18 = vpop.f32.mrb[45].mxu0  ;;  %v1918_v23 = vsel %vm637_vm0, %v1774_v17, 0.0  ;;  %v4139_v17 = vld [vmem:[%s4860_s10 + $0x38] sm:$0xff]  }
 0x5fe   : > { %v1777_v19 = vpop.f32.mrb[46].mxu0 }
 0x5ff   : > { %v3866_v20 = vpop.f32.mrb[47].mxu0 }
 0x600   : > { %v1820_v22 = vpop.f32.mrb[36].mxu1 }
 0x601   : > { %v1919_v24 = vsel %vm637_vm0, %v1820_v22, 0.0  ;;  %v3871_v25 = vpop.f32.mrb[37].mxu1 }
 0x602   : > { %v1920_v26 = vadd.f32 %v1919_v24, %v1918_v23  ;;  %v1823_v27 = vpop.f32.mrb[38].mxu1 }
 0x603   : > { %v3872_v28 = vpop.f32.mrb[39].mxu1 }
 0x605   : > { %v1866_v29 = vpop.f32.mrb[48].mxu0 }
 0x606   : > { %v1921_v30 = vsel %vm637_vm0, %v1866_v29, 0.0  ;;  %v3877_v31 = vpop.f32.mrb[49].mxu0 }
 0x607   : > { %v1922_v32 = vadd.f32 %v1921_v30, %v1920_v26  ;;  %v1869_v33 = vpop.f32.mrb[50].mxu0 }
 0x608   : > { %v3878_v34 = vpop.f32.mrb[51].mxu0  ;;  %v1912_v35 = vpop.f32.mrb[40].mxu1 }
 0x609   : > { %v1923_v36 = vsel %vm637_vm0, %v1912_v35, 0.0  ;;  %v3883_v37 = vpop.f32.mrb[41].mxu1 }
 0x60a   : > { %v1924_v39 = vadd.f32 %v1923_v36, %v1922_v32  ;;  %v1915_v40 = vpop.f32.mrb[42].mxu1 }
 0x60b   : > { %v3884_v41 = vpop.f32.mrb[43].mxu1 }
 0x60c   : > { %v4555_v42 = vadd.f32 %v1924_v39, %v4297_v0  ;;  %v4117_v0 = vld [vmem:[%s4858_s8 + $0x10] sm:$0xff]  }
 0x60d   : > { %3894 = vmatpush3.bf16.msra.mxu1 %v4117_v0 }
 0x60e   : > { %v1926_v43 = vsel %vm637_vm0, %v4555_v42, 0.0  ;;  %3895 = vmatprep.subr.bf16.mxu1 %v4200_v9 }
 0x60f   : > { %1927 = vadd.xlane.f32.xlu0 %v1926_v43 }
 0x611   : > { %3896 = vmatpush3.bf16.msra.mxu1 %v4119_v49 }
 0x612   : > { %3909 = vmatprep.subr.bf16.mxu1 %v4200_v9 }
 0x69c   : > { %v1928_v44 = vpop.xlane.xlu0 %1927 }
 0x69d   : > { %v1929_v45 = vmul.f32 0.03125, %v1928_v44 }
 0x69f   : > { %v1930_v46 = vsub.f32 %v4555_v42, %v1929_v45 }
 0x6a1   : > { %v1931_v38 = vmul.f32 %v1930_v46, %v1930_v46 }
 0x6a3   : > { %v1932_v47 = vsel %vm637_vm0, %v1931_v38, 0.0 }
 0x6a4   : > { %1933 = vadd.xlane.f32.xlu1 %v1932_v47 }
 0x731   : > { %v1934_v50 = vpop.xlane.xlu1 %1933 }
 0x732   : > { %v1935_v51 = vmul.f32 0.03125, %v1934_v50 }
 0x734   : > { %v1936_v52 = vadd.f32 1e-05, %v1935_v51 }
 0x736   : > { %4168 = vrsqrt.f32 %v1936_v52 }
 0x740   : > { %v4169_v53 = vpop.eup %4168 }
 0x741   : > { %v1938_v55 = vmul.f32 %v4169_v53, %v1930_v46 }
 0x743   : > { %v1945_v56 = vmul.f32 %v3522_v54, %v1938_v55 }
 0x745   : > { %v1946_v59 = vpack.c.bf16 %v1945_v56, %v1945_v56 }
 0x747   : > { %3890 = vmatmul.mubr.msk.bf16.vlgmr.msra.gmra.mrb[52].mxu0 %vm637_vm0, %v1946_v59  ;;  %3898 = vmatmul.mubr.msk.bf16.vlgmr.msra.gmra.mrb[44].mxu1 %vm637_vm0, %v1946_v59 }
 0x748   : > { %3902 = vmatpush3.bf16.msra.mxu0 %v4120_v57  ;;  %3910 = vmatpush3.bf16.msra.mxu1 %v4121_v58 }
 0x749   : > { %3903 = vmatprep.subr.bf16.mxu0 %v4200_v9  ;;  %3911 = vmatprep.subr.bf16.mxu1 %v4200_v9 }
 0x74a   : > { %3905 = vmatprep.mubr.msk.bf16.mxu0 %vm4201_vm1, %v4200_v9  ;;  %3913 = vmatprep.mubr.msk.bf16.mxu1 %vm4201_vm1, %v4200_v9 }
 0x74c   : > { %3904 = vmatpush3.bf16.msra.mxu0 %v4122_v60  ;;  %3912 = vmatpush3.bf16.msra.mxu1 %v4123_v61 }
 0x74d   : > { %3917 = vmatprep.subr.bf16.mxu0 %v4200_v9  ;;  %3925 = vmatprep.subr.bf16.mxu1 %v4200_v9 }
 0x74f   : > { %3906 = vmatmul.mubr.msk.bf16.vlgmr.msra.gmra.mrb[56].mxu0 %vm637_vm0, %v1946_v59  ;;  %3914 = vmatmul.mubr.msk.bf16.vlgmr.msra.gmra.mrb[48].mxu1 %vm637_vm0, %v1946_v59 }
 0x750   : > { %3918 = vmatpush3.bf16.msra.mxu0 %v4124_v62  ;;  %3926 = vmatpush3.bf16.msra.mxu1 %v4125_v63 }
 0x751   : > { %3919 = vmatprep.subr.bf16.mxu0 %v4200_v9  ;;  %3927 = vmatprep.subr.bf16.mxu1 %v4200_v9 }
 0x752   : > { %3921 = vmatprep.mubr.msk.bf16.mxu0 %vm4201_vm1, %v4200_v9  ;;  %3929 = vmatprep.mubr.msk.bf16.mxu1 %vm4201_vm1, %v4200_v9 }
 0x754   : > { %3920 = vmatpush3.bf16.msra.mxu0 %v4126_v2  ;;  %3928 = vmatpush3.bf16.msra.mxu1 %v4127_v3 }
 0x755   : > { %3933 = vmatprep.subr.bf16.mxu0 %v4200_v9  ;;  %3941 = vmatprep.subr.bf16.mxu1 %v4200_v9 }
 0x757   : > { %3922 = vmatmul.mubr.msk.bf16.vlgmr.msra.gmra.mrb[60].mxu0 %vm637_vm0, %v1947_v4  ;;  %3930 = vmatmul.mubr.msk.bf16.vlgmr.msra.gmra.mrb[52].mxu1 %vm637_vm0, %v1947_v4 }
 0x758   : > { %3934 = vmatpush3.bf16.msra.mxu0 %v4128_v5  ;;  %3942 = vmatpush3.bf16.msra.mxu1 %v4129_v6 }
 0x759   : > { %3935 = vmatprep.subr.bf16.mxu0 %v4200_v9  ;;  %3943 = vmatprep.subr.bf16.mxu1 %v4200_v9 }
 0x75a   : > { %3937 = vmatprep.mubr.msk.bf16.mxu0 %vm4201_vm1, %v4200_v9  ;;  %3945 = vmatprep.mubr.msk.bf16.mxu1 %vm4201_vm1, %v4200_v9 }
 0x75c   : > { %3936 = vmatpush3.bf16.msra.mxu0 %v4130_v7  ;;  %3944 = vmatpush3.bf16.msra.mxu1 %v4131_v8 }
 0x75d   : > { %3949 = vmatprep.subr.bf16.mxu0 %v4200_v9  ;;  %3957 = vmatprep.subr.bf16.mxu1 %v4200_v9 }
 0x75f   : > { %3938 = vmatmul.mubr.msk.bf16.vlgmr.msra.gmra.mrb[64].mxu0 %vm637_vm0, %v1947_v4  ;;  %3946 = vmatmul.mubr.msk.bf16.vlgmr.msra.gmra.mrb[56].mxu1 %vm637_vm0, %v1947_v4 }
 0x760   : > { %3950 = vmatpush3.bf16.msra.mxu0 %v4132_v10  ;;  %3958 = vmatpush3.bf16.msra.mxu1 %v4133_v11 }
 0x761   : > { %3951 = vmatprep.subr.bf16.mxu0 %v4200_v9  ;;  %3959 = vmatprep.subr.bf16.mxu1 %v4200_v9 }
 0x762   : > { %3953 = vmatprep.mubr.msk.bf16.mxu0 %vm4201_vm1, %v4200_v9  ;;  %3961 = vmatprep.mubr.msk.bf16.mxu1 %vm4201_vm1, %v4200_v9 }
 0x764   : > { %3952 = vmatpush3.bf16.msra.mxu0 %v4134_v12  ;;  %3960 = vmatpush3.bf16.msra.mxu1 %v4135_v13 }
 0x765   : > { %3965 = vmatprep.subr.bf16.mxu0 %v4200_v9  ;;  %3973 = vmatprep.subr.bf16.mxu1 %v4200_v9 }
 0x767   : > { %3954 = vmatmul.mubr.msk.bf16.vlgmr.msra.gmra.mrb[68].mxu0 %vm637_vm0, %v1947_v4  ;;  %3962 = vmatmul.mubr.msk.bf16.vlgmr.msra.gmra.mrb[60].mxu1 %vm637_vm0, %v1947_v4 }
 0x768   : > { %3966 = vmatpush3.bf16.msra.mxu0 %v4136_v14  ;;  %3969 = vmatprep.mubr.msk.bf16.mxu0 %vm4201_vm1, %v4200_v9 }
 0x769   : > { %3967 = vmatprep.subr.bf16.mxu0 %v4200_v9  ;;  %3974 = vmatpush3.bf16.msra.mxu1 %v4137_v15 }
 0x76a   : > { %3977 = vmatprep.mubr.msk.bf16.mxu1 %vm4201_vm1, %v4200_v9  ;;  %3975 = vmatprep.subr.bf16.mxu1 %v4200_v9 }
 0x76c   : > { %3968 = vmatpush3.bf16.msra.mxu0 %v4138_v16 }
 0x76d   : > { %3976 = vmatpush3.bf16.msra.mxu1 %v4139_v17  ;;  %3981 = vmatprep.subr.bf16.mxu0 %v4200_v9 }
 0x76e   : > { %3987 = vmatprep.subr.bf16.mxu1 %v4200_v9 }
 0x76f   : > { %3970 = vmatmul.mubr.msk.bf16.vlgmr.msra.gmra.mrb[72].mxu0 %vm637_vm0, %v1947_v4 }
 0x770   : > { %3978 = vmatmul.mubr.msk.bf16.vlgmr.msra.gmra.mrb[64].mxu1 %vm637_vm0, %v1947_v4  ;;  %3983 = vmatprep.mubr.msk.bf16.mxu0 %vm4201_vm1, %v4200_v9 }
 0x771   : > { %3989 = vmatprep.mubr.msk.bf16.mxu1 %vm4201_vm1, %v4200_v9 }
 0x81a   : > { %v1997_v18 = vpop.f32.mrb[52].mxu0  ;;  %v2049_v19 = vpop.f32.mrb[44].mxu1 }
 0x81b   : > { %v3891_v20 = vpop.f32.mrb[53].mxu0  ;;  %v3899_v22 = vpop.f32.mrb[45].mxu1  ;;  %v2578_v48 = vpack.c.bf16 %v1997_v18, %v1997_v18  ;;  %v2579_v49 = vpack.c.bf16 %v2049_v19, %v2049_v19 }
 0x81c   : > { %v2000_v23 = vpop.f32.mrb[54].mxu0  ;;  %v2052_v24 = vpop.f32.mrb[46].mxu1 }
 0x81d   : > { %v3892_v25 = vpop.f32.mrb[55].mxu0  ;;  %v3900_v26 = vpop.f32.mrb[47].mxu1 }
 0x822   : > { %v2101_v27 = vpop.f32.mrb[56].mxu0  ;;  %v2153_v28 = vpop.f32.mrb[48].mxu1 }
 0x823   : > { %v3907_v29 = vpop.f32.mrb[57].mxu0  ;;  %v3915_v30 = vpop.f32.mrb[49].mxu1  ;;  %v2580_v60 = vpack.c.bf16 %v2101_v27, %v2101_v27  ;;  %v2581_v61 = vpack.c.bf16 %v2153_v28, %v2153_v28 }
 0x824   : > { %v2104_v31 = vpop.f32.mrb[58].mxu0  ;;  %v2156_v32 = vpop.f32.mrb[50].mxu1 }
 0x825   : > { %v3908_v33 = vpop.f32.mrb[59].mxu0  ;;  %v3916_v34 = vpop.f32.mrb[51].mxu1 }
 0x82a   : > { %v2208_v35 = vpop.f32.mrb[60].mxu0  ;;  %v2260_v36 = vpop.f32.mrb[52].mxu1 }
 0x82b   : > { %v2582_v37 = vpack.c.bf16 %v2208_v35, %v2208_v35  ;;  %v2583_v39 = vpack.c.bf16 %v2260_v36, %v2260_v36  ;;  %v3923_v40 = vpop.f32.mrb[61].mxu0  ;;  %v3931_v41 = vpop.f32.mrb[53].mxu1 }
 0x82c   : > { %v2211_v43 = vpop.f32.mrb[62].mxu0  ;;  %v2263_v44 = vpop.f32.mrb[54].mxu1 }
 0x82d   : > { %v2590_v45 = vsel %vm1295_vm2, %v2582_v37, 0  ;;  %v2636_v46 = vsel %vm1295_vm2, %v2583_v39, 0  ;;  %v3924_v38 = vpop.f32.mrb[63].mxu0  ;;  %v3932_v47 = vpop.f32.mrb[55].mxu1 }
 0x82e   : > { %3982 = vmatpush3.bf16.xpose.msra.mxu0 %v2590_v45  ;;  %3988 = vmatpush3.bf16.xpose.msra.mxu1 %v2636_v46 }
 0x82f   : > { %3993 = vmatprep.subr.bf16.mxu0 %v4200_v9  ;;  %3999 = vmatprep.subr.bf16.mxu1 %v4200_v9 }
 0x832   : > { %v2312_v21 = vpop.f32.mrb[64].mxu0  ;;  %v2364_v0 = vpop.f32.mrb[56].mxu1 }
 0x833   : > { %v2584_v50 = vpack.c.bf16 %v2312_v21, %v2312_v21  ;;  %v2585_v51 = vpack.c.bf16 %v2364_v0, %v2364_v0  ;;  %v3939_v52 = vpop.f32.mrb[65].mxu0  ;;  %v3947_v53 = vpop.f32.mrb[57].mxu1 }
 0x834   : > { %v2315_v54 = vpop.f32.mrb[66].mxu0  ;;  %v2367_v55 = vpop.f32.mrb[58].mxu1 }
 0x835   : > { %v2682_v56 = vsel %vm1295_vm2, %v2584_v50, 0  ;;  %v2728_v57 = vsel %vm1295_vm2, %v2585_v51, 0  ;;  %v3940_v58 = vpop.f32.mrb[67].mxu0  ;;  %v3948_v59 = vpop.f32.mrb[59].mxu1  ;;  %3984 = vmatmul.mubr.msk.bf16.vlgmr.msra.gmra.mrb[76].mxu0 %vm1295_vm2, %v2578_v48  ;;  %3990 = vmatmul.mubr.msk.bf16.vlgmr.msra.gmra.mrb[68].mxu1 %vm1295_vm2, %v2579_v49 }
 0x836   : > { %3994 = vmatpush3.bf16.xpose.msra.mxu0 %v2682_v56  ;;  %4000 = vmatpush3.bf16.xpose.msra.mxu1 %v2728_v57 }
 0x837   : > { %3995 = vmatprep.mubr.msk.bf16.mxu0 %vm4201_vm1, %v4200_v9  ;;  %4001 = vmatprep.mubr.msk.bf16.mxu1 %vm4201_vm1, %v4200_v9 }
 0x838   : > { %4005 = vmatprep.subr.bf16.mxu0 %v4200_v9  ;;  %4011 = vmatprep.subr.bf16.mxu1 %v4200_v9 }
 0x83a   : > { %v2416_v62 = vpop.f32.mrb[68].mxu0  ;;  %v2468_v3 = vpop.f32.mrb[60].mxu1 }
 0x83b   : > { %v2822_v63 = vpack.c.bf16 %v2416_v62, %v2416_v62  ;;  %v3955_v1 = vpop.f32.mrb[69].mxu0  ;;  %v2823_v5 = vpack.c.bf16 %v2468_v3, %v2468_v3  ;;  %v3963_v7 = vpop.f32.mrb[61].mxu1 }
 0x83c   : > { %v2419_v2 = vpop.f32.mrb[70].mxu0  ;;  %v2471_v8 = vpop.f32.mrb[62].mxu1 }
 0x83d   : > { %3996 = vmatmul.mubr.msk.bf16.vlgmr.msra.gmra.mrb[80].mxu0 %vm1295_vm2, %v2580_v60  ;;  %4002 = vmatmul.mubr.msk.bf16.vlgmr.msra.gmra.mrb[72].mxu1 %vm1295_vm2, %v2581_v61  ;;  %v2830_v4 = vsel %vm1548_vm3, %v2822_v63, 0  ;;  %v3956_v6 = vpop.f32.mrb[71].mxu0  ;;  %v2876_v10 = vsel %vm1548_vm3, %v2823_v5, 0  ;;  %v3964_v11 = vpop.f32.mrb[63].mxu1 }
 0x83e   : > { %4007 = vmatprep.mubr.msk.bf16.mxu0 %vm4201_vm1, %v4200_v9  ;;  %4013 = vmatprep.mubr.msk.bf16.mxu1 %vm4201_vm1, %v4200_v9 }
 0x83f   : > { %4006 = vmatpush3.bf16.msra.mxu0 %v2830_v4  ;;  %4012 = vmatpush3.bf16.msra.mxu1 %v2876_v10 }
 0x840   : > { %4017 = vmatprep.subr.bf16.mxu0 %v4200_v9  ;;  %4023 = vmatprep.subr.bf16.mxu1 %v4200_v9 }
 0x842   : > { %v4724_v12 = vpop.f32.mrb[72].mxu0 }
 0x843   : > { %v4726_v13 = vpop.f32.mrb[64].mxu1  ;;  %v3971_v14 = vpop.f32.mrb[73].mxu0  ;;  %v2824_v10 = vpack.c.bf16 %v4724_v12, %v4724_v12  ;;  %v613_v12 = vld [vmem:[%s4861_s11 + $0x4] sm:$0xf] }
 0x844   : > { %v3979_v15 = vpop.f32.mrb[65].mxu1  ;;  %v2523_v16 = vpop.f32.mrb[74].mxu0  ;;  %v2825_v7 = vpack.c.bf16 %v4726_v13, %v4726_v13 }
 0x845   : > { %v2575_v17 = vpop.f32.mrb[66].mxu1  ;;  %v3972_v18 = vpop.f32.mrb[75].mxu0 }
 0x846   : > { %v3980_v19 = vpop.f32.mrb[67].mxu1  ;;  %v2968_v16 = vsel %vm1548_vm3, %v2825_v7, 0  ;;  %v2922_v17 = vsel %vm1548_vm3, %v2824_v10, 0 }
 0x908   : > { %v2626_v20 = vpop.f32.mrb[76].mxu0  ;;  %v2672_v22 = vpop.f32.mrb[68].mxu1 }
 0x909   : > { %v2770_v23 = vmul.f32 0.35355338, %v2626_v20  ;;  %v2771_v24 = vmul.f32 0.35355338, %v2672_v22  ;;  %v3985_v25 = vpop.f32.mrb[77].mxu0  ;;  %v3991_v26 = vpop.f32.mrb[69].mxu1 }
 0x90a   : > { %v2629_v27 = vpop.f32.mrb[78].mxu0  ;;  %v2675_v28 = vpop.f32.mrb[70].mxu1  ;;  %v612_v20 = vld [vmem:[%s4861_s11] sm:$0xf] }
 0x90b   : > { %v3986_v29 = vpop.f32.mrb[79].mxu0  ;;  %v3992_v30 = vpop.f32.mrb[71].mxu1  ;;  %v2777_v31 = vsel %vm1295_vm2, %v2771_v24, -inf  ;;  %v2774_v32 = vsel %vm1295_vm2, %v2770_v23, -inf  ;;  %v3018_v26 = vsel %vm1548_vm3, %v612_v20, 0 }
 0x90c   : > { %2778 = vmax.xlane.f32.xlu1 %v2777_v31  ;;  %2775 = vmax.xlane.f32.xlu0 %v2774_v32  ;;  %v615_v27 = vld [vmem:[%s4861_s11 + $0xc] sm:$0xf]  ;;  %v614_v28 = vld [vmem:[%s4861_s11 + $0x8] sm:$0xf] }
 0x910   : > { %v2718_v33 = vpop.f32.mrb[80].mxu0  ;;  %v2764_v34 = vpop.f32.mrb[72].mxu1 }
 0x911   : > { %v2772_v35 = vmul.f32 0.35355338, %v2718_v33  ;;  %v2773_v36 = vmul.f32 0.35355338, %v2764_v34  ;;  %v3997_v37 = vpop.f32.mrb[81].mxu0  ;;  %v4003_v39 = vpop.f32.mrb[73].mxu1 }
 0x912   : > { %v2721_v40 = vpop.f32.mrb[82].mxu0  ;;  %v2767_v41 = vpop.f32.mrb[74].mxu1  ;;  %v3156_v33 = vsel %vm1548_vm3, %v615_v27, 0  ;;  %v3110_v37 = vsel %vm1548_vm3, %v614_v28, 0  ;;  %v4142_v28 = vld [vmem:[%s4864_s14] sm:$0xff]  }
 0x913   : > { %v3998_v43 = vpop.f32.mrb[83].mxu0  ;;  %v4004_v44 = vpop.f32.mrb[75].mxu1  ;;  %v2783_v45 = vsel %vm1295_vm2, %v2773_v36, -inf  ;;  %v2780_v46 = vsel %vm1295_vm2, %v2772_v35, -inf }
 0x914   : > { %2784 = vmax.xlane.f32.xlu1 %v2783_v45  ;;  %2781 = vmax.xlane.f32.xlu0 %v2780_v46 }
 0x999   : > { %v2779_v38 = vpop.xlane.xlu1 %2778  ;;  %v2776_v47 = vpop.xlane.xlu0 %2775 }
 0x99a   : > { %v2787_v21 = vsub.f32 %v2771_v24, %v2779_v38  ;;  %v2786_v0 = vsub.f32 %v2770_v23, %v2776_v47  ;;  %v3064_v24 = vsel %vm1548_vm3, %v613_v12, 0 }
 0x99c   : > { %v2792_v48 = vmul.f32 1.442695, %v2787_v21  ;;  %v2790_v49 = vmul.f32 1.442695, %v2786_v0 }
 0x99e   : > { %4170 = vpow2.f32 %v2792_v48 }
 0x99f   : > { %4172 = vpow2.f32 %v2790_v49 }
 0x9a1   : > { %v2785_v50 = vpop.xlane.xlu1 %2784  ;;  %v2782_v51 = vpop.xlane.xlu0 %2781 }
 0x9a2   : > { %v2789_v52 = vsub.f32 %v2773_v36, %v2785_v50  ;;  %v2788_v53 = vsub.f32 %v2772_v35, %v2782_v51 }
 0x9a4   : > { %v2796_v54 = vmul.f32 1.442695, %v2789_v52  ;;  %v2794_v55 = vmul.f32 1.442695, %v2788_v53 }
 0x9a6   : > { %4174 = vpow2.f32 %v2796_v54 }
 0x9a7   : > { %4176 = vpow2.f32 %v2794_v55 }
 0x9a8   : > { %v4171_v56 = vpop.eup %4170 }
 0x9a9   : > { %v4173_v57 = vpop.eup %4172  ;;  %v2801_v58 = vsel %vm1295_vm2, %v4171_v56, 0.0 }
 0x9aa   : > { %2802 = vadd.xlane.f32.xlu1 %v2801_v58  ;;  %v2798_v59 = vsel %vm1295_vm2, %v4173_v57, 0.0 }
 0x9ab   : > { %2799 = vadd.xlane.f32.xlu0 %v2798_v59 }
 0x9b0   : > { %v4175_v60 = vpop.eup %4174 }
 0x9b1   : > { %v4177_v61 = vpop.eup %4176  ;;  %v2807_v62 = vsel %vm1295_vm2, %v4175_v60, 0.0 }
 0x9b2   : > { %2808 = vadd.xlane.f32.xlu1 %v2807_v62  ;;  %v2804_v63 = vsel %vm1295_vm2, %v4177_v61, 0.0 }
 0x9b3   : > { %2805 = vadd.xlane.f32.xlu0 %v2804_v63 }
 0xa37   : > { %v2803_v1 = vpop.xlane.xlu1 %2802 }
 0xa38   : > { %4178 = vrcp.f32 %v2803_v1  ;;  %v2800_v2 = vpop.xlane.xlu0 %2799 }
 0xa39   : > { %4180 = vrcp.f32 %v2800_v2 }
 0xa3f   : > { %v2809_v3 = vpop.xlane.xlu1 %2808 }
 0xa40   : > { %4182 = vrcp.f32 %v2809_v3  ;;  %v2806_v4 = vpop.xlane.xlu0 %2805 }
 0xa41   : > { %4184 = vrcp.f32 %v2806_v4 }
 0xa42   : > { %v4179_v5 = vpop.eup %4178 }
 0xa43   : > { %v4181_v6 = vpop.eup %4180  ;;  %v2815_v8 = vmul.f32 %v4179_v5, %v4171_v56 }
 0xa44   : > { %v2814_v11 = vmul.f32 %v4181_v6, %v4173_v57 }
 0xa45   : > { %v2819_v14 = vpack.c.bf16 %v2815_v8, %v2815_v8 }
 0xa46   : > { %v2818_v15 = vpack.c.bf16 %v2814_v11, %v2814_v11 }
 0xa47   : > { %4014 = vmatmul.mubr.msk.bf16.vlgmr.msra.gmra.mrb[76].mxu1 %vm1295_vm2, %v2819_v14 }
 0xa48   : > { %4008 = vmatmul.mubr.msk.bf16.vlgmr.msra.gmra.mrb[84].mxu0 %vm1295_vm2, %v2818_v15  ;;  %4024 = vmatpush3.bf16.msra.mxu1 %v2968_v16 }
 0xa49   : > { %4018 = vmatpush3.bf16.msra.mxu0 %v2922_v17  ;;  %4019 = vmatprep.mubr.msk.bf16.mxu0 %vm4201_vm1, %v4200_v9 }
 0xa4a   : > { %v4183_v13 = vpop.eup %4182  ;;  %4025 = vmatprep.mubr.msk.bf16.mxu1 %vm4201_vm1, %v4200_v9  ;;  %4029 = vmatprep.subr.bf16.mxu0 %v4200_v9 }
 0xa4b   : > { %v4185_v18 = vpop.eup %4184  ;;  %v2817_v19 = vmul.f32 %v4183_v13, %v4175_v60  ;;  %4035 = vmatprep.subr.bf16.mxu1 %v4200_v9 }
 0xa4c   : > { %v2816_v22 = vmul.f32 %v4185_v18, %v4177_v61  ;;  %v4140_v18 = vld [vmem:[%s4863_s13] sm:$0xff]  }
 0xa4d   : > { %v2821_v23 = vpack.c.bf16 %v2817_v19, %v2817_v19 }
 0xa4e   : > { %v2820_v25 = vpack.c.bf16 %v2816_v22, %v2816_v22 }
 0xa4f   : > { %4026 = vmatmul.mubr.msk.bf16.vlgmr.msra.gmra.mrb[80].mxu1 %vm1295_vm2, %v2821_v23 }
 0xa50   : > { %4020 = vmatmul.mubr.msk.bf16.vlgmr.msra.gmra.mrb[88].mxu0 %vm1295_vm2, %v2820_v25  ;;  %4036 = vmatpush3.bf16.msra.mxu1 %v3064_v24  ;;  %v3571_v24 = vld [vmem:[%s4862_s12] ss:$0 sm:$0xff] }
 0xa51   : > { %4030 = vmatpush3.bf16.msra.mxu0 %v3018_v26  ;;  %4031 = vmatprep.mubr.msk.bf16.mxu0 %vm4201_vm1, %v4200_v9 }
 0xa52   : > { %4037 = vmatprep.mubr.msk.bf16.mxu1 %vm4201_vm1, %v4200_v9  ;;  %4041 = vmatprep.subr.bf16.mxu0 %v4200_v9 }
 0xa53   : > { %4047 = vmatprep.subr.bf16.mxu1 %v4200_v9 }
 0xb1a   : > { %v2912_v29 = vpop.f32.mrb[76].mxu1 }
 0xb1b   : > { %v2866_v30 = vpop.f32.mrb[84].mxu0  ;;  %v3011_v31 = vpack.c.bf16 %v2912_v29, %v2912_v29  ;;  %v4015_v32 = vpop.f32.mrb[77].mxu1  ;;  %v4143_v29 = vld [vmem:[%s4864_s14 + $0x8] sm:$0xff]  }
 0xb1c   : > { %v3010_v34 = vpack.c.bf16 %v2866_v30, %v2866_v30  ;;  %v4009_v35 = vpop.f32.mrb[85].mxu0  ;;  %v2915_v36 = vpop.f32.mrb[78].mxu1  ;;  %v4144_v30 = vld [vmem:[%s4864_s14 + $0x10] sm:$0xff]   ;;  %v4146_v32 = vld [vmem:[%s4864_s14 + $0x20] sm:$0xff]  }
 0xb1d   : > { %v2869_v39 = vpop.f32.mrb[86].mxu0  ;;  %v4016_v40 = vpop.f32.mrb[79].mxu1  ;;  %4038 = vmatmul.mubr.msk.bf16.vlgmr.msra.gmra.mrb[84].mxu1 %vm1295_vm2, %v3011_v31  ;;  %v4145_v31 = vld [vmem:[%s4864_s14 + $0x18] sm:$0xff]  }
 0xb1e   : > { %v4010_v41 = vpop.f32.mrb[87].mxu0  ;;  %4032 = vmatmul.mubr.msk.bf16.vlgmr.msra.gmra.mrb[92].mxu0 %vm1295_vm2, %v3010_v34  ;;  %4048 = vmatpush3.bf16.msra.mxu1 %v3156_v33  ;;  %v4147_v33 = vld [vmem:[%s4864_s14 + $0x28] sm:$0xff]   ;;  %v4148_v34 = vld [vmem:[%s4864_s14 + $0x30] sm:$0xff]   ;;  %v4149_v35 = vld [vmem:[%s4864_s14 + $0x38] sm:$0xff]  }
 0xb1f   : > { %4042 = vmatpush3.bf16.msra.mxu0 %v3110_v37  ;;  %4043 = vmatprep.mubr.msk.bf16.mxu0 %vm4201_vm1, %v4200_v9 }
 0xb20   : > { %4049 = vmatprep.mubr.msk.bf16.mxu1 %vm4201_vm1, %v4200_v9  ;;  %4053 = vmatprep.subr.bf16.mxu0 %v4200_v9 }
 0xb21   : > { %4061 = vmatprep.subr.bf16.mxu1 %v4200_v9 }
 0xb22   : > { %v3004_v43 = vpop.f32.mrb[80].mxu1 }
 0xb23   : > { %v2958_v44 = vpop.f32.mrb[88].mxu0  ;;  %v3013_v45 = vpack.c.bf16 %v3004_v43, %v3004_v43  ;;  %v4027_v46 = vpop.f32.mrb[81].mxu1 }
 0xb24   : > { %v3012_v38 = vpack.c.bf16 %v2958_v44, %v2958_v44  ;;  %v4021_v47 = vpop.f32.mrb[89].mxu0  ;;  %v3007_v21 = vpop.f32.mrb[82].mxu1 }
 0xb25   : > { %v2961_v0 = vpop.f32.mrb[90].mxu0  ;;  %v4028_v48 = vpop.f32.mrb[83].mxu1  ;;  %4050 = vmatmul.mubr.msk.bf16.vlgmr.msra.gmra.mrb[88].mxu1 %vm1295_vm2, %v3013_v45 }
 0xb26   : > { %v4022_v49 = vpop.f32.mrb[91].mxu0  ;;  %4044 = vmatmul.mubr.msk.bf16.vlgmr.msra.gmra.mrb[96].mxu0 %vm1295_vm2, %v3012_v38  ;;  %4077 = vmatprep.mubr.msk.bf16.mxu1 %vm4201_vm1, %v4200_v9 }
 0xb27   : > { %4057 = vmatprep.mubr.msk.bf16.mxu0 %vm4201_vm1, %v4200_v9  ;;  %4054 = vmatpush3.bf16.msra.mxu0 %v4140_v18 }
 0xb28   : > { %4055 = vmatprep.subr.bf16.mxu0 %v4200_v9  ;;  %4062 = vmatpush3.bf16.msra.mxu1 %v4142_v28 }
 0xb29   : > { %4063 = vmatprep.subr.bf16.mxu1 %v4200_v9 }
 0xb2c   : > { %4064 = vmatpush3.bf16.msra.mxu1 %v4143_v29 }
 0xb2d   : > { %4065 = vmatprep.subr.bf16.mxu1 %v4200_v9 }
 0xb30   : > { %4066 = vmatpush3.bf16.msra.mxu1 %v4144_v30 }
 0xb31   : > { %4067 = vmatprep.subr.bf16.mxu1 %v4200_v9 }
 0xb34   : > { %4068 = vmatpush3.bf16.msra.mxu1 %v4145_v31 }
 0xb35   : > { %4069 = vmatprep.subr.bf16.mxu1 %v4200_v9 }
 0xb38   : > { %4070 = vmatpush3.bf16.msra.mxu1 %v4146_v32 }
 0xb39   : > { %4071 = vmatprep.subr.bf16.mxu1 %v4200_v9 }
 0xb3c   : > { %4072 = vmatpush3.bf16.msra.mxu1 %v4147_v33 }
 0xb3d   : > { %4073 = vmatprep.subr.bf16.mxu1 %v4200_v9 }
 0xb40   : > { %4074 = vmatpush3.bf16.msra.mxu1 %v4148_v34 }
 0xb41   : > { %4075 = vmatprep.subr.bf16.mxu1 %v4200_v9 }
 0xb44   : > { %4076 = vmatpush3.bf16.msra.mxu1 %v4149_v35 }
 0xbf0   : > { %v3100_v50 = vpop.f32.mrb[84].mxu1 }
 0xbf1   : > { %v3054_v51 = vpop.f32.mrb[92].mxu0  ;;  %v3199_v52 = vsel %vm637_vm0, %v3100_v50, 0.0  ;;  %v4039_v53 = vpop.f32.mrb[85].mxu1 }
 0xbf2   : > { %v3198_v54 = vsel %vm637_vm0, %v3054_v51, 0.0  ;;  %v4033_v55 = vpop.f32.mrb[93].mxu0  ;;  %v3103_v56 = vpop.f32.mrb[86].mxu1 }
 0xbf3   : > { %v3200_v57 = vadd.f32 %v3199_v52, %v3198_v54  ;;  %v3057_v58 = vpop.f32.mrb[94].mxu0  ;;  %v4040_v59 = vpop.f32.mrb[87].mxu1 }
 0xbf4   : > { %v4034_v60 = vpop.f32.mrb[95].mxu0  ;;  %v4202_v58 = vmov -1.0  }
 0xbf8   : > { %v3192_v61 = vpop.f32.mrb[88].mxu1 }
 0xbf9   : > { %v3146_v62 = vpop.f32.mrb[96].mxu0  ;;  %v4051_v63 = vpop.f32.mrb[89].mxu1  ;;  %v3203_v7 = vsel %vm637_vm0, %v3192_v61, 0.0 }
 0xbfa   : > { %v3201_v1 = vsel %vm637_vm0, %v3146_v62, 0.0  ;;  %v4045_v2 = vpop.f32.mrb[97].mxu0  ;;  %v3195_v3 = vpop.f32.mrb[90].mxu1 }
 0xbfb   : > { %v3202_v4 = vadd.f32 %v3201_v1, %v3200_v57  ;;  %v3149_v5 = vpop.f32.mrb[98].mxu0  ;;  %v4052_v6 = vpop.f32.mrb[91].mxu1 }
 0xbfc   : > { %v4046_v8 = vpop.f32.mrb[99].mxu0 }
 0xbfd   : > { %v3204_v10 = vadd.f32 %v3203_v7, %v3202_v4 }
 0xbff   : > { %v4793_v11 = vadd.f32 %v3204_v10, %v4555_v42  ;;  %v4141_v42 = vld [vmem:[%s4863_s13 + $0x8] sm:$0xff]  }
 0xc00   : > { %4056 = vmatpush3.bf16.msra.mxu0 %v4141_v42 }
 0xc01   : > { %v3206_v14 = vsel %vm637_vm0, %v4793_v11, 0.0 }
 0xc02   : > { %3207 = vadd.xlane.f32.xlu0 %v3206_v14 }
 0xc8f   : > { %v3208_v15 = vpop.xlane.xlu0 %3207 }
 0xc90   : > { %v3209_v16 = vmul.f32 0.03125, %v3208_v15 }
 0xc92   : > { %v3210_v17 = vsub.f32 %v4793_v11, %v3209_v16 }
 0xc94   : > { %v3211_v13 = vmul.f32 %v3210_v17, %v3210_v17 }
 0xc96   : > { %v3212_v12 = vsel %vm637_vm0, %v3211_v13, 0.0 }
 0xc97   : > { %3213 = vadd.xlane.f32.xlu1 %v3212_v12 }
 0xd24   : > { %v3214_v19 = vpop.xlane.xlu1 %3213 }
 0xd25   : > { %v3215_v20 = vmul.f32 0.03125, %v3214_v19 }
 0xd27   : > { %v3216_v22 = vadd.f32 1e-05, %v3215_v20 }
 0xd29   : > { %4186 = vrsqrt.f32 %v3216_v22 }
 0xd33   : > { %v4187_v23 = vpop.eup %4186 }
 0xd34   : > { %v3218_v25 = vmul.f32 %v4187_v23, %v3210_v17 }
 0xd36   : > { %v3225_v26 = vmul.f32 %v3571_v24, %v3218_v25 }
 0xd38   : > { %v3226_v27 = vpack.c.bf16 %v3225_v26, %v3225_v26 }
 0xd3a   : > { %4058 = vmatmul.mubr.msk.bf16.vlgmr.msra.gmra.mrb[100].mxu0 %vm637_vm0, %v3226_v27 }
 0xe0d   : > { %v3276_v36 = vpop.f32.mrb[100].mxu0 }
 0xe0e   : > { %v3283_v37 = vmul.f32 0.70710677, %v3276_v36  ;;  %v4059_v39 = vpop.f32.mrb[101].mxu0  ;;  %v3282_v61 = vmul.f32 0.5, %v3276_v36 }
 0xe0f   : > { %v3279_v40 = vpop.f32.mrb[102].mxu0 }
 0xe10   : > { %v3286_v41 = vand.u32 2147483647, %v3283_v37  ;;  %v4060_v43 = vpop.f32.mrb[103].mxu0  ;;  %vm3284_vm5 = vcmp.ge.f32.partialorder %v3283_v37, 0.0 }
 0xe11   : > { %v3285_v59 = vsel %vm3284_vm5, 1.0, %v4202_v58 }
 0xe12   : > { %v3287_v44 = vmul.f32 0.3275911, %v3286_v41  ;;  %v3300_v46 = vsub.f32 0.0, %v3286_v41 }
 0xe14   : > { %v3288_v45 = vadd.f32 1.0, %v3287_v44  ;;  %v3301_v47 = vmul.f32 %v3300_v46, %v3286_v41 }
 0xe16   : > { %4188 = vrcp.f32 %v3288_v45  ;;  %v3302_v9 = vmul.f32 1.442695, %v3301_v47 }
 0xe18   : > { %4190 = vpow2.f32 %v3302_v9 }
 0xe20   : > { %v4189_v38 = vpop.eup %4188 }
 0xe21   : > { %v3291_v21 = vmul.f32 1.0614054, %v4189_v38 }
 0xe22   : > { %v4191_v55 = vpop.eup %4190 }
 0xe23   : > { %v3292_v0 = vadd.f32 -1.4531521, %v3291_v21 }
 0xe25   : > { %v3293_v48 = vmul.f32 %v4189_v38, %v3292_v0 }
 0xe27   : > { %v3294_v49 = vadd.f32 1.4214138, %v3293_v48 }
 0xe29   : > { %v3295_v50 = vmul.f32 %v4189_v38, %v3294_v49 }
 0xe2b   : > { %v3296_v51 = vadd.f32 -0.28449672, %v3295_v50 }
 0xe2d   : > { %v3297_v52 = vmul.f32 %v4189_v38, %v3296_v51 }
 0xe2f   : > { %v3298_v53 = vadd.f32 0.2548296, %v3297_v52 }
 0xe31   : > { %v3299_v54 = vmul.f32 %v4189_v38, %v3298_v53 }
 0xe33   : > { %v3304_v56 = vmul.f32 %v4191_v55, %v3299_v54 }
 0xe35   : > { %v3305_v57 = vsub.f32 1.0, %v3304_v56 }
 0xe37   : > { %v3306_v60 = vmul.f32 %v3305_v57, %v3285_v59 }
 0xe39   : > { %v3307_v62 = vadd.f32 1.0, %v3306_v60 }
 0xe3b   : > { %v3308_v63 = vmul.f32 %v3307_v62, %v3282_v61 }
 0xe3d   : > { %v3309_v1 = vpack.c.bf16 %v3308_v63, %v3308_v63 }
 0xe3f   : > { %4078 = vmatmul.mubr.bf16.vlgmr.msra.gmra.mrb[92].mxu1 %v3309_v1 }
 0xf12   : > { %v3392_v2 = vpop.f32.mrb[92].mxu1 }
 0xf13   : > { %v3398_v3 = vadd.f32 %v3392_v2, %v4793_v11  ;;  %v4079_v4 = vpop.f32.mrb[93].mxu1 }
 0xf14   : > { %v3395_v5 = vpop.f32.mrb[94].mxu1 }
 0xf15   : > { %3399 = vst.msk [vmem:[%s506_s24] sm:$0xff] %vm637_vm0, %v3398_v3  ;;  %v4080_v6 = vpop.f32.mrb[95].mxu1 }
 0xf16 PF: > { %s25_s18 = sadd.s32 1, %s4198_s18  }
 0xf17   : > { %p22_p4 = scmp.ge.s32.totalorder %s25_s18, 4  }
 0xf19   :  { %24 = sbr.rel (!%p22_p4) target bundleno = 1 (0x1), region = 113 }

// kernel: _lambda_.7
= control target key start
LH: loop header
LB: loop body
LE: loop exit
PB: predicated region body
PF: predicated region fallthrough
CT: control target
= control target key end

     0   :  { %s5219_s0 = inlined_call_operand.vmem [shape: f32[2,8,32], index: 0, kind: input, shape index: {}]   ;;  %s5220_s1 = inlined_call_operand.vmem [shape: f32[2,8,32], index: 1, kind: input, shape index: {}]   ;;  %s5221_s2 = inlined_call_operand.vmem [shape: f32[1,32], index: 2, kind: input, shape index: {}]   ;;  %s5222_s3 = inlined_call_operand.vmem [shape: bf16[4,32,8], index: 3, kind: input, shape index: {}]   ;;  %s5223_s4 = inlined_call_operand.vmem [shape: bf16[4,32,8], index: 4, kind: input, shape index: {}]   ;;  %s5224_s5 = inlined_call_operand.vmem [shape: bf16[4,32,8], index: 5, kind: input, shape index: {}]   ;;  %s5225_s6 = inlined_call_operand.vmem [shape: bf16[4,8,32], index: 6, kind: input, shape index: {}]   ;;  %s5226_s7 = inlined_call_operand.vmem [shape: f32[1,32], index: 7, kind: input, shape index: {}]   ;;  %s5227_s8 = inlined_call_operand.vmem [shape: bf16[4,32,8], index: 8, kind: input, shape index: {}]   ;;  %s5228_s9 = inlined_call_operand.vmem [shape: bf16[4,32,8], index: 9, kind: input, shape index: {}]   ;;  %s5229_s10 = inlined_call_operand.vmem [shape: bf16[4,32,8], index: 10, kind: input, shape index: {}]   ;;  %s5230_s11 = inlined_call_operand.vmem [shape: bf16[4,8,32], index: 11, kind: input, shape index: {}]   ;;  %s5231_s12 = inlined_call_operand.vmem [shape: f32[1,32], index: 12, kind: input, shape index: {}]   ;;  %s5232_s13 = inlined_call_operand.vmem [shape: bf16[32,128], index: 13, kind: input, shape index: {}]   ;;  %s5233_s14 = inlined_call_operand.vmem [shape: bf16[128,32], index: 14, kind: input, shape index: {}]   ;;  %s5234_s15 = inlined_call_operand.vmem [shape: f32[1,32], index: 15, kind: input, shape index: {}]   ;;  %s5235_s16 = inlined_call_operand.vmem [shape: bf16[32,48], index: 16, kind: input, shape index: {}]   ;;  %s5236_s17 = inlined_call_operand.hbm [shape: f32[2,1,48], index: 17, kind: output, shape index: {}]  }
   0x1   :  { %5239 = sst [smem:[#allocation7_spill]] %s5219_s0 }
   0x2   :  { %5240 = sst [smem:[#allocation8_spill]] %s5220_s1 }
   0x3   :  { %5241 = sst [smem:[#allocation9_spill]] %s5221_s2 }
   0x4   :  { %5242 = sst [smem:[#allocation10_spill]] %s5222_s3 }
   0x5   :  { %22 = vsyncpa [#allocation3], 0 }
   0x6   :  { %24 = vsyncpa [#allocation3 + $0x1], 0  ;;  %s4554_s24 = smov 0   ;;  %s4556_s25 = smov 0  }
   0x7   :  { %s4558_s26 = smov 0   ;;  %s4560_s27 = smov 0  }
   0x8 LB: > { %5243 = sst [smem:[#allocation5_spill]] %s4454_s26  ;;  %s4575_s28 = sadd.s32 4294967295, %s4458_s27   ;;  %s4458_s27 = sphi %s4560_s27, %s5256_s27   ;;  %s4454_s26 = sphi %s4558_s26, %s5253_s26   ;;  %s4450_s25 = sphi %s4556_s25, %s5255_s25   ;;  %s4446_s24 = sphi %s4554_s24, %s5254_s24  }
   0x9   : > { %s3620_s29 = sadd.s32 4294967294, %s4458_s27   ;;  %s4579_s0 = sadd.s32 1, %s4458_s27  }
   0xa   : > { %s404_s30 = sadd.s32 1, %s4454_s26  ;;  %s401_s18 = ssub.s32 %s4458_s27, %s4579_s0 }
   0xb   : > { %p414_p0 = scmp.ne.s32.totalorder %s4454_s26, %s4450_s25  ;;  %p402_p1 = scmp.eq.s32.totalorder %s401_s18, 0 }
   0xc   : > { %p415_p2 = scmp.eq.s32.totalorder %s4575_s28, 1  ;;  %p420_p3 = scmp.ne.s32.totalorder %s4450_s25, %s4446_s24 }
   0xd   : > { %p421_p4 = scmp.eq.s32.totalorder %s3620_s29, 1  ;;  %p3623_p7 = scmp.ge.s32.totalorder %s4458_s27, 1 }
   0xe   : > { %s4590_s19 = scalar_select %p402_p1, %s4454_s26, %s404_s30  }
   0xf   : > { %p4592_p5 = por %p415_p2, %p414_p0  ;;  %p4596_p6 = por %p421_p4, %p420_p3 }
  0x10   : > { %5244 = sst [smem:[#allocation6_spill]] %s4590_s19  ;;  %p498_p8 = scmp.lt.s32.totalorder %s4458_s27, 3 }
  0x12   : > { %p499_p9 = pnand %p3623_p7, %p498_p8 }
  0x13   : > { %p552_p10 = scmp.lt.s32.totalorder (!%p499_p9), %s4575_s28, 1  ;;  %vm690_vm0 = vcmask (!%p499_p9), 261120   ;;  %s5247_s30 = sld [smem:[#allocation7_spill]] (!%p499_p9)  ;;  %v4460_v9 = vmov (!%p499_p9), 0.0   ;;  %vm4461_vm1 = vmmov (!%p499_p9), 0   ;;  %v4297_v20 = vld [vmem:[%s5223_s4 + $0x10] sm:$0xff] (!%p499_p9)  }
  0x14   : > { %502 = sbr.rel (%p499_p9) target bundleno = 4420 (0x1144), region = 88  ;;  %s5248_s3 = sld [smem:[#allocation10_spill]] (!%p499_p9)  ;;  %3878 = vmatprep.subr.bf16.mxu0 (!%p499_p9), %v4460_v9  ;;  %3902 = vmatprep.subr.bf16.mxu1 (!%p499_p9), %v4460_v9  ;;  %v4299_v23 = vld [vmem:[%s5223_s4 + $0x18] sm:$0xff] (!%p499_p9)   ;;  %v4301_v25 = vld [vmem:[%s5223_s4 + $0x30] sm:$0xff] (!%p499_p9)   ;;  %v4304_v28 = vld [vmem:[%s5223_s4] sm:$0xff] (!%p499_p9)   ;;  %vm1348_vm2 = vcmask (!%p499_p9), 64512  }
  0x15   : > { %3882 = vmatprep.mubr.msk.bf16.mxu0 (!%p499_p9), %vm4461_vm1, %v4460_v9  ;;  %3906 = vmatprep.mubr.msk.bf16.mxu1 (!%p499_p9), %vm4461_vm1, %v4460_v9  ;;  %s5249_s2 = sld [smem:[#allocation9_spill]] (!%p499_p9)  ;;  %v4303_v27 = vld [vmem:[%s5223_s4 + $0x38] sm:$0xff] (!%p499_p9)   ;;  %v4305_v29 = vld [vmem:[%s5224_s5 + $0x10] sm:$0xff] (!%p499_p9)   ;;  %v4306_v30 = vld [vmem:[%s5223_s4 + $0x8] sm:$0xff] (!%p499_p9)   ;;  %vm1601_vm3 = vcmask (!%p499_p9), 1043456   ;;  %vm3453_vm6 = vcmask (!%p499_p9), 261127  }
  0x16   : > { %v4307_v31 = vld [vmem:[%s5224_s5 + $0x18] sm:$0xff] (!%p499_p9)   ;;  %v4308_v32 = vld [vmem:[%s5223_s4 + $0x20] sm:$0xff] (!%p499_p9)   ;;  %v4309_v33 = vld [vmem:[%s5224_s5 + $0x30] sm:$0xff] (!%p499_p9)   ;;  %s3740_s19 = sshll.u32 (!%p499_p9), %s4575_s28, 4  ;;  %vm3538_vm7 = vcmask (!%p499_p9), 385024  }
  0x17   : > { %v4310_v34 = vld [vmem:[%s5223_s4 + $0x28] sm:$0xff] (!%p499_p9)   ;;  %v4311_v35 = vld [vmem:[%s5224_s5 + $0x38] sm:$0xff] (!%p499_p9)   ;;  %v4312_v36 = vld [vmem:[%s5224_s5] sm:$0xff] (!%p499_p9)  }
  0x18   : > { %v4313_v37 = vld [vmem:[%s5224_s5 + $0x8] sm:$0xff] (!%p499_p9)   ;;  %v4314_v38 = vld [vmem:[%s5224_s5 + $0x20] sm:$0xff] (!%p499_p9)  }
  0x19   : > { %v4315_v39 = vld [vmem:[%s5224_s5 + $0x28] sm:$0xff] (!%p499_p9)  }
  0x1a   : > { %v4292_v7 = vld [vmem:[%s5248_s3] sm:$0xff] (!%p499_p9)   ;;  %v4293_v8 = vld [vmem:[%s5248_s3 + $0x30] sm:$0xff] (!%p499_p9)   ;;  %v4294_v10 = vld [vmem:[%s5248_s3 + $0x8] sm:$0xff] (!%p499_p9)  }
  0x1b   : > { %s4604_s21 = scalar_select %p552_p10, %s4575_s28, 1  ;;  %3879 = vmatpush3.bf16.msra.mxu0 %v4292_v7  ;;  %3903 = vmatpush3.bf16.msra.mxu1 %v4293_v8  ;;  %v4295_v11 = vld [vmem:[%s5248_s3 + $0x38] sm:$0xff]   ;;  %v3626_v16 = vld [vmem:[%s5249_s2] ss:$0 sm:$0xff]  ;;  %v4296_v19 = vld [vmem:[%s5248_s3 + $0x10] sm:$0xff]  }
  0x1c   : > { %3880 = vmatprep.subr.bf16.mxu0 %v4460_v9  ;;  %3904 = vmatprep.subr.bf16.mxu1 %v4460_v9  ;;  %v4298_v22 = vld [vmem:[%s5248_s3 + $0x18] sm:$0xff]   ;;  %v4300_v24 = vld [vmem:[%s5248_s3 + $0x20] sm:$0xff]   ;;  %v4302_v26 = vld [vmem:[%s5248_s3 + $0x28] sm:$0xff]   ;;  %s5177_s2 = scalar_lea.hbm %s5236_s17, %s3740_s19  ;;  %s4463_s28 = smov [#allocation2]  }
  0x1d   : > { %s5238_s22 = sshll.u32 %s4604_s21, 3  ;;  %s5250_s23 = sshll.u32 %s4604_s21, 3 }
  0x1e   : > { %s555_s18 = scalar_lea.vmem %s5247_s30, %s5238_s22  ;;  %s4400_s26 = sshll.u32 %s4463_s28, 4  ;;  %s4401_s26 = int_to_ptr.vmem [resolvable:$false] %s4400_s26 }
  0x1f   : > { %v4612_v0 = vld [vmem:[%s555_s18] sm:$0xff]  ;;  %3881 = vmatpush3.bf16.msra.mxu0 %v4294_v10  ;;  %3905 = vmatpush3.bf16.msra.mxu1 %v4295_v11  ;;  %s5251_s18 = sld [smem:[#allocation8_spill]]  ;;  %s4402_s19 = scalar_lea.vmem %s4401_s26, 32 }
  0x20   : > { %v691_v1 = vsel %vm690_vm0, %v4612_v0, 0.0  ;;  %3886 = vmatprep.subr.bf16.mxu0 %v4460_v9  ;;  %3918 = vmatprep.subr.bf16.mxu1 %v4460_v9 }
  0x21   : > { %692 = vadd.xlane.f32.xlu0 %v691_v1 }
  0x25   : > { %s559_s3 = scalar_lea.vmem %s5251_s18, %s5250_s23 }
  0xae   : > { %v693_v2 = vpop.xlane.xlu0 %692 }
  0xaf   : > { %v695_v3 = vmul.f32 0.03125, %v693_v2 }
  0xb1   : > { %v696_v4 = vsub.f32 %v4612_v0, %v695_v3 }
  0xb3   : > { %v697_v5 = vmul.f32 %v696_v4, %v696_v4 }
  0xb5   : > { %v698_v6 = vsel %vm690_vm0, %v697_v5, 0.0 }
  0xb6   : > { %699 = vadd.xlane.f32.xlu0 %v698_v6 }
 0x143   : > { %v700_v12 = vpop.xlane.xlu0 %699 }
 0x144   : > { %v701_v13 = vmul.f32 0.03125, %v700_v12 }
 0x146   : > { %v702_v14 = vadd.f32 1e-05, %v701_v13 }
 0x148   : > { %4352 = vrsqrt.f32 %v702_v14 }
 0x152   : > { %v4353_v15 = vpop.eup %4352 }
 0x153   : > { %v704_v17 = vmul.f32 %v4353_v15, %v696_v4 }
 0x155   : > { %v711_v18 = vmul.f32 %v3626_v16, %v704_v17 }
 0x157   : > { %v4649_v21 = vpack.c.bf16 %v711_v18, %v711_v18 }
 0x159   : > { %3883 = vmatmul.mubr.msk.bf16.vlgmr.msra.gmra.mrb[0].mxu0 %vm690_vm0, %v4649_v21  ;;  %3907 = vmatmul.mubr.msk.bf16.vlgmr.msra.gmra.mrb[0].mxu1 %vm690_vm0, %v4649_v21 }
 0x15a   : > { %3887 = vmatpush3.bf16.msra.mxu0 %v4296_v19  ;;  %3919 = vmatpush3.bf16.msra.mxu1 %v4297_v20 }
 0x15b   : > { %3888 = vmatprep.subr.bf16.mxu0 %v4460_v9  ;;  %3920 = vmatprep.subr.bf16.mxu1 %v4460_v9 }
 0x15c   : > { %3890 = vmatprep.mubr.msk.bf16.mxu0 %vm4461_vm1, %v4460_v9  ;;  %3922 = vmatprep.mubr.msk.bf16.mxu1 %vm4461_vm1, %v4460_v9 }
 0x15e   : > { %3889 = vmatpush3.bf16.msra.mxu0 %v4298_v22  ;;  %3921 = vmatpush3.bf16.msra.mxu1 %v4299_v23 }
 0x15f   : > { %3894 = vmatprep.subr.bf16.mxu0 %v4460_v9  ;;  %3934 = vmatprep.subr.bf16.mxu1 %v4460_v9 }
 0x161   : > { %3891 = vmatmul.mubr.msk.bf16.vlgmr.msra.gmra.mrb[4].mxu0 %vm690_vm0, %v4649_v21  ;;  %3923 = vmatmul.mubr.msk.bf16.vlgmr.msra.gmra.mrb[4].mxu1 %vm690_vm0, %v4649_v21 }
 0x162   : > { %3895 = vmatpush3.bf16.msra.mxu0 %v4300_v24  ;;  %3935 = vmatpush3.bf16.msra.mxu1 %v4301_v25 }
 0x163   : > { %3896 = vmatprep.subr.bf16.mxu0 %v4460_v9  ;;  %3936 = vmatprep.subr.bf16.mxu1 %v4460_v9 }
 0x164   : > { %3898 = vmatprep.mubr.msk.bf16.mxu0 %vm4461_vm1, %v4460_v9  ;;  %3938 = vmatprep.mubr.msk.bf16.mxu1 %vm4461_vm1, %v4460_v9 }
 0x166   : > { %3897 = vmatpush3.bf16.msra.mxu0 %v4302_v26  ;;  %3937 = vmatpush3.bf16.msra.mxu1 %v4303_v27 }
 0x167   : > { %3910 = vmatprep.subr.bf16.mxu0 %v4460_v9  ;;  %3950 = vmatprep.subr.bf16.mxu1 %v4460_v9 }
 0x169   : > { %3899 = vmatmul.mubr.msk.bf16.vlgmr.msra.gmra.mrb[8].mxu0 %vm690_vm0, %v4649_v21  ;;  %3939 = vmatmul.mubr.msk.bf16.vlgmr.msra.gmra.mrb[8].mxu1 %vm690_vm0, %v4649_v21 }
 0x16a   : > { %3911 = vmatpush3.bf16.msra.mxu0 %v4304_v28  ;;  %3951 = vmatpush3.bf16.msra.mxu1 %v4305_v29 }
 0x16b   : > { %3912 = vmatprep.subr.bf16.mxu0 %v4460_v9  ;;  %3952 = vmatprep.subr.bf16.mxu1 %v4460_v9 }
 0x16c   : > { %3914 = vmatprep.mubr.msk.bf16.mxu0 %vm4461_vm1, %v4460_v9  ;;  %3954 = vmatprep.mubr.msk.bf16.mxu1 %vm4461_vm1, %v4460_v9 }
 0x16e   : > { %3913 = vmatpush3.bf16.msra.mxu0 %v4306_v30  ;;  %3953 = vmatpush3.bf16.msra.mxu1 %v4307_v31 }
 0x16f   : > { %3926 = vmatprep.subr.bf16.mxu0 %v4460_v9  ;;  %3966 = vmatprep.subr.bf16.mxu1 %v4460_v9 }
 0x171   : > { %3915 = vmatmul.mubr.msk.bf16.vlgmr.msra.gmra.mrb[12].mxu0 %vm690_vm0, %v4649_v21  ;;  %3955 = vmatmul.mubr.msk.bf16.vlgmr.msra.gmra.mrb[12].mxu1 %vm690_vm0, %v4649_v21 }
 0x172   : > { %3927 = vmatpush3.bf16.msra.mxu0 %v4308_v32  ;;  %3967 = vmatpush3.bf16.msra.mxu1 %v4309_v33 }
 0x173   : > { %3928 = vmatprep.subr.bf16.mxu0 %v4460_v9  ;;  %3968 = vmatprep.subr.bf16.mxu1 %v4460_v9 }
 0x174   : > { %3930 = vmatprep.mubr.msk.bf16.mxu0 %vm4461_vm1, %v4460_v9  ;;  %3970 = vmatprep.mubr.msk.bf16.mxu1 %vm4461_vm1, %v4460_v9 }
 0x176   : > { %3929 = vmatpush3.bf16.msra.mxu0 %v4310_v34  ;;  %3969 = vmatpush3.bf16.msra.mxu1 %v4311_v35 }
 0x177   : > { %3942 = vmatprep.subr.bf16.mxu0 %v4460_v9  ;;  %3980 = vmatprep.subr.bf16.mxu1 %v4460_v9 }
 0x179   : > { %3931 = vmatmul.mubr.msk.bf16.vlgmr.msra.gmra.mrb[16].mxu0 %vm690_vm0, %v4649_v21  ;;  %3971 = vmatmul.mubr.msk.bf16.vlgmr.msra.gmra.mrb[16].mxu1 %vm690_vm0, %v4649_v21 }
 0x17a   : > { %3943 = vmatpush3.bf16.msra.mxu0 %v4312_v36  ;;  %3946 = vmatprep.mubr.msk.bf16.mxu0 %vm4461_vm1, %v4460_v9 }
 0x17b   : > { %3944 = vmatprep.subr.bf16.mxu0 %v4460_v9  ;;  %3982 = vmatprep.mubr.msk.bf16.mxu1 %vm4461_vm1, %v4460_v9 }
 0x17e   : > { %3945 = vmatpush3.bf16.msra.mxu0 %v4313_v37 }
 0x17f   : > { %3958 = vmatprep.subr.bf16.mxu0 %v4460_v9 }
 0x181   : > { %3947 = vmatmul.mubr.msk.bf16.vlgmr.msra.gmra.mrb[20].mxu0 %vm690_vm0, %v4649_v21 }
 0x182   : > { %3959 = vmatpush3.bf16.msra.mxu0 %v4314_v38  ;;  %3962 = vmatprep.mubr.msk.bf16.mxu0 %vm4461_vm1, %v4460_v9 }
 0x183   : > { %3960 = vmatprep.subr.bf16.mxu0 %v4460_v9 }
 0x186   : > { %3961 = vmatpush3.bf16.msra.mxu0 %v4315_v39 }
 0x187   : > { %3974 = vmatprep.subr.bf16.mxu0 %v4460_v9 }
 0x189   : > { %3963 = vmatmul.mubr.msk.bf16.vlgmr.msra.gmra.mrb[24].mxu0 %vm690_vm0, %v4649_v21 }
 0x18a   : > { %3976 = vmatprep.mubr.msk.bf16.mxu0 %vm4461_vm1, %v4460_v9 }
 0x22c   : > { %v4773_v40 = vpop.f32.mrb[0].mxu0  ;;  %v918_v41 = vpop.f32.mrb[0].mxu1 }
 0x22d   : > { %v3884_v42 = vpop.f32.mrb[1].mxu0  ;;  %v3908_v43 = vpop.f32.mrb[1].mxu1  ;;  %v1343_v8 = vpack.c.bf16 %v918_v41, %v918_v41  ;;  %v1340_v22 = vpack.c.bf16 %v4773_v40, %v4773_v40 }
 0x22e   : > { %v765_v44 = vpop.f32.mrb[2].mxu0  ;;  %v921_v45 = vpop.f32.mrb[2].mxu1 }
 0x22f   : > { %v3885_v46 = vpop.f32.mrb[3].mxu0  ;;  %v3909_v47 = vpop.f32.mrb[3].mxu1 }
 0x234   : > { %v814_v48 = vpop.f32.mrb[4].mxu0  ;;  %v1022_v49 = vpop.f32.mrb[4].mxu1 }
 0x235   : > { %v1345_v50 = vpack.c.bf16 %v1022_v49, %v1022_v49  ;;  %v3892_v51 = vpop.f32.mrb[5].mxu0  ;;  %v3924_v52 = vpop.f32.mrb[5].mxu1  ;;  %v1341_v60 = vpack.c.bf16 %v814_v48, %v814_v48  ;;  %v1537_v49 = vlaneseq }
 0x236   : > { %v817_v53 = vpop.f32.mrb[6].mxu0  ;;  %v1025_v54 = vpop.f32.mrb[6].mxu1 }
 0x237   : > { %v1399_v55 = vsel %vm1348_vm2, %v1345_v50, 0  ;;  %v3893_v56 = vpop.f32.mrb[7].mxu0  ;;  %v3925_v57 = vpop.f32.mrb[7].mxu1  ;;  %v1538_v51 = vshrl.u32 %v1537_v49, 7  ;;  %v1540_v52 = vand.u32 127, %v1537_v49 }
 0x238   : > { %3981 = vmatpush3.bf16.xpose.msra.mxu1 %v1399_v55 }
 0x239   : > { %3992 = vmatprep.subr.bf16.mxu1 %v4460_v9  ;;  %vm1541_vm4 = vcmp.le.s32.totalorder %v1540_v52, %v1538_v51 }
 0x23c   : > { %v866_v58 = vpop.f32.mrb[8].mxu0  ;;  %v1126_v59 = vpop.f32.mrb[8].mxu1 }
 0x23d   : > { %v1347_v61 = vpack.c.bf16 %v1126_v59, %v1126_v59  ;;  %v3900_v62 = vpop.f32.mrb[9].mxu0  ;;  %v3940_v63 = vpop.f32.mrb[9].mxu1  ;;  %v1342_v32 = vpack.c.bf16 %v866_v58, %v866_v58 }
 0x23e   : > { %v869_v1 = vpop.f32.mrb[10].mxu0  ;;  %v1129_v2 = vpop.f32.mrb[10].mxu1 }
 0x23f   : > { %v1491_v3 = vsel %vm1348_vm2, %v1347_v61, 0  ;;  %v3901_v4 = vpop.f32.mrb[11].mxu0  ;;  %v3941_v5 = vpop.f32.mrb[11].mxu1  ;;  %3983 = vmatmul.mubr.msk.bf16.vlgmr.msra.gmra.mrb[20].mxu1 %vm1348_vm2, %v1341_v60 }
 0x240   : > { %3993 = vmatpush3.bf16.xpose.msra.mxu1 %v1491_v3  ;;  %3994 = vmatprep.mubr.msk.bf16.mxu1 %vm4461_vm1, %v4460_v9 }
 0x241   : > { %4004 = vmatprep.subr.bf16.mxu1 %v4460_v9 }
 0x244   : > { %v970_v6 = vpop.f32.mrb[12].mxu0  ;;  %v1230_v7 = vpop.f32.mrb[12].mxu1 }
 0x245   : > { %v1344_v10 = vpack.c.bf16 %v970_v6, %v970_v6  ;;  %v1595_v11 = vpack.c.bf16 %v1230_v7, %v1230_v7  ;;  %v3916_v12 = vpop.f32.mrb[13].mxu0  ;;  %v3956_v13 = vpop.f32.mrb[13].mxu1 }
 0x246   : > { %v973_v14 = vpop.f32.mrb[14].mxu0  ;;  %v1233_v15 = vpop.f32.mrb[14].mxu1 }
 0x247   : > { %v1353_v16 = vsel %vm1348_vm2, %v1344_v10, 0  ;;  %v1649_v17 = vsel %vm1601_vm3, %v1595_v11, 0  ;;  %v3917_v18 = vpop.f32.mrb[15].mxu0  ;;  %v3957_v19 = vpop.f32.mrb[15].mxu1  ;;  %3995 = vmatmul.mubr.msk.bf16.vlgmr.msra.gmra.mrb[24].mxu1 %vm1348_vm2, %v1343_v8 }
 0x248   : > { %3975 = vmatpush3.bf16.xpose.msra.mxu0 %v1353_v16  ;;  %4005 = vmatpush3.bf16.msra.mxu1 %v1649_v17 }
 0x249   : > { %3986 = vmatprep.subr.bf16.mxu0 %v4460_v9  ;;  %4006 = vmatprep.mubr.msk.bf16.mxu1 %vm4461_vm1, %v4460_v9 }
 0x24a   : > { %4016 = vmatprep.subr.bf16.mxu1 %v4460_v9 }
 0x24c   : > { %v1074_v20 = vpop.f32.mrb[16].mxu0  ;;  %v4789_v21 = vpop.f32.mrb[16].mxu1 }
 0x24d   : > { %v1346_v23 = vpack.c.bf16 %v1074_v20, %v1074_v20  ;;  %v3932_v24 = vpop.f32.mrb[17].mxu0  ;;  %v3972_v25 = vpop.f32.mrb[17].mxu1 }
 0x24e   : > { %v1077_v26 = vpop.f32.mrb[18].mxu0  ;;  %v1337_v27 = vpop.f32.mrb[18].mxu1 }
 0x24f   : > { %v1445_v28 = vsel %vm1348_vm2, %v1346_v23, 0  ;;  %v3933_v29 = vpop.f32.mrb[19].mxu0  ;;  %v3973_v30 = vpop.f32.mrb[19].mxu1  ;;  %3977 = vmatmul.mubr.msk.bf16.vlgmr.msra.gmra.mrb[28].mxu0 %vm1348_vm2, %v1340_v22 }
 0x250   : > { %3987 = vmatpush3.bf16.xpose.msra.mxu0 %v1445_v28  ;;  %3988 = vmatprep.mubr.msk.bf16.mxu0 %vm4461_vm1, %v4460_v9 }
 0x251   : > { %3998 = vmatprep.subr.bf16.mxu0 %v4460_v9 }
 0x254   : > { %v1178_v31 = vpop.f32.mrb[20].mxu0 }
 0x255   : > { %v1594_v33 = vpack.c.bf16 %v1178_v31, %v1178_v31  ;;  %v3948_v34 = vpop.f32.mrb[21].mxu0 }
 0x256   : > { %v1181_v35 = vpop.f32.mrb[22].mxu0 }
 0x257   : > { %v1603_v36 = vsel %vm1601_vm3, %v1594_v33, 0  ;;  %v3949_v37 = vpop.f32.mrb[23].mxu0  ;;  %3989 = vmatmul.mubr.msk.bf16.vlgmr.msra.gmra.mrb[32].mxu0 %vm1348_vm2, %v1342_v32 }
 0x258   : > { %3999 = vmatpush3.bf16.msra.mxu0 %v1603_v36  ;;  %4000 = vmatprep.mubr.msk.bf16.mxu0 %vm4461_vm1, %v4460_v9 }
 0x259   : > { %4010 = vmatprep.subr.bf16.mxu0 %v4460_v9 }
 0x25c   : > { %v4803_v38 = vpop.f32.mrb[24].mxu0 }
 0x25d   : > { %v3964_v39 = vpop.f32.mrb[25].mxu0  ;;  %v1596_v37 = vpack.c.bf16 %v4803_v38, %v4803_v38 }
 0x25e   : > { %v1285_v40 = vpop.f32.mrb[26].mxu0 }
 0x25f   : > { %v3965_v41 = vpop.f32.mrb[27].mxu0 }
 0x312   : > { %v1435_v42 = vpop.f32.mrb[20].mxu1 }
 0x313   : > { %v3984_v43 = vpop.f32.mrb[21].mxu1  ;;  %v1534_v54 = vmul.f32 0.35355338, %v1435_v42  ;;  %v1597_v42 = vpack.c.bf16 %v4789_v21, %v4789_v21  ;;  %v612_v21 = vld [vmem:[%s5225_s6] sm:$0xf] }
 0x314   : > { %v1438_v44 = vpop.f32.mrb[22].mxu1  ;;  %v1695_v43 = vsel %vm1601_vm3, %v1596_v37, 0  ;;  %v1791_v51 = vsel %vm1601_vm3, %v612_v21, 0  ;;  %v4316_v21 = vld [vmem:[%s5227_s8] sm:$0xff]  }
 0x315   : > { %v3985_v45 = vpop.f32.mrb[23].mxu1  ;;  %v1543_v62 = vsel %vm1541_vm4, %v1534_v54, -1e+30 }
 0x316   : > { %v1549_v1 = vsel %vm1348_vm2, %v1543_v62, -inf }
 0x31a   : > { %v1527_v46 = vpop.f32.mrb[24].mxu1 }
 0x31b   : > { %v3996_v47 = vpop.f32.mrb[25].mxu1  ;;  %v1536_v61 = vmul.f32 0.35355338, %v1527_v46 }
 0x31c   : > { %v1530_v48 = vpop.f32.mrb[26].mxu1  ;;  %v1741_v47 = vsel %vm1601_vm3, %v1597_v42, 0 }
 0x31d   : > { %v3997_v50 = vpop.f32.mrb[27].mxu1  ;;  %v1545_v4 = vsel %vm1541_vm4, %v1536_v61, -1e+30  ;;  %v615_v61 = vld [vmem:[%s5225_s6 + $0xc] sm:$0xf] }
 0x31e   : > { %v1555_v8 = vsel %vm1348_vm2, %v1545_v4, -inf }
 0x322   : > { %v1389_v53 = vpop.f32.mrb[28].mxu0 }
 0x323   : > { %v1533_v55 = vmul.f32 0.35355338, %v1389_v53  ;;  %v3978_v56 = vpop.f32.mrb[29].mxu0  ;;  %v613_v53 = vld [vmem:[%s5225_s6 + $0x4] sm:$0xf] }
 0x324   : > { %v1392_v57 = vpop.f32.mrb[30].mxu0  ;;  %v1837_v54 = vsel %vm1601_vm3, %v613_v53, 0 }
 0x325   : > { %v3979_v58 = vpop.f32.mrb[31].mxu0  ;;  %v1542_v59 = vsel %vm1541_vm4, %v1533_v55, -1e+30  ;;  %v614_v55 = vld [vmem:[%s5225_s6 + $0x8] sm:$0xf] }
 0x326   : > { %v1546_v60 = vsel %vm1348_vm2, %v1542_v59, -inf }
 0x327   : > { %1547 = vmax.xlane.f32.xlu1 %v1546_v60 }
 0x32a   : > { %v1481_v63 = vpop.f32.mrb[32].mxu0 }
 0x32b   : > { %v1535_v2 = vmul.f32 0.35355338, %v1481_v63  ;;  %1550 = vmax.xlane.f32.xlu1 %v1549_v1  ;;  %v3990_v3 = vpop.f32.mrb[33].mxu0 }
 0x32c   : > { %v1484_v5 = vpop.f32.mrb[34].mxu0  ;;  %v1929_v3 = vsel %vm1601_vm3, %v615_v61, 0  ;;  %v4323_v61 = vld [vmem:[%s5227_s8 + $0x38] sm:$0xff]  }
 0x32d   : > { %v3991_v6 = vpop.f32.mrb[35].mxu0  ;;  %v1544_v7 = vsel %vm1541_vm4, %v1535_v2, -1e+30 }
 0x32e   : > { %v1552_v10 = vsel %vm1348_vm2, %v1544_v7, -inf }
 0x32f   : > { %1556 = vmax.xlane.f32.xlu1 %v1555_v8  ;;  %1553 = vmax.xlane.f32.xlu0 %v1552_v10 }
 0x3b4   : > { %v1548_v11 = vpop.xlane.xlu1 %1547 }
 0x3b5   : > { %v1558_v12 = vsub.f32 %v1542_v59, %v1548_v11  ;;  %v1883_v59 = vsel %vm1601_vm3, %v614_v55, 0 }
 0x3b7   : > { %v1562_v13 = vmul.f32 1.442695, %v1558_v12 }
 0x3b8   : > { %v1551_v14 = vpop.xlane.xlu1 %1550 }
 0x3b9   : > { %4354 = vpow2.f32 %v1562_v13  ;;  %v1559_v15 = vsub.f32 %v1543_v62, %v1551_v14 }
 0x3bb   : > { %v1564_v16 = vmul.f32 1.442695, %v1559_v15 }
 0x3bc   : > { %v1557_v17 = vpop.xlane.xlu1 %1556  ;;  %v1554_v18 = vpop.xlane.xlu0 %1553 }
 0x3bd   : > { %4356 = vpow2.f32 %v1564_v16  ;;  %v1561_v19 = vsub.f32 %v1545_v4, %v1557_v17  ;;  %v1560_v20 = vsub.f32 %v1544_v7, %v1554_v18 }
 0x3bf   : > { %v1568_v22 = vmul.f32 1.442695, %v1561_v19  ;;  %v1566_v23 = vmul.f32 1.442695, %v1560_v20 }
 0x3c1   : > { %4358 = vpow2.f32 %v1568_v22 }
 0x3c2   : > { %4360 = vpow2.f32 %v1566_v23 }
 0x3c3   : > { %v4355_v24 = vpop.eup %4354 }
 0x3c4   : > { %v1570_v25 = vsel %vm1348_vm2, %v4355_v24, 0.0 }
 0x3c5   : > { %1571 = vadd.xlane.f32.xlu0 %v1570_v25 }
 0x3c7   : > { %v4357_v26 = vpop.eup %4356 }
 0x3c8   : > { %v1573_v27 = vsel %vm1348_vm2, %v4357_v26, 0.0 }
 0x3c9   : > { %1574 = vadd.xlane.f32.xlu1 %v1573_v27 }
 0x3cb   : > { %v4359_v28 = vpop.eup %4358 }
 0x3cc   : > { %v4361_v29 = vpop.eup %4360  ;;  %v1579_v30 = vsel %vm1348_vm2, %v4359_v28, 0.0 }
 0x3cd   : > { %1580 = vadd.xlane.f32.xlu1 %v1579_v30  ;;  %v1576_v31 = vsel %vm1348_vm2, %v4361_v29, 0.0 }
 0x3ce   : > { %1577 = vadd.xlane.f32.xlu0 %v1576_v31 }
 0x452   : > { %v1572_v32 = vpop.xlane.xlu0 %1571 }
 0x453   : > { %4362 = vrcp.f32 %v1572_v32 }
 0x456   : > { %v1575_v33 = vpop.xlane.xlu1 %1574 }
 0x457   : > { %4364 = vrcp.f32 %v1575_v33 }
 0x45a   : > { %v1581_v34 = vpop.xlane.xlu1 %1580 }
 0x45b   : > { %4366 = vrcp.f32 %v1581_v34  ;;  %v1578_v35 = vpop.xlane.xlu0 %1577 }
 0x45c   : > { %4368 = vrcp.f32 %v1578_v35 }
 0x45d   : > { %v4363_v36 = vpop.eup %4362 }
 0x45e   : > { %v1586_v39 = vmul.f32 %v4363_v36, %v4355_v24 }
 0x460   : > { %v1590_v40 = vpack.c.bf16 %v1586_v39, %v1586_v39 }
 0x461   : > { %v4365_v41 = vpop.eup %4364 }
 0x462   : > { %v1587_v44 = vmul.f32 %v4365_v41, %v4357_v26  ;;  %4001 = vmatmul.mubr.msk.bf16.vlgmr.msra.gmra.mrb[36].mxu0 %vm1348_vm2, %v1590_v40 }
 0x463   : > { %4011 = vmatpush3.bf16.msra.mxu0 %v1695_v43  ;;  %4012 = vmatprep.mubr.msk.bf16.mxu0 %vm4461_vm1, %v4460_v9 }
 0x464   : > { %v1591_v45 = vpack.c.bf16 %v1587_v44, %v1587_v44  ;;  %4022 = vmatprep.subr.bf16.mxu0 %v4460_v9 }
 0x465   : > { %v4367_v46 = vpop.eup %4366 }
 0x466   : > { %v4369_v38 = vpop.eup %4368  ;;  %4007 = vmatmul.mubr.msk.bf16.vlgmr.msra.gmra.mrb[28].mxu1 %vm1348_vm2, %v1591_v45  ;;  %v1589_v49 = vmul.f32 %v4367_v46, %v4359_v28 }
 0x467   : > { %v1588_v48 = vmul.f32 %v4369_v38, %v4361_v29  ;;  %4017 = vmatpush3.bf16.msra.mxu1 %v1741_v47  ;;  %4018 = vmatprep.mubr.msk.bf16.mxu1 %vm4461_vm1, %v4460_v9 }
 0x468   : > { %4028 = vmatprep.subr.bf16.mxu1 %v4460_v9  ;;  %v1593_v52 = vpack.c.bf16 %v1589_v49, %v1589_v49  ;;  %v4319_v49 = vld [vmem:[%s5227_s8 + $0x18] sm:$0xff]  }
 0x469   : > { %v1592_v50 = vpack.c.bf16 %v1588_v48, %v1588_v48  ;;  %v4318_v48 = vld [vmem:[%s5227_s8 + $0x8] sm:$0xff]  }
 0x46b   : > { %4013 = vmatmul.mubr.msk.bf16.vlgmr.msra.gmra.mrb[40].mxu0 %vm1348_vm2, %v1592_v50 }
 0x46c   : > { %4023 = vmatpush3.bf16.msra.mxu0 %v1791_v51  ;;  %4024 = vmatprep.mubr.msk.bf16.mxu0 %vm4461_vm1, %v4460_v9 }
 0x46d   : > { %4034 = vmatprep.subr.bf16.mxu0 %v4460_v9 }
 0x46e   : > { %4019 = vmatmul.mubr.msk.bf16.vlgmr.msra.gmra.mrb[32].mxu1 %vm1348_vm2, %v1593_v52 }
 0x46f   : > { %4030 = vmatprep.mubr.msk.bf16.mxu1 %vm4461_vm1, %v4460_v9  ;;  %4029 = vmatpush3.bf16.msra.mxu1 %v1837_v54  ;;  %v3675_v54 = vld [vmem:[%s5226_s7] ss:$0 sm:$0xff] }
 0x470   : > { %4040 = vmatprep.subr.bf16.mxu1 %v4460_v9 }
 0x535   : > { %v1639_v56 = vpop.f32.mrb[36].mxu0 }
 0x536   : > { %v1783_v57 = vpack.c.bf16 %v1639_v56, %v1639_v56  ;;  %v4002_v58 = vpop.f32.mrb[37].mxu0 }
 0x537   : > { %v1642_v60 = vpop.f32.mrb[38].mxu0  ;;  %v4321_v58 = vld [vmem:[%s5227_s8 + $0x30] sm:$0xff]  }
 0x538   : > { %v4003_v62 = vpop.f32.mrb[39].mxu0  ;;  %4025 = vmatmul.mubr.msk.bf16.vlgmr.msra.gmra.mrb[44].mxu0 %vm1348_vm2, %v1783_v57  ;;  %v4320_v57 = vld [vmem:[%s5227_s8 + $0x20] sm:$0xff]   ;;  %v4322_v60 = vld [vmem:[%s5227_s8 + $0x28] sm:$0xff]  }
 0x539   : > { %v1685_v63 = vpop.f32.mrb[28].mxu1  ;;  %4035 = vmatpush3.bf16.msra.mxu0 %v1883_v59  ;;  %4036 = vmatprep.mubr.msk.bf16.mxu0 %vm4461_vm1, %v4460_v9  ;;  %v4324_v62 = vld [vmem:[%s5228_s9] sm:$0xff]  }
 0x53a   : > { %v1784_v1 = vpack.c.bf16 %v1685_v63, %v1685_v63  ;;  %v4008_v2 = vpop.f32.mrb[29].mxu1  ;;  %4046 = vmatprep.subr.bf16.mxu0 %v4460_v9  ;;  %v4325_v63 = vld [vmem:[%s5228_s9 + $0x10] sm:$0xff]  }
 0x53b   : > { %v1688_v4 = vpop.f32.mrb[30].mxu1  ;;  %v4326_v2 = vld [vmem:[%s5228_s9 + $0x8] sm:$0xff]  }
 0x53c   : > { %v4009_v5 = vpop.f32.mrb[31].mxu1  ;;  %4031 = vmatmul.mubr.msk.bf16.vlgmr.msra.gmra.mrb[36].mxu1 %vm1348_vm2, %v1784_v1  ;;  %v562_v1 = vld [vmem:[%s559_s3] sm:$0xff]  ;;  %s550_s3 = sand.u32 1, %s4450_s25  }
 0x53d   : > { %4041 = vmatpush3.bf16.msra.mxu1 %v1929_v3  ;;  %4042 = vmatprep.mubr.msk.bf16.mxu1 %vm4461_vm1, %v4460_v9  ;;  %v4327_v3 = vld [vmem:[%s5228_s9 + $0x18] sm:$0xff]   ;;  %v2000_v4 = vpack.c.bf16 %v562_v1, %v562_v1  ;;  %v4328_v5 = vld [vmem:[%s5228_s9 + $0x20] sm:$0xff]   ;;  %s551_s23 = scalar_lea.vmem [#allocation2], %s550_s3  ;;  %s3541_s22 = scalar_lea.sflag [#allocation3], %s550_s3 }
 0x53e   : > { %v1731_v6 = vpop.f32.mrb[40].mxu0  ;;  %4054 = vmatprep.subr.bf16.mxu1 %v4460_v9  ;;  %s3553_s29 = sshll.u32 %s551_s23, 4  ;;  %s5179_s29 = int_to_ptr.vmem [resolvable:$true] %s3553_s29 }
 0x53f   : > { %v1785_v7 = vpack.c.bf16 %v1731_v6, %v1731_v6  ;;  %v4014_v8 = vpop.f32.mrb[41].mxu0  ;;  %v4329_v6 = vld [vmem:[%s5228_s9 + $0x30] sm:$0xff]   ;;  %s4396_s21 = scalar_lea.vmem %s5179_s29, 16  ;;  %p4403_p0 = scmp.lt.s32.totalorder %s5179_s29, %s4401_s26 }
 0x540   : > { %v1734_v10 = vpop.f32.mrb[42].mxu0  ;;  %v4331_v8 = vld [vmem:[%s5228_s9 + $0x38] sm:$0xff]   ;;  %p4397_p11 = scmp.ne.s32.totalorder %s5179_s29, %s4396_s21  ;;  %p4404_p1 = scmp.lt.s32.totalorder %s4402_s19, %s4396_s21 }
 0x541   : > { %v4015_v11 = vpop.f32.mrb[43].mxu0  ;;  %4037 = vmatmul.mubr.msk.bf16.vlgmr.msra.gmra.mrb[48].mxu0 %vm1348_vm2, %v1785_v7  ;;  %v1777_v12 = vpop.f32.mrb[32].mxu1  ;;  %v4330_v7 = vld [vmem:[%s5228_s9 + $0x28] sm:$0xff]   ;;  %v4332_v10 = vld [vmem:[%s5229_s10] sm:$0xff]  }
 0x542   : > { %v1786_v13 = vpack.c.bf16 %v1777_v12, %v1777_v12  ;;  %v4020_v14 = vpop.f32.mrb[33].mxu1  ;;  %4050 = vmatprep.mubr.msk.bf16.mxu0 %vm4461_vm1, %v4460_v9  ;;  %4047 = vmatpush3.bf16.msra.mxu0 %v4316_v21  ;;  %v4333_v11 = vld [vmem:[%s5229_s10 + $0x10] sm:$0xff]   ;;  %v4334_v12 = vld [vmem:[%s5229_s10 + $0x8] sm:$0xff]   ;;  %p4398_p12 = pnand %p4397_p11, %p4592_p5  ;;  %p4405_p2 = por %p4404_p1, %p4403_p0 }
 0x543   : > { %v1780_v15 = vpop.f32.mrb[34].mxu1  ;;  %4048 = vmatprep.subr.bf16.mxu0 %v4460_v9  ;;  %v4336_v14 = vld [vmem:[%s5229_s10 + $0x20] sm:$0xff]  }
 0x544   : > { %v4021_v16 = vpop.f32.mrb[35].mxu1  ;;  %4043 = vmatmul.mubr.msk.bf16.vlgmr.msra.gmra.mrb[40].mxu1 %vm1348_vm2, %v1786_v13  ;;  %v4335_v13 = vld [vmem:[%s5229_s10 + $0x18] sm:$0xff]   ;;  %v4337_v15 = vld [vmem:[%s5229_s10 + $0x30] sm:$0xff]   ;;  %p4399_p13 = pneg %p4398_p12 }
 0x545   : > { %4058 = vmatprep.mubr.msk.bf16.mxu1 %vm4461_vm1, %v4460_v9  ;;  %v4338_v16 = vld [vmem:[%s5229_s10 + $0x28] sm:$0xff]  }
 0x546   : > { %4049 = vmatpush3.bf16.msra.mxu0 %v4318_v48  ;;  %p4406_p3 = pnand %p4405_p2, %p4399_p13 }
 0x547   : > { %4062 = vmatprep.subr.bf16.mxu0 %v4460_v9 }
 0x60b   : > { %v1827_v17 = vpop.f32.mrb[44].mxu0 }
 0x60c   : > { %v4026_v18 = vpop.f32.mrb[45].mxu0  ;;  %v1971_v23 = vsel %vm690_vm0, %v1827_v17, 0.0  ;;  %v4339_v17 = vld [vmem:[%s5229_s10 + $0x38] sm:$0xff]  }
 0x60d   : > { %v1830_v19 = vpop.f32.mrb[46].mxu0 }
 0x60e   : > { %v4027_v20 = vpop.f32.mrb[47].mxu0 }
 0x60f   : > { %v1873_v22 = vpop.f32.mrb[36].mxu1 }
 0x610   : > { %v1972_v24 = vsel %vm690_vm0, %v1873_v22, 0.0  ;;  %v4032_v25 = vpop.f32.mrb[37].mxu1 }
 0x611   : > { %v1973_v26 = vadd.f32 %v1972_v24, %v1971_v23  ;;  %v1876_v27 = vpop.f32.mrb[38].mxu1 }
 0x612   : > { %v4033_v28 = vpop.f32.mrb[39].mxu1 }
 0x614   : > { %v1919_v29 = vpop.f32.mrb[48].mxu0 }
 0x615   : > { %v1974_v30 = vsel %vm690_vm0, %v1919_v29, 0.0  ;;  %v4038_v31 = vpop.f32.mrb[49].mxu0 }
 0x616   : > { %v1975_v32 = vadd.f32 %v1974_v30, %v1973_v26  ;;  %v1922_v33 = vpop.f32.mrb[50].mxu0 }
 0x617   : > { %v4039_v34 = vpop.f32.mrb[51].mxu0  ;;  %v1965_v35 = vpop.f32.mrb[40].mxu1 }
 0x618   : > { %v1976_v36 = vsel %vm690_vm0, %v1965_v35, 0.0  ;;  %v4044_v37 = vpop.f32.mrb[41].mxu1 }
 0x619   : > { %v1977_v39 = vadd.f32 %v1976_v36, %v1975_v32  ;;  %v1968_v40 = vpop.f32.mrb[42].mxu1 }
 0x61a   : > { %v4045_v41 = vpop.f32.mrb[43].mxu1 }
 0x61b   : > { %v4870_v42 = vadd.f32 %v1977_v39, %v4612_v0  ;;  %v4317_v0 = vld [vmem:[%s5227_s8 + $0x10] sm:$0xff]  }
 0x61c   : > { %4055 = vmatpush3.bf16.msra.mxu1 %v4317_v0 }
 0x61d   : > { %v1979_v43 = vsel %vm690_vm0, %v4870_v42, 0.0  ;;  %4056 = vmatprep.subr.bf16.mxu1 %v4460_v9 }
 0x61e   : > { %1980 = vadd.xlane.f32.xlu0 %v1979_v43 }
 0x620   : > { %4057 = vmatpush3.bf16.msra.mxu1 %v4319_v49 }
 0x621   : > { %4070 = vmatprep.subr.bf16.mxu1 %v4460_v9 }
 0x6ab   : > { %v1981_v44 = vpop.xlane.xlu0 %1980 }
 0x6ac   : > { %v1982_v45 = vmul.f32 0.03125, %v1981_v44 }
 0x6ae   : > { %v1983_v46 = vsub.f32 %v4870_v42, %v1982_v45 }
 0x6b0   : > { %v1984_v38 = vmul.f32 %v1983_v46, %v1983_v46 }
 0x6b2   : > { %v1985_v47 = vsel %vm690_vm0, %v1984_v38, 0.0 }
 0x6b3   : > { %1986 = vadd.xlane.f32.xlu1 %v1985_v47 }
 0x740   : > { %v1987_v50 = vpop.xlane.xlu1 %1986 }
 0x741   : > { %v1988_v51 = vmul.f32 0.03125, %v1987_v50 }
 0x743   : > { %v1989_v52 = vadd.f32 1e-05, %v1988_v51 }
 0x745   : > { %4370 = vrsqrt.f32 %v1989_v52 }
 0x74f   : > { %v4371_v53 = vpop.eup %4370 }
 0x750   : > { %v1991_v55 = vmul.f32 %v4371_v53, %v1983_v46 }
 0x752   : > { %v1998_v56 = vmul.f32 %v3675_v54, %v1991_v55 }
 0x754   : > { %v1999_v59 = vpack.c.bf16 %v1998_v56, %v1998_v56 }
 0x756   : > { %4051 = vmatmul.mubr.msk.bf16.vlgmr.msra.gmra.mrb[52].mxu0 %vm690_vm0, %v1999_v59  ;;  %4059 = vmatmul.mubr.msk.bf16.vlgmr.msra.gmra.mrb[44].mxu1 %vm690_vm0, %v1999_v59 }
 0x757   : > { %4063 = vmatpush3.bf16.msra.mxu0 %v4320_v57  ;;  %4071 = vmatpush3.bf16.msra.mxu1 %v4321_v58 }
 0x758   : > { %4064 = vmatprep.subr.bf16.mxu0 %v4460_v9  ;;  %4072 = vmatprep.subr.bf16.mxu1 %v4460_v9 }
 0x759   : > { %4066 = vmatprep.mubr.msk.bf16.mxu0 %vm4461_vm1, %v4460_v9  ;;  %4074 = vmatprep.mubr.msk.bf16.mxu1 %vm4461_vm1, %v4460_v9 }
 0x75b   : > { %4065 = vmatpush3.bf16.msra.mxu0 %v4322_v60  ;;  %4073 = vmatpush3.bf16.msra.mxu1 %v4323_v61 }
 0x75c   : > { %4078 = vmatprep.subr.bf16.mxu0 %v4460_v9  ;;  %4086 = vmatprep.subr.bf16.mxu1 %v4460_v9 }
 0x75e   : > { %4067 = vmatmul.mubr.msk.bf16.vlgmr.msra.gmra.mrb[56].mxu0 %vm690_vm0, %v1999_v59  ;;  %4075 = vmatmul.mubr.msk.bf16.vlgmr.msra.gmra.mrb[48].mxu1 %vm690_vm0, %v1999_v59 }
 0x75f   : > { %4079 = vmatpush3.bf16.msra.mxu0 %v4324_v62  ;;  %4087 = vmatpush3.bf16.msra.mxu1 %v4325_v63 }
 0x760   : > { %4080 = vmatprep.subr.bf16.mxu0 %v4460_v9  ;;  %4088 = vmatprep.subr.bf16.mxu1 %v4460_v9 }
 0x761   : > { %4082 = vmatprep.mubr.msk.bf16.mxu0 %vm4461_vm1, %v4460_v9  ;;  %4090 = vmatprep.mubr.msk.bf16.mxu1 %vm4461_vm1, %v4460_v9 }
 0x763   : > { %4081 = vmatpush3.bf16.msra.mxu0 %v4326_v2  ;;  %4089 = vmatpush3.bf16.msra.mxu1 %v4327_v3 }
 0x764   : > { %4094 = vmatprep.subr.bf16.mxu0 %v4460_v9  ;;  %4102 = vmatprep.subr.bf16.mxu1 %v4460_v9 }
 0x766   : > { %4083 = vmatmul.mubr.msk.bf16.vlgmr.msra.gmra.mrb[60].mxu0 %vm690_vm0, %v2000_v4  ;;  %4091 = vmatmul.mubr.msk.bf16.vlgmr.msra.gmra.mrb[52].mxu1 %vm690_vm0, %v2000_v4 }
 0x767   : > { %4095 = vmatpush3.bf16.msra.mxu0 %v4328_v5  ;;  %4103 = vmatpush3.bf16.msra.mxu1 %v4329_v6 }
 0x768   : > { %4096 = vmatprep.subr.bf16.mxu0 %v4460_v9  ;;  %4104 = vmatprep.subr.bf16.mxu1 %v4460_v9 }
 0x769   : > { %4098 = vmatprep.mubr.msk.bf16.mxu0 %vm4461_vm1, %v4460_v9  ;;  %4106 = vmatprep.mubr.msk.bf16.mxu1 %vm4461_vm1, %v4460_v9 }
 0x76b   : > { %4097 = vmatpush3.bf16.msra.mxu0 %v4330_v7  ;;  %4105 = vmatpush3.bf16.msra.mxu1 %v4331_v8 }
 0x76c   : > { %4110 = vmatprep.subr.bf16.mxu0 %v4460_v9  ;;  %4118 = vmatprep.subr.bf16.mxu1 %v4460_v9 }
 0x76e   : > { %4099 = vmatmul.mubr.msk.bf16.vlgmr.msra.gmra.mrb[64].mxu0 %vm690_vm0, %v2000_v4  ;;  %4107 = vmatmul.mubr.msk.bf16.vlgmr.msra.gmra.mrb[56].mxu1 %vm690_vm0, %v2000_v4 }
 0x76f   : > { %4111 = vmatpush3.bf16.msra.mxu0 %v4332_v10  ;;  %4119 = vmatpush3.bf16.msra.mxu1 %v4333_v11 }
 0x770   : > { %4112 = vmatprep.subr.bf16.mxu0 %v4460_v9  ;;  %4120 = vmatprep.subr.bf16.mxu1 %v4460_v9 }
 0x771   : > { %4114 = vmatprep.mubr.msk.bf16.mxu0 %vm4461_vm1, %v4460_v9  ;;  %4122 = vmatprep.mubr.msk.bf16.mxu1 %vm4461_vm1, %v4460_v9 }
 0x773   : > { %4113 = vmatpush3.bf16.msra.mxu0 %v4334_v12  ;;  %4121 = vmatpush3.bf16.msra.mxu1 %v4335_v13 }
 0x774   : > { %4126 = vmatprep.subr.bf16.mxu0 %v4460_v9  ;;  %4134 = vmatprep.subr.bf16.mxu1 %v4460_v9 }
 0x776   : > { %4115 = vmatmul.mubr.msk.bf16.vlgmr.msra.gmra.mrb[68].mxu0 %vm690_vm0, %v2000_v4  ;;  %4123 = vmatmul.mubr.msk.bf16.vlgmr.msra.gmra.mrb[60].mxu1 %vm690_vm0, %v2000_v4 }
 0x777   : > { %4127 = vmatpush3.bf16.msra.mxu0 %v4336_v14  ;;  %4130 = vmatprep.mubr.msk.bf16.mxu0 %vm4461_vm1, %v4460_v9 }
 0x778   : > { %4128 = vmatprep.subr.bf16.mxu0 %v4460_v9  ;;  %4135 = vmatpush3.bf16.msra.mxu1 %v4337_v15 }
 0x779   : > { %4138 = vmatprep.mubr.msk.bf16.mxu1 %vm4461_vm1, %v4460_v9  ;;  %4136 = vmatprep.subr.bf16.mxu1 %v4460_v9 }
 0x77b   : > { %4129 = vmatpush3.bf16.msra.mxu0 %v4338_v16 }
 0x77c   : > { %4137 = vmatpush3.bf16.msra.mxu1 %v4339_v17  ;;  %4142 = vmatprep.subr.bf16.mxu0 %v4460_v9 }
 0x77d   : > { %4148 = vmatprep.subr.bf16.mxu1 %v4460_v9 }
 0x77e   : > { %4131 = vmatmul.mubr.msk.bf16.vlgmr.msra.gmra.mrb[72].mxu0 %vm690_vm0, %v2000_v4 }
 0x77f   : > { %4139 = vmatmul.mubr.msk.bf16.vlgmr.msra.gmra.mrb[64].mxu1 %vm690_vm0, %v2000_v4  ;;  %4144 = vmatprep.mubr.msk.bf16.mxu0 %vm4461_vm1, %v4460_v9 }
 0x780   : > { %4150 = vmatprep.mubr.msk.bf16.mxu1 %vm4461_vm1, %v4460_v9 }
 0x829   : > { %v2050_v18 = vpop.f32.mrb[52].mxu0  ;;  %v2102_v19 = vpop.f32.mrb[44].mxu1 }
 0x82a   : > { %v4052_v20 = vpop.f32.mrb[53].mxu0  ;;  %v4060_v22 = vpop.f32.mrb[45].mxu1  ;;  %v2631_v48 = vpack.c.bf16 %v2050_v18, %v2050_v18  ;;  %v2632_v49 = vpack.c.bf16 %v2102_v19, %v2102_v19 }
 0x82b   : > { %v2053_v23 = vpop.f32.mrb[54].mxu0  ;;  %v2105_v24 = vpop.f32.mrb[46].mxu1 }
 0x82c   : > { %v4053_v25 = vpop.f32.mrb[55].mxu0  ;;  %v4061_v26 = vpop.f32.mrb[47].mxu1 }
 0x831   : > { %v2154_v27 = vpop.f32.mrb[56].mxu0  ;;  %v2206_v28 = vpop.f32.mrb[48].mxu1 }
 0x832   : > { %v4068_v29 = vpop.f32.mrb[57].mxu0  ;;  %v4076_v30 = vpop.f32.mrb[49].mxu1  ;;  %v2633_v60 = vpack.c.bf16 %v2154_v27, %v2154_v27  ;;  %v2634_v61 = vpack.c.bf16 %v2206_v28, %v2206_v28 }
 0x833   : > { %v2157_v31 = vpop.f32.mrb[58].mxu0  ;;  %v2209_v32 = vpop.f32.mrb[50].mxu1 }
 0x834   : > { %v4069_v33 = vpop.f32.mrb[59].mxu0  ;;  %v4077_v34 = vpop.f32.mrb[51].mxu1 }
 0x839   : > { %v2261_v35 = vpop.f32.mrb[60].mxu0  ;;  %v2313_v36 = vpop.f32.mrb[52].mxu1 }
 0x83a   : > { %v2635_v37 = vpack.c.bf16 %v2261_v35, %v2261_v35  ;;  %v2636_v39 = vpack.c.bf16 %v2313_v36, %v2313_v36  ;;  %v4084_v40 = vpop.f32.mrb[61].mxu0  ;;  %v4092_v41 = vpop.f32.mrb[53].mxu1 }
 0x83b   : > { %v2264_v43 = vpop.f32.mrb[62].mxu0  ;;  %v2316_v44 = vpop.f32.mrb[54].mxu1 }
 0x83c   : > { %v2643_v45 = vsel %vm1348_vm2, %v2635_v37, 0  ;;  %v2689_v46 = vsel %vm1348_vm2, %v2636_v39, 0  ;;  %v4085_v38 = vpop.f32.mrb[63].mxu0  ;;  %v4093_v47 = vpop.f32.mrb[55].mxu1 }
 0x83d   : > { %4143 = vmatpush3.bf16.xpose.msra.mxu0 %v2643_v45  ;;  %4149 = vmatpush3.bf16.xpose.msra.mxu1 %v2689_v46 }
 0x83e   : > { %4154 = vmatprep.subr.bf16.mxu0 %v4460_v9  ;;  %4160 = vmatprep.subr.bf16.mxu1 %v4460_v9 }
 0x841   : > { %v2365_v21 = vpop.f32.mrb[64].mxu0  ;;  %v2417_v0 = vpop.f32.mrb[56].mxu1 }
 0x842   : > { %v2637_v50 = vpack.c.bf16 %v2365_v21, %v2365_v21  ;;  %v2638_v51 = vpack.c.bf16 %v2417_v0, %v2417_v0  ;;  %v4100_v52 = vpop.f32.mrb[65].mxu0  ;;  %v4108_v53 = vpop.f32.mrb[57].mxu1 }
 0x843   : > { %v2368_v54 = vpop.f32.mrb[66].mxu0  ;;  %v2420_v55 = vpop.f32.mrb[58].mxu1 }
 0x844   : > { %v2735_v56 = vsel %vm1348_vm2, %v2637_v50, 0  ;;  %v2781_v57 = vsel %vm1348_vm2, %v2638_v51, 0  ;;  %v4101_v58 = vpop.f32.mrb[67].mxu0  ;;  %v4109_v59 = vpop.f32.mrb[59].mxu1  ;;  %4145 = vmatmul.mubr.msk.bf16.vlgmr.msra.gmra.mrb[76].mxu0 %vm1348_vm2, %v2631_v48  ;;  %4151 = vmatmul.mubr.msk.bf16.vlgmr.msra.gmra.mrb[68].mxu1 %vm1348_vm2, %v2632_v49 }
 0x845   : > { %4155 = vmatpush3.bf16.xpose.msra.mxu0 %v2735_v56  ;;  %4161 = vmatpush3.bf16.xpose.msra.mxu1 %v2781_v57 }
 0x846   : > { %4156 = vmatprep.mubr.msk.bf16.mxu0 %vm4461_vm1, %v4460_v9  ;;  %4162 = vmatprep.mubr.msk.bf16.mxu1 %vm4461_vm1, %v4460_v9 }
 0x847   : > { %4166 = vmatprep.subr.bf16.mxu0 %v4460_v9  ;;  %4172 = vmatprep.subr.bf16.mxu1 %v4460_v9 }
 0x849   : > { %v2469_v62 = vpop.f32.mrb[68].mxu0  ;;  %v2521_v3 = vpop.f32.mrb[60].mxu1 }
 0x84a   : > { %v2875_v63 = vpack.c.bf16 %v2469_v62, %v2469_v62  ;;  %v4116_v1 = vpop.f32.mrb[69].mxu0  ;;  %v2876_v5 = vpack.c.bf16 %v2521_v3, %v2521_v3  ;;  %v4124_v7 = vpop.f32.mrb[61].mxu1 }
 0x84b   : > { %v2472_v2 = vpop.f32.mrb[70].mxu0  ;;  %v2524_v8 = vpop.f32.mrb[62].mxu1 }
 0x84c   : > { %4157 = vmatmul.mubr.msk.bf16.vlgmr.msra.gmra.mrb[80].mxu0 %vm1348_vm2, %v2633_v60  ;;  %4163 = vmatmul.mubr.msk.bf16.vlgmr.msra.gmra.mrb[72].mxu1 %vm1348_vm2, %v2634_v61  ;;  %v2883_v4 = vsel %vm1601_vm3, %v2875_v63, 0  ;;  %v4117_v6 = vpop.f32.mrb[71].mxu0  ;;  %v2929_v10 = vsel %vm1601_vm3, %v2876_v5, 0  ;;  %v4125_v11 = vpop.f32.mrb[63].mxu1 }
 0x84d   : > { %4168 = vmatprep.mubr.msk.bf16.mxu0 %vm4461_vm1, %v4460_v9  ;;  %4174 = vmatprep.mubr.msk.bf16.mxu1 %vm4461_vm1, %v4460_v9 }
 0x84e   : > { %4167 = vmatpush3.bf16.msra.mxu0 %v2883_v4  ;;  %4173 = vmatpush3.bf16.msra.mxu1 %v2929_v10 }
 0x84f   : > { %4178 = vmatprep.subr.bf16.mxu0 %v4460_v9  ;;  %4184 = vmatprep.subr.bf16.mxu1 %v4460_v9 }
 0x851   : > { %v5040_v12 = vpop.f32.mrb[72].mxu0 }
 0x852   : > { %v5042_v13 = vpop.f32.mrb[64].mxu1  ;;  %v4132_v14 = vpop.f32.mrb[73].mxu0  ;;  %v2877_v10 = vpack.c.bf16 %v5040_v12, %v5040_v12  ;;  %v666_v12 = vld [vmem:[%s5230_s11 + $0x4] sm:$0xf] }
 0x853   : > { %v4140_v15 = vpop.f32.mrb[65].mxu1  ;;  %v2576_v16 = vpop.f32.mrb[74].mxu0  ;;  %v2878_v7 = vpack.c.bf16 %v5042_v13, %v5042_v13 }
 0x854   : > { %v2628_v17 = vpop.f32.mrb[66].mxu1  ;;  %v4133_v18 = vpop.f32.mrb[75].mxu0 }
 0x855   : > { %v4141_v19 = vpop.f32.mrb[67].mxu1  ;;  %v3021_v16 = vsel %vm1601_vm3, %v2878_v7, 0  ;;  %v2975_v17 = vsel %vm1601_vm3, %v2877_v10, 0 }
 0x917   : > { %v2679_v20 = vpop.f32.mrb[76].mxu0  ;;  %v2725_v22 = vpop.f32.mrb[68].mxu1 }
 0x918   : > { %v2823_v23 = vmul.f32 0.35355338, %v2679_v20  ;;  %v2824_v24 = vmul.f32 0.35355338, %v2725_v22  ;;  %v4146_v25 = vpop.f32.mrb[77].mxu0  ;;  %v4152_v26 = vpop.f32.mrb[69].mxu1 }
 0x919   : > { %v2682_v27 = vpop.f32.mrb[78].mxu0  ;;  %v2728_v28 = vpop.f32.mrb[70].mxu1  ;;  %v665_v20 = vld [vmem:[%s5230_s11] sm:$0xf] }
 0x91a   : > { %v4147_v29 = vpop.f32.mrb[79].mxu0  ;;  %v4153_v30 = vpop.f32.mrb[71].mxu1  ;;  %v2830_v31 = vsel %vm1348_vm2, %v2824_v24, -inf  ;;  %v2827_v32 = vsel %vm1348_vm2, %v2823_v23, -inf  ;;  %v3071_v26 = vsel %vm1601_vm3, %v665_v20, 0 }
 0x91b   : > { %2831 = vmax.xlane.f32.xlu1 %v2830_v31  ;;  %2828 = vmax.xlane.f32.xlu0 %v2827_v32  ;;  %v668_v27 = vld [vmem:[%s5230_s11 + $0xc] sm:$0xf]  ;;  %v667_v28 = vld [vmem:[%s5230_s11 + $0x8] sm:$0xf] }
 0x91f   : > { %v2771_v33 = vpop.f32.mrb[80].mxu0  ;;  %v2817_v34 = vpop.f32.mrb[72].mxu1 }
 0x920   : > { %v2825_v35 = vmul.f32 0.35355338, %v2771_v33  ;;  %v2826_v36 = vmul.f32 0.35355338, %v2817_v34  ;;  %v4158_v37 = vpop.f32.mrb[81].mxu0  ;;  %v4164_v39 = vpop.f32.mrb[73].mxu1 }
 0x921   : > { %v2774_v40 = vpop.f32.mrb[82].mxu0  ;;  %v2820_v41 = vpop.f32.mrb[74].mxu1  ;;  %v3209_v33 = vsel %vm1601_vm3, %v668_v27, 0  ;;  %v3163_v37 = vsel %vm1601_vm3, %v667_v28, 0  ;;  %v4342_v28 = vld [vmem:[%s5233_s14] sm:$0xff]  }
 0x922   : > { %v4159_v43 = vpop.f32.mrb[83].mxu0  ;;  %v4165_v44 = vpop.f32.mrb[75].mxu1  ;;  %v2836_v45 = vsel %vm1348_vm2, %v2826_v36, -inf  ;;  %v2833_v46 = vsel %vm1348_vm2, %v2825_v35, -inf }
 0x923   : > { %2837 = vmax.xlane.f32.xlu1 %v2836_v45  ;;  %2834 = vmax.xlane.f32.xlu0 %v2833_v46 }
 0x9a8   : > { %v2832_v38 = vpop.xlane.xlu1 %2831  ;;  %v2829_v47 = vpop.xlane.xlu0 %2828 }
 0x9a9   : > { %v2840_v21 = vsub.f32 %v2824_v24, %v2832_v38  ;;  %v2839_v0 = vsub.f32 %v2823_v23, %v2829_v47  ;;  %v3117_v24 = vsel %vm1601_vm3, %v666_v12, 0 }
 0x9ab   : > { %v2845_v48 = vmul.f32 1.442695, %v2840_v21  ;;  %v2843_v49 = vmul.f32 1.442695, %v2839_v0 }
 0x9ad   : > { %4372 = vpow2.f32 %v2845_v48 }
 0x9ae   : > { %4374 = vpow2.f32 %v2843_v49 }
 0x9b0   : > { %v2838_v50 = vpop.xlane.xlu1 %2837  ;;  %v2835_v51 = vpop.xlane.xlu0 %2834 }
 0x9b1   : > { %v2842_v52 = vsub.f32 %v2826_v36, %v2838_v50  ;;  %v2841_v53 = vsub.f32 %v2825_v35, %v2835_v51 }
 0x9b3   : > { %v2849_v54 = vmul.f32 1.442695, %v2842_v52  ;;  %v2847_v55 = vmul.f32 1.442695, %v2841_v53 }
 0x9b5   : > { %4376 = vpow2.f32 %v2849_v54 }
 0x9b6   : > { %4378 = vpow2.f32 %v2847_v55 }
 0x9b7   : > { %v4373_v56 = vpop.eup %4372 }
 0x9b8   : > { %v4375_v57 = vpop.eup %4374  ;;  %v2854_v58 = vsel %vm1348_vm2, %v4373_v56, 0.0 }
 0x9b9   : > { %2855 = vadd.xlane.f32.xlu1 %v2854_v58  ;;  %v2851_v59 = vsel %vm1348_vm2, %v4375_v57, 0.0 }
 0x9ba   : > { %2852 = vadd.xlane.f32.xlu0 %v2851_v59 }
 0x9bf   : > { %v4377_v60 = vpop.eup %4376 }
 0x9c0   : > { %v4379_v61 = vpop.eup %4378  ;;  %v2860_v62 = vsel %vm1348_vm2, %v4377_v60, 0.0 }
 0x9c1   : > { %2861 = vadd.xlane.f32.xlu1 %v2860_v62  ;;  %v2857_v63 = vsel %vm1348_vm2, %v4379_v61, 0.0 }
 0x9c2   : > { %2858 = vadd.xlane.f32.xlu0 %v2857_v63 }
 0xa46   : > { %v2856_v1 = vpop.xlane.xlu1 %2855 }
 0xa47   : > { %4380 = vrcp.f32 %v2856_v1  ;;  %v2853_v2 = vpop.xlane.xlu0 %2852 }
 0xa48   : > { %4382 = vrcp.f32 %v2853_v2 }
 0xa4e   : > { %v2862_v3 = vpop.xlane.xlu1 %2861 }
 0xa4f   : > { %4384 = vrcp.f32 %v2862_v3  ;;  %v2859_v4 = vpop.xlane.xlu0 %2858 }
 0xa50   : > { %4386 = vrcp.f32 %v2859_v4 }
 0xa51   : > { %v4381_v5 = vpop.eup %4380 }
 0xa52   : > { %v4383_v6 = vpop.eup %4382  ;;  %v2868_v8 = vmul.f32 %v4381_v5, %v4373_v56 }
 0xa53   : > { %v2867_v11 = vmul.f32 %v4383_v6, %v4375_v57 }
 0xa54   : > { %v2872_v14 = vpack.c.bf16 %v2868_v8, %v2868_v8 }
 0xa55   : > { %v2871_v15 = vpack.c.bf16 %v2867_v11, %v2867_v11 }
 0xa56   : > { %4175 = vmatmul.mubr.msk.bf16.vlgmr.msra.gmra.mrb[76].mxu1 %vm1348_vm2, %v2872_v14 }
 0xa57   : > { %4169 = vmatmul.mubr.msk.bf16.vlgmr.msra.gmra.mrb[84].mxu0 %vm1348_vm2, %v2871_v15  ;;  %4185 = vmatpush3.bf16.msra.mxu1 %v3021_v16 }
 0xa58   : > { %4179 = vmatpush3.bf16.msra.mxu0 %v2975_v17  ;;  %4180 = vmatprep.mubr.msk.bf16.mxu0 %vm4461_vm1, %v4460_v9 }
 0xa59   : > { %v4385_v13 = vpop.eup %4384  ;;  %4186 = vmatprep.mubr.msk.bf16.mxu1 %vm4461_vm1, %v4460_v9  ;;  %4190 = vmatprep.subr.bf16.mxu0 %v4460_v9 }
 0xa5a   : > { %v4387_v18 = vpop.eup %4386  ;;  %v2870_v19 = vmul.f32 %v4385_v13, %v4377_v60  ;;  %4196 = vmatprep.subr.bf16.mxu1 %v4460_v9 }
 0xa5b   : > { %v2869_v22 = vmul.f32 %v4387_v18, %v4379_v61  ;;  %v4340_v18 = vld [vmem:[%s5232_s13] sm:$0xff]  }
 0xa5c   : > { %v2874_v23 = vpack.c.bf16 %v2870_v19, %v2870_v19 }
 0xa5d   : > { %v2873_v25 = vpack.c.bf16 %v2869_v22, %v2869_v22 }
 0xa5e   : > { %4187 = vmatmul.mubr.msk.bf16.vlgmr.msra.gmra.mrb[80].mxu1 %vm1348_vm2, %v2874_v23 }
 0xa5f   : > { %4181 = vmatmul.mubr.msk.bf16.vlgmr.msra.gmra.mrb[88].mxu0 %vm1348_vm2, %v2873_v25  ;;  %4197 = vmatpush3.bf16.msra.mxu1 %v3117_v24  ;;  %v3724_v24 = vld [vmem:[%s5231_s12] ss:$0 sm:$0xff] }
 0xa60   : > { %4191 = vmatpush3.bf16.msra.mxu0 %v3071_v26  ;;  %4192 = vmatprep.mubr.msk.bf16.mxu0 %vm4461_vm1, %v4460_v9 }
 0xa61   : > { %4198 = vmatprep.mubr.msk.bf16.mxu1 %vm4461_vm1, %v4460_v9  ;;  %4202 = vmatprep.subr.bf16.mxu0 %v4460_v9 }
 0xa62   : > { %4208 = vmatprep.subr.bf16.mxu1 %v4460_v9 }
 0xb29   : > { %v2965_v29 = vpop.f32.mrb[76].mxu1 }
 0xb2a   : > { %v2919_v30 = vpop.f32.mrb[84].mxu0  ;;  %v3064_v31 = vpack.c.bf16 %v2965_v29, %v2965_v29  ;;  %v4176_v32 = vpop.f32.mrb[77].mxu1  ;;  %v4343_v29 = vld [vmem:[%s5233_s14 + $0x8] sm:$0xff]  }
 0xb2b   : > { %v3063_v34 = vpack.c.bf16 %v2919_v30, %v2919_v30  ;;  %v4170_v35 = vpop.f32.mrb[85].mxu0  ;;  %v2968_v36 = vpop.f32.mrb[78].mxu1  ;;  %v4344_v30 = vld [vmem:[%s5233_s14 + $0x10] sm:$0xff]   ;;  %v4346_v32 = vld [vmem:[%s5233_s14 + $0x20] sm:$0xff]  }
 0xb2c   : > { %v2922_v39 = vpop.f32.mrb[86].mxu0  ;;  %v4177_v40 = vpop.f32.mrb[79].mxu1  ;;  %4199 = vmatmul.mubr.msk.bf16.vlgmr.msra.gmra.mrb[84].mxu1 %vm1348_vm2, %v3064_v31  ;;  %v4345_v31 = vld [vmem:[%s5233_s14 + $0x18] sm:$0xff]  }
 0xb2d   : > { %v4171_v41 = vpop.f32.mrb[87].mxu0  ;;  %4193 = vmatmul.mubr.msk.bf16.vlgmr.msra.gmra.mrb[92].mxu0 %vm1348_vm2, %v3063_v34  ;;  %4209 = vmatpush3.bf16.msra.mxu1 %v3209_v33  ;;  %v4347_v33 = vld [vmem:[%s5233_s14 + $0x28] sm:$0xff]   ;;  %v4348_v34 = vld [vmem:[%s5233_s14 + $0x30] sm:$0xff]   ;;  %v4349_v35 = vld [vmem:[%s5233_s14 + $0x38] sm:$0xff]  }
 0xb2e   : > { %4203 = vmatpush3.bf16.msra.mxu0 %v3163_v37  ;;  %4204 = vmatprep.mubr.msk.bf16.mxu0 %vm4461_vm1, %v4460_v9 }
 0xb2f   : > { %4210 = vmatprep.mubr.msk.bf16.mxu1 %vm4461_vm1, %v4460_v9  ;;  %4214 = vmatprep.subr.bf16.mxu0 %v4460_v9 }
 0xb30   : > { %4222 = vmatprep.subr.bf16.mxu1 %v4460_v9 }
 0xb31   : > { %v3057_v43 = vpop.f32.mrb[80].mxu1 }
 0xb32   : > { %v3011_v44 = vpop.f32.mrb[88].mxu0  ;;  %v3066_v45 = vpack.c.bf16 %v3057_v43, %v3057_v43  ;;  %v4188_v46 = vpop.f32.mrb[81].mxu1 }
 0xb33   : > { %v3065_v38 = vpack.c.bf16 %v3011_v44, %v3011_v44  ;;  %v4182_v47 = vpop.f32.mrb[89].mxu0  ;;  %v3060_v21 = vpop.f32.mrb[82].mxu1 }
 0xb34   : > { %v3014_v0 = vpop.f32.mrb[90].mxu0  ;;  %v4189_v48 = vpop.f32.mrb[83].mxu1  ;;  %4211 = vmatmul.mubr.msk.bf16.vlgmr.msra.gmra.mrb[88].mxu1 %vm1348_vm2, %v3066_v45 }
 0xb35   : > { %v4183_v49 = vpop.f32.mrb[91].mxu0  ;;  %4205 = vmatmul.mubr.msk.bf16.vlgmr.msra.gmra.mrb[96].mxu0 %vm1348_vm2, %v3065_v38  ;;  %4238 = vmatprep.mubr.msk.bf16.mxu1 %vm4461_vm1, %v4460_v9 }
 0xb36   : > { %4218 = vmatprep.mubr.msk.bf16.mxu0 %vm4461_vm1, %v4460_v9  ;;  %4215 = vmatpush3.bf16.msra.mxu0 %v4340_v18 }
 0xb37   : > { %4216 = vmatprep.subr.bf16.mxu0 %v4460_v9  ;;  %4223 = vmatpush3.bf16.msra.mxu1 %v4342_v28 }
 0xb38   : > { %4224 = vmatprep.subr.bf16.mxu1 %v4460_v9 }
 0xb3b   : > { %4225 = vmatpush3.bf16.msra.mxu1 %v4343_v29 }
 0xb3c   : > { %4226 = vmatprep.subr.bf16.mxu1 %v4460_v9 }
 0xb3f   : > { %4227 = vmatpush3.bf16.msra.mxu1 %v4344_v30 }
 0xb40   : > { %4228 = vmatprep.subr.bf16.mxu1 %v4460_v9 }
 0xb43   : > { %4229 = vmatpush3.bf16.msra.mxu1 %v4345_v31 }
 0xb44   : > { %4230 = vmatprep.subr.bf16.mxu1 %v4460_v9 }
 0xb47   : > { %4231 = vmatpush3.bf16.msra.mxu1 %v4346_v32 }
 0xb48   : > { %4232 = vmatprep.subr.bf16.mxu1 %v4460_v9 }
 0xb4b   : > { %4233 = vmatpush3.bf16.msra.mxu1 %v4347_v33 }
 0xb4c   : > { %4234 = vmatprep.subr.bf16.mxu1 %v4460_v9 }
 0xb4f   : > { %4235 = vmatpush3.bf16.msra.mxu1 %v4348_v34 }
 0xb50   : > { %4236 = vmatprep.subr.bf16.mxu1 %v4460_v9 }
 0xb53   : > { %4237 = vmatpush3.bf16.msra.mxu1 %v4349_v35 }
 0xbff   : > { %v3153_v50 = vpop.f32.mrb[84].mxu1 }
 0xc00   : > { %v3107_v51 = vpop.f32.mrb[92].mxu0  ;;  %v3252_v52 = vsel %vm690_vm0, %v3153_v50, 0.0  ;;  %v4200_v53 = vpop.f32.mrb[85].mxu1 }
 0xc01   : > { %v3251_v54 = vsel %vm690_vm0, %v3107_v51, 0.0  ;;  %v4194_v55 = vpop.f32.mrb[93].mxu0  ;;  %v3156_v56 = vpop.f32.mrb[86].mxu1 }
 0xc02   : > { %v3253_v57 = vadd.f32 %v3252_v52, %v3251_v54  ;;  %v3110_v58 = vpop.f32.mrb[94].mxu0  ;;  %v4201_v59 = vpop.f32.mrb[87].mxu1 }
 0xc03   : > { %v4195_v60 = vpop.f32.mrb[95].mxu0  ;;  %v4462_v59 = vmov -1.0  }
 0xc07   : > { %v3245_v61 = vpop.f32.mrb[88].mxu1 }
 0xc08   : > { %v3199_v62 = vpop.f32.mrb[96].mxu0  ;;  %v4212_v63 = vpop.f32.mrb[89].mxu1  ;;  %v3256_v7 = vsel %vm690_vm0, %v3245_v61, 0.0 }
 0xc09   : > { %v3254_v1 = vsel %vm690_vm0, %v3199_v62, 0.0  ;;  %v4206_v2 = vpop.f32.mrb[97].mxu0  ;;  %v3248_v3 = vpop.f32.mrb[90].mxu1 }
 0xc0a   : > { %v3255_v4 = vadd.f32 %v3254_v1, %v3253_v57  ;;  %v3202_v5 = vpop.f32.mrb[98].mxu0  ;;  %v4213_v6 = vpop.f32.mrb[91].mxu1 }
 0xc0b   : > { %v4207_v8 = vpop.f32.mrb[99].mxu0 }
 0xc0c   : > { %v3257_v10 = vadd.f32 %v3256_v7, %v3255_v4 }
 0xc0e   : > { %v5109_v11 = vadd.f32 %v3257_v10, %v4870_v42  ;;  %v4341_v42 = vld [vmem:[%s5232_s13 + $0x8] sm:$0xff]  }
 0xc0f   : > { %4217 = vmatpush3.bf16.msra.mxu0 %v4341_v42 }
 0xc10   : > { %v3259_v14 = vsel %vm690_vm0, %v5109_v11, 0.0  ;;  %4242 = vmatprep.subr.bf16.mxu0 %v4460_v9 }
 0xc11   : > { %3260 = vadd.xlane.f32.xlu0 %v3259_v14 }
 0xc9e   : > { %v3261_v15 = vpop.xlane.xlu0 %3260 }
 0xc9f   : > { %v3262_v16 = vmul.f32 0.03125, %v3261_v15 }
 0xca1   : > { %v3263_v17 = vsub.f32 %v5109_v11, %v3262_v16 }
 0xca3   : > { %v3264_v13 = vmul.f32 %v3263_v17, %v3263_v17 }
 0xca5   : > { %v3265_v12 = vsel %vm690_vm0, %v3264_v13, 0.0  ;;  %v4350_v13 = vld [vmem:[%s5235_s16] sm:$0xff]  }
 0xca6   : > { %3266 = vadd.xlane.f32.xlu1 %v3265_v12 }
 0xd33   : > { %v3267_v19 = vpop.xlane.xlu1 %3266 }
 0xd34   : > { %v3268_v20 = vmul.f32 0.03125, %v3267_v19 }
 0xd36   : > { %v3269_v22 = vadd.f32 1e-05, %v3268_v20  ;;  %v3736_v20 = vld [vmem:[%s5234_s15] ss:$0 sm:$0xff] }
 0xd38   : > { %4388 = vrsqrt.f32 %v3269_v22 }
 0xd42   : > { %v4389_v23 = vpop.eup %4388 }
 0xd43   : > { %v3271_v25 = vmul.f32 %v4389_v23, %v3263_v17 }
 0xd45   : > { %v3278_v26 = vmul.f32 %v3724_v24, %v3271_v25 }
 0xd47   : > { %v3279_v27 = vpack.c.bf16 %v3278_v26, %v3278_v26 }
 0xd49   : > { %4219 = vmatmul.mubr.msk.bf16.vlgmr.msra.gmra.mrb[100].mxu0 %vm690_vm0, %v3279_v27 }
 0xd4a   : > { %4246 = vmatprep.mubr.msk.bf16.mxu0 %vm4461_vm1, %v4460_v9  ;;  %4243 = vmatpush3.bf16.msra.mxu0 %v4350_v13 }
 0xd4b   : > { %4244 = vmatprep.subr.bf16.mxu0 %v4460_v9 }
 0xe1c   : > { %v3329_v36 = vpop.f32.mrb[100].mxu0 }
 0xe1d   : > { %v3336_v37 = vmul.f32 0.70710677, %v3329_v36  ;;  %v4220_v39 = vpop.f32.mrb[101].mxu0  ;;  %v3335_v62 = vmul.f32 0.5, %v3329_v36 }
 0xe1e   : > { %v3332_v40 = vpop.f32.mrb[102].mxu0 }
 0xe1f   : > { %v3339_v41 = vand.u32 2147483647, %v3336_v37  ;;  %v4221_v43 = vpop.f32.mrb[103].mxu0  ;;  %vm3337_vm5 = vcmp.ge.f32.partialorder %v3336_v37, 0.0 }
 0xe20   : > { %v3338_v60 = vsel %vm3337_vm5, 1.0, %v4462_v59 }
 0xe21   : > { %v3340_v44 = vmul.f32 0.3275911, %v3339_v41  ;;  %v3353_v46 = vsub.f32 0.0, %v3339_v41 }
 0xe23   : > { %v3341_v45 = vadd.f32 1.0, %v3340_v44  ;;  %v3354_v47 = vmul.f32 %v3353_v46, %v3339_v41 }
 0xe25   : > { %4390 = vrcp.f32 %v3341_v45  ;;  %v3355_v48 = vmul.f32 1.442695, %v3354_v47 }
 0xe27   : > { %4392 = vpow2.f32 %v3355_v48 }
 0xe2f   : > { %v4391_v38 = vpop.eup %4390 }
 0xe30   : > { %v3344_v21 = vmul.f32 1.0614054, %v4391_v38 }
 0xe31   : > { %v4393_v56 = vpop.eup %4392 }
 0xe32   : > { %v3345_v0 = vadd.f32 -1.4531521, %v3344_v21 }
 0xe34   : > { %v3346_v49 = vmul.f32 %v4391_v38, %v3345_v0 }
 0xe36   : > { %v3347_v50 = vadd.f32 1.4214138, %v3346_v49 }
 0xe38   : > { %v3348_v51 = vmul.f32 %v4391_v38, %v3347_v50 }
 0xe3a   : > { %v3349_v52 = vadd.f32 -0.28449672, %v3348_v51 }
 0xe3c   : > { %v3350_v53 = vmul.f32 %v4391_v38, %v3349_v52 }
 0xe3e   : > { %v3351_v54 = vadd.f32 0.2548296, %v3350_v53 }
 0xe40   : > { %v3352_v55 = vmul.f32 %v4391_v38, %v3351_v54 }
 0xe42   : > { %v3357_v57 = vmul.f32 %v4393_v56, %v3352_v55 }
 0xe44   : > { %v3358_v58 = vsub.f32 1.0, %v3357_v57 }
 0xe46   : > { %v3359_v61 = vmul.f32 %v3358_v58, %v3338_v60 }
 0xe48   : > { %v3360_v63 = vadd.f32 1.0, %v3359_v61 }
 0xe4a   : > { %v3361_v1 = vmul.f32 %v3360_v63, %v3335_v62 }
 0xe4c   : > { %v3362_v2 = vpack.c.bf16 %v3361_v1, %v3361_v1 }
 0xe4e   : > { %4239 = vmatmul.mubr.bf16.vlgmr.msra.gmra.mrb[92].mxu1 %v3362_v2 }
 0xf21   : > { %v3445_v3 = vpop.f32.mrb[92].mxu1 }
 0xf22   : > { %v3451_v4 = vadd.f32 %v3445_v3, %v5109_v11  ;;  %v4240_v5 = vpop.f32.mrb[93].mxu1  ;;  %v4351_v11 = vld [vmem:[%s5235_s16 + $0x8] sm:$0xff]  }
 0xf23   : > { %v3448_v6 = vpop.f32.mrb[94].mxu1  ;;  %4245 = vmatpush3.bf16.msra.mxu0 %v4351_v11 }
 0xf24   : > { %v4241_v7 = vpop.f32.mrb[95].mxu1  ;;  %v3454_v8 = vsel %vm3453_vm6, %v3451_v4, 0.0 }
 0xf25   : > { %3455 = vadd.xlane.f32.xlu0 %v3454_v8 }
 0xfb2   : > { %v3456_v10 = vpop.xlane.xlu0 %3455 }
 0xfb3   : > { %v3457_v14 = vmul.f32 0.03125, %v3456_v10 }
 0xfb5   : > { %v3458_v15 = vsub.f32 %v3451_v4, %v3457_v14 }
 0xfb7   : > { %v3459_v16 = vmul.f32 %v3458_v15, %v3458_v15 }
 0xfb9   : > { %v3460_v17 = vsel %vm3453_vm6, %v3459_v16, 0.0 }
 0xfba   : > { %3461 = vadd.xlane.f32.xlu1 %v3460_v17 }
0x1047   : > { %v3462_v12 = vpop.xlane.xlu1 %3461 }
0x1048   : > { %v3463_v18 = vmul.f32 0.03125, %v3462_v12 }
0x104a   : > { %v3464_v42 = vadd.f32 1e-05, %v3463_v18 }
0x104c   : > { %4394 = vrsqrt.f32 %v3464_v42 }
0x1056   : > { %v4395_v19 = vpop.eup %4394 }
0x1057   : > { %v3466_v22 = vmul.f32 %v4395_v19, %v3458_v15 }
0x1059   : > { %v3473_v23 = vmul.f32 %v3736_v20, %v3466_v22 }
0x105b   : > { %v3474_v24 = vpack.c.bf16 %v3473_v23, %v3473_v23 }
0x105d   : > { %v3480_v25 = vshrl.u32 %v3474_v24, 16 }
0x105f   : > { %v3482_v26 = vrot.slane %v3480_v25, 3 }
0x1061   : > { %4247 = vmatmul.mubr.msk.bf16.vlgmr.msra.gmra.mrb[104].mxu0 %vm690_vm0, %v3482_v26 }
0x1134   : > { %v3532_v9 = vpop.f32.mrb[104].mxu0 }
0x1135   : > { %3539 = vst.msk [vmem:[%s551_s23] sm:$0x1] %vm3538_vm7, %v3532_v9  ;;  %v4248_v27 = vpop.f32.mrb[105].mxu0 }
0x1136   : > { %v3535_v28 = vpop.f32.mrb[106].mxu0 }
0x1137   : > { %4409 = shalt.err (!%p4406_p3)
}
0x1138   : > { %s4410_s3 = scalar_lea.hbm %s5177_s2, 16  ;;  %s4414_s18 = scalar_lea.hbm %s5236_s17, 32 }
0x1139   : > { %p4411_p4 = scmp.ne.s32.totalorder %s5177_s2, %s4410_s3  ;;  %p4415_p9 = scmp.lt.u32.totalorder %s5177_s2, %s5236_s17 }
0x113a   : > { %p4416_p10 = scmp.lt.u32.totalorder %s4414_s18, %s4410_s3  ;;  %p4418_p12 = scmp.lt.u32.totalorder %s4410_s3, %s5177_s2 }
0x113b   : > { %p4412_p7 = pnand %p4411_p4, %p4592_p5 }
0x113c   : > { %p4417_p11 = por %p4416_p10, %p4415_p9 }
0x113d   : > { %p4413_p8 = pneg %p4412_p7 }
0x113e   : > { %p4419_p13 = por %p4418_p12, %p4417_p11 }
0x1140   : > { %p4420_p0 = pnand %p4419_p13, %p4413_p8 }
0x1142   : > { %4423 = shalt.err (!%p4420_p0)
}
0x1143   : > { %4250 = dma.vmem_to_hbm [thread:$0]  (%p4592_p5), %s5179_s29, 16, %s5177_s2, %s3541_s22   ;;  %v4249_v29 = vpop.f32.mrb[107].mxu0 }
0x1144 PF: > { %p4256_p1 = scmp.ge.s32.totalorder %s4458_s27, 2  ;;  %s3565_s21 = sand.u32 1, %s4446_s24  }
0x1145   : > { %s3566_s19 = scalar_lea.sflag [#allocation3], %s3565_s21 }
0x1146   : > { %p4253_p2 = pnand %p4256_p1, %p4596_p6 }
0x1148   : > { %4441 = dma.done.wait (!%p4253_p2), %s3566_s19, 16  }
0x1149   : > { %4443 = vsyncadd (!%p4253_p2), %s3566_s19, 4294967280  ;;  %s5252_s3 = sld [smem:[#allocation5_spill]]  ;;  %s5253_s26 = sld [smem:[#allocation6_spill]] }
0x114a   : > { %p27_p3 = scmp.ge.s32.totalorder %s4579_s0, 4   ;;  %s5254_s24 = smov %s4450_s25 }
0x114b   : > { %s5256_s27 = smov %s4579_s0 }
0x114c   :  { %29 = sbr.rel (!%p27_p3) target bundleno = 8 (0x8), region = 126 }
0x114f   : > { %s5255_s25 = smov %s5252_s3 }
0x1153   :  { %3570 = vsyncpa [#allocation3], 1 }
0x1154   :  { %3572 = vsyncpa [#allocation3 + $0x1], 1 }

</bundles_post_ra>
